<compile_context>
chip_gen: v7x
topology: tpu7x:2x2x1
jax: 0.10.0
libtpu: 0.0.40
codegen_flags: <defaults>
</compile_context>

<pallas_src>
import functools
import math

import numpy as np
import jax
import jax.numpy as jnp
from jax.experimental import pallas as pl
from jax.experimental.pallas import tpu as pltpu


_VMEM_LIMIT = 48 * 1024 * 1024


def _leaky(x, slope):
    return jnp.where(x >= 0, x, x * slope)


def _pick_tt(T, halo, target):
    """Largest multiple of 128 <= target that divides T and is >= halo, else T."""
    if T <= max(target, halo) or T % 128 != 0:
        return T
    tt = (min(target, T) // 128) * 128
    while tt >= 128:
        if T % tt == 0 and tt >= halo:
            return tt
        tt -= 128
    return T


def _pick_lt(L, stride, halo, target_out):
    """Input-time tile for the upsample kernel (output tile = LT * stride)."""
    tgt_in = max(128, target_out // stride)
    if L <= max(tgt_in, halo) or L % 128 != 0:
        return L
    lt = (min(tgt_in, L) // 128) * 128
    while lt >= 128:
        if L % lt == 0 and lt >= halo:
            return lt
        lt -= 128
    return L


def _halo_width(TT, halo):
    """Width of the halo block (multiple of 128 dividing TT when possible)."""
    if TT % 128 == 0:
        hw = max(128, -(-halo // 128) * 128)
        while TT % hw != 0:
            hw += 128
        return hw
    return TT


def _xcol_dtype(c):
    # bf16 im2col scratch only when row offsets (multiples of c) stay aligned
    # to the packed (16,128) bf16 tile; f32 fallback otherwise.
    return jnp.bfloat16 if c % 16 == 0 else jnp.float32


# ----------------------------------------------------------------------------
# Kernel A: fused causal conv (conv_pre)
# ----------------------------------------------------------------------------
def _conv_kernel(xh_ref, xc_ref, w_ref, b_ref, o_ref, xw_ref, xcol_ref, *,
                 K, dil, halo, HW, TT, C_in):
    t = pl.program_id(1)
    if halo > 0:
        tail = xh_ref[0][:, HW - halo:].astype(xw_ref.dtype)
        tail = jnp.where(t == 0, jnp.zeros_like(tail), tail)
        xw_ref[:, :halo] = tail
    xw_ref[:, halo:] = xc_ref[0].astype(xw_ref.dtype)
    a = xw_ref[...]
    # im2col: K shifted windows stacked along the contraction axis.
    for k in range(K):
        xcol_ref[k * C_in:(k + 1) * C_in, :] = a[:, k * dil:k * dil + TT]
    acc = jnp.dot(w_ref[...], xcol_ref[...].astype(jnp.bfloat16),
                  preferred_element_type=jnp.float32) + b_ref[...]
    o_ref[0] = acc.astype(o_ref.dtype)


def causal_conv1d(x, w_flat, b, *, dilation=1, out_dtype=jnp.bfloat16,
                  tile_target=2048):
    """Causal dilated Conv1d. x: (B, C_in, T); w_flat: (C_out, K*C_in) bf16."""
    B, C_in, T = x.shape
    C_out = w_flat.shape[0]
    assert w_flat.shape[1] % C_in == 0
    K = w_flat.shape[1] // C_in
    halo = (K - 1) * dilation
    TT = _pick_tt(T, halo, tile_target)
    assert T % TT == 0 and TT >= halo
    NT = T // TT
    HW = _halo_width(TT, halo)
    NH = TT // HW
    cdt = _xcol_dtype(C_in)

    kern = functools.partial(_conv_kernel, K=K, dil=dilation, halo=halo,
                             HW=HW, TT=TT, C_in=C_in)
    return pl.pallas_call(
        kern,
        out_shape=jax.ShapeDtypeStruct((B, C_out, T), out_dtype),
        grid=(B, NT),
        in_specs=[
            pl.BlockSpec((1, C_in, HW),
                         lambda b_, t_, NH=NH: (b_, 0, jnp.maximum(t_ * NH - 1, 0))),
            pl.BlockSpec((1, C_in, TT), lambda b_, t_: (b_, 0, t_)),
            pl.BlockSpec(w_flat.shape, lambda b_, t_: (0, 0)),
            pl.BlockSpec(b.shape, lambda b_, t_: (0, 0)),
        ],
        out_specs=pl.BlockSpec((1, C_out, TT), lambda b_, t_: (b_, 0, t_)),
        scratch_shapes=[pltpu.VMEM((C_in, TT + halo), cdt),
                        pltpu.VMEM((K * C_in, TT), cdt)],
        compiler_params=pltpu.CompilerParams(
            dimension_semantics=("parallel", "parallel"),
            vmem_limit_bytes=_VMEM_LIMIT),
    )(x, x, w_flat, b)


# ----------------------------------------------------------------------------
# Kernel B: fused upsample front (repeat-upsample conv + transposed conv + add)
# ----------------------------------------------------------------------------
def _upsample_kernel(xh_ref, xc_ref, w_ref, b_ref, pm_ref, o_ref,
                     xw_ref, xcol_ref, ycat_ref, *,
                     stride, M, LT, HW, C_in, C_out, G):
    t = pl.program_id(1)
    if M > 0:
        tail = xh_ref[0][:, HW - M:].astype(xw_ref.dtype)
        tail = jnp.where(t == 0, jnp.zeros_like(tail), tail)
        xw_ref[:, :M] = tail
    xw_ref[:, M:] = xc_ref[0].astype(xw_ref.dtype)
    a = xw_ref[...]                                       # (C_in, LT + M)
    # im2col over the original (pre-upsample) timeline: block m holds x[q - m]
    for m in range(M + 1):
        xcol_ref[m * C_in:(m + 1) * C_in, :] = a[:, M - m:M - m + LT]
    # one MXU matmul for ALL phases (phase-major rows), bias added in f32
    y = jnp.dot(w_ref[...], xcol_ref[...].astype(jnp.bfloat16),
                preferred_element_type=jnp.float32) + b_ref[...]
    # phase interleave, grouped in G-column chunks:
    #   ycat[:, n*SG + p*G + q'] = y[p*C_out + c, n*G + q']
    #   out[:, n*SG + q'*stride + p] = ycat[:, n*SG + p*G + q']  (small pm matmul)
    NB = LT // G
    SG = stride * G
    for n in range(NB):
        for p in range(stride):
            ycat_ref[:, n * SG + p * G:n * SG + (p + 1) * G] = (
                y[p * C_out:(p + 1) * C_out, n * G:(n + 1) * G]
                .astype(ycat_ref.dtype))
    for n in range(NB):
        blk = jnp.dot(ycat_ref[:, n * SG:(n + 1) * SG], pm_ref[...],
                      preferred_element_type=jnp.float32)
        o_ref[0, :, n * SG:(n + 1) * SG] = blk.astype(o_ref.dtype)


def upsample_front(a, w_all, b_all, *, stride, tile_target_out=2048):
    """a: (B, C_in, L) pre-activated input; returns (B, C_out, L*stride) bf16."""
    B, C_in, L = a.shape
    assert w_all.shape[0] % stride == 0 and w_all.shape[1] % C_in == 0
    C_out = w_all.shape[0] // stride
    M = w_all.shape[1] // C_in - 1
    LT = _pick_lt(L, stride, M, tile_target_out)
    assert L % LT == 0 and LT >= M
    NT = L // LT
    TT = LT * stride
    HW = _halo_width(LT, M)
    NH = LT // HW
    cdt = _xcol_dtype(C_in)

    # interleave granularity: 128 columns when possible (lane aligned)
    if LT % 128 == 0:
        G = 128
    else:
        G = 1
        for g in range(min(128, LT), 0, -1):
            if LT % g == 0:
                G = g
                break
    SG = stride * G
    j = np.arange(SG)
    pm_np = np.zeros((SG, SG), np.float32)
    pm_np[(j % stride) * G + j // stride, j] = 1.0
    pm = jnp.asarray(pm_np, jnp.bfloat16)

    kern = functools.partial(_upsample_kernel, stride=stride, M=M, LT=LT,
                             HW=HW, C_in=C_in, C_out=C_out, G=G)
    return pl.pallas_call(
        kern,
        out_shape=jax.ShapeDtypeStruct((B, C_out, L * stride), jnp.bfloat16),
        grid=(B, NT),
        in_specs=[
            pl.BlockSpec((1, C_in, HW),
                         lambda b_, t_, NH=NH: (b_, 0, jnp.maximum(t_ * NH - 1, 0))),
            pl.BlockSpec((1, C_in, LT), lambda b_, t_: (b_, 0, t_)),
            pl.BlockSpec(w_all.shape, lambda b_, t_: (0, 0)),
            pl.BlockSpec(b_all.shape, lambda b_, t_: (0, 0)),
            pl.BlockSpec(pm.shape, lambda b_, t_: (0, 0)),
        ],
        out_specs=pl.BlockSpec((1, C_out, TT), lambda b_, t_: (b_, 0, t_)),
        scratch_shapes=[pltpu.VMEM((C_in, LT + M), cdt),
                        pltpu.VMEM(((M + 1) * C_in, LT), cdt),
                        pltpu.VMEM((C_out, TT), jnp.bfloat16)],
        compiler_params=pltpu.CompilerParams(
            dimension_semantics=("parallel", "parallel"),
            vmem_limit_bytes=_VMEM_LIMIT),
    )(a, a, w_all, b_all, pm)


# ----------------------------------------------------------------------------
# Kernel C: fused residual-block stack (+ optional leaky/conv_post/tanh)
# ----------------------------------------------------------------------------
def _resblock_stack_kernel(*args, branches, C, TT, H, HW, extra, slope,
                           post_cfg):
    n_br = len(branches)
    xh_ref, xc_ref = args[0], args[1]
    br_refs = args[2:2 + 2 * n_br]
    pos = 2 + 2 * n_br
    if post_cfg is not None:
        pw_ref, pb_ref = args[pos], args[pos + 1]
        pos += 2
    o_ref, xw_ref, xcol_ref = args[pos], args[pos + 1], args[pos + 2]

    t = pl.program_id(1)
    keep = TT + extra
    cdt = xcol_ref.dtype

    if H > 0:
        tail = xh_ref[0][:, HW - H:].astype(jnp.float32)
        tail = jnp.where(t == 0, jnp.zeros_like(tail), tail)
        xw_ref[:, :H] = tail
    xw_ref[:, H:] = xc_ref[0].astype(jnp.float32)
    x_win = xw_ref[...]                      # (C, TT + H); pre-sequence cols 0

    def mask_pre(arr, lead):
        # Zero columns before the start of the sequence (tile 0 only) so the
        # deeper convs see the same zero left-padding as the reference.
        if lead <= 0:
            return arr
        col = jax.lax.broadcasted_iota(jnp.int32, arr.shape, 1)
        bad = jnp.logical_and(t == 0, col < lead)
        return jnp.where(bad, jnp.zeros_like(arr), arr)

    def conv(a_act, w, b, K, dil):
        w_out = a_act.shape[1] - (K - 1) * dil
        a_c = a_act.astype(cdt)              # cast once before the tap loop
        for k in range(K):
            xcol_ref[k * C:(k + 1) * C, :w_out] = a_c[:, k * dil:k * dil + w_out]
        y = jnp.dot(w, xcol_ref[:K * C, :w_out].astype(jnp.bfloat16),
                    preferred_element_type=jnp.float32)
        return y + b

    acc = jnp.zeros((C, keep), jnp.float32)
    for j, (K, dils) in enumerate(branches):
        w_st, b_st = br_refs[2 * j], br_refs[2 * j + 1]
        cur = x_win
        trim = 0
        for li, d in enumerate(dils):
            h = conv(_leaky(cur, slope), w_st[2 * li], b_st[2 * li], K, d)
            trim1 = trim + (K - 1) * d
            h = mask_pre(h, H - trim1)
            h = conv(_leaky(h, slope), w_st[2 * li + 1], b_st[2 * li + 1], K, 1)
            trim2 = trim1 + (K - 1)
            h = mask_pre(h, H - trim2)
            cur = cur[:, trim2 - trim:] + h          # residual (time aligned)
            trim = trim2
        acc = acc + cur[:, cur.shape[1] - keep:]
    acc = acc * (1.0 / float(len(branches)))

    if post_cfg is None:
        o_ref[0] = acc.astype(o_ref.dtype)
    else:
        K_post, post_slope = post_cfg
        a = mask_pre(_leaky(acc, post_slope), extra)
        y = conv(a, pw_ref[...], pb_ref[...], K_post, 1)
        o_ref[0] = jnp.tanh(y).astype(o_ref.dtype)


def resblock_stack(x, branch_wb, branch_dils, *, slope, post=None,
                   post_slope=0.01, tile_target=2048):
    """Fused stack of residual blocks (averaged), optionally + conv_post/tanh."""
    B, C, T = x.shape
    branches = []
    flat = []
    for (wstack, bstack), dils in zip(branch_wb, branch_dils):
        K_j = wstack.shape[2] // C
        branches.append((K_j, tuple(dils)))
        flat += [wstack, bstack]
    branches = tuple(branches)

    if post is not None:
        pw, pb = post
        K_post = pw.shape[1] // C
        extra = K_post - 1
        flat += [pw, pb]
        post_cfg = (K_post, post_slope)
        C_out = pw.shape[0]
        out_dtype = jnp.float32
    else:
        K_post = 0
        extra = 0
        post_cfg = None
        C_out = C
        out_dtype = jnp.bfloat16

    H_res = max(sum((K - 1) * (d + 1) for d in dils) for K, dils in branches)
    H = H_res + extra
    TT = _pick_tt(T, H, tile_target)
    assert T % TT == 0 and TT >= H
    NT = T // TT
    HW = _halo_width(TT, H)
    NH = TT // HW
    maxK = max([K for K, _ in branches] + ([K_post] if post is not None else []))
    cdt = _xcol_dtype(C)

    kern = functools.partial(_resblock_stack_kernel, branches=branches, C=C,
                             TT=TT, H=H, HW=HW, extra=extra, slope=slope,
                             post_cfg=post_cfg)
    in_specs = [
        pl.BlockSpec((1, C, HW),
                     lambda b_, t_, NH=NH: (b_, 0, jnp.maximum(t_ * NH - 1, 0))),
        pl.BlockSpec((1, C, TT), lambda b_, t_: (b_, 0, t_)),
    ] + [pl.BlockSpec(a.shape, lambda b_, t_, n=a.ndim: (0,) * n) for a in flat]

    return pl.pallas_call(
        kern,
        out_shape=jax.ShapeDtypeStruct((B, C_out, T), out_dtype),
        grid=(B, NT),
        in_specs=in_specs,
        out_specs=pl.BlockSpec((1, C_out, TT), lambda b_, t_: (b_, 0, t_)),
        scratch_shapes=[pltpu.VMEM((C, TT + H), jnp.float32),
                        pltpu.VMEM((maxK * C, TT + H), cdt)],
        compiler_params=pltpu.CompilerParams(
            dimension_semantics=("parallel", "parallel"),
            vmem_limit_bytes=_VMEM_LIMIT),
    )(x, x, *flat)


# ----------------------------------------------------------------------------
# Parameter construction (deterministic, synthetic) + kernel-ready fusion
# ----------------------------------------------------------------------------
def _make_conv_params(key, c_out, c_in, k):
    k1, k2 = jax.random.split(key)
    scale = 1.0 / math.sqrt(c_in * k)
    w = jax.random.normal(k1, (c_out, c_in, k), jnp.float32) * scale
    b = jax.random.normal(k2, (c_out,), jnp.float32) * scale
    return w, b


def _make_convT_params(key, c_in, c_out, k):
    k1, k2 = jax.random.split(key)
    scale = 1.0 / math.sqrt(c_in * k)
    w = jax.random.normal(k1, (c_in, c_out, k), jnp.float32) * scale
    b = jax.random.normal(k2, (c_out,), jnp.float32) * scale
    return w, b


def init_generator_params(key, cfg):
    ks = cfg["kernel_size"]
    ch = cfg["channels"]
    keys = iter(jax.random.split(key, 512))
    params = {"up": [], "rep": [], "res": []}
    params["conv_pre"] = _make_conv_params(next(keys), ch, cfg["in_channels"], ks)
    c_last = ch
    for i, (s, uk) in enumerate(zip(cfg["upsample_scales"],
                                    cfg["upsample_kernal_sizes"])):
        c_in = ch // 2 ** i
        c_out = ch // 2 ** (i + 1)
        c_last = c_out
        params["up"].append(_make_convT_params(next(keys), c_in, c_out, uk))
        params["rep"].append(_make_conv_params(next(keys), c_out, c_in, ks))
        stage_blocks = []
        for j, rk in enumerate(cfg["resblock_kernel_sizes"]):
            layers = []
            for _d in cfg["resblock_dilations"][j]:
                w1, b1 = _make_conv_params(next(keys), c_out, c_out, rk)
                w2, b2 = _make_conv_params(next(keys), c_out, c_out, rk)
                layers.append((w1, b1, w2, b2))
            stage_blocks.append(layers)
        params["res"].append(stage_blocks)
    params["conv_post"] = _make_conv_params(next(keys), cfg["out_channels"],
                                            c_last, ks)
    return params


def _flatten_conv_w(w):
    # (C_out, C_in, K) torch layout -> (C_out, K*C_in) bf16, tap-major blocks
    # matching the in-kernel im2col ordering (block k == tap k).
    c_out, c_in, k = w.shape
    return jnp.transpose(w, (0, 2, 1)).reshape(c_out, k * c_in).astype(jnp.bfloat16)


def _bias2(b):
    return b.reshape(-1, 1).astype(jnp.float32)


def _polyphase_fuse(w_rep, b_rep, w_tr, b_tr, stride):
    """Combine repeat-upsample conv and ConvTranspose1d into polyphase weights.

    out[:, q*s + p] = bias + sum_m W_comb[p, m] @ x_act[q - m]
    where W_comb merges the nearest-repeat conv (kernel reversed, taps grouped
    per phase) with the transposed-conv taps at k = p + m*s.  Phases are
    concatenated along the output-channel axis (phase-major rows).
    """
    C_out, C_in, K_rep = w_rep.shape
    K_tr = w_tr.shape[2]
    assert K_tr >= stride, "transposed-conv kernel must be >= stride"
    M_rep = -(-(K_rep - 1) // stride)
    M_tr = (K_tr - 1) // stride
    M = max(M_rep, M_tr)
    w_tr_t = jnp.transpose(w_tr, (1, 0, 2))          # (C_out, C_in, K_tr)
    phases = []
    for p in range(stride):
        taps = []
        for m in range(M + 1):
            acc = jnp.zeros((C_out, C_in), jnp.float32)
            # repeat-upsample conv contribution (cross-correlation -> reverse)
            for j in range(K_rep):
                if -((p - j) // stride) == m:
                    acc = acc + w_rep[:, :, K_rep - 1 - j]
            # transposed conv contribution
            kk = p + m * stride
            if kk < K_tr:
                acc = acc + w_tr_t[:, :, kk]
            taps.append(acc)
        phases.append(jnp.concatenate(taps, axis=1))  # (C_out, (M+1)*C_in)
    w_all = jnp.concatenate(phases, axis=0).astype(jnp.bfloat16)
    b_all = jnp.tile((b_rep + b_tr).reshape(C_out, 1),
                     (stride, 1)).astype(jnp.float32)
    return w_all, b_all


def fuse_generator_params(raw, cfg):
    fused = {"up": [], "res": []}
    fused["conv_pre"] = (_flatten_conv_w(raw["conv_pre"][0]),
                         _bias2(raw["conv_pre"][1]))
    for i, s in enumerate(cfg["upsample_scales"]):
        w_rep, b_rep = raw["rep"][i]
        w_tr, b_tr = raw["up"][i]
        fused["up"].append(_polyphase_fuse(w_rep, b_rep, w_tr, b_tr, s))
        stage = []
        for layers in raw["res"][i]:
            ws = jnp.stack([_flatten_conv_w(w)
                            for (w1, b1, w2, b2) in layers for w in (w1, w2)], 0)
            bs = jnp.stack([_bias2(b)
                            for (w1, b1, w2, b2) in layers for b in (b1, b2)], 0)
            stage.append((ws, bs))
        fused["res"].append(stage)
    fused["conv_post"] = (_flatten_conv_w(raw["conv_post"][0]),
                          _bias2(raw["conv_post"][1]))
    return fused


# ----------------------------------------------------------------------------
# Forward pass (mirrors Generator.forward with default flags:
#   repeat_upsample=True, causal=True, nsf disabled, conv_post + tanh)
# ----------------------------------------------------------------------------
def generator_forward(fused, mel, cfg, *, tile_target=2048, tile_target_out=2048):
    slope = cfg["nonlinear_slope"]
    wp, bp = fused["conv_pre"]
    x = causal_conv1d(mel, wp, bp, tile_target=tile_target)      # bf16 out

    n_stages = len(cfg["upsample_scales"])
    for i, s in enumerate(cfg["upsample_scales"]):
        # x = sin(x) + x, then LeakyReLU (shared by both upsample branches);
        # one fused bf16 XLA elementwise pass on the small pre-upsample tensor.
        a = _leaky(jnp.sin(x) + x, slope)
        wf, bf = fused["up"][i]
        x = upsample_front(a, wf, bf, stride=s,
                           tile_target_out=tile_target_out)      # bf16 out
        post = fused["conv_post"] if i == n_stages - 1 else None
        x = resblock_stack(x, fused["res"][i], cfg["resblock_dilations"],
                           slope=slope, post=post, tile_target=tile_target)
    return x


# ----------------------------------------------------------------------------
# Demo
# ----------------------------------------------------------------------------
if __name__ == "__main__":
    cfg = dict(
        in_channels=16,
        out_channels=1,
        channels=32,
        kernel_size=7,
        upsample_scales=(4, 4),
        upsample_kernal_sizes=(8, 8),
        resblock_kernel_sizes=(3, 5),
        resblock_dilations=((1, 3), (1, 3)),
        nonlinear_slope=0.1,
    )

    key = jax.random.PRNGKey(0)
    pkey, xkey = jax.random.split(key)
    raw_params = init_generator_params(pkey, cfg)
    fused_params = fuse_generator_params(raw_params, cfg)

    B, T = 2, 64
    mel = jax.random.normal(xkey, (B, cfg["in_channels"], T), jnp.float32)

    # Small tile targets here so the tiny demo also exercises the multi-tile
    # halo path (NT > 1) in both the upsample and the resblock kernels; real
    # audio lengths use the 2048 defaults.
    fwd = jax.jit(lambda p, m: generator_forward(p, m, cfg,
                                                 tile_target=512,
                                                 tile_target_out=512))
    out = jax.block_until_ready(fwd(fused_params, mel))

    total_up = int(np.prod(cfg["upsample_scales"]))
    assert out.shape == (B, cfg["out_channels"], T * total_up), out.shape
    assert out.dtype == jnp.float32
    assert bool(jnp.all(jnp.isfinite(out)))
    assert bool(jnp.all(jnp.abs(out) <= 1.0))            # tanh output range
    print("KERNEL_OK")
</pallas_src>

<mosaic_0001>
module attributes {stable_mosaic.version = 11 : i64} {
  func.func @_conv_kernel(%arg0: i32, %arg1: i32, %arg2: memref<1x16x64xf32, #tpu.memory_space<vmem>>, %arg3: memref<1x16x64xf32, #tpu.memory_space<vmem>>, %arg4: memref<32x112xbf16, #tpu.memory_space<vmem>>, %arg5: memref<32x1xf32, #tpu.memory_space<vmem>>, %arg6: memref<1x32x64xbf16, #tpu.memory_space<vmem>>, %arg7: memref<16x70xbf16, #tpu.memory_space<vmem>>, %arg8: memref<112x64xbf16, #tpu.memory_space<vmem>>) attributes {dimension_semantics = [#tpu.dimension_semantics<parallel>, #tpu.dimension_semantics<parallel>], iteration_bounds = array<i64: 2, 1>, scalar_prefetch = 0 : i64, scratch_operands = 2 : i64, tpu.core_type = #tpu.core_type<tc>, window_params = [{transform_indices = @transform_0, window_bounds = array<i64: 1, 16, 64>}, {transform_indices = @transform_1, window_bounds = array<i64: 1, 16, 64>}, {pipeline_mode = #tpu.pipeline_mode<synchronous>, transform_indices = @transform_2, window_bounds = array<i64: 32, 112>}, {pipeline_mode = #tpu.pipeline_mode<synchronous>, transform_indices = @transform_3, window_bounds = array<i64: 32, 1>}, {transform_indices = @transform_4, window_bounds = array<i64: 1, 32, 64>}]} {
    %c0 = arith.constant 0 : index
    %c0_0 = arith.constant 0 : index
    %c0_1 = arith.constant 0 : index
    %0 = vector.load %arg2[%c0, %c0_0, %c0_1] : memref<1x16x64xf32, #tpu.memory_space<vmem>>, vector<1x16x64xf32>
    %1 = vector.shape_cast %0 : vector<1x16x64xf32> to vector<16x64xf32>
    %2 = vector.extract_strided_slice %1 {offsets = [0, 58], sizes = [16, 6], strides = [1, 1]} : vector<16x64xf32> to vector<16x6xf32>
    %3 = arith.truncf %2 : vector<16x6xf32> to vector<16x6xbf16>
    %c0_i32 = arith.constant 0 : i32
    %4 = arith.cmpi eq, %arg1, %c0_i32 : i32
    %cst = arith.constant 0.000000e+00 : bf16
    %5 = vector.broadcast %cst : bf16 to vector<16x6xbf16>
    %6 = arith.select %4, %5, %3 : vector<16x6xbf16>
    %c0_2 = arith.constant 0 : index
    %c0_3 = arith.constant 0 : index
    %7 = vector.load %arg7[%c0_2, %c0_3] : memref<16x70xbf16, #tpu.memory_space<vmem>>, vector<16x6xbf16>
    tpu.vector_store %arg7[%c0_2, %c0_3], %6 {strides = array<i32>} : memref<16x70xbf16, #tpu.memory_space<vmem>>, vector<16x6xbf16>,
    %c0_4 = arith.constant 0 : index
    %c0_5 = arith.constant 0 : index
    %c0_6 = arith.constant 0 : index
    %8 = vector.load %arg3[%c0_4, %c0_5, %c0_6] : memref<1x16x64xf32, #tpu.memory_space<vmem>>, vector<1x16x64xf32>
    %9 = vector.shape_cast %8 : vector<1x16x64xf32> to vector<16x64xf32>
    %10 = arith.truncf %9 : vector<16x64xf32> to vector<16x64xbf16>
    %c0_7 = arith.constant 0 : index
    %c6 = arith.constant 6 : index
    %11 = vector.load %arg7[%c0_7, %c6] : memref<16x70xbf16, #tpu.memory_space<vmem>>, vector<16x64xbf16>
    tpu.vector_store %arg7[%c0_7, %c6], %10 {strides = array<i32>} : memref<16x70xbf16, #tpu.memory_space<vmem>>, vector<16x64xbf16>,
    %c0_8 = arith.constant 0 : index
    %c0_9 = arith.constant 0 : index
    %12 = vector.load %arg7[%c0_8, %c0_9] : memref<16x70xbf16, #tpu.memory_space<vmem>>, vector<16x70xbf16>
    %13 = vector.extract_strided_slice %12 {offsets = [0, 0], sizes = [16, 64], strides = [1, 1]} : vector<16x70xbf16> to vector<16x64xbf16>
    %c0_10 = arith.constant 0 : index
    %c0_11 = arith.constant 0 : index
    %14 = vector.load %arg8[%c0_10, %c0_11] : memref<112x64xbf16, #tpu.memory_space<vmem>>, vector<16x64xbf16>
    tpu.vector_store %arg8[%c0_10, %c0_11], %13 {strides = array<i32>} : memref<112x64xbf16, #tpu.memory_space<vmem>>, vector<16x64xbf16>,
    %15 = vector.extract_strided_slice %12 {offsets = [0, 1], sizes = [16, 64], strides = [1, 1]} : vector<16x70xbf16> to vector<16x64xbf16>
    %c16 = arith.constant 16 : index
    %c0_12 = arith.constant 0 : index
    %16 = vector.load %arg8[%c16, %c0_12] : memref<112x64xbf16, #tpu.memory_space<vmem>>, vector<16x64xbf16>
    tpu.vector_store %arg8[%c16, %c0_12], %15 {strides = array<i32>} : memref<112x64xbf16, #tpu.memory_space<vmem>>, vector<16x64xbf16>,
    %17 = vector.extract_strided_slice %12 {offsets = [0, 2], sizes = [16, 64], strides = [1, 1]} : vector<16x70xbf16> to vector<16x64xbf16>
    %c32 = arith.constant 32 : index
    %c0_13 = arith.constant 0 : index
    %18 = vector.load %arg8[%c32, %c0_13] : memref<112x64xbf16, #tpu.memory_space<vmem>>, vector<16x64xbf16>
    tpu.vector_store %arg8[%c32, %c0_13], %17 {strides = array<i32>} : memref<112x64xbf16, #tpu.memory_space<vmem>>, vector<16x64xbf16>,
    %19 = vector.extract_strided_slice %12 {offsets = [0, 3], sizes = [16, 64], strides = [1, 1]} : vector<16x70xbf16> to vector<16x64xbf16>
    %c48 = arith.constant 48 : index
    %c0_14 = arith.constant 0 : index
    %20 = vector.load %arg8[%c48, %c0_14] : memref<112x64xbf16, #tpu.memory_space<vmem>>, vector<16x64xbf16>
    tpu.vector_store %arg8[%c48, %c0_14], %19 {strides = array<i32>} : memref<112x64xbf16, #tpu.memory_space<vmem>>, vector<16x64xbf16>,
    %21 = vector.extract_strided_slice %12 {offsets = [0, 4], sizes = [16, 64], strides = [1, 1]} : vector<16x70xbf16> to vector<16x64xbf16>
    %c64 = arith.constant 64 : index
    %c0_15 = arith.constant 0 : index
    %22 = vector.load %arg8[%c64, %c0_15] : memref<112x64xbf16, #tpu.memory_space<vmem>>, vector<16x64xbf16>
    tpu.vector_store %arg8[%c64, %c0_15], %21 {strides = array<i32>} : memref<112x64xbf16, #tpu.memory_space<vmem>>, vector<16x64xbf16>,
    %23 = vector.extract_strided_slice %12 {offsets = [0, 5], sizes = [16, 64], strides = [1, 1]} : vector<16x70xbf16> to vector<16x64xbf16>
    %c80 = arith.constant 80 : index
    %c0_16 = arith.constant 0 : index
    %24 = vector.load %arg8[%c80, %c0_16] : memref<112x64xbf16, #tpu.memory_space<vmem>>, vector<16x64xbf16>
    tpu.vector_store %arg8[%c80, %c0_16], %23 {strides = array<i32>} : memref<112x64xbf16, #tpu.memory_space<vmem>>, vector<16x64xbf16>,
    %25 = vector.extract_strided_slice %12 {offsets = [0, 6], sizes = [16, 64], strides = [1, 1]} : vector<16x70xbf16> to vector<16x64xbf16>
    %c96 = arith.constant 96 : index
    %c0_17 = arith.constant 0 : index
    %26 = vector.load %arg8[%c96, %c0_17] : memref<112x64xbf16, #tpu.memory_space<vmem>>, vector<16x64xbf16>
    tpu.vector_store %arg8[%c96, %c0_17], %25 {strides = array<i32>} : memref<112x64xbf16, #tpu.memory_space<vmem>>, vector<16x64xbf16>,
    %c0_18 = arith.constant 0 : index
    %c0_19 = arith.constant 0 : index
    %27 = vector.load %arg4[%c0_18, %c0_19] : memref<32x112xbf16, #tpu.memory_space<vmem>>, vector<32x112xbf16>
    %c0_20 = arith.constant 0 : index
    %c0_21 = arith.constant 0 : index
    %28 = vector.load %arg8[%c0_20, %c0_21] : memref<112x64xbf16, #tpu.memory_space<vmem>>, vector<112x64xbf16>
    %cst_22 = arith.constant dense<0.000000e+00> : vector<32x64xf32>
    %29 = tpu.matmul %27, %28, %cst_22 {dimension_numbers = #tpu.dot_dimension_numbers<[1], [0], [0], [1], [0, 0, 1, 1], [], []>} : vector<32x112xbf16>, vector<112x64xbf16>, vector<32x64xf32> -> vector<32x64xf32>
    %c0_23 = arith.constant 0 : index
    %c0_24 = arith.constant 0 : index
    %30 = vector.load %arg5[%c0_23, %c0_24] : memref<32x1xf32, #tpu.memory_space<vmem>>, vector<32x1xf32>
    %31 = vector.broadcast %30 : vector<32x1xf32> to vector<32x64xf32>
    %32 = arith.addf %29, %31 : vector<32x64xf32>
    %33 = arith.truncf %32 : vector<32x64xf32> to vector<32x64xbf16>
    %c0_25 = arith.constant 0 : index
    %c0_26 = arith.constant 0 : index
    %c0_27 = arith.constant 0 : index
    %34 = vector.load %arg6[%c0_25, %c0_26, %c0_27] : memref<1x32x64xbf16, #tpu.memory_space<vmem>>, vector<1x32x64xbf16>
    %35 = vector.shape_cast %34 : vector<1x32x64xbf16> to vector<32x64xbf16>
    %36 = vector.shape_cast %33 : vector<32x64xbf16> to vector<1x32x64xbf16>
    tpu.vector_store %arg6[%c0_25, %c0_26, %c0_27], %36 {strides = array<i32>} : memref<1x32x64xbf16, #tpu.memory_space<vmem>>, vector<1x32x64xbf16>,
    return
  }
  func.func @transform_0(%arg0: i32, %arg1: i32) -> (i32, i32, i32) {
    %c1_i32 = arith.constant 1 : i32
    %0 = arith.muli %arg1, %c1_i32 : i32
    %c1_i32_0 = arith.constant 1 : i32
    %1 = arith.subi %0, %c1_i32_0 : i32
    %c0_i32 = arith.constant 0 : i32
    %2 = arith.maxsi %1, %c0_i32 : i32
    %c0_i32_1 = arith.constant 0 : i32
    %c0_i32_2 = arith.constant 0 : i32
    return %arg0, %c0_i32_1, %2 : i32, i32, i32
  }
  func.func @transform_1(%arg0: i32, %arg1: i32) -> (i32, i32, i32) {
    %c0_i32 = arith.constant 0 : i32
    %c0_i32_0 = arith.constant 0 : i32
    return %arg0, %c0_i32, %arg1 : i32, i32, i32
  }
  func.func @transform_2(%arg0: i32, %arg1: i32) -> (i32, i32) {
    %c0_i32 = arith.constant 0 : i32
    %c0_i32_0 = arith.constant 0 : i32
    %c0_i32_1 = arith.constant 0 : i32
    return %c0_i32, %c0_i32_0 : i32, i32
  }
  func.func @transform_3(%arg0: i32, %arg1: i32) -> (i32, i32) {
    %c0_i32 = arith.constant 0 : i32
    %c0_i32_0 = arith.constant 0 : i32
    %c0_i32_1 = arith.constant 0 : i32
    return %c0_i32, %c0_i32_0 : i32, i32
  }
  func.func @transform_4(%arg0: i32, %arg1: i32) -> (i32, i32, i32) {
    %c0_i32 = arith.constant 0 : i32
    %c0_i32_0 = arith.constant 0 : i32
    return %arg0, %c0_i32, %arg1 : i32, i32, i32
  }
}

module attributes {stable_mosaic.version = 11 : i64} {
  func.func @_upsample_kernel(%arg0: i32, %arg1: i32, %arg2: memref<1x32x64xbf16, #tpu.memory_space<vmem>>, %arg3: memref<1x32x64xbf16, #tpu.memory_space<vmem>>, %arg4: memref<64x96xbf16, #tpu.memory_space<vmem>>, %arg5: memref<64x1xf32, #tpu.memory_space<vmem>>, %arg6: memref<256x256xbf16, #tpu.memory_space<vmem>>, %arg7: memref<1x16x256xbf16, #tpu.memory_space<vmem>>, %arg8: memref<32x66xbf16, #tpu.memory_space<vmem>>, %arg9: memref<96x64xbf16, #tpu.memory_space<vmem>>, %arg10: memref<16x256xbf16, #tpu.memory_space<vmem>>) attributes {dimension_semantics = [#tpu.dimension_semantics<parallel>, #tpu.dimension_semantics<parallel>], iteration_bounds = array<i64: 2, 1>, scalar_prefetch = 0 : i64, scratch_operands = 3 : i64, tpu.core_type = #tpu.core_type<tc>, window_params = [{transform_indices = @transform_0, window_bounds = array<i64: 1, 32, 64>}, {transform_indices = @transform_1, window_bounds = array<i64: 1, 32, 64>}, {pipeline_mode = #tpu.pipeline_mode<synchronous>, transform_indices = @transform_2, window_bounds = array<i64: 64, 96>}, {pipeline_mode = #tpu.pipeline_mode<synchronous>, transform_indices = @transform_3, window_bounds = array<i64: 64, 1>}, {pipeline_mode = #tpu.pipeline_mode<synchronous>, transform_indices = @transform_4, window_bounds = array<i64: 256, 256>}, {transform_indices = @transform_5, window_bounds = array<i64: 1, 16, 256>}]} {
    %c0 = arith.constant 0 : index
    %c0_0 = arith.constant 0 : index
    %c0_1 = arith.constant 0 : index
    %0 = vector.load %arg2[%c0, %c0_0, %c0_1] : memref<1x32x64xbf16, #tpu.memory_space<vmem>>, vector<1x32x64xbf16>
    %1 = vector.shape_cast %0 : vector<1x32x64xbf16> to vector<32x64xbf16>
    %2 = vector.extract_strided_slice %1 {offsets = [0, 62], sizes = [32, 2], strides = [1, 1]} : vector<32x64xbf16> to vector<32x2xbf16>
    %c0_i32 = arith.constant 0 : i32
    %3 = arith.cmpi eq, %arg1, %c0_i32 : i32
    %cst = arith.constant 0.000000e+00 : bf16
    %4 = vector.broadcast %cst : bf16 to vector<32x2xbf16>
    %5 = arith.select %3, %4, %2 : vector<32x2xbf16>
    %c0_2 = arith.constant 0 : index
    %c0_3 = arith.constant 0 : index
    %6 = vector.load %arg8[%c0_2, %c0_3] : memref<32x66xbf16, #tpu.memory_space<vmem>>, vector<32x2xbf16>
    tpu.vector_store %arg8[%c0_2, %c0_3], %5 {strides = array<i32>} : memref<32x66xbf16, #tpu.memory_space<vmem>>, vector<32x2xbf16>,
    %c0_4 = arith.constant 0 : index
    %c0_5 = arith.constant 0 : index
    %c0_6 = arith.constant 0 : index
    %7 = vector.load %arg3[%c0_4, %c0_5, %c0_6] : memref<1x32x64xbf16, #tpu.memory_space<vmem>>, vector<1x32x64xbf16>
    %8 = vector.shape_cast %7 : vector<1x32x64xbf16> to vector<32x64xbf16>
    %c0_7 = arith.constant 0 : index
    %c2 = arith.constant 2 : index
    %9 = vector.load %arg8[%c0_7, %c2] : memref<32x66xbf16, #tpu.memory_space<vmem>>, vector<32x64xbf16>
    tpu.vector_store %arg8[%c0_7, %c2], %8 {strides = array<i32>} : memref<32x66xbf16, #tpu.memory_space<vmem>>, vector<32x64xbf16>,
    %c0_8 = arith.constant 0 : index
    %c0_9 = arith.constant 0 : index
    %10 = vector.load %arg8[%c0_8, %c0_9] : memref<32x66xbf16, #tpu.memory_space<vmem>>, vector<32x66xbf16>
    %11 = vector.extract_strided_slice %10 {offsets = [0, 2], sizes = [32, 64], strides = [1, 1]} : vector<32x66xbf16> to vector<32x64xbf16>
    %c0_10 = arith.constant 0 : index
    %c0_11 = arith.constant 0 : index
    %12 = vector.load %arg9[%c0_10, %c0_11] : memref<96x64xbf16, #tpu.memory_space<vmem>>, vector<32x64xbf16>
    tpu.vector_store %arg9[%c0_10, %c0_11], %11 {strides = array<i32>} : memref<96x64xbf16, #tpu.memory_space<vmem>>, vector<32x64xbf16>,
    %13 = vector.extract_strided_slice %10 {offsets = [0, 1], sizes = [32, 64], strides = [1, 1]} : vector<32x66xbf16> to vector<32x64xbf16>
    %c32 = arith.constant 32 : index
    %c0_12 = arith.constant 0 : index
    %14 = vector.load %arg9[%c32, %c0_12] : memref<96x64xbf16, #tpu.memory_space<vmem>>, vector<32x64xbf16>
    tpu.vector_store %arg9[%c32, %c0_12], %13 {strides = array<i32>} : memref<96x64xbf16, #tpu.memory_space<vmem>>, vector<32x64xbf16>,
    %15 = vector.extract_strided_slice %10 {offsets = [0, 0], sizes = [32, 64], strides = [1, 1]} : vector<32x66xbf16> to vector<32x64xbf16>
    %c64 = arith.constant 64 : index
    %c0_13 = arith.constant 0 : index
    %16 = vector.load %arg9[%c64, %c0_13] : memref<96x64xbf16, #tpu.memory_space<vmem>>, vector<32x64xbf16>
    tpu.vector_store %arg9[%c64, %c0_13], %15 {strides = array<i32>} : memref<96x64xbf16, #tpu.memory_space<vmem>>, vector<32x64xbf16>,
    %c0_14 = arith.constant 0 : index
    %c0_15 = arith.constant 0 : index
    %17 = vector.load %arg4[%c0_14, %c0_15] : memref<64x96xbf16, #tpu.memory_space<vmem>>, vector<64x96xbf16>
    %c0_16 = arith.constant 0 : index
    %c0_17 = arith.constant 0 : index
    %18 = vector.load %arg9[%c0_16, %c0_17] : memref<96x64xbf16, #tpu.memory_space<vmem>>, vector<96x64xbf16>
    %cst_18 = arith.constant dense<0.000000e+00> : vector<64x64xf32>
    %19 = tpu.matmul %17, %18, %cst_18 {dimension_numbers = #tpu.dot_dimension_numbers<[1], [0], [0], [1], [0, 0, 1, 1], [], []>} : vector<64x96xbf16>, vector<96x64xbf16>, vector<64x64xf32> -> vector<64x64xf32>
    %c0_19 = arith.constant 0 : index
    %c0_20 = arith.constant 0 : index
    %20 = vector.load %arg5[%c0_19, %c0_20] : memref<64x1xf32, #tpu.memory_space<vmem>>, vector<64x1xf32>
    %21 = vector.broadcast %20 : vector<64x1xf32> to vector<64x64xf32>
    %22 = arith.addf %19, %21 : vector<64x64xf32>
    %23 = vector.extract_strided_slice %22 {offsets = [0, 0], sizes = [16, 64], strides = [1, 1]} : vector<64x64xf32> to vector<16x64xf32>
    %24 = arith.truncf %23 : vector<16x64xf32> to vector<16x64xbf16>
    %c0_21 = arith.constant 0 : index
    %c0_22 = arith.constant 0 : index
    %25 = vector.load %arg10[%c0_21, %c0_22] : memref<16x256xbf16, #tpu.memory_space<vmem>>, vector<16x64xbf16>
    tpu.vector_store %arg10[%c0_21, %c0_22], %24 {strides = array<i32>} : memref<16x256xbf16, #tpu.memory_space<vmem>>, vector<16x64xbf16>,
    %26 = vector.extract_strided_slice %22 {offsets = [16, 0], sizes = [16, 64], strides = [1, 1]} : vector<64x64xf32> to vector<16x64xf32>
    %27 = arith.truncf %26 : vector<16x64xf32> to vector<16x64xbf16>
    %c0_23 = arith.constant 0 : index
    %c64_24 = arith.constant 64 : index
    %28 = vector.load %arg10[%c0_23, %c64_24] : memref<16x256xbf16, #tpu.memory_space<vmem>>, vector<16x64xbf16>
    tpu.vector_store %arg10[%c0_23, %c64_24], %27 {strides = array<i32>} : memref<16x256xbf16, #tpu.memory_space<vmem>>, vector<16x64xbf16>,
    %29 = vector.extract_strided_slice %22 {offsets = [32, 0], sizes = [16, 64], strides = [1, 1]} : vector<64x64xf32> to vector<16x64xf32>
    %30 = arith.truncf %29 : vector<16x64xf32> to vector<16x64xbf16>
    %c0_25 = arith.constant 0 : index
    %c128 = arith.constant 128 : index
    %31 = vector.load %arg10[%c0_25, %c128] : memref<16x256xbf16, #tpu.memory_space<vmem>>, vector<16x64xbf16>
    tpu.vector_store %arg10[%c0_25, %c128], %30 {strides = array<i32>} : memref<16x256xbf16, #tpu.memory_space<vmem>>, vector<16x64xbf16>,
    %32 = vector.extract_strided_slice %22 {offsets = [48, 0], sizes = [16, 64], strides = [1, 1]} : vector<64x64xf32> to vector<16x64xf32>
    %33 = arith.truncf %32 : vector<16x64xf32> to vector<16x64xbf16>
    %c0_26 = arith.constant 0 : index
    %c192 = arith.constant 192 : index
    %34 = vector.load %arg10[%c0_26, %c192] : memref<16x256xbf16, #tpu.memory_space<vmem>>, vector<16x64xbf16>
    tpu.vector_store %arg10[%c0_26, %c192], %33 {strides = array<i32>} : memref<16x256xbf16, #tpu.memory_space<vmem>>, vector<16x64xbf16>,
    %c0_27 = arith.constant 0 : index
    %c0_28 = arith.constant 0 : index
    %35 = vector.load %arg10[%c0_27, %c0_28] : memref<16x256xbf16, #tpu.memory_space<vmem>>, vector<16x256xbf16>
    %c0_29 = arith.constant 0 : index
    %c0_30 = arith.constant 0 : index
    %36 = vector.load %arg6[%c0_29, %c0_30] : memref<256x256xbf16, #tpu.memory_space<vmem>>, vector<256x256xbf16>
    %cst_31 = arith.constant dense<0.000000e+00> : vector<16x256xf32>
    %37 = tpu.matmul %35, %36, %cst_31 {dimension_numbers = #tpu.dot_dimension_numbers<[1], [0], [0], [1], [0, 0, 1, 1], [], []>} : vector<16x256xbf16>, vector<256x256xbf16>, vector<16x256xf32> -> vector<16x256xf32>
    %38 = arith.truncf %37 : vector<16x256xf32> to vector<16x256xbf16>
    %c0_32 = arith.constant 0 : index
    %c0_33 = arith.constant 0 : index
    %c0_34 = arith.constant 0 : index
    %39 = vector.load %arg7[%c0_32, %c0_33, %c0_34] : memref<1x16x256xbf16, #tpu.memory_space<vmem>>, vector<1x16x256xbf16>
    %40 = vector.shape_cast %39 : vector<1x16x256xbf16> to vector<16x256xbf16>
    %41 = vector.shape_cast %38 : vector<16x256xbf16> to vector<1x16x256xbf16>
    tpu.vector_store %arg7[%c0_32, %c0_33, %c0_34], %41 {strides = array<i32>} : memref<1x16x256xbf16, #tpu.memory_space<vmem>>, vector<1x16x256xbf16>,
    return
  }
  func.func @transform_0(%arg0: i32, %arg1: i32) -> (i32, i32, i32) {
    %c1_i32 = arith.constant 1 : i32
    %0 = arith.muli %arg1, %c1_i32 : i32
    %c1_i32_0 = arith.constant 1 : i32
    %1 = arith.subi %0, %c1_i32_0 : i32
    %c0_i32 = arith.constant 0 : i32
    %2 = arith.maxsi %1, %c0_i32 : i32
    %c0_i32_1 = arith.constant 0 : i32
    %c0_i32_2 = arith.constant 0 : i32
    return %arg0, %c0_i32_1, %2 : i32, i32, i32
  }
  func.func @transform_1(%arg0: i32, %arg1: i32) -> (i32, i32, i32) {
    %c0_i32 = arith.constant 0 : i32
    %c0_i32_0 = arith.constant 0 : i32
    return %arg0, %c0_i32, %arg1 : i32, i32, i32
  }
  func.func @transform_2(%arg0: i32, %arg1: i32) -> (i32, i32) {
    %c0_i32 = arith.constant 0 : i32
    %c0_i32_0 = arith.constant 0 : i32
    %c0_i32_1 = arith.constant 0 : i32
    return %c0_i32, %c0_i32_0 : i32, i32
  }
  func.func @transform_3(%arg0: i32, %arg1: i32) -> (i32, i32) {
    %c0_i32 = arith.constant 0 : i32
    %c0_i32_0 = arith.constant 0 : i32
    %c0_i32_1 = arith.constant 0 : i32
    return %c0_i32, %c0_i32_0 : i32, i32
  }
  func.func @transform_4(%arg0: i32, %arg1: i32) -> (i32, i32) {
    %c0_i32 = arith.constant 0 : i32
    %c0_i32_0 = arith.constant 0 : i32
    %c0_i32_1 = arith.constant 0 : i32
    return %c0_i32, %c0_i32_0 : i32, i32
  }
  func.func @transform_5(%arg0: i32, %arg1: i32) -> (i32, i32, i32) {
    %c0_i32 = arith.constant 0 : i32
    %c0_i32_0 = arith.constant 0 : i32
    return %arg0, %c0_i32, %arg1 : i32, i32, i32
  }
}

module attributes {stable_mosaic.version = 11 : i64} {
  func.func @_resblock_stack_kernel(%arg0: i32, %arg1: i32, %arg2: memref<1x16x128xbf16, #tpu.memory_space<vmem>>, %arg3: memref<1x16x256xbf16, #tpu.memory_space<vmem>>, %arg4: memref<4x16x48xbf16, #tpu.memory_space<vmem>>, %arg5: memref<4x16x1xf32, #tpu.memory_space<vmem>>, %arg6: memref<4x16x80xbf16, #tpu.memory_space<vmem>>, %arg7: memref<4x16x1xf32, #tpu.memory_space<vmem>>, %arg8: memref<1x16x256xbf16, #tpu.memory_space<vmem>>, %arg9: memref<16x280xf32, #tpu.memory_space<vmem>>, %arg10: memref<80x280xbf16, #tpu.memory_space<vmem>>) attributes {dimension_semantics = [#tpu.dimension_semantics<parallel>, #tpu.dimension_semantics<parallel>], iteration_bounds = array<i64: 2, 1>, scalar_prefetch = 0 : i64, scratch_operands = 2 : i64, tpu.core_type = #tpu.core_type<tc>, window_params = [{transform_indices = @transform_0, window_bounds = array<i64: 1, 16, 128>}, {transform_indices = @transform_1, window_bounds = array<i64: 1, 16, 256>}, {pipeline_mode = #tpu.pipeline_mode<synchronous>, transform_indices = @transform_2, window_bounds = array<i64: 4, 16, 48>}, {pipeline_mode = #tpu.pipeline_mode<synchronous>, transform_indices = @transform_3, window_bounds = array<i64: 4, 16, 1>}, {pipeline_mode = #tpu.pipeline_mode<synchronous>, transform_indices = @transform_4, window_bounds = array<i64: 4, 16, 80>}, {pipeline_mode = #tpu.pipeline_mode<synchronous>, transform_indices = @transform_5, window_bounds = array<i64: 4, 16, 1>}, {transform_indices = @transform_6, window_bounds = array<i64: 1, 16, 256>}]} {
    %c0 = arith.constant 0 : index
    %c0_0 = arith.constant 0 : index
    %c0_1 = arith.constant 0 : index
    %0 = vector.load %arg2[%c0, %c0_0, %c0_1] : memref<1x16x128xbf16, #tpu.memory_space<vmem>>, vector<1x16x128xbf16>
    %1 = vector.shape_cast %0 : vector<1x16x128xbf16> to vector<16x128xbf16>
    %2 = vector.extract_strided_slice %1 {offsets = [0, 104], sizes = [16, 24], strides = [1, 1]} : vector<16x128xbf16> to vector<16x24xbf16>
    %3 = arith.extf %2 : vector<16x24xbf16> to vector<16x24xf32>
    %c0_i32 = arith.constant 0 : i32
    %4 = arith.cmpi eq, %arg1, %c0_i32 : i32
    %cst = arith.constant 0.000000e+00 : f32
    %5 = vector.broadcast %cst : f32 to vector<16x24xf32>
    %6 = arith.select %4, %5, %3 : vector<16x24xf32>
    %c0_2 = arith.constant 0 : index
    %c0_3 = arith.constant 0 : index
    %7 = vector.load %arg9[%c0_2, %c0_3] : memref<16x280xf32, #tpu.memory_space<vmem>>, vector<16x24xf32>
    tpu.vector_store %arg9[%c0_2, %c0_3], %6 {strides = array<i32>} : memref<16x280xf32, #tpu.memory_space<vmem>>, vector<16x24xf32>,
    %c0_4 = arith.constant 0 : index
    %c0_5 = arith.constant 0 : index
    %c0_6 = arith.constant 0 : index
    %8 = vector.load %arg3[%c0_4, %c0_5, %c0_6] : memref<1x16x256xbf16, #tpu.memory_space<vmem>>, vector<1x16x256xbf16>
    %9 = vector.shape_cast %8 : vector<1x16x256xbf16> to vector<16x256xbf16>
    %10 = arith.extf %9 : vector<16x256xbf16> to vector<16x256xf32>
    %c0_7 = arith.constant 0 : index
    %c24 = arith.constant 24 : index
    %11 = vector.load %arg9[%c0_7, %c24] : memref<16x280xf32, #tpu.memory_space<vmem>>, vector<16x256xf32>
    tpu.vector_store %arg9[%c0_7, %c24], %10 {strides = array<i32>} : memref<16x280xf32, #tpu.memory_space<vmem>>, vector<16x256xf32>,
    %c0_8 = arith.constant 0 : index
    %c0_9 = arith.constant 0 : index
    %12 = vector.load %arg9[%c0_8, %c0_9] : memref<16x280xf32, #tpu.memory_space<vmem>>, vector<16x280xf32>
    %cst_10 = arith.constant 0.000000e+00 : f32
    %13 = vector.broadcast %cst_10 : f32 to vector<16x256xf32>
    %cst_11 = arith.constant 0.000000e+00 : f32
    %14 = vector.broadcast %cst_11 : f32 to vector<16x280xf32>
    %15 = arith.cmpf oge, %12, %14 : vector<16x280xf32>
    %cst_12 = arith.constant 1.000000e-01 : f32
    %16 = vector.broadcast %cst_12 : f32 to vector<16x280xf32>
    %17 = arith.mulf %12, %16 : vector<16x280xf32>
    %18 = arith.select %15, %12, %17 : vector<16x280xi1>, vector<16x280xf32>
    %c0_13 = arith.constant 0 : index
    %c0_14 = arith.constant 0 : index
    %c0_15 = arith.constant 0 : index
    %19 = vector.load %arg4[%c0_13, %c0_14, %c0_15] : memref<4x16x48xbf16, #tpu.memory_space<vmem>>, vector<1x16x48xbf16>
    %20 = vector.shape_cast %19 : vector<1x16x48xbf16> to vector<16x48xbf16>
    %c0_16 = arith.constant 0 : index
    %c0_17 = arith.constant 0 : index
    %c0_18 = arith.constant 0 : index
    %21 = vector.load %arg5[%c0_16, %c0_17, %c0_18] : memref<4x16x1xf32, #tpu.memory_space<vmem>>, vector<1x16x1xf32>
    %22 = vector.shape_cast %21 : vector<1x16x1xf32> to vector<16x1xf32>
    %23 = arith.truncf %18 : vector<16x280xf32> to vector<16x280xbf16>
    %24 = vector.extract_strided_slice %23 {offsets = [0, 0], sizes = [16, 278], strides = [1, 1]} : vector<16x280xbf16> to vector<16x278xbf16>
    %c0_19 = arith.constant 0 : index
    %c0_20 = arith.constant 0 : index
    %25 = vector.load %arg10[%c0_19, %c0_20] : memref<80x280xbf16, #tpu.memory_space<vmem>>, vector<16x278xbf16>
    tpu.vector_store %arg10[%c0_19, %c0_20], %24 {strides = array<i32>} : memref<80x280xbf16, #tpu.memory_space<vmem>>, vector<16x278xbf16>,
    %26 = vector.extract_strided_slice %23 {offsets = [0, 1], sizes = [16, 278], strides = [1, 1]} : vector<16x280xbf16> to vector<16x278xbf16>
    %c16 = arith.constant 16 : index
    %c0_21 = arith.constant 0 : index
    %27 = vector.load %arg10[%c16, %c0_21] : memref<80x280xbf16, #tpu.memory_space<vmem>>, vector<16x278xbf16>
    tpu.vector_store %arg10[%c16, %c0_21], %26 {strides = array<i32>} : memref<80x280xbf16, #tpu.memory_space<vmem>>, vector<16x278xbf16>,
    %28 = vector.extract_strided_slice %23 {offsets = [0, 2], sizes = [16, 278], strides = [1, 1]} : vector<16x280xbf16> to vector<16x278xbf16>
    %c32 = arith.constant 32 : index
    %c0_22 = arith.constant 0 : index
    %29 = vector.load %arg10[%c32, %c0_22] : memref<80x280xbf16, #tpu.memory_space<vmem>>, vector<16x278xbf16>
    tpu.vector_store %arg10[%c32, %c0_22], %28 {strides = array<i32>} : memref<80x280xbf16, #tpu.memory_space<vmem>>, vector<16x278xbf16>,
    %c0_23 = arith.constant 0 : index
    %c0_24 = arith.constant 0 : index
    %30 = vector.load %arg10[%c0_23, %c0_24] : memref<80x280xbf16, #tpu.memory_space<vmem>>, vector<48x278xbf16>
    %cst_25 = arith.constant dense<0.000000e+00> : vector<16x278xf32>
    %31 = tpu.matmul %20, %30, %cst_25 {dimension_numbers = #tpu.dot_dimension_numbers<[1], [0], [0], [1], [0, 0, 1, 1], [], []>} : vector<16x48xbf16>, vector<48x278xbf16>, vector<16x278xf32> -> vector<16x278xf32>
    %32 = vector.broadcast %22 : vector<16x1xf32> to vector<16x278xf32>
    %33 = arith.addf %31, %32 : vector<16x278xf32>
    %34 = tpu.iota {dimensions = array<i32: 1>} : vector<16x278xi32>
    %c0_i32_26 = arith.constant 0 : i32
    %35 = arith.cmpi eq, %arg1, %c0_i32_26 : i32
    %c22_i32 = arith.constant 22 : i32
    %36 = vector.broadcast %c22_i32 : i32 to vector<16x278xi32>
    %37 = arith.cmpi slt, %34, %36 : vector<16x278xi32>
    %38 = vector.broadcast %35 : i1 to vector<16x278xi1>
    %39 = arith.andi %38, %37 : vector<16x278xi1>
    %cst_27 = arith.constant 0.000000e+00 : f32
    %40 = vector.broadcast %cst_27 : f32 to vector<16x278xf32>
    %41 = arith.select %39, %40, %33 : vector<16x278xi1>, vector<16x278xf32>
    %cst_28 = arith.constant 0.000000e+00 : f32
    %42 = vector.broadcast %cst_28 : f32 to vector<16x278xf32>
    %43 = arith.cmpf oge, %41, %42 : vector<16x278xf32>
    %cst_29 = arith.constant 1.000000e-01 : f32
    %44 = vector.broadcast %cst_29 : f32 to vector<16x278xf32>
    %45 = arith.mulf %41, %44 : vector<16x278xf32>
    %46 = arith.select %43, %41, %45 : vector<16x278xi1>, vector<16x278xf32>
    %c1 = arith.constant 1 : index
    %c0_30 = arith.constant 0 : index
    %c0_31 = arith.constant 0 : index
    %47 = vector.load %arg4[%c1, %c0_30, %c0_31] : memref<4x16x48xbf16, #tpu.memory_space<vmem>>, vector<1x16x48xbf16>
    %48 = vector.shape_cast %47 : vector<1x16x48xbf16> to vector<16x48xbf16>
    %c1_32 = arith.constant 1 : index
    %c0_33 = arith.constant 0 : index
    %c0_34 = arith.constant 0 : index
    %49 = vector.load %arg5[%c1_32, %c0_33, %c0_34] : memref<4x16x1xf32, #tpu.memory_space<vmem>>, vector<1x16x1xf32>
    %50 = vector.shape_cast %49 : vector<1x16x1xf32> to vector<16x1xf32>
    %51 = arith.truncf %46 : vector<16x278xf32> to vector<16x278xbf16>
    %52 = vector.extract_strided_slice %51 {offsets = [0, 0], sizes = [16, 276], strides = [1, 1]} : vector<16x278xbf16> to vector<16x276xbf16>
    %c0_35 = arith.constant 0 : index
    %c0_36 = arith.constant 0 : index
    %53 = vector.load %arg10[%c0_35, %c0_36] : memref<80x280xbf16, #tpu.memory_space<vmem>>, vector<16x276xbf16>
    tpu.vector_store %arg10[%c0_35, %c0_36], %52 {strides = array<i32>} : memref<80x280xbf16, #tpu.memory_space<vmem>>, vector<16x276xbf16>,
    %54 = vector.extract_strided_slice %51 {offsets = [0, 1], sizes = [16, 276], strides = [1, 1]} : vector<16x278xbf16> to vector<16x276xbf16>
    %c16_37 = arith.constant 16 : index
    %c0_38 = arith.constant 0 : index
    %55 = vector.load %arg10[%c16_37, %c0_38] : memref<80x280xbf16, #tpu.memory_space<vmem>>, vector<16x276xbf16>
    tpu.vector_store %arg10[%c16_37, %c0_38], %54 {strides = array<i32>} : memref<80x280xbf16, #tpu.memory_space<vmem>>, vector<16x276xbf16>,
    %56 = vector.extract_strided_slice %51 {offsets = [0, 2], sizes = [16, 276], strides = [1, 1]} : vector<16x278xbf16> to vector<16x276xbf16>
    %c32_39 = arith.constant 32 : index
    %c0_40 = arith.constant 0 : index
    %57 = vector.load %arg10[%c32_39, %c0_40] : memref<80x280xbf16, #tpu.memory_space<vmem>>, vector<16x276xbf16>
    tpu.vector_store %arg10[%c32_39, %c0_40], %56 {strides = array<i32>} : memref<80x280xbf16, #tpu.memory_space<vmem>>, vector<16x276xbf16>,
    %c0_41 = arith.constant 0 : index
    %c0_42 = arith.constant 0 : index
    %58 = vector.load %arg10[%c0_41, %c0_42] : memref<80x280xbf16, #tpu.memory_space<vmem>>, vector<48x276xbf16>
    %cst_43 = arith.constant dense<0.000000e+00> : vector<16x276xf32>
    %59 = tpu.matmul %48, %58, %cst_43 {dimension_numbers = #tpu.dot_dimension_numbers<[1], [0], [0], [1], [0, 0, 1, 1], [], []>} : vector<16x48xbf16>, vector<48x276xbf16>, vector<16x276xf32> -> vector<16x276xf32>
    %60 = vector.broadcast %50 : vector<16x1xf32> to vector<16x276xf32>
    %61 = arith.addf %59, %60 : vector<16x276xf32>
    %62 = tpu.iota {dimensions = array<i32: 1>} : vector<16x276xi32>
    %c0_i32_44 = arith.constant 0 : i32
    %63 = arith.cmpi eq, %arg1, %c0_i32_44 : i32
    %c20_i32 = arith.constant 20 : i32
    %64 = vector.broadcast %c20_i32 : i32 to vector<16x276xi32>
    %65 = arith.cmpi slt, %62, %64 : vector<16x276xi32>
    %66 = vector.broadcast %63 : i1 to vector<16x276xi1>
    %67 = arith.andi %66, %65 : vector<16x276xi1>
    %cst_45 = arith.constant 0.000000e+00 : f32
    %68 = vector.broadcast %cst_45 : f32 to vector<16x276xf32>
    %69 = arith.select %67, %68, %61 : vector<16x276xi1>, vector<16x276xf32>
    %70 = vector.extract_strided_slice %12 {offsets = [0, 4], sizes = [16, 276], strides = [1, 1]} : vector<16x280xf32> to vector<16x276xf32>
    %71 = arith.addf %70, %69 : vector<16x276xf32>
    %cst_46 = arith.constant 0.000000e+00 : f32
    %72 = vector.broadcast %cst_46 : f32 to vector<16x276xf32>
    %73 = arith.cmpf oge, %71, %72 : vector<16x276xf32>
    %cst_47 = arith.constant 1.000000e-01 : f32
    %74 = vector.broadcast %cst_47 : f32 to vector<16x276xf32>
    %75 = arith.mulf %71, %74 : vector<16x276xf32>
    %76 = arith.select %73, %71, %75 : vector<16x276xi1>, vector<16x276xf32>
    %c2 = arith.constant 2 : index
    %c0_48 = arith.constant 0 : index
    %c0_49 = arith.constant 0 : index
    %77 = vector.load %arg4[%c2, %c0_48, %c0_49] : memref<4x16x48xbf16, #tpu.memory_space<vmem>>, vector<1x16x48xbf16>
    %78 = vector.shape_cast %77 : vector<1x16x48xbf16> to vector<16x48xbf16>
    %c2_50 = arith.constant 2 : index
    %c0_51 = arith.constant 0 : index
    %c0_52 = arith.constant 0 : index
    %79 = vector.load %arg5[%c2_50, %c0_51, %c0_52] : memref<4x16x1xf32, #tpu.memory_space<vmem>>, vector<1x16x1xf32>
    %80 = vector.shape_cast %79 : vector<1x16x1xf32> to vector<16x1xf32>
    %81 = arith.truncf %76 : vector<16x276xf32> to vector<16x276xbf16>
    %82 = vector.extract_strided_slice %81 {offsets = [0, 0], sizes = [16, 270], strides = [1, 1]} : vector<16x276xbf16> to vector<16x270xbf16>
    %c0_53 = arith.constant 0 : index
    %c0_54 = arith.constant 0 : index
    %83 = vector.load %arg10[%c0_53, %c0_54] : memref<80x280xbf16, #tpu.memory_space<vmem>>, vector<16x270xbf16>
    tpu.vector_store %arg10[%c0_53, %c0_54], %82 {strides = array<i32>} : memref<80x280xbf16, #tpu.memory_space<vmem>>, vector<16x270xbf16>,
    %84 = vector.extract_strided_slice %81 {offsets = [0, 3], sizes = [16, 270], strides = [1, 1]} : vector<16x276xbf16> to vector<16x270xbf16>
    %c16_55 = arith.constant 16 : index
    %c0_56 = arith.constant 0 : index
    %85 = vector.load %arg10[%c16_55, %c0_56] : memref<80x280xbf16, #tpu.memory_space<vmem>>, vector<16x270xbf16>
    tpu.vector_store %arg10[%c16_55, %c0_56], %84 {strides = array<i32>} : memref<80x280xbf16, #tpu.memory_space<vmem>>, vector<16x270xbf16>,
    %86 = vector.extract_strided_slice %81 {offsets = [0, 6], sizes = [16, 270], strides = [1, 1]} : vector<16x276xbf16> to vector<16x270xbf16>
    %c32_57 = arith.constant 32 : index
    %c0_58 = arith.constant 0 : index
    %87 = vector.load %arg10[%c32_57, %c0_58] : memref<80x280xbf16, #tpu.memory_space<vmem>>, vector<16x270xbf16>
    tpu.vector_store %arg10[%c32_57, %c0_58], %86 {strides = array<i32>} : memref<80x280xbf16, #tpu.memory_space<vmem>>, vector<16x270xbf16>,
    %c0_59 = arith.constant 0 : index
    %c0_60 = arith.constant 0 : index
    %88 = vector.load %arg10[%c0_59, %c0_60] : memref<80x280xbf16, #tpu.memory_space<vmem>>, vector<48x270xbf16>
    %cst_61 = arith.constant dense<0.000000e+00> : vector<16x270xf32>
    %89 = tpu.matmul %78, %88, %cst_61 {dimension_numbers = #tpu.dot_dimension_numbers<[1], [0], [0], [1], [0, 0, 1, 1], [], []>} : vector<16x48xbf16>, vector<48x270xbf16>, vector<16x270xf32> -> vector<16x270xf32>
    %90 = vector.broadcast %80 : vector<16x1xf32> to vector<16x270xf32>
    %91 = arith.addf %89, %90 : vector<16x270xf32>
    %92 = tpu.iota {dimensions = array<i32: 1>} : vector<16x270xi32>
    %c0_i32_62 = arith.constant 0 : i32
    %93 = arith.cmpi eq, %arg1, %c0_i32_62 : i32
    %c14_i32 = arith.constant 14 : i32
    %94 = vector.broadcast %c14_i32 : i32 to vector<16x270xi32>
    %95 = arith.cmpi slt, %92, %94 : vector<16x270xi32>
    %96 = vector.broadcast %93 : i1 to vector<16x270xi1>
    %97 = arith.andi %96, %95 : vector<16x270xi1>
    %cst_63 = arith.constant 0.000000e+00 : f32
    %98 = vector.broadcast %cst_63 : f32 to vector<16x270xf32>
    %99 = arith.select %97, %98, %91 : vector<16x270xi1>, vector<16x270xf32>
    %cst_64 = arith.constant 0.000000e+00 : f32
    %100 = vector.broadcast %cst_64 : f32 to vector<16x270xf32>
    %101 = arith.cmpf oge, %99, %100 : vector<16x270xf32>
    %cst_65 = arith.constant 1.000000e-01 : f32
    %102 = vector.broadcast %cst_65 : f32 to vector<16x270xf32>
    %103 = arith.mulf %99, %102 : vector<16x270xf32>
    %104 = arith.select %101, %99, %103 : vector<16x270xi1>, vector<16x270xf32>
    %c3 = arith.constant 3 : index
    %c0_66 = arith.constant 0 : index
    %c0_67 = arith.constant 0 : index
    %105 = vector.load %arg4[%c3, %c0_66, %c0_67] : memref<4x16x48xbf16, #tpu.memory_space<vmem>>, vector<1x16x48xbf16>
    %106 = vector.shape_cast %105 : vector<1x16x48xbf16> to vector<16x48xbf16>
    %c3_68 = arith.constant 3 : index
    %c0_69 = arith.constant 0 : index
    %c0_70 = arith.constant 0 : index
    %107 = vector.load %arg5[%c3_68, %c0_69, %c0_70] : memref<4x16x1xf32, #tpu.memory_space<vmem>>, vector<1x16x1xf32>
    %108 = vector.shape_cast %107 : vector<1x16x1xf32> to vector<16x1xf32>
    %109 = arith.truncf %104 : vector<16x270xf32> to vector<16x270xbf16>
    %110 = vector.extract_strided_slice %109 {offsets = [0, 0], sizes = [16, 268], strides = [1, 1]} : vector<16x270xbf16> to vector<16x268xbf16>
    %c0_71 = arith.constant 0 : index
    %c0_72 = arith.constant 0 : index
    %111 = vector.load %arg10[%c0_71, %c0_72] : memref<80x280xbf16, #tpu.memory_space<vmem>>, vector<16x268xbf16>
    tpu.vector_store %arg10[%c0_71, %c0_72], %110 {strides = array<i32>} : memref<80x280xbf16, #tpu.memory_space<vmem>>, vector<16x268xbf16>,
    %112 = vector.extract_strided_slice %109 {offsets = [0, 1], sizes = [16, 268], strides = [1, 1]} : vector<16x270xbf16> to vector<16x268xbf16>
    %c16_73 = arith.constant 16 : index
    %c0_74 = arith.constant 0 : index
    %113 = vector.load %arg10[%c16_73, %c0_74] : memref<80x280xbf16, #tpu.memory_space<vmem>>, vector<16x268xbf16>
    tpu.vector_store %arg10[%c16_73, %c0_74], %112 {strides = array<i32>} : memref<80x280xbf16, #tpu.memory_space<vmem>>, vector<16x268xbf16>,
    %114 = vector.extract_strided_slice %109 {offsets = [0, 2], sizes = [16, 268], strides = [1, 1]} : vector<16x270xbf16> to vector<16x268xbf16>
    %c32_75 = arith.constant 32 : index
    %c0_76 = arith.constant 0 : index
    %115 = vector.load %arg10[%c32_75, %c0_76] : memref<80x280xbf16, #tpu.memory_space<vmem>>, vector<16x268xbf16>
    tpu.vector_store %arg10[%c32_75, %c0_76], %114 {strides = array<i32>} : memref<80x280xbf16, #tpu.memory_space<vmem>>, vector<16x268xbf16>,
    %c0_77 = arith.constant 0 : index
    %c0_78 = arith.constant 0 : index
    %116 = vector.load %arg10[%c0_77, %c0_78] : memref<80x280xbf16, #tpu.memory_space<vmem>>, vector<48x268xbf16>
    %cst_79 = arith.constant dense<0.000000e+00> : vector<16x268xf32>
    %117 = tpu.matmul %106, %116, %cst_79 {dimension_numbers = #tpu.dot_dimension_numbers<[1], [0], [0], [1], [0, 0, 1, 1], [], []>} : vector<16x48xbf16>, vector<48x268xbf16>, vector<16x268xf32> -> vector<16x268xf32>
    %118 = vector.broadcast %108 : vector<16x1xf32> to vector<16x268xf32>
    %119 = arith.addf %117, %118 : vector<16x268xf32>
    %120 = tpu.iota {dimensions = array<i32: 1>} : vector<16x268xi32>
    %c0_i32_80 = arith.constant 0 : i32
    %121 = arith.cmpi eq, %arg1, %c0_i32_80 : i32
    %c12_i32 = arith.constant 12 : i32
    %122 = vector.broadcast %c12_i32 : i32 to vector<16x268xi32>
    %123 = arith.cmpi slt, %120, %122 : vector<16x268xi32>
    %124 = vector.broadcast %121 : i1 to vector<16x268xi1>
    %125 = arith.andi %124, %123 : vector<16x268xi1>
    %cst_81 = arith.constant 0.000000e+00 : f32
    %126 = vector.broadcast %cst_81 : f32 to vector<16x268xf32>
    %127 = arith.select %125, %126, %119 : vector<16x268xi1>, vector<16x268xf32>
    %128 = vector.extract_strided_slice %71 {offsets = [0, 8], sizes = [16, 268], strides = [1, 1]} : vector<16x276xf32> to vector<16x268xf32>
    %129 = arith.addf %128, %127 : vector<16x268xf32>
    %130 = vector.extract_strided_slice %129 {offsets = [0, 12], sizes = [16, 256], strides = [1, 1]} : vector<16x268xf32> to vector<16x256xf32>
    %131 = arith.addf %13, %130 : vector<16x256xf32>
    %cst_82 = arith.constant 0.000000e+00 : f32
    %132 = vector.broadcast %cst_82 : f32 to vector<16x280xf32>
    %133 = arith.cmpf oge, %12, %132 : vector<16x280xf32>
    %cst_83 = arith.constant 1.000000e-01 : f32
    %134 = vector.broadcast %cst_83 : f32 to vector<16x280xf32>
    %135 = arith.mulf %12, %134 : vector<16x280xf32>
    %136 = arith.select %133, %12, %135 : vector<16x280xi1>, vector<16x280xf32>
    %c0_84 = arith.constant 0 : index
    %c0_85 = arith.constant 0 : index
    %c0_86 = arith.constant 0 : index
    %137 = vector.load %arg6[%c0_84, %c0_85, %c0_86] : memref<4x16x80xbf16, #tpu.memory_space<vmem>>, vector<1x16x80xbf16>
    %138 = vector.shape_cast %137 : vector<1x16x80xbf16> to vector<16x80xbf16>
    %c0_87 = arith.constant 0 : index
    %c0_88 = arith.constant 0 : index
    %c0_89 = arith.constant 0 : index
    %139 = vector.load %arg7[%c0_87, %c0_88, %c0_89] : memref<4x16x1xf32, #tpu.memory_space<vmem>>, vector<1x16x1xf32>
    %140 = vector.shape_cast %139 : vector<1x16x1xf32> to vector<16x1xf32>
    %141 = arith.truncf %136 : vector<16x280xf32> to vector<16x280xbf16>
    %142 = vector.extract_strided_slice %141 {offsets = [0, 0], sizes = [16, 276], strides = [1, 1]} : vector<16x280xbf16> to vector<16x276xbf16>
    %c0_90 = arith.constant 0 : index
    %c0_91 = arith.constant 0 : index
    %143 = vector.load %arg10[%c0_90, %c0_91] : memref<80x280xbf16, #tpu.memory_space<vmem>>, vector<16x276xbf16>
    tpu.vector_store %arg10[%c0_90, %c0_91], %142 {strides = array<i32>} : memref<80x280xbf16, #tpu.memory_space<vmem>>, vector<16x276xbf16>,
    %144 = vector.extract_strided_slice %141 {offsets = [0, 1], sizes = [16, 276], strides = [1, 1]} : vector<16x280xbf16> to vector<16x276xbf16>
    %c16_92 = arith.constant 16 : index
    %c0_93 = arith.constant 0 : index
    %145 = vector.load %arg10[%c16_92, %c0_93] : memref<80x280xbf16, #tpu.memory_space<vmem>>, vector<16x276xbf16>
    tpu.vector_store %arg10[%c16_92, %c0_93], %144 {strides = array<i32>} : memref<80x280xbf16, #tpu.memory_space<vmem>>, vector<16x276xbf16>,
    %146 = vector.extract_strided_slice %141 {offsets = [0, 2], sizes = [16, 276], strides = [1, 1]} : vector<16x280xbf16> to vector<16x276xbf16>
    %c32_94 = arith.constant 32 : index
    %c0_95 = arith.constant 0 : index
    %147 = vector.load %arg10[%c32_94, %c0_95] : memref<80x280xbf16, #tpu.memory_space<vmem>>, vector<16x276xbf16>
    tpu.vector_store %arg10[%c32_94, %c0_95], %146 {strides = array<i32>} : memref<80x280xbf16, #tpu.memory_space<vmem>>, vector<16x276xbf16>,
    %148 = vector.extract_strided_slice %141 {offsets = [0, 3], sizes = [16, 276], strides = [1, 1]} : vector<16x280xbf16> to vector<16x276xbf16>
    %c48 = arith.constant 48 : index
    %c0_96 = arith.constant 0 : index
    %149 = vector.load %arg10[%c48, %c0_96] : memref<80x280xbf16, #tpu.memory_space<vmem>>, vector<16x276xbf16>
    tpu.vector_store %arg10[%c48, %c0_96], %148 {strides = array<i32>} : memref<80x280xbf16, #tpu.memory_space<vmem>>, vector<16x276xbf16>,
    %150 = vector.extract_strided_slice %141 {offsets = [0, 4], sizes = [16, 276], strides = [1, 1]} : vector<16x280xbf16> to vector<16x276xbf16>
    %c64 = arith.constant 64 : index
    %c0_97 = arith.constant 0 : index
    %151 = vector.load %arg10[%c64, %c0_97] : memref<80x280xbf16, #tpu.memory_space<vmem>>, vector<16x276xbf16>
    tpu.vector_store %arg10[%c64, %c0_97], %150 {strides = array<i32>} : memref<80x280xbf16, #tpu.memory_space<vmem>>, vector<16x276xbf16>,
    %c0_98 = arith.constant 0 : index
    %c0_99 = arith.constant 0 : index
    %152 = vector.load %arg10[%c0_98, %c0_99] : memref<80x280xbf16, #tpu.memory_space<vmem>>, vector<80x276xbf16>
    %cst_100 = arith.constant dense<0.000000e+00> : vector<16x276xf32>
    %153 = tpu.matmul %138, %152, %cst_100 {dimension_numbers = #tpu.dot_dimension_numbers<[1], [0], [0], [1], [0, 0, 1, 1], [], []>} : vector<16x80xbf16>, vector<80x276xbf16>, vector<16x276xf32> -> vector<16x276xf32>
    %154 = vector.broadcast %140 : vector<16x1xf32> to vector<16x276xf32>
    %155 = arith.addf %153, %154 : vector<16x276xf32>
    %156 = tpu.iota {dimensions = array<i32: 1>} : vector<16x276xi32>
    %c0_i32_101 = arith.constant 0 : i32
    %157 = arith.cmpi eq, %arg1, %c0_i32_101 : i32
    %c20_i32_102 = arith.constant 20 : i32
    %158 = vector.broadcast %c20_i32_102 : i32 to vector<16x276xi32>
    %159 = arith.cmpi slt, %156, %158 : vector<16x276xi32>
    %160 = vector.broadcast %157 : i1 to vector<16x276xi1>
    %161 = arith.andi %160, %159 : vector<16x276xi1>
    %cst_103 = arith.constant 0.000000e+00 : f32
    %162 = vector.broadcast %cst_103 : f32 to vector<16x276xf32>
    %163 = arith.select %161, %162, %155 : vector<16x276xi1>, vector<16x276xf32>
    %cst_104 = arith.constant 0.000000e+00 : f32
    %164 = vector.broadcast %cst_104 : f32 to vector<16x276xf32>
    %165 = arith.cmpf oge, %163, %164 : vector<16x276xf32>
    %cst_105 = arith.constant 1.000000e-01 : f32
    %166 = vector.broadcast %cst_105 : f32 to vector<16x276xf32>
    %167 = arith.mulf %163, %166 : vector<16x276xf32>
    %168 = arith.select %165, %163, %167 : vector<16x276xi1>, vector<16x276xf32>
    %c1_106 = arith.constant 1 : index
    %c0_107 = arith.constant 0 : index
    %c0_108 = arith.constant 0 : index
    %169 = vector.load %arg6[%c1_106, %c0_107, %c0_108] : memref<4x16x80xbf16, #tpu.memory_space<vmem>>, vector<1x16x80xbf16>
    %170 = vector.shape_cast %169 : vector<1x16x80xbf16> to vector<16x80xbf16>
    %c1_109 = arith.constant 1 : index
    %c0_110 = arith.constant 0 : index
    %c0_111 = arith.constant 0 : index
    %171 = vector.load %arg7[%c1_109, %c0_110, %c0_111] : memref<4x16x1xf32, #tpu.memory_space<vmem>>, vector<1x16x1xf32>
    %172 = vector.shape_cast %171 : vector<1x16x1xf32> to vector<16x1xf32>
    %173 = arith.truncf %168 : vector<16x276xf32> to vector<16x276xbf16>
    %174 = vector.extract_strided_slice %173 {offsets = [0, 0], sizes = [16, 272], strides = [1, 1]} : vector<16x276xbf16> to vector<16x272xbf16>
    %c0_112 = arith.constant 0 : index
    %c0_113 = arith.constant 0 : index
    %175 = vector.load %arg10[%c0_112, %c0_113] : memref<80x280xbf16, #tpu.memory_space<vmem>>, vector<16x272xbf16>
    tpu.vector_store %arg10[%c0_112, %c0_113], %174 {strides = array<i32>} : memref<80x280xbf16, #tpu.memory_space<vmem>>, vector<16x272xbf16>,
    %176 = vector.extract_strided_slice %173 {offsets = [0, 1], sizes = [16, 272], strides = [1, 1]} : vector<16x276xbf16> to vector<16x272xbf16>
    %c16_114 = arith.constant 16 : index
    %c0_115 = arith.constant 0 : index
    %177 = vector.load %arg10[%c16_114, %c0_115] : memref<80x280xbf16, #tpu.memory_space<vmem>>, vector<16x272xbf16>
    tpu.vector_store %arg10[%c16_114, %c0_115], %176 {strides = array<i32>} : memref<80x280xbf16, #tpu.memory_space<vmem>>, vector<16x272xbf16>,
    %178 = vector.extract_strided_slice %173 {offsets = [0, 2], sizes = [16, 272], strides = [1, 1]} : vector<16x276xbf16> to vector<16x272xbf16>
    %c32_116 = arith.constant 32 : index
    %c0_117 = arith.constant 0 : index
    %179 = vector.load %arg10[%c32_116, %c0_117] : memref<80x280xbf16, #tpu.memory_space<vmem>>, vector<16x272xbf16>
    tpu.vector_store %arg10[%c32_116, %c0_117], %178 {strides = array<i32>} : memref<80x280xbf16, #tpu.memory_space<vmem>>, vector<16x272xbf16>,
    %180 = vector.extract_strided_slice %173 {offsets = [0, 3], sizes = [16, 272], strides = [1, 1]} : vector<16x276xbf16> to vector<16x272xbf16>
    %c48_118 = arith.constant 48 : index
    %c0_119 = arith.constant 0 : index
    %181 = vector.load %arg10[%c48_118, %c0_119] : memref<80x280xbf16, #tpu.memory_space<vmem>>, vector<16x272xbf16>
    tpu.vector_store %arg10[%c48_118, %c0_119], %180 {strides = array<i32>} : memref<80x280xbf16, #tpu.memory_space<vmem>>, vector<16x272xbf16>,
    %182 = vector.extract_strided_slice %173 {offsets = [0, 4], sizes = [16, 272], strides = [1, 1]} : vector<16x276xbf16> to vector<16x272xbf16>
    %c64_120 = arith.constant 64 : index
    %c0_121 = arith.constant 0 : index
    %183 = vector.load %arg10[%c64_120, %c0_121] : memref<80x280xbf16, #tpu.memory_space<vmem>>, vector<16x272xbf16>
    tpu.vector_store %arg10[%c64_120, %c0_121], %182 {strides = array<i32>} : memref<80x280xbf16, #tpu.memory_space<vmem>>, vector<16x272xbf16>,
    %c0_122 = arith.constant 0 : index
    %c0_123 = arith.constant 0 : index
    %184 = vector.load %arg10[%c0_122, %c0_123] : memref<80x280xbf16, #tpu.memory_space<vmem>>, vector<80x272xbf16>
    %cst_124 = arith.constant dense<0.000000e+00> : vector<16x272xf32>
    %185 = tpu.matmul %170, %184, %cst_124 {dimension_numbers = #tpu.dot_dimension_numbers<[1], [0], [0], [1], [0, 0, 1, 1], [], []>} : vector<16x80xbf16>, vector<80x272xbf16>, vector<16x272xf32> -> vector<16x272xf32>
    %186 = vector.broadcast %172 : vector<16x1xf32> to vector<16x272xf32>
    %187 = arith.addf %185, %186 : vector<16x272xf32>
    %188 = tpu.iota {dimensions = array<i32: 1>} : vector<16x272xi32>
    %c0_i32_125 = arith.constant 0 : i32
    %189 = arith.cmpi eq, %arg1, %c0_i32_125 : i32
    %c16_i32 = arith.constant 16 : i32
    %190 = vector.broadcast %c16_i32 : i32 to vector<16x272xi32>
    %191 = arith.cmpi slt, %188, %190 : vector<16x272xi32>
    %192 = vector.broadcast %189 : i1 to vector<16x272xi1>
    %193 = arith.andi %192, %191 : vector<16x272xi1>
    %cst_126 = arith.constant 0.000000e+00 : f32
    %194 = vector.broadcast %cst_126 : f32 to vector<16x272xf32>
    %195 = arith.select %193, %194, %187 : vector<16x272xi1>, vector<16x272xf32>
    %196 = vector.extract_strided_slice %12 {offsets = [0, 8], sizes = [16, 272], strides = [1, 1]} : vector<16x280xf32> to vector<16x272xf32>
    %197 = arith.addf %196, %195 : vector<16x272xf32>
    %cst_127 = arith.constant 0.000000e+00 : f32
    %198 = vector.broadcast %cst_127 : f32 to vector<16x272xf32>
    %199 = arith.cmpf oge, %197, %198 : vector<16x272xf32>
    %cst_128 = arith.constant 1.000000e-01 : f32
    %200 = vector.broadcast %cst_128 : f32 to vector<16x272xf32>
    %201 = arith.mulf %197, %200 : vector<16x272xf32>
    %202 = arith.select %199, %197, %201 : vector<16x272xi1>, vector<16x272xf32>
    %c2_129 = arith.constant 2 : index
    %c0_130 = arith.constant 0 : index
    %c0_131 = arith.constant 0 : index
    %203 = vector.load %arg6[%c2_129, %c0_130, %c0_131] : memref<4x16x80xbf16, #tpu.memory_space<vmem>>, vector<1x16x80xbf16>
    %204 = vector.shape_cast %203 : vector<1x16x80xbf16> to vector<16x80xbf16>
    %c2_132 = arith.constant 2 : index
    %c0_133 = arith.constant 0 : index
    %c0_134 = arith.constant 0 : index
    %205 = vector.load %arg7[%c2_132, %c0_133, %c0_134] : memref<4x16x1xf32, #tpu.memory_space<vmem>>, vector<1x16x1xf32>
    %206 = vector.shape_cast %205 : vector<1x16x1xf32> to vector<16x1xf32>
    %207 = arith.truncf %202 : vector<16x272xf32> to vector<16x272xbf16>
    %208 = vector.extract_strided_slice %207 {offsets = [0, 0], sizes = [16, 260], strides = [1, 1]} : vector<16x272xbf16> to vector<16x260xbf16>
    %c0_135 = arith.constant 0 : index
    %c0_136 = arith.constant 0 : index
    %209 = vector.load %arg10[%c0_135, %c0_136] : memref<80x280xbf16, #tpu.memory_space<vmem>>, vector<16x260xbf16>
    tpu.vector_store %arg10[%c0_135, %c0_136], %208 {strides = array<i32>} : memref<80x280xbf16, #tpu.memory_space<vmem>>, vector<16x260xbf16>,
    %210 = vector.extract_strided_slice %207 {offsets = [0, 3], sizes = [16, 260], strides = [1, 1]} : vector<16x272xbf16> to vector<16x260xbf16>
    %c16_137 = arith.constant 16 : index
    %c0_138 = arith.constant 0 : index
    %211 = vector.load %arg10[%c16_137, %c0_138] : memref<80x280xbf16, #tpu.memory_space<vmem>>, vector<16x260xbf16>
    tpu.vector_store %arg10[%c16_137, %c0_138], %210 {strides = array<i32>} : memref<80x280xbf16, #tpu.memory_space<vmem>>, vector<16x260xbf16>,
    %212 = vector.extract_strided_slice %207 {offsets = [0, 6], sizes = [16, 260], strides = [1, 1]} : vector<16x272xbf16> to vector<16x260xbf16>
    %c32_139 = arith.constant 32 : index
    %c0_140 = arith.constant 0 : index
    %213 = vector.load %arg10[%c32_139, %c0_140] : memref<80x280xbf16, #tpu.memory_space<vmem>>, vector<16x260xbf16>
    tpu.vector_store %arg10[%c32_139, %c0_140], %212 {strides = array<i32>} : memref<80x280xbf16, #tpu.memory_space<vmem>>, vector<16x260xbf16>,
    %214 = vector.extract_strided_slice %207 {offsets = [0, 9], sizes = [16, 260], strides = [1, 1]} : vector<16x272xbf16> to vector<16x260xbf16>
    %c48_141 = arith.constant 48 : index
    %c0_142 = arith.constant 0 : index
    %215 = vector.load %arg10[%c48_141, %c0_142] : memref<80x280xbf16, #tpu.memory_space<vmem>>, vector<16x260xbf16>
    tpu.vector_store %arg10[%c48_141, %c0_142], %214 {strides = array<i32>} : memref<80x280xbf16, #tpu.memory_space<vmem>>, vector<16x260xbf16>,
    %216 = vector.extract_strided_slice %207 {offsets = [0, 12], sizes = [16, 260], strides = [1, 1]} : vector<16x272xbf16> to vector<16x260xbf16>
    %c64_143 = arith.constant 64 : index
    %c0_144 = arith.constant 0 : index
    %217 = vector.load %arg10[%c64_143, %c0_144] : memref<80x280xbf16, #tpu.memory_space<vmem>>, vector<16x260xbf16>
    tpu.vector_store %arg10[%c64_143, %c0_144], %216 {strides = array<i32>} : memref<80x280xbf16, #tpu.memory_space<vmem>>, vector<16x260xbf16>,
    %c0_145 = arith.constant 0 : index
    %c0_146 = arith.constant 0 : index
    %218 = vector.load %arg10[%c0_145, %c0_146] : memref<80x280xbf16, #tpu.memory_space<vmem>>, vector<80x260xbf16>
    %cst_147 = arith.constant dense<0.000000e+00> : vector<16x260xf32>
    %219 = tpu.matmul %204, %218, %cst_147 {dimension_numbers = #tpu.dot_dimension_numbers<[1], [0], [0], [1], [0, 0, 1, 1], [], []>} : vector<16x80xbf16>, vector<80x260xbf16>, vector<16x260xf32> -> vector<16x260xf32>
    %220 = vector.broadcast %206 : vector<16x1xf32> to vector<16x260xf32>
    %221 = arith.addf %219, %220 : vector<16x260xf32>
    %222 = tpu.iota {dimensions = array<i32: 1>} : vector<16x260xi32>
    %c0_i32_148 = arith.constant 0 : i32
    %223 = arith.cmpi eq, %arg1, %c0_i32_148 : i32
    %c4_i32 = arith.constant 4 : i32
    %224 = vector.broadcast %c4_i32 : i32 to vector<16x260xi32>
    %225 = arith.cmpi slt, %222, %224 : vector<16x260xi32>
    %226 = vector.broadcast %223 : i1 to vector<16x260xi1>
    %227 = arith.andi %226, %225 : vector<16x260xi1>
    %cst_149 = arith.constant 0.000000e+00 : f32
    %228 = vector.broadcast %cst_149 : f32 to vector<16x260xf32>
    %229 = arith.select %227, %228, %221 : vector<16x260xi1>, vector<16x260xf32>
    %cst_150 = arith.constant 0.000000e+00 : f32
    %230 = vector.broadcast %cst_150 : f32 to vector<16x260xf32>
    %231 = arith.cmpf oge, %229, %230 : vector<16x260xf32>
    %cst_151 = arith.constant 1.000000e-01 : f32
    %232 = vector.broadcast %cst_151 : f32 to vector<16x260xf32>
    %233 = arith.mulf %229, %232 : vector<16x260xf32>
    %234 = arith.select %231, %229, %233 : vector<16x260xi1>, vector<16x260xf32>
    %c3_152 = arith.constant 3 : index
    %c0_153 = arith.constant 0 : index
    %c0_154 = arith.constant 0 : index
    %235 = vector.load %arg6[%c3_152, %c0_153, %c0_154] : memref<4x16x80xbf16, #tpu.memory_space<vmem>>, vector<1x16x80xbf16>
    %236 = vector.shape_cast %235 : vector<1x16x80xbf16> to vector<16x80xbf16>
    %c3_155 = arith.constant 3 : index
    %c0_156 = arith.constant 0 : index
    %c0_157 = arith.constant 0 : index
    %237 = vector.load %arg7[%c3_155, %c0_156, %c0_157] : memref<4x16x1xf32, #tpu.memory_space<vmem>>, vector<1x16x1xf32>
    %238 = vector.shape_cast %237 : vector<1x16x1xf32> to vector<16x1xf32>
    %239 = arith.truncf %234 : vector<16x260xf32> to vector<16x260xbf16>
    %240 = vector.extract_strided_slice %239 {offsets = [0, 0], sizes = [16, 256], strides = [1, 1]} : vector<16x260xbf16> to vector<16x256xbf16>
    %c0_158 = arith.constant 0 : index
    %c0_159 = arith.constant 0 : index
    %241 = vector.load %arg10[%c0_158, %c0_159] : memref<80x280xbf16, #tpu.memory_space<vmem>>, vector<16x256xbf16>
    tpu.vector_store %arg10[%c0_158, %c0_159], %240 {strides = array<i32>} : memref<80x280xbf16, #tpu.memory_space<vmem>>, vector<16x256xbf16>,
    %242 = vector.extract_strided_slice %239 {offsets = [0, 1], sizes = [16, 256], strides = [1, 1]} : vector<16x260xbf16> to vector<16x256xbf16>
    %c16_160 = arith.constant 16 : index
    %c0_161 = arith.constant 0 : index
    %243 = vector.load %arg10[%c16_160, %c0_161] : memref<80x280xbf16, #tpu.memory_space<vmem>>, vector<16x256xbf16>
    tpu.vector_store %arg10[%c16_160, %c0_161], %242 {strides = array<i32>} : memref<80x280xbf16, #tpu.memory_space<vmem>>, vector<16x256xbf16>,
    %244 = vector.extract_strided_slice %239 {offsets = [0, 2], sizes = [16, 256], strides = [1, 1]} : vector<16x260xbf16> to vector<16x256xbf16>
    %c32_162 = arith.constant 32 : index
    %c0_163 = arith.constant 0 : index
    %245 = vector.load %arg10[%c32_162, %c0_163] : memref<80x280xbf16, #tpu.memory_space<vmem>>, vector<16x256xbf16>
    tpu.vector_store %arg10[%c32_162, %c0_163], %244 {strides = array<i32>} : memref<80x280xbf16, #tpu.memory_space<vmem>>, vector<16x256xbf16>,
    %246 = vector.extract_strided_slice %239 {offsets = [0, 3], sizes = [16, 256], strides = [1, 1]} : vector<16x260xbf16> to vector<16x256xbf16>
    %c48_164 = arith.constant 48 : index
    %c0_165 = arith.constant 0 : index
    %247 = vector.load %arg10[%c48_164, %c0_165] : memref<80x280xbf16, #tpu.memory_space<vmem>>, vector<16x256xbf16>
    tpu.vector_store %arg10[%c48_164, %c0_165], %246 {strides = array<i32>} : memref<80x280xbf16, #tpu.memory_space<vmem>>, vector<16x256xbf16>,
    %248 = vector.extract_strided_slice %239 {offsets = [0, 4], sizes = [16, 256], strides = [1, 1]} : vector<16x260xbf16> to vector<16x256xbf16>
    %c64_166 = arith.constant 64 : index
    %c0_167 = arith.constant 0 : index
    %249 = vector.load %arg10[%c64_166, %c0_167] : memref<80x280xbf16, #tpu.memory_space<vmem>>, vector<16x256xbf16>
    tpu.vector_store %arg10[%c64_166, %c0_167], %248 {strides = array<i32>} : memref<80x280xbf16, #tpu.memory_space<vmem>>, vector<16x256xbf16>,
    %c0_168 = arith.constant 0 : index
    %c0_169 = arith.constant 0 : index
    %250 = vector.load %arg10[%c0_168, %c0_169] : memref<80x280xbf16, #tpu.memory_space<vmem>>, vector<80x256xbf16>
    %cst_170 = arith.constant dense<0.000000e+00> : vector<16x256xf32>
    %251 = tpu.matmul %236, %250, %cst_170 {dimension_numbers = #tpu.dot_dimension_numbers<[1], [0], [0], [1], [0, 0, 1, 1], [], []>} : vector<16x80xbf16>, vector<80x256xbf16>, vector<16x256xf32> -> vector<16x256xf32>
    %252 = vector.broadcast %238 : vector<16x1xf32> to vector<16x256xf32>
    %253 = arith.addf %251, %252 : vector<16x256xf32>
    %254 = vector.extract_strided_slice %197 {offsets = [0, 16], sizes = [16, 256], strides = [1, 1]} : vector<16x272xf32> to vector<16x256xf32>
    %255 = arith.addf %254, %253 : vector<16x256xf32>
    %256 = arith.addf %131, %255 : vector<16x256xf32>
    %cst_171 = arith.constant 5.000000e-01 : f32
    %257 = vector.broadcast %cst_171 : f32 to vector<16x256xf32>
    %258 = arith.mulf %256, %257 : vector<16x256xf32>
    %259 = arith.truncf %258 : vector<16x256xf32> to vector<16x256xbf16>
    %c0_172 = arith.constant 0 : index
    %c0_173 = arith.constant 0 : index
    %c0_174 = arith.constant 0 : index
    %260 = vector.load %arg8[%c0_172, %c0_173, %c0_174] : memref<1x16x256xbf16, #tpu.memory_space<vmem>>, vector<1x16x256xbf16>
    %261 = vector.shape_cast %260 : vector<1x16x256xbf16> to vector<16x256xbf16>
    %262 = vector.shape_cast %259 : vector<16x256xbf16> to vector<1x16x256xbf16>
    tpu.vector_store %arg8[%c0_172, %c0_173, %c0_174], %262 {strides = array<i32>} : memref<1x16x256xbf16, #tpu.memory_space<vmem>>, vector<1x16x256xbf16>,
    return
  }
  func.func @transform_0(%arg0: i32, %arg1: i32) -> (i32, i32, i32) {
    %c2_i32 = arith.constant 2 : i32
    %0 = arith.muli %arg1, %c2_i32 : i32
    %c1_i32 = arith.constant 1 : i32
    %1 = arith.subi %0, %c1_i32 : i32
    %c0_i32 = arith.constant 0 : i32
    %2 = arith.maxsi %1, %c0_i32 : i32
    %c0_i32_0 = arith.constant 0 : i32
    %c0_i32_1 = arith.constant 0 : i32
    return %arg0, %c0_i32_0, %2 : i32, i32, i32
  }
  func.func @transform_1(%arg0: i32, %arg1: i32) -> (i32, i32, i32) {
    %c0_i32 = arith.constant 0 : i32
    %c0_i32_0 = arith.constant 0 : i32
    return %arg0, %c0_i32, %arg1 : i32, i32, i32
  }
  func.func @transform_2(%arg0: i32, %arg1: i32) -> (i32, i32, i32) {
    %c0_i32 = arith.constant 0 : i32
    %c0_i32_0 = arith.constant 0 : i32
    %c0_i32_1 = arith.constant 0 : i32
    %c0_i32_2 = arith.constant 0 : i32
    return %c0_i32, %c0_i32_0, %c0_i32_1 : i32, i32, i32
  }
  func.func @transform_3(%arg0: i32, %arg1: i32) -> (i32, i32, i32) {
    %c0_i32 = arith.constant 0 : i32
    %c0_i32_0 = arith.constant 0 : i32
    %c0_i32_1 = arith.constant 0 : i32
    %c0_i32_2 = arith.constant 0 : i32
    return %c0_i32, %c0_i32_0, %c0_i32_1 : i32, i32, i32
  }
  func.func @transform_4(%arg0: i32, %arg1: i32) -> (i32, i32, i32) {
    %c0_i32 = arith.constant 0 : i32
    %c0_i32_0 = arith.constant 0 : i32
    %c0_i32_1 = arith.constant 0 : i32
    %c0_i32_2 = arith.constant 0 : i32
    return %c0_i32, %c0_i32_0, %c0_i32_1 : i32, i32, i32
  }
  func.func @transform_5(%arg0: i32, %arg1: i32) -> (i32, i32, i32) {
    %c0_i32 = arith.constant 0 : i32
    %c0_i32_0 = arith.constant 0 : i32
    %c0_i32_1 = arith.constant 0 : i32
    %c0_i32_2 = arith.constant 0 : i32
    return %c0_i32, %c0_i32_0, %c0_i32_1 : i32, i32, i32
  }
  func.func @transform_6(%arg0: i32, %arg1: i32) -> (i32, i32, i32) {
    %c0_i32 = arith.constant 0 : i32
    %c0_i32_0 = arith.constant 0 : i32
    return %arg0, %c0_i32, %arg1 : i32, i32, i32
  }
}

module attributes {stable_mosaic.version = 11 : i64} {
  func.func @_upsample_kernel(%arg0: i32, %arg1: i32, %arg2: memref<1x16x128xbf16, #tpu.memory_space<vmem>>, %arg3: memref<1x16x128xbf16, #tpu.memory_space<vmem>>, %arg4: memref<32x48xbf16, #tpu.memory_space<vmem>>, %arg5: memref<32x1xf32, #tpu.memory_space<vmem>>, %arg6: memref<512x512xbf16, #tpu.memory_space<vmem>>, %arg7: memref<1x8x512xbf16, #tpu.memory_space<vmem>>, %arg8: memref<16x130xbf16, #tpu.memory_space<vmem>>, %arg9: memref<48x128xbf16, #tpu.memory_space<vmem>>, %arg10: memref<8x512xbf16, #tpu.memory_space<vmem>>) attributes {dimension_semantics = [#tpu.dimension_semantics<parallel>, #tpu.dimension_semantics<parallel>], iteration_bounds = array<i64: 2, 2>, scalar_prefetch = 0 : i64, scratch_operands = 3 : i64, tpu.core_type = #tpu.core_type<tc>, window_params = [{transform_indices = @transform_0, window_bounds = array<i64: 1, 16, 128>}, {transform_indices = @transform_1, window_bounds = array<i64: 1, 16, 128>}, {pipeline_mode = #tpu.pipeline_mode<synchronous>, transform_indices = @transform_2, window_bounds = array<i64: 32, 48>}, {pipeline_mode = #tpu.pipeline_mode<synchronous>, transform_indices = @transform_3, window_bounds = array<i64: 32, 1>}, {pipeline_mode = #tpu.pipeline_mode<synchronous>, transform_indices = @transform_4, window_bounds = array<i64: 512, 512>}, {transform_indices = @transform_5, window_bounds = array<i64: 1, 8, 512>}]} {
    %c0 = arith.constant 0 : index
    %c0_0 = arith.constant 0 : index
    %c0_1 = arith.constant 0 : index
    %0 = vector.load %arg2[%c0, %c0_0, %c0_1] : memref<1x16x128xbf16, #tpu.memory_space<vmem>>, vector<1x16x128xbf16>
    %1 = vector.shape_cast %0 : vector<1x16x128xbf16> to vector<16x128xbf16>
    %2 = vector.extract_strided_slice %1 {offsets = [0, 126], sizes = [16, 2], strides = [1, 1]} : vector<16x128xbf16> to vector<16x2xbf16>
    %c0_i32 = arith.constant 0 : i32
    %3 = arith.cmpi eq, %arg1, %c0_i32 : i32
    %cst = arith.constant 0.000000e+00 : bf16
    %4 = vector.broadcast %cst : bf16 to vector<16x2xbf16>
    %5 = arith.select %3, %4, %2 : vector<16x2xbf16>
    %c0_2 = arith.constant 0 : index
    %c0_3 = arith.constant 0 : index
    %6 = vector.load %arg8[%c0_2, %c0_3] : memref<16x130xbf16, #tpu.memory_space<vmem>>, vector<16x2xbf16>
    tpu.vector_store %arg8[%c0_2, %c0_3], %5 {strides = array<i32>} : memref<16x130xbf16, #tpu.memory_space<vmem>>, vector<16x2xbf16>,
    %c0_4 = arith.constant 0 : index
    %c0_5 = arith.constant 0 : index
    %c0_6 = arith.constant 0 : index
    %7 = vector.load %arg3[%c0_4, %c0_5, %c0_6] : memref<1x16x128xbf16, #tpu.memory_space<vmem>>, vector<1x16x128xbf16>
    %8 = vector.shape_cast %7 : vector<1x16x128xbf16> to vector<16x128xbf16>
    %c0_7 = arith.constant 0 : index
    %c2 = arith.constant 2 : index
    %9 = vector.load %arg8[%c0_7, %c2] : memref<16x130xbf16, #tpu.memory_space<vmem>>, vector<16x128xbf16>
    tpu.vector_store %arg8[%c0_7, %c2], %8 {strides = array<i32>} : memref<16x130xbf16, #tpu.memory_space<vmem>>, vector<16x128xbf16>,
    %c0_8 = arith.constant 0 : index
    %c0_9 = arith.constant 0 : index
    %10 = vector.load %arg8[%c0_8, %c0_9] : memref<16x130xbf16, #tpu.memory_space<vmem>>, vector<16x130xbf16>
    %11 = vector.extract_strided_slice %10 {offsets = [0, 2], sizes = [16, 128], strides = [1, 1]} : vector<16x130xbf16> to vector<16x128xbf16>
    %c0_10 = arith.constant 0 : index
    %c0_11 = arith.constant 0 : index
    %12 = vector.load %arg9[%c0_10, %c0_11] : memref<48x128xbf16, #tpu.memory_space<vmem>>, vector<16x128xbf16>
    tpu.vector_store %arg9[%c0_10, %c0_11], %11 {strides = array<i32>} : memref<48x128xbf16, #tpu.memory_space<vmem>>, vector<16x128xbf16>,
    %13 = vector.extract_strided_slice %10 {offsets = [0, 1], sizes = [16, 128], strides = [1, 1]} : vector<16x130xbf16> to vector<16x128xbf16>
    %c16 = arith.constant 16 : index
    %c0_12 = arith.constant 0 : index
    %14 = vector.load %arg9[%c16, %c0_12] : memref<48x128xbf16, #tpu.memory_space<vmem>>, vector<16x128xbf16>
    tpu.vector_store %arg9[%c16, %c0_12], %13 {strides = array<i32>} : memref<48x128xbf16, #tpu.memory_space<vmem>>, vector<16x128xbf16>,
    %15 = vector.extract_strided_slice %10 {offsets = [0, 0], sizes = [16, 128], strides = [1, 1]} : vector<16x130xbf16> to vector<16x128xbf16>
    %c32 = arith.constant 32 : index
    %c0_13 = arith.constant 0 : index
    %16 = vector.load %arg9[%c32, %c0_13] : memref<48x128xbf16, #tpu.memory_space<vmem>>, vector<16x128xbf16>
    tpu.vector_store %arg9[%c32, %c0_13], %15 {strides = array<i32>} : memref<48x128xbf16, #tpu.memory_space<vmem>>, vector<16x128xbf16>,
    %c0_14 = arith.constant 0 : index
    %c0_15 = arith.constant 0 : index
    %17 = vector.load %arg4[%c0_14, %c0_15] : memref<32x48xbf16, #tpu.memory_space<vmem>>, vector<32x48xbf16>
    %c0_16 = arith.constant 0 : index
    %c0_17 = arith.constant 0 : index
    %18 = vector.load %arg9[%c0_16, %c0_17] : memref<48x128xbf16, #tpu.memory_space<vmem>>, vector<48x128xbf16>
    %cst_18 = arith.constant dense<0.000000e+00> : vector<32x128xf32>
    %19 = tpu.matmul %17, %18, %cst_18 {dimension_numbers = #tpu.dot_dimension_numbers<[1], [0], [0], [1], [0, 0, 1, 1], [], []>} : vector<32x48xbf16>, vector<48x128xbf16>, vector<32x128xf32> -> vector<32x128xf32>
    %c0_19 = arith.constant 0 : index
    %c0_20 = arith.constant 0 : index
    %20 = vector.load %arg5[%c0_19, %c0_20] : memref<32x1xf32, #tpu.memory_space<vmem>>, vector<32x1xf32>
    %21 = vector.broadcast %20 : vector<32x1xf32> to vector<32x128xf32>
    %22 = arith.addf %19, %21 : vector<32x128xf32>
    %23 = vector.extract_strided_slice %22 {offsets = [0, 0], sizes = [8, 128], strides = [1, 1]} : vector<32x128xf32> to vector<8x128xf32>
    %24 = arith.truncf %23 : vector<8x128xf32> to vector<8x128xbf16>
    %c0_21 = arith.constant 0 : index
    %c0_22 = arith.constant 0 : index
    %25 = vector.load %arg10[%c0_21, %c0_22] : memref<8x512xbf16, #tpu.memory_space<vmem>>, vector<8x128xbf16>
    tpu.vector_store %arg10[%c0_21, %c0_22], %24 {strides = array<i32>} : memref<8x512xbf16, #tpu.memory_space<vmem>>, vector<8x128xbf16>,
    %26 = vector.extract_strided_slice %22 {offsets = [8, 0], sizes = [8, 128], strides = [1, 1]} : vector<32x128xf32> to vector<8x128xf32>
    %27 = arith.truncf %26 : vector<8x128xf32> to vector<8x128xbf16>
    %c0_23 = arith.constant 0 : index
    %c128 = arith.constant 128 : index
    %28 = vector.load %arg10[%c0_23, %c128] : memref<8x512xbf16, #tpu.memory_space<vmem>>, vector<8x128xbf16>
    tpu.vector_store %arg10[%c0_23, %c128], %27 {strides = array<i32>} : memref<8x512xbf16, #tpu.memory_space<vmem>>, vector<8x128xbf16>,
    %29 = vector.extract_strided_slice %22 {offsets = [16, 0], sizes = [8, 128], strides = [1, 1]} : vector<32x128xf32> to vector<8x128xf32>
    %30 = arith.truncf %29 : vector<8x128xf32> to vector<8x128xbf16>
    %c0_24 = arith.constant 0 : index
    %c256 = arith.constant 256 : index
    %31 = vector.load %arg10[%c0_24, %c256] : memref<8x512xbf16, #tpu.memory_space<vmem>>, vector<8x128xbf16>
    tpu.vector_store %arg10[%c0_24, %c256], %30 {strides = array<i32>} : memref<8x512xbf16, #tpu.memory_space<vmem>>, vector<8x128xbf16>,
    %32 = vector.extract_strided_slice %22 {offsets = [24, 0], sizes = [8, 128], strides = [1, 1]} : vector<32x128xf32> to vector<8x128xf32>
    %33 = arith.truncf %32 : vector<8x128xf32> to vector<8x128xbf16>
    %c0_25 = arith.constant 0 : index
    %c384 = arith.constant 384 : index
    %34 = vector.load %arg10[%c0_25, %c384] : memref<8x512xbf16, #tpu.memory_space<vmem>>, vector<8x128xbf16>
    tpu.vector_store %arg10[%c0_25, %c384], %33 {strides = array<i32>} : memref<8x512xbf16, #tpu.memory_space<vmem>>, vector<8x128xbf16>,
    %c0_26 = arith.constant 0 : index
    %c0_27 = arith.constant 0 : index
    %35 = vector.load %arg10[%c0_26, %c0_27] : memref<8x512xbf16, #tpu.memory_space<vmem>>, vector<8x512xbf16>
    %c0_28 = arith.constant 0 : index
    %c0_29 = arith.constant 0 : index
    %36 = vector.load %arg6[%c0_28, %c0_29] : memref<512x512xbf16, #tpu.memory_space<vmem>>, vector<512x512xbf16>
    %cst_30 = arith.constant dense<0.000000e+00> : vector<8x512xf32>
    %37 = tpu.matmul %35, %36, %cst_30 {dimension_numbers = #tpu.dot_dimension_numbers<[1], [0], [0], [1], [0, 0, 1, 1], [], []>} : vector<8x512xbf16>, vector<512x512xbf16>, vector<8x512xf32> -> vector<8x512xf32>
    %38 = arith.truncf %37 : vector<8x512xf32> to vector<8x512xbf16>
    %c0_31 = arith.constant 0 : index
    %c0_32 = arith.constant 0 : index
    %c0_33 = arith.constant 0 : index
    %39 = vector.load %arg7[%c0_31, %c0_32, %c0_33] : memref<1x8x512xbf16, #tpu.memory_space<vmem>>, vector<1x8x512xbf16>
    %40 = vector.shape_cast %39 : vector<1x8x512xbf16> to vector<8x512xbf16>
    %41 = vector.shape_cast %38 : vector<8x512xbf16> to vector<1x8x512xbf16>
    tpu.vector_store %arg7[%c0_31, %c0_32, %c0_33], %41 {strides = array<i32>} : memref<1x8x512xbf16, #tpu.memory_space<vmem>>, vector<1x8x512xbf16>,
    return
  }
  func.func @transform_0(%arg0: i32, %arg1: i32) -> (i32, i32, i32) {
    %c1_i32 = arith.constant 1 : i32
    %0 = arith.muli %arg1, %c1_i32 : i32
    %c1_i32_0 = arith.constant 1 : i32
    %1 = arith.subi %0, %c1_i32_0 : i32
    %c0_i32 = arith.constant 0 : i32
    %2 = arith.maxsi %1, %c0_i32 : i32
    %c0_i32_1 = arith.constant 0 : i32
    %c0_i32_2 = arith.constant 0 : i32
    return %arg0, %c0_i32_1, %2 : i32, i32, i32
  }
  func.func @transform_1(%arg0: i32, %arg1: i32) -> (i32, i32, i32) {
    %c0_i32 = arith.constant 0 : i32
    %c0_i32_0 = arith.constant 0 : i32
    return %arg0, %c0_i32, %arg1 : i32, i32, i32
  }
  func.func @transform_2(%arg0: i32, %arg1: i32) -> (i32, i32) {
    %c0_i32 = arith.constant 0 : i32
    %c0_i32_0 = arith.constant 0 : i32
    %c0_i32_1 = arith.constant 0 : i32
    return %c0_i32, %c0_i32_0 : i32, i32
  }
  func.func @transform_3(%arg0: i32, %arg1: i32) -> (i32, i32) {
    %c0_i32 = arith.constant 0 : i32
    %c0_i32_0 = arith.constant 0 : i32
    %c0_i32_1 = arith.constant 0 : i32
    return %c0_i32, %c0_i32_0 : i32, i32
  }
  func.func @transform_4(%arg0: i32, %arg1: i32) -> (i32, i32) {
    %c0_i32 = arith.constant 0 : i32
    %c0_i32_0 = arith.constant 0 : i32
    %c0_i32_1 = arith.constant 0 : i32
    return %c0_i32, %c0_i32_0 : i32, i32
  }
  func.func @transform_5(%arg0: i32, %arg1: i32) -> (i32, i32, i32) {
    %c0_i32 = arith.constant 0 : i32
    %c0_i32_0 = arith.constant 0 : i32
    return %arg0, %c0_i32, %arg1 : i32, i32, i32
  }
}

module attributes {stable_mosaic.version = 11 : i64} {
  func.func @_resblock_stack_kernel(%arg0: i32, %arg1: i32, %arg2: memref<1x8x128xbf16, #tpu.memory_space<vmem>>, %arg3: memref<1x8x512xbf16, #tpu.memory_space<vmem>>, %arg4: memref<4x8x24xbf16, #tpu.memory_space<vmem>>, %arg5: memref<4x8x1xf32, #tpu.memory_space<vmem>>, %arg6: memref<4x8x40xbf16, #tpu.memory_space<vmem>>, %arg7: memref<4x8x1xf32, #tpu.memory_space<vmem>>, %arg8: memref<1x56xbf16, #tpu.memory_space<vmem>>, %arg9: memref<1x1xf32, #tpu.memory_space<vmem>>, %arg10: memref<1x1x512xf32, #tpu.memory_space<vmem>>, %arg11: memref<8x542xf32, #tpu.memory_space<vmem>>, %arg12: memref<56x542xf32, #tpu.memory_space<vmem>>) attributes {dimension_semantics = [#tpu.dimension_semantics<parallel>, #tpu.dimension_semantics<parallel>], iteration_bounds = array<i64: 2, 2>, scalar_prefetch = 0 : i64, scratch_operands = 2 : i64, tpu.core_type = #tpu.core_type<tc>, window_params = [{transform_indices = @transform_0, window_bounds = array<i64: 1, 8, 128>}, {transform_indices = @transform_1, window_bounds = array<i64: 1, 8, 512>}, {pipeline_mode = #tpu.pipeline_mode<synchronous>, transform_indices = @transform_2, window_bounds = array<i64: 4, 8, 24>}, {pipeline_mode = #tpu.pipeline_mode<synchronous>, transform_indices = @transform_3, window_bounds = array<i64: 4, 8, 1>}, {pipeline_mode = #tpu.pipeline_mode<synchronous>, transform_indices = @transform_4, window_bounds = array<i64: 4, 8, 40>}, {pipeline_mode = #tpu.pipeline_mode<synchronous>, transform_indices = @transform_5, window_bounds = array<i64: 4, 8, 1>}, {pipeline_mode = #tpu.pipeline_mode<synchronous>, transform_indices = @transform_6, window_bounds = array<i64: 1, 56>}, {pipeline_mode = #tpu.pipeline_mode<synchronous>, transform_indices = @transform_7, window_bounds = array<i64: 1, 1>}, {transform_indices = @transform_8, window_bounds = array<i64: 1, 1, 512>}]} {
    %c0 = arith.constant 0 : index
    %c0_0 = arith.constant 0 : index
    %c0_1 = arith.constant 0 : index
    %0 = vector.load %arg2[%c0, %c0_0, %c0_1] : memref<1x8x128xbf16, #tpu.memory_space<vmem>>, vector<1x8x128xbf16>
    %1 = vector.shape_cast %0 : vector<1x8x128xbf16> to vector<8x128xbf16>
    %2 = vector.extract_strided_slice %1 {offsets = [0, 98], sizes = [8, 30], strides = [1, 1]} : vector<8x128xbf16> to vector<8x30xbf16>
    %3 = arith.extf %2 : vector<8x30xbf16> to vector<8x30xf32>
    %c0_i32 = arith.constant 0 : i32
    %4 = arith.cmpi eq, %arg1, %c0_i32 : i32
    %cst = arith.constant 0.000000e+00 : f32
    %5 = vector.broadcast %cst : f32 to vector<8x30xf32>
    %6 = arith.select %4, %5, %3 : vector<8x30xf32>
    %c0_2 = arith.constant 0 : index
    %c0_3 = arith.constant 0 : index
    %7 = vector.load %arg11[%c0_2, %c0_3] : memref<8x542xf32, #tpu.memory_space<vmem>>, vector<8x30xf32>
    tpu.vector_store %arg11[%c0_2, %c0_3], %6 {strides = array<i32>} : memref<8x542xf32, #tpu.memory_space<vmem>>, vector<8x30xf32>,
    %c0_4 = arith.constant 0 : index
    %c0_5 = arith.constant 0 : index
    %c0_6 = arith.constant 0 : index
    %8 = vector.load %arg3[%c0_4, %c0_5, %c0_6] : memref<1x8x512xbf16, #tpu.memory_space<vmem>>, vector<1x8x512xbf16>
    %9 = vector.shape_cast %8 : vector<1x8x512xbf16> to vector<8x512xbf16>
    %10 = arith.extf %9 : vector<8x512xbf16> to vector<8x512xf32>
    %c0_7 = arith.constant 0 : index
    %c30 = arith.constant 30 : index
    %11 = vector.load %arg11[%c0_7, %c30] : memref<8x542xf32, #tpu.memory_space<vmem>>, vector<8x512xf32>
    tpu.vector_store %arg11[%c0_7, %c30], %10 {strides = array<i32>} : memref<8x542xf32, #tpu.memory_space<vmem>>, vector<8x512xf32>,
    %c0_8 = arith.constant 0 : index
    %c0_9 = arith.constant 0 : index
    %12 = vector.load %arg11[%c0_8, %c0_9] : memref<8x542xf32, #tpu.memory_space<vmem>>, vector<8x542xf32>
    %cst_10 = arith.constant 0.000000e+00 : f32
    %13 = vector.broadcast %cst_10 : f32 to vector<8x518xf32>
    %cst_11 = arith.constant 0.000000e+00 : f32
    %14 = vector.broadcast %cst_11 : f32 to vector<8x542xf32>
    %15 = arith.cmpf oge, %12, %14 : vector<8x542xf32>
    %cst_12 = arith.constant 1.000000e-01 : f32
    %16 = vector.broadcast %cst_12 : f32 to vector<8x542xf32>
    %17 = arith.mulf %12, %16 : vector<8x542xf32>
    %18 = arith.select %15, %12, %17 : vector<8x542xi1>, vector<8x542xf32>
    %c0_13 = arith.constant 0 : index
    %c0_14 = arith.constant 0 : index
    %c0_15 = arith.constant 0 : index
    %19 = vector.load %arg4[%c0_13, %c0_14, %c0_15] : memref<4x8x24xbf16, #tpu.memory_space<vmem>>, vector<1x8x24xbf16>
    %20 = vector.shape_cast %19 : vector<1x8x24xbf16> to vector<8x24xbf16>
    %c0_16 = arith.constant 0 : index
    %c0_17 = arith.constant 0 : index
    %c0_18 = arith.constant 0 : index
    %21 = vector.load %arg5[%c0_16, %c0_17, %c0_18] : memref<4x8x1xf32, #tpu.memory_space<vmem>>, vector<1x8x1xf32>
    %22 = vector.shape_cast %21 : vector<1x8x1xf32> to vector<8x1xf32>
    %23 = vector.extract_strided_slice %18 {offsets = [0, 0], sizes = [8, 540], strides = [1, 1]} : vector<8x542xf32> to vector<8x540xf32>
    %c0_19 = arith.constant 0 : index
    %c0_20 = arith.constant 0 : index
    %24 = vector.load %arg12[%c0_19, %c0_20] : memref<56x542xf32, #tpu.memory_space<vmem>>, vector<8x540xf32>
    tpu.vector_store %arg12[%c0_19, %c0_20], %23 {strides = array<i32>} : memref<56x542xf32, #tpu.memory_space<vmem>>, vector<8x540xf32>,
    %25 = vector.extract_strided_slice %18 {offsets = [0, 1], sizes = [8, 540], strides = [1, 1]} : vector<8x542xf32> to vector<8x540xf32>
    %c8 = arith.constant 8 : index
    %c0_21 = arith.constant 0 : index
    %26 = vector.load %arg12[%c8, %c0_21] : memref<56x542xf32, #tpu.memory_space<vmem>>, vector<8x540xf32>
    tpu.vector_store %arg12[%c8, %c0_21], %25 {strides = array<i32>} : memref<56x542xf32, #tpu.memory_space<vmem>>, vector<8x540xf32>,
    %27 = vector.extract_strided_slice %18 {offsets = [0, 2], sizes = [8, 540], strides = [1, 1]} : vector<8x542xf32> to vector<8x540xf32>
    %c16 = arith.constant 16 : index
    %c0_22 = arith.constant 0 : index
    %28 = vector.load %arg12[%c16, %c0_22] : memref<56x542xf32, #tpu.memory_space<vmem>>, vector<8x540xf32>
    tpu.vector_store %arg12[%c16, %c0_22], %27 {strides = array<i32>} : memref<56x542xf32, #tpu.memory_space<vmem>>, vector<8x540xf32>,
    %c0_23 = arith.constant 0 : index
    %c0_24 = arith.constant 0 : index
    %29 = vector.load %arg12[%c0_23, %c0_24] : memref<56x542xf32, #tpu.memory_space<vmem>>, vector<24x540xf32>
    %30 = arith.truncf %29 : vector<24x540xf32> to vector<24x540xbf16>
    %cst_25 = arith.constant dense<0.000000e+00> : vector<8x540xf32>
    %31 = tpu.matmul %20, %30, %cst_25 {dimension_numbers = #tpu.dot_dimension_numbers<[1], [0], [0], [1], [0, 0, 1, 1], [], []>} : vector<8x24xbf16>, vector<24x540xbf16>, vector<8x540xf32> -> vector<8x540xf32>
    %32 = vector.broadcast %22 : vector<8x1xf32> to vector<8x540xf32>
    %33 = arith.addf %31, %32 : vector<8x540xf32>
    %34 = tpu.iota {dimensions = array<i32: 1>} : vector<8x540xi32>
    %c0_i32_26 = arith.constant 0 : i32
    %35 = arith.cmpi eq, %arg1, %c0_i32_26 : i32
    %c28_i32 = arith.constant 28 : i32
    %36 = vector.broadcast %c28_i32 : i32 to vector<8x540xi32>
    %37 = arith.cmpi slt, %34, %36 : vector<8x540xi32>
    %38 = vector.broadcast %35 : i1 to vector<8x540xi1>
    %39 = arith.andi %38, %37 : vector<8x540xi1>
    %cst_27 = arith.constant 0.000000e+00 : f32
    %40 = vector.broadcast %cst_27 : f32 to vector<8x540xf32>
    %41 = arith.select %39, %40, %33 : vector<8x540xi1>, vector<8x540xf32>
    %cst_28 = arith.constant 0.000000e+00 : f32
    %42 = vector.broadcast %cst_28 : f32 to vector<8x540xf32>
    %43 = arith.cmpf oge, %41, %42 : vector<8x540xf32>
    %cst_29 = arith.constant 1.000000e-01 : f32
    %44 = vector.broadcast %cst_29 : f32 to vector<8x540xf32>
    %45 = arith.mulf %41, %44 : vector<8x540xf32>
    %46 = arith.select %43, %41, %45 : vector<8x540xi1>, vector<8x540xf32>
    %c1 = arith.constant 1 : index
    %c0_30 = arith.constant 0 : index
    %c0_31 = arith.constant 0 : index
    %47 = vector.load %arg4[%c1, %c0_30, %c0_31] : memref<4x8x24xbf16, #tpu.memory_space<vmem>>, vector<1x8x24xbf16>
    %48 = vector.shape_cast %47 : vector<1x8x24xbf16> to vector<8x24xbf16>
    %c1_32 = arith.constant 1 : index
    %c0_33 = arith.constant 0 : index
    %c0_34 = arith.constant 0 : index
    %49 = vector.load %arg5[%c1_32, %c0_33, %c0_34] : memref<4x8x1xf32, #tpu.memory_space<vmem>>, vector<1x8x1xf32>
    %50 = vector.shape_cast %49 : vector<1x8x1xf32> to vector<8x1xf32>
    %51 = vector.extract_strided_slice %46 {offsets = [0, 0], sizes = [8, 538], strides = [1, 1]} : vector<8x540xf32> to vector<8x538xf32>
    %c0_35 = arith.constant 0 : index
    %c0_36 = arith.constant 0 : index
    %52 = vector.load %arg12[%c0_35, %c0_36] : memref<56x542xf32, #tpu.memory_space<vmem>>, vector<8x538xf32>
    tpu.vector_store %arg12[%c0_35, %c0_36], %51 {strides = array<i32>} : memref<56x542xf32, #tpu.memory_space<vmem>>, vector<8x538xf32>,
    %53 = vector.extract_strided_slice %46 {offsets = [0, 1], sizes = [8, 538], strides = [1, 1]} : vector<8x540xf32> to vector<8x538xf32>
    %c8_37 = arith.constant 8 : index
    %c0_38 = arith.constant 0 : index
    %54 = vector.load %arg12[%c8_37, %c0_38] : memref<56x542xf32, #tpu.memory_space<vmem>>, vector<8x538xf32>
    tpu.vector_store %arg12[%c8_37, %c0_38], %53 {strides = array<i32>} : memref<56x542xf32, #tpu.memory_space<vmem>>, vector<8x538xf32>,
    %55 = vector.extract_strided_slice %46 {offsets = [0, 2], sizes = [8, 538], strides = [1, 1]} : vector<8x540xf32> to vector<8x538xf32>
    %c16_39 = arith.constant 16 : index
    %c0_40 = arith.constant 0 : index
    %56 = vector.load %arg12[%c16_39, %c0_40] : memref<56x542xf32, #tpu.memory_space<vmem>>, vector<8x538xf32>
    tpu.vector_store %arg12[%c16_39, %c0_40], %55 {strides = array<i32>} : memref<56x542xf32, #tpu.memory_space<vmem>>, vector<8x538xf32>,
    %c0_41 = arith.constant 0 : index
    %c0_42 = arith.constant 0 : index
    %57 = vector.load %arg12[%c0_41, %c0_42] : memref<56x542xf32, #tpu.memory_space<vmem>>, vector<24x538xf32>
    %58 = arith.truncf %57 : vector<24x538xf32> to vector<24x538xbf16>
    %cst_43 = arith.constant dense<0.000000e+00> : vector<8x538xf32>
    %59 = tpu.matmul %48, %58, %cst_43 {dimension_numbers = #tpu.dot_dimension_numbers<[1], [0], [0], [1], [0, 0, 1, 1], [], []>} : vector<8x24xbf16>, vector<24x538xbf16>, vector<8x538xf32> -> vector<8x538xf32>
    %60 = vector.broadcast %50 : vector<8x1xf32> to vector<8x538xf32>
    %61 = arith.addf %59, %60 : vector<8x538xf32>
    %62 = tpu.iota {dimensions = array<i32: 1>} : vector<8x538xi32>
    %c0_i32_44 = arith.constant 0 : i32
    %63 = arith.cmpi eq, %arg1, %c0_i32_44 : i32
    %c26_i32 = arith.constant 26 : i32
    %64 = vector.broadcast %c26_i32 : i32 to vector<8x538xi32>
    %65 = arith.cmpi slt, %62, %64 : vector<8x538xi32>
    %66 = vector.broadcast %63 : i1 to vector<8x538xi1>
    %67 = arith.andi %66, %65 : vector<8x538xi1>
    %cst_45 = arith.constant 0.000000e+00 : f32
    %68 = vector.broadcast %cst_45 : f32 to vector<8x538xf32>
    %69 = arith.select %67, %68, %61 : vector<8x538xi1>, vector<8x538xf32>
    %70 = vector.extract_strided_slice %12 {offsets = [0, 4], sizes = [8, 538], strides = [1, 1]} : vector<8x542xf32> to vector<8x538xf32>
    %71 = arith.addf %70, %69 : vector<8x538xf32>
    %cst_46 = arith.constant 0.000000e+00 : f32
    %72 = vector.broadcast %cst_46 : f32 to vector<8x538xf32>
    %73 = arith.cmpf oge, %71, %72 : vector<8x538xf32>
    %cst_47 = arith.constant 1.000000e-01 : f32
    %74 = vector.broadcast %cst_47 : f32 to vector<8x538xf32>
    %75 = arith.mulf %71, %74 : vector<8x538xf32>
    %76 = arith.select %73, %71, %75 : vector<8x538xi1>, vector<8x538xf32>
    %c2 = arith.constant 2 : index
    %c0_48 = arith.constant 0 : index
    %c0_49 = arith.constant 0 : index
    %77 = vector.load %arg4[%c2, %c0_48, %c0_49] : memref<4x8x24xbf16, #tpu.memory_space<vmem>>, vector<1x8x24xbf16>
    %78 = vector.shape_cast %77 : vector<1x8x24xbf16> to vector<8x24xbf16>
    %c2_50 = arith.constant 2 : index
    %c0_51 = arith.constant 0 : index
    %c0_52 = arith.constant 0 : index
    %79 = vector.load %arg5[%c2_50, %c0_51, %c0_52] : memref<4x8x1xf32, #tpu.memory_space<vmem>>, vector<1x8x1xf32>
    %80 = vector.shape_cast %79 : vector<1x8x1xf32> to vector<8x1xf32>
    %81 = vector.extract_strided_slice %76 {offsets = [0, 0], sizes = [8, 532], strides = [1, 1]} : vector<8x538xf32> to vector<8x532xf32>
    %c0_53 = arith.constant 0 : index
    %c0_54 = arith.constant 0 : index
    %82 = vector.load %arg12[%c0_53, %c0_54] : memref<56x542xf32, #tpu.memory_space<vmem>>, vector<8x532xf32>
    tpu.vector_store %arg12[%c0_53, %c0_54], %81 {strides = array<i32>} : memref<56x542xf32, #tpu.memory_space<vmem>>, vector<8x532xf32>,
    %83 = vector.extract_strided_slice %76 {offsets = [0, 3], sizes = [8, 532], strides = [1, 1]} : vector<8x538xf32> to vector<8x532xf32>
    %c8_55 = arith.constant 8 : index
    %c0_56 = arith.constant 0 : index
    %84 = vector.load %arg12[%c8_55, %c0_56] : memref<56x542xf32, #tpu.memory_space<vmem>>, vector<8x532xf32>
    tpu.vector_store %arg12[%c8_55, %c0_56], %83 {strides = array<i32>} : memref<56x542xf32, #tpu.memory_space<vmem>>, vector<8x532xf32>,
    %85 = vector.extract_strided_slice %76 {offsets = [0, 6], sizes = [8, 532], strides = [1, 1]} : vector<8x538xf32> to vector<8x532xf32>
    %c16_57 = arith.constant 16 : index
    %c0_58 = arith.constant 0 : index
    %86 = vector.load %arg12[%c16_57, %c0_58] : memref<56x542xf32, #tpu.memory_space<vmem>>, vector<8x532xf32>
    tpu.vector_store %arg12[%c16_57, %c0_58], %85 {strides = array<i32>} : memref<56x542xf32, #tpu.memory_space<vmem>>, vector<8x532xf32>,
    %c0_59 = arith.constant 0 : index
    %c0_60 = arith.constant 0 : index
    %87 = vector.load %arg12[%c0_59, %c0_60] : memref<56x542xf32, #tpu.memory_space<vmem>>, vector<24x532xf32>
    %88 = arith.truncf %87 : vector<24x532xf32> to vector<24x532xbf16>
    %cst_61 = arith.constant dense<0.000000e+00> : vector<8x532xf32>
    %89 = tpu.matmul %78, %88, %cst_61 {dimension_numbers = #tpu.dot_dimension_numbers<[1], [0], [0], [1], [0, 0, 1, 1], [], []>} : vector<8x24xbf16>, vector<24x532xbf16>, vector<8x532xf32> -> vector<8x532xf32>
    %90 = vector.broadcast %80 : vector<8x1xf32> to vector<8x532xf32>
    %91 = arith.addf %89, %90 : vector<8x532xf32>
    %92 = tpu.iota {dimensions = array<i32: 1>} : vector<8x532xi32>
    %c0_i32_62 = arith.constant 0 : i32
    %93 = arith.cmpi eq, %arg1, %c0_i32_62 : i32
    %c20_i32 = arith.constant 20 : i32
    %94 = vector.broadcast %c20_i32 : i32 to vector<8x532xi32>
    %95 = arith.cmpi slt, %92, %94 : vector<8x532xi32>
    %96 = vector.broadcast %93 : i1 to vector<8x532xi1>
    %97 = arith.andi %96, %95 : vector<8x532xi1>
    %cst_63 = arith.constant 0.000000e+00 : f32
    %98 = vector.broadcast %cst_63 : f32 to vector<8x532xf32>
    %99 = arith.select %97, %98, %91 : vector<8x532xi1>, vector<8x532xf32>
    %cst_64 = arith.constant 0.000000e+00 : f32
    %100 = vector.broadcast %cst_64 : f32 to vector<8x532xf32>
    %101 = arith.cmpf oge, %99, %100 : vector<8x532xf32>
    %cst_65 = arith.constant 1.000000e-01 : f32
    %102 = vector.broadcast %cst_65 : f32 to vector<8x532xf32>
    %103 = arith.mulf %99, %102 : vector<8x532xf32>
    %104 = arith.select %101, %99, %103 : vector<8x532xi1>, vector<8x532xf32>
    %c3 = arith.constant 3 : index
    %c0_66 = arith.constant 0 : index
    %c0_67 = arith.constant 0 : index
    %105 = vector.load %arg4[%c3, %c0_66, %c0_67] : memref<4x8x24xbf16, #tpu.memory_space<vmem>>, vector<1x8x24xbf16>
    %106 = vector.shape_cast %105 : vector<1x8x24xbf16> to vector<8x24xbf16>
    %c3_68 = arith.constant 3 : index
    %c0_69 = arith.constant 0 : index
    %c0_70 = arith.constant 0 : index
    %107 = vector.load %arg5[%c3_68, %c0_69, %c0_70] : memref<4x8x1xf32, #tpu.memory_space<vmem>>, vector<1x8x1xf32>
    %108 = vector.shape_cast %107 : vector<1x8x1xf32> to vector<8x1xf32>
    %109 = vector.extract_strided_slice %104 {offsets = [0, 0], sizes = [8, 530], strides = [1, 1]} : vector<8x532xf32> to vector<8x530xf32>
    %c0_71 = arith.constant 0 : index
    %c0_72 = arith.constant 0 : index
    %110 = vector.load %arg12[%c0_71, %c0_72] : memref<56x542xf32, #tpu.memory_space<vmem>>, vector<8x530xf32>
    tpu.vector_store %arg12[%c0_71, %c0_72], %109 {strides = array<i32>} : memref<56x542xf32, #tpu.memory_space<vmem>>, vector<8x530xf32>,
    %111 = vector.extract_strided_slice %104 {offsets = [0, 1], sizes = [8, 530], strides = [1, 1]} : vector<8x532xf32> to vector<8x530xf32>
    %c8_73 = arith.constant 8 : index
    %c0_74 = arith.constant 0 : index
    %112 = vector.load %arg12[%c8_73, %c0_74] : memref<56x542xf32, #tpu.memory_space<vmem>>, vector<8x530xf32>
    tpu.vector_store %arg12[%c8_73, %c0_74], %111 {strides = array<i32>} : memref<56x542xf32, #tpu.memory_space<vmem>>, vector<8x530xf32>,
    %113 = vector.extract_strided_slice %104 {offsets = [0, 2], sizes = [8, 530], strides = [1, 1]} : vector<8x532xf32> to vector<8x530xf32>
    %c16_75 = arith.constant 16 : index
    %c0_76 = arith.constant 0 : index
    %114 = vector.load %arg12[%c16_75, %c0_76] : memref<56x542xf32, #tpu.memory_space<vmem>>, vector<8x530xf32>
    tpu.vector_store %arg12[%c16_75, %c0_76], %113 {strides = array<i32>} : memref<56x542xf32, #tpu.memory_space<vmem>>, vector<8x530xf32>,
    %c0_77 = arith.constant 0 : index
    %c0_78 = arith.constant 0 : index
    %115 = vector.load %arg12[%c0_77, %c0_78] : memref<56x542xf32, #tpu.memory_space<vmem>>, vector<24x530xf32>
    %116 = arith.truncf %115 : vector<24x530xf32> to vector<24x530xbf16>
    %cst_79 = arith.constant dense<0.000000e+00> : vector<8x530xf32>
    %117 = tpu.matmul %106, %116, %cst_79 {dimension_numbers = #tpu.dot_dimension_numbers<[1], [0], [0], [1], [0, 0, 1, 1], [], []>} : vector<8x24xbf16>, vector<24x530xbf16>, vector<8x530xf32> -> vector<8x530xf32>
    %118 = vector.broadcast %108 : vector<8x1xf32> to vector<8x530xf32>
    %119 = arith.addf %117, %118 : vector<8x530xf32>
    %120 = tpu.iota {dimensions = array<i32: 1>} : vector<8x530xi32>
    %c0_i32_80 = arith.constant 0 : i32
    %121 = arith.cmpi eq, %arg1, %c0_i32_80 : i32
    %c18_i32 = arith.constant 18 : i32
    %122 = vector.broadcast %c18_i32 : i32 to vector<8x530xi32>
    %123 = arith.cmpi slt, %120, %122 : vector<8x530xi32>
    %124 = vector.broadcast %121 : i1 to vector<8x530xi1>
    %125 = arith.andi %124, %123 : vector<8x530xi1>
    %cst_81 = arith.constant 0.000000e+00 : f32
    %126 = vector.broadcast %cst_81 : f32 to vector<8x530xf32>
    %127 = arith.select %125, %126, %119 : vector<8x530xi1>, vector<8x530xf32>
    %128 = vector.extract_strided_slice %71 {offsets = [0, 8], sizes = [8, 530], strides = [1, 1]} : vector<8x538xf32> to vector<8x530xf32>
    %129 = arith.addf %128, %127 : vector<8x530xf32>
    %130 = vector.extract_strided_slice %129 {offsets = [0, 12], sizes = [8, 518], strides = [1, 1]} : vector<8x530xf32> to vector<8x518xf32>
    %131 = arith.addf %13, %130 : vector<8x518xf32>
    %cst_82 = arith.constant 0.000000e+00 : f32
    %132 = vector.broadcast %cst_82 : f32 to vector<8x542xf32>
    %133 = arith.cmpf oge, %12, %132 : vector<8x542xf32>
    %cst_83 = arith.constant 1.000000e-01 : f32
    %134 = vector.broadcast %cst_83 : f32 to vector<8x542xf32>
    %135 = arith.mulf %12, %134 : vector<8x542xf32>
    %136 = arith.select %133, %12, %135 : vector<8x542xi1>, vector<8x542xf32>
    %c0_84 = arith.constant 0 : index
    %c0_85 = arith.constant 0 : index
    %c0_86 = arith.constant 0 : index
    %137 = vector.load %arg6[%c0_84, %c0_85, %c0_86] : memref<4x8x40xbf16, #tpu.memory_space<vmem>>, vector<1x8x40xbf16>
    %138 = vector.shape_cast %137 : vector<1x8x40xbf16> to vector<8x40xbf16>
    %c0_87 = arith.constant 0 : index
    %c0_88 = arith.constant 0 : index
    %c0_89 = arith.constant 0 : index
    %139 = vector.load %arg7[%c0_87, %c0_88, %c0_89] : memref<4x8x1xf32, #tpu.memory_space<vmem>>, vector<1x8x1xf32>
    %140 = vector.shape_cast %139 : vector<1x8x1xf32> to vector<8x1xf32>
    %141 = vector.extract_strided_slice %136 {offsets = [0, 0], sizes = [8, 538], strides = [1, 1]} : vector<8x542xf32> to vector<8x538xf32>
    %c0_90 = arith.constant 0 : index
    %c0_91 = arith.constant 0 : index
    %142 = vector.load %arg12[%c0_90, %c0_91] : memref<56x542xf32, #tpu.memory_space<vmem>>, vector<8x538xf32>
    tpu.vector_store %arg12[%c0_90, %c0_91], %141 {strides = array<i32>} : memref<56x542xf32, #tpu.memory_space<vmem>>, vector<8x538xf32>,
    %143 = vector.extract_strided_slice %136 {offsets = [0, 1], sizes = [8, 538], strides = [1, 1]} : vector<8x542xf32> to vector<8x538xf32>
    %c8_92 = arith.constant 8 : index
    %c0_93 = arith.constant 0 : index
    %144 = vector.load %arg12[%c8_92, %c0_93] : memref<56x542xf32, #tpu.memory_space<vmem>>, vector<8x538xf32>
    tpu.vector_store %arg12[%c8_92, %c0_93], %143 {strides = array<i32>} : memref<56x542xf32, #tpu.memory_space<vmem>>, vector<8x538xf32>,
    %145 = vector.extract_strided_slice %136 {offsets = [0, 2], sizes = [8, 538], strides = [1, 1]} : vector<8x542xf32> to vector<8x538xf32>
    %c16_94 = arith.constant 16 : index
    %c0_95 = arith.constant 0 : index
    %146 = vector.load %arg12[%c16_94, %c0_95] : memref<56x542xf32, #tpu.memory_space<vmem>>, vector<8x538xf32>
    tpu.vector_store %arg12[%c16_94, %c0_95], %145 {strides = array<i32>} : memref<56x542xf32, #tpu.memory_space<vmem>>, vector<8x538xf32>,
    %147 = vector.extract_strided_slice %136 {offsets = [0, 3], sizes = [8, 538], strides = [1, 1]} : vector<8x542xf32> to vector<8x538xf32>
    %c24 = arith.constant 24 : index
    %c0_96 = arith.constant 0 : index
    %148 = vector.load %arg12[%c24, %c0_96] : memref<56x542xf32, #tpu.memory_space<vmem>>, vector<8x538xf32>
    tpu.vector_store %arg12[%c24, %c0_96], %147 {strides = array<i32>} : memref<56x542xf32, #tpu.memory_space<vmem>>, vector<8x538xf32>,
    %149 = vector.extract_strided_slice %136 {offsets = [0, 4], sizes = [8, 538], strides = [1, 1]} : vector<8x542xf32> to vector<8x538xf32>
    %c32 = arith.constant 32 : index
    %c0_97 = arith.constant 0 : index
    %150 = vector.load %arg12[%c32, %c0_97] : memref<56x542xf32, #tpu.memory_space<vmem>>, vector<8x538xf32>
    tpu.vector_store %arg12[%c32, %c0_97], %149 {strides = array<i32>} : memref<56x542xf32, #tpu.memory_space<vmem>>, vector<8x538xf32>,
    %c0_98 = arith.constant 0 : index
    %c0_99 = arith.constant 0 : index
    %151 = vector.load %arg12[%c0_98, %c0_99] : memref<56x542xf32, #tpu.memory_space<vmem>>, vector<40x538xf32>
    %152 = arith.truncf %151 : vector<40x538xf32> to vector<40x538xbf16>
    %cst_100 = arith.constant dense<0.000000e+00> : vector<8x538xf32>
    %153 = tpu.matmul %138, %152, %cst_100 {dimension_numbers = #tpu.dot_dimension_numbers<[1], [0], [0], [1], [0, 0, 1, 1], [], []>} : vector<8x40xbf16>, vector<40x538xbf16>, vector<8x538xf32> -> vector<8x538xf32>
    %154 = vector.broadcast %140 : vector<8x1xf32> to vector<8x538xf32>
    %155 = arith.addf %153, %154 : vector<8x538xf32>
    %156 = tpu.iota {dimensions = array<i32: 1>} : vector<8x538xi32>
    %c0_i32_101 = arith.constant 0 : i32
    %157 = arith.cmpi eq, %arg1, %c0_i32_101 : i32
    %c26_i32_102 = arith.constant 26 : i32
    %158 = vector.broadcast %c26_i32_102 : i32 to vector<8x538xi32>
    %159 = arith.cmpi slt, %156, %158 : vector<8x538xi32>
    %160 = vector.broadcast %157 : i1 to vector<8x538xi1>
    %161 = arith.andi %160, %159 : vector<8x538xi1>
    %cst_103 = arith.constant 0.000000e+00 : f32
    %162 = vector.broadcast %cst_103 : f32 to vector<8x538xf32>
    %163 = arith.select %161, %162, %155 : vector<8x538xi1>, vector<8x538xf32>
    %cst_104 = arith.constant 0.000000e+00 : f32
    %164 = vector.broadcast %cst_104 : f32 to vector<8x538xf32>
    %165 = arith.cmpf oge, %163, %164 : vector<8x538xf32>
    %cst_105 = arith.constant 1.000000e-01 : f32
    %166 = vector.broadcast %cst_105 : f32 to vector<8x538xf32>
    %167 = arith.mulf %163, %166 : vector<8x538xf32>
    %168 = arith.select %165, %163, %167 : vector<8x538xi1>, vector<8x538xf32>
    %c1_106 = arith.constant 1 : index
    %c0_107 = arith.constant 0 : index
    %c0_108 = arith.constant 0 : index
    %169 = vector.load %arg6[%c1_106, %c0_107, %c0_108] : memref<4x8x40xbf16, #tpu.memory_space<vmem>>, vector<1x8x40xbf16>
    %170 = vector.shape_cast %169 : vector<1x8x40xbf16> to vector<8x40xbf16>
    %c1_109 = arith.constant 1 : index
    %c0_110 = arith.constant 0 : index
    %c0_111 = arith.constant 0 : index
    %171 = vector.load %arg7[%c1_109, %c0_110, %c0_111] : memref<4x8x1xf32, #tpu.memory_space<vmem>>, vector<1x8x1xf32>
    %172 = vector.shape_cast %171 : vector<1x8x1xf32> to vector<8x1xf32>
    %173 = vector.extract_strided_slice %168 {offsets = [0, 0], sizes = [8, 534], strides = [1, 1]} : vector<8x538xf32> to vector<8x534xf32>
    %c0_112 = arith.constant 0 : index
    %c0_113 = arith.constant 0 : index
    %174 = vector.load %arg12[%c0_112, %c0_113] : memref<56x542xf32, #tpu.memory_space<vmem>>, vector<8x534xf32>
    tpu.vector_store %arg12[%c0_112, %c0_113], %173 {strides = array<i32>} : memref<56x542xf32, #tpu.memory_space<vmem>>, vector<8x534xf32>,
    %175 = vector.extract_strided_slice %168 {offsets = [0, 1], sizes = [8, 534], strides = [1, 1]} : vector<8x538xf32> to vector<8x534xf32>
    %c8_114 = arith.constant 8 : index
    %c0_115 = arith.constant 0 : index
    %176 = vector.load %arg12[%c8_114, %c0_115] : memref<56x542xf32, #tpu.memory_space<vmem>>, vector<8x534xf32>
    tpu.vector_store %arg12[%c8_114, %c0_115], %175 {strides = array<i32>} : memref<56x542xf32, #tpu.memory_space<vmem>>, vector<8x534xf32>,
    %177 = vector.extract_strided_slice %168 {offsets = [0, 2], sizes = [8, 534], strides = [1, 1]} : vector<8x538xf32> to vector<8x534xf32>
    %c16_116 = arith.constant 16 : index
    %c0_117 = arith.constant 0 : index
    %178 = vector.load %arg12[%c16_116, %c0_117] : memref<56x542xf32, #tpu.memory_space<vmem>>, vector<8x534xf32>
    tpu.vector_store %arg12[%c16_116, %c0_117], %177 {strides = array<i32>} : memref<56x542xf32, #tpu.memory_space<vmem>>, vector<8x534xf32>,
    %179 = vector.extract_strided_slice %168 {offsets = [0, 3], sizes = [8, 534], strides = [1, 1]} : vector<8x538xf32> to vector<8x534xf32>
    %c24_118 = arith.constant 24 : index
    %c0_119 = arith.constant 0 : index
    %180 = vector.load %arg12[%c24_118, %c0_119] : memref<56x542xf32, #tpu.memory_space<vmem>>, vector<8x534xf32>
    tpu.vector_store %arg12[%c24_118, %c0_119], %179 {strides = array<i32>} : memref<56x542xf32, #tpu.memory_space<vmem>>, vector<8x534xf32>,
    %181 = vector.extract_strided_slice %168 {offsets = [0, 4], sizes = [8, 534], strides = [1, 1]} : vector<8x538xf32> to vector<8x534xf32>
    %c32_120 = arith.constant 32 : index
    %c0_121 = arith.constant 0 : index
    %182 = vector.load %arg12[%c32_120, %c0_121] : memref<56x542xf32, #tpu.memory_space<vmem>>, vector<8x534xf32>
    tpu.vector_store %arg12[%c32_120, %c0_121], %181 {strides = array<i32>} : memref<56x542xf32, #tpu.memory_space<vmem>>, vector<8x534xf32>,
    %c0_122 = arith.constant 0 : index
    %c0_123 = arith.constant 0 : index
    %183 = vector.load %arg12[%c0_122, %c0_123] : memref<56x542xf32, #tpu.memory_space<vmem>>, vector<40x534xf32>
    %184 = arith.truncf %183 : vector<40x534xf32> to vector<40x534xbf16>
    %cst_124 = arith.constant dense<0.000000e+00> : vector<8x534xf32>
    %185 = tpu.matmul %170, %184, %cst_124 {dimension_numbers = #tpu.dot_dimension_numbers<[1], [0], [0], [1], [0, 0, 1, 1], [], []>} : vector<8x40xbf16>, vector<40x534xbf16>, vector<8x534xf32> -> vector<8x534xf32>
    %186 = vector.broadcast %172 : vector<8x1xf32> to vector<8x534xf32>
    %187 = arith.addf %185, %186 : vector<8x534xf32>
    %188 = tpu.iota {dimensions = array<i32: 1>} : vector<8x534xi32>
    %c0_i32_125 = arith.constant 0 : i32
    %189 = arith.cmpi eq, %arg1, %c0_i32_125 : i32
    %c22_i32 = arith.constant 22 : i32
    %190 = vector.broadcast %c22_i32 : i32 to vector<8x534xi32>
    %191 = arith.cmpi slt, %188, %190 : vector<8x534xi32>
    %192 = vector.broadcast %189 : i1 to vector<8x534xi1>
    %193 = arith.andi %192, %191 : vector<8x534xi1>
    %cst_126 = arith.constant 0.000000e+00 : f32
    %194 = vector.broadcast %cst_126 : f32 to vector<8x534xf32>
    %195 = arith.select %193, %194, %187 : vector<8x534xi1>, vector<8x534xf32>
    %196 = vector.extract_strided_slice %12 {offsets = [0, 8], sizes = [8, 534], strides = [1, 1]} : vector<8x542xf32> to vector<8x534xf32>
    %197 = arith.addf %196, %195 : vector<8x534xf32>
    %cst_127 = arith.constant 0.000000e+00 : f32
    %198 = vector.broadcast %cst_127 : f32 to vector<8x534xf32>
    %199 = arith.cmpf oge, %197, %198 : vector<8x534xf32>
    %cst_128 = arith.constant 1.000000e-01 : f32
    %200 = vector.broadcast %cst_128 : f32 to vector<8x534xf32>
    %201 = arith.mulf %197, %200 : vector<8x534xf32>
    %202 = arith.select %199, %197, %201 : vector<8x534xi1>, vector<8x534xf32>
    %c2_129 = arith.constant 2 : index
    %c0_130 = arith.constant 0 : index
    %c0_131 = arith.constant 0 : index
    %203 = vector.load %arg6[%c2_129, %c0_130, %c0_131] : memref<4x8x40xbf16, #tpu.memory_space<vmem>>, vector<1x8x40xbf16>
    %204 = vector.shape_cast %203 : vector<1x8x40xbf16> to vector<8x40xbf16>
    %c2_132 = arith.constant 2 : index
    %c0_133 = arith.constant 0 : index
    %c0_134 = arith.constant 0 : index
    %205 = vector.load %arg7[%c2_132, %c0_133, %c0_134] : memref<4x8x1xf32, #tpu.memory_space<vmem>>, vector<1x8x1xf32>
    %206 = vector.shape_cast %205 : vector<1x8x1xf32> to vector<8x1xf32>
    %207 = vector.extract_strided_slice %202 {offsets = [0, 0], sizes = [8, 522], strides = [1, 1]} : vector<8x534xf32> to vector<8x522xf32>
    %c0_135 = arith.constant 0 : index
    %c0_136 = arith.constant 0 : index
    %208 = vector.load %arg12[%c0_135, %c0_136] : memref<56x542xf32, #tpu.memory_space<vmem>>, vector<8x522xf32>
    tpu.vector_store %arg12[%c0_135, %c0_136], %207 {strides = array<i32>} : memref<56x542xf32, #tpu.memory_space<vmem>>, vector<8x522xf32>,
    %209 = vector.extract_strided_slice %202 {offsets = [0, 3], sizes = [8, 522], strides = [1, 1]} : vector<8x534xf32> to vector<8x522xf32>
    %c8_137 = arith.constant 8 : index
    %c0_138 = arith.constant 0 : index
    %210 = vector.load %arg12[%c8_137, %c0_138] : memref<56x542xf32, #tpu.memory_space<vmem>>, vector<8x522xf32>
    tpu.vector_store %arg12[%c8_137, %c0_138], %209 {strides = array<i32>} : memref<56x542xf32, #tpu.memory_space<vmem>>, vector<8x522xf32>,
    %211 = vector.extract_strided_slice %202 {offsets = [0, 6], sizes = [8, 522], strides = [1, 1]} : vector<8x534xf32> to vector<8x522xf32>
    %c16_139 = arith.constant 16 : index
    %c0_140 = arith.constant 0 : index
    %212 = vector.load %arg12[%c16_139, %c0_140] : memref<56x542xf32, #tpu.memory_space<vmem>>, vector<8x522xf32>
    tpu.vector_store %arg12[%c16_139, %c0_140], %211 {strides = array<i32>} : memref<56x542xf32, #tpu.memory_space<vmem>>, vector<8x522xf32>,
    %213 = vector.extract_strided_slice %202 {offsets = [0, 9], sizes = [8, 522], strides = [1, 1]} : vector<8x534xf32> to vector<8x522xf32>
    %c24_141 = arith.constant 24 : index
    %c0_142 = arith.constant 0 : index
    %214 = vector.load %arg12[%c24_141, %c0_142] : memref<56x542xf32, #tpu.memory_space<vmem>>, vector<8x522xf32>
    tpu.vector_store %arg12[%c24_141, %c0_142], %213 {strides = array<i32>} : memref<56x542xf32, #tpu.memory_space<vmem>>, vector<8x522xf32>,
    %215 = vector.extract_strided_slice %202 {offsets = [0, 12], sizes = [8, 522], strides = [1, 1]} : vector<8x534xf32> to vector<8x522xf32>
    %c32_143 = arith.constant 32 : index
    %c0_144 = arith.constant 0 : index
    %216 = vector.load %arg12[%c32_143, %c0_144] : memref<56x542xf32, #tpu.memory_space<vmem>>, vector<8x522xf32>
    tpu.vector_store %arg12[%c32_143, %c0_144], %215 {strides = array<i32>} : memref<56x542xf32, #tpu.memory_space<vmem>>, vector<8x522xf32>,
    %c0_145 = arith.constant 0 : index
    %c0_146 = arith.constant 0 : index
    %217 = vector.load %arg12[%c0_145, %c0_146] : memref<56x542xf32, #tpu.memory_space<vmem>>, vector<40x522xf32>
    %218 = arith.truncf %217 : vector<40x522xf32> to vector<40x522xbf16>
    %cst_147 = arith.constant dense<0.000000e+00> : vector<8x522xf32>
    %219 = tpu.matmul %204, %218, %cst_147 {dimension_numbers = #tpu.dot_dimension_numbers<[1], [0], [0], [1], [0, 0, 1, 1], [], []>} : vector<8x40xbf16>, vector<40x522xbf16>, vector<8x522xf32> -> vector<8x522xf32>
    %220 = vector.broadcast %206 : vector<8x1xf32> to vector<8x522xf32>
    %221 = arith.addf %219, %220 : vector<8x522xf32>
    %222 = tpu.iota {dimensions = array<i32: 1>} : vector<8x522xi32>
    %c0_i32_148 = arith.constant 0 : i32
    %223 = arith.cmpi eq, %arg1, %c0_i32_148 : i32
    %c10_i32 = arith.constant 10 : i32
    %224 = vector.broadcast %c10_i32 : i32 to vector<8x522xi32>
    %225 = arith.cmpi slt, %222, %224 : vector<8x522xi32>
    %226 = vector.broadcast %223 : i1 to vector<8x522xi1>
    %227 = arith.andi %226, %225 : vector<8x522xi1>
    %cst_149 = arith.constant 0.000000e+00 : f32
    %228 = vector.broadcast %cst_149 : f32 to vector<8x522xf32>
    %229 = arith.select %227, %228, %221 : vector<8x522xi1>, vector<8x522xf32>
    %cst_150 = arith.constant 0.000000e+00 : f32
    %230 = vector.broadcast %cst_150 : f32 to vector<8x522xf32>
    %231 = arith.cmpf oge, %229, %230 : vector<8x522xf32>
    %cst_151 = arith.constant 1.000000e-01 : f32
    %232 = vector.broadcast %cst_151 : f32 to vector<8x522xf32>
    %233 = arith.mulf %229, %232 : vector<8x522xf32>
    %234 = arith.select %231, %229, %233 : vector<8x522xi1>, vector<8x522xf32>
    %c3_152 = arith.constant 3 : index
    %c0_153 = arith.constant 0 : index
    %c0_154 = arith.constant 0 : index
    %235 = vector.load %arg6[%c3_152, %c0_153, %c0_154] : memref<4x8x40xbf16, #tpu.memory_space<vmem>>, vector<1x8x40xbf16>
    %236 = vector.shape_cast %235 : vector<1x8x40xbf16> to vector<8x40xbf16>
    %c3_155 = arith.constant 3 : index
    %c0_156 = arith.constant 0 : index
    %c0_157 = arith.constant 0 : index
    %237 = vector.load %arg7[%c3_155, %c0_156, %c0_157] : memref<4x8x1xf32, #tpu.memory_space<vmem>>, vector<1x8x1xf32>
    %238 = vector.shape_cast %237 : vector<1x8x1xf32> to vector<8x1xf32>
    %239 = vector.extract_strided_slice %234 {offsets = [0, 0], sizes = [8, 518], strides = [1, 1]} : vector<8x522xf32> to vector<8x518xf32>
    %c0_158 = arith.constant 0 : index
    %c0_159 = arith.constant 0 : index
    %240 = vector.load %arg12[%c0_158, %c0_159] : memref<56x542xf32, #tpu.memory_space<vmem>>, vector<8x518xf32>
    tpu.vector_store %arg12[%c0_158, %c0_159], %239 {strides = array<i32>} : memref<56x542xf32, #tpu.memory_space<vmem>>, vector<8x518xf32>,
    %241 = vector.extract_strided_slice %234 {offsets = [0, 1], sizes = [8, 518], strides = [1, 1]} : vector<8x522xf32> to vector<8x518xf32>
    %c8_160 = arith.constant 8 : index
    %c0_161 = arith.constant 0 : index
    %242 = vector.load %arg12[%c8_160, %c0_161] : memref<56x542xf32, #tpu.memory_space<vmem>>, vector<8x518xf32>
    tpu.vector_store %arg12[%c8_160, %c0_161], %241 {strides = array<i32>} : memref<56x542xf32, #tpu.memory_space<vmem>>, vector<8x518xf32>,
    %243 = vector.extract_strided_slice %234 {offsets = [0, 2], sizes = [8, 518], strides = [1, 1]} : vector<8x522xf32> to vector<8x518xf32>
    %c16_162 = arith.constant 16 : index
    %c0_163 = arith.constant 0 : index
    %244 = vector.load %arg12[%c16_162, %c0_163] : memref<56x542xf32, #tpu.memory_space<vmem>>, vector<8x518xf32>
    tpu.vector_store %arg12[%c16_162, %c0_163], %243 {strides = array<i32>} : memref<56x542xf32, #tpu.memory_space<vmem>>, vector<8x518xf32>,
    %245 = vector.extract_strided_slice %234 {offsets = [0, 3], sizes = [8, 518], strides = [1, 1]} : vector<8x522xf32> to vector<8x518xf32>
    %c24_164 = arith.constant 24 : index
    %c0_165 = arith.constant 0 : index
    %246 = vector.load %arg12[%c24_164, %c0_165] : memref<56x542xf32, #tpu.memory_space<vmem>>, vector<8x518xf32>
    tpu.vector_store %arg12[%c24_164, %c0_165], %245 {strides = array<i32>} : memref<56x542xf32, #tpu.memory_space<vmem>>, vector<8x518xf32>,
    %247 = vector.extract_strided_slice %234 {offsets = [0, 4], sizes = [8, 518], strides = [1, 1]} : vector<8x522xf32> to vector<8x518xf32>
    %c32_166 = arith.constant 32 : index
    %c0_167 = arith.constant 0 : index
    %248 = vector.load %arg12[%c32_166, %c0_167] : memref<56x542xf32, #tpu.memory_space<vmem>>, vector<8x518xf32>
    tpu.vector_store %arg12[%c32_166, %c0_167], %247 {strides = array<i32>} : memref<56x542xf32, #tpu.memory_space<vmem>>, vector<8x518xf32>,
    %c0_168 = arith.constant 0 : index
    %c0_169 = arith.constant 0 : index
    %249 = vector.load %arg12[%c0_168, %c0_169] : memref<56x542xf32, #tpu.memory_space<vmem>>, vector<40x518xf32>
    %250 = arith.truncf %249 : vector<40x518xf32> to vector<40x518xbf16>
    %cst_170 = arith.constant dense<0.000000e+00> : vector<8x518xf32>
    %251 = tpu.matmul %236, %250, %cst_170 {dimension_numbers = #tpu.dot_dimension_numbers<[1], [0], [0], [1], [0, 0, 1, 1], [], []>} : vector<8x40xbf16>, vector<40x518xbf16>, vector<8x518xf32> -> vector<8x518xf32>
    %252 = vector.broadcast %238 : vector<8x1xf32> to vector<8x518xf32>
    %253 = arith.addf %251, %252 : vector<8x518xf32>
    %254 = tpu.iota {dimensions = array<i32: 1>} : vector<8x518xi32>
    %c0_i32_171 = arith.constant 0 : i32
    %255 = arith.cmpi eq, %arg1, %c0_i32_171 : i32
    %c6_i32 = arith.constant 6 : i32
    %256 = vector.broadcast %c6_i32 : i32 to vector<8x518xi32>
    %257 = arith.cmpi slt, %254, %256 : vector<8x518xi32>
    %258 = vector.broadcast %255 : i1 to vector<8x518xi1>
    %259 = arith.andi %258, %257 : vector<8x518xi1>
    %cst_172 = arith.constant 0.000000e+00 : f32
    %260 = vector.broadcast %cst_172 : f32 to vector<8x518xf32>
    %261 = arith.select %259, %260, %253 : vector<8x518xi1>, vector<8x518xf32>
    %262 = vector.extract_strided_slice %197 {offsets = [0, 16], sizes = [8, 518], strides = [1, 1]} : vector<8x534xf32> to vector<8x518xf32>
    %263 = arith.addf %262, %261 : vector<8x518xf32>
    %264 = arith.addf %131, %263 : vector<8x518xf32>
    %cst_173 = arith.constant 5.000000e-01 : f32
    %265 = vector.broadcast %cst_173 : f32 to vector<8x518xf32>
    %266 = arith.mulf %264, %265 : vector<8x518xf32>
    %cst_174 = arith.constant 0.000000e+00 : f32
    %267 = vector.broadcast %cst_174 : f32 to vector<8x518xf32>
    %268 = arith.cmpf oge, %266, %267 : vector<8x518xf32>
    %cst_175 = arith.constant 0.00999999977 : f32
    %269 = vector.broadcast %cst_175 : f32 to vector<8x518xf32>
    %270 = arith.mulf %266, %269 : vector<8x518xf32>
    %271 = arith.select %268, %266, %270 : vector<8x518xi1>, vector<8x518xf32>
    %272 = tpu.iota {dimensions = array<i32: 1>} : vector<8x518xi32>
    %c0_i32_176 = arith.constant 0 : i32
    %273 = arith.cmpi eq, %arg1, %c0_i32_176 : i32
    %c6_i32_177 = arith.constant 6 : i32
    %274 = vector.broadcast %c6_i32_177 : i32 to vector<8x518xi32>
    %275 = arith.cmpi slt, %272, %274 : vector<8x518xi32>
    %276 = vector.broadcast %273 : i1 to vector<8x518xi1>
    %277 = arith.andi %276, %275 : vector<8x518xi1>
    %cst_178 = arith.constant 0.000000e+00 : f32
    %278 = vector.broadcast %cst_178 : f32 to vector<8x518xf32>
    %279 = arith.select %277, %278, %271 : vector<8x518xi1>, vector<8x518xf32>
    %c0_179 = arith.constant 0 : index
    %c0_180 = arith.constant 0 : index
    %280 = vector.load %arg8[%c0_179, %c0_180] : memref<1x56xbf16, #tpu.memory_space<vmem>>, vector<1x56xbf16>
    %c0_181 = arith.constant 0 : index
    %c0_182 = arith.constant 0 : index
    %281 = vector.load %arg9[%c0_181, %c0_182] : memref<1x1xf32, #tpu.memory_space<vmem>>, vector<1x1xf32>
    %282 = vector.extract_strided_slice %279 {offsets = [0, 0], sizes = [8, 512], strides = [1, 1]} : vector<8x518xf32> to vector<8x512xf32>
    %c0_183 = arith.constant 0 : index
    %c0_184 = arith.constant 0 : index
    %283 = vector.load %arg12[%c0_183, %c0_184] : memref<56x542xf32, #tpu.memory_space<vmem>>, vector<8x512xf32>
    tpu.vector_store %arg12[%c0_183, %c0_184], %282 {strides = array<i32>} : memref<56x542xf32, #tpu.memory_space<vmem>>, vector<8x512xf32>,
    %284 = vector.extract_strided_slice %279 {offsets = [0, 1], sizes = [8, 512], strides = [1, 1]} : vector<8x518xf32> to vector<8x512xf32>
    %c8_185 = arith.constant 8 : index
    %c0_186 = arith.constant 0 : index
    %285 = vector.load %arg12[%c8_185, %c0_186] : memref<56x542xf32, #tpu.memory_space<vmem>>, vector<8x512xf32>
    tpu.vector_store %arg12[%c8_185, %c0_186], %284 {strides = array<i32>} : memref<56x542xf32, #tpu.memory_space<vmem>>, vector<8x512xf32>,
    %286 = vector.extract_strided_slice %279 {offsets = [0, 2], sizes = [8, 512], strides = [1, 1]} : vector<8x518xf32> to vector<8x512xf32>
    %c16_187 = arith.constant 16 : index
    %c0_188 = arith.constant 0 : index
    %287 = vector.load %arg12[%c16_187, %c0_188] : memref<56x542xf32, #tpu.memory_space<vmem>>, vector<8x512xf32>
    tpu.vector_store %arg12[%c16_187, %c0_188], %286 {strides = array<i32>} : memref<56x542xf32, #tpu.memory_space<vmem>>, vector<8x512xf32>,
    %288 = vector.extract_strided_slice %279 {offsets = [0, 3], sizes = [8, 512], strides = [1, 1]} : vector<8x518xf32> to vector<8x512xf32>
    %c24_189 = arith.constant 24 : index
    %c0_190 = arith.constant 0 : index
    %289 = vector.load %arg12[%c24_189, %c0_190] : memref<56x542xf32, #tpu.memory_space<vmem>>, vector<8x512xf32>
    tpu.vector_store %arg12[%c24_189, %c0_190], %288 {strides = array<i32>} : memref<56x542xf32, #tpu.memory_space<vmem>>, vector<8x512xf32>,
    %290 = vector.extract_strided_slice %279 {offsets = [0, 4], sizes = [8, 512], strides = [1, 1]} : vector<8x518xf32> to vector<8x512xf32>
    %c32_191 = arith.constant 32 : index
    %c0_192 = arith.constant 0 : index
    %291 = vector.load %arg12[%c32_191, %c0_192] : memref<56x542xf32, #tpu.memory_space<vmem>>, vector<8x512xf32>
    tpu.vector_store %arg12[%c32_191, %c0_192], %290 {strides = array<i32>} : memref<56x542xf32, #tpu.memory_space<vmem>>, vector<8x512xf32>,
    %292 = vector.extract_strided_slice %279 {offsets = [0, 5], sizes = [8, 512], strides = [1, 1]} : vector<8x518xf32> to vector<8x512xf32>
    %c40 = arith.constant 40 : index
    %c0_193 = arith.constant 0 : index
    %293 = vector.load %arg12[%c40, %c0_193] : memref<56x542xf32, #tpu.memory_space<vmem>>, vector<8x512xf32>
    tpu.vector_store %arg12[%c40, %c0_193], %292 {strides = array<i32>} : memref<56x542xf32, #tpu.memory_space<vmem>>, vector<8x512xf32>,
    %294 = vector.extract_strided_slice %279 {offsets = [0, 6], sizes = [8, 512], strides = [1, 1]} : vector<8x518xf32> to vector<8x512xf32>
    %c48 = arith.constant 48 : index
    %c0_194 = arith.constant 0 : index
    %295 = vector.load %arg12[%c48, %c0_194] : memref<56x542xf32, #tpu.memory_space<vmem>>, vector<8x512xf32>
    tpu.vector_store %arg12[%c48, %c0_194], %294 {strides = array<i32>} : memref<56x542xf32, #tpu.memory_space<vmem>>, vector<8x512xf32>,
    %c0_195 = arith.constant 0 : index
    %c0_196 = arith.constant 0 : index
    %296 = vector.load %arg12[%c0_195, %c0_196] : memref<56x542xf32, #tpu.memory_space<vmem>>, vector<56x512xf32>
    %297 = arith.truncf %296 : vector<56x512xf32> to vector<56x512xbf16>
    %cst_197 = arith.constant dense<0.000000e+00> : vector<1x512xf32>
    %298 = tpu.matmul %280, %297, %cst_197 {dimension_numbers = #tpu.dot_dimension_numbers<[1], [0], [0], [1], [0, 0, 1, 1], [], []>} : vector<1x56xbf16>, vector<56x512xbf16>, vector<1x512xf32> -> vector<1x512xf32>
    %299 = vector.broadcast %281 : vector<1x1xf32> to vector<1x512xf32>
    %300 = arith.addf %298, %299 : vector<1x512xf32>
    %301 = math.tanh %300 : vector<1x512xf32>
    %c0_198 = arith.constant 0 : index
    %c0_199 = arith.constant 0 : index
    %c0_200 = arith.constant 0 : index
    %302 = vector.load %arg10[%c0_198, %c0_199, %c0_200] : memref<1x1x512xf32, #tpu.memory_space<vmem>>, vector<1x1x512xf32>
    %303 = vector.shape_cast %302 : vector<1x1x512xf32> to vector<1x512xf32>
    %304 = vector.shape_cast %301 : vector<1x512xf32> to vector<1x1x512xf32>
    tpu.vector_store %arg10[%c0_198, %c0_199, %c0_200], %304 {strides = array<i32>} : memref<1x1x512xf32, #tpu.memory_space<vmem>>, vector<1x1x512xf32>,
    return
  }
  func.func @transform_0(%arg0: i32, %arg1: i32) -> (i32, i32, i32) {
    %c4_i32 = arith.constant 4 : i32
    %0 = arith.muli %arg1, %c4_i32 : i32
    %c1_i32 = arith.constant 1 : i32
    %1 = arith.subi %0, %c1_i32 : i32
    %c0_i32 = arith.constant 0 : i32
    %2 = arith.maxsi %1, %c0_i32 : i32
    %c0_i32_0 = arith.constant 0 : i32
    %c0_i32_1 = arith.constant 0 : i32
    return %arg0, %c0_i32_0, %2 : i32, i32, i32
  }
  func.func @transform_1(%arg0: i32, %arg1: i32) -> (i32, i32, i32) {
    %c0_i32 = arith.constant 0 : i32
    %c0_i32_0 = arith.constant 0 : i32
    return %arg0, %c0_i32, %arg1 : i32, i32, i32
  }
  func.func @transform_2(%arg0: i32, %arg1: i32) -> (i32, i32, i32) {
    %c0_i32 = arith.constant 0 : i32
    %c0_i32_0 = arith.constant 0 : i32
    %c0_i32_1 = arith.constant 0 : i32
    %c0_i32_2 = arith.constant 0 : i32
    return %c0_i32, %c0_i32_0, %c0_i32_1 : i32, i32, i32
  }
  func.func @transform_3(%arg0: i32, %arg1: i32) -> (i32, i32, i32) {
    %c0_i32 = arith.constant 0 : i32
    %c0_i32_0 = arith.constant 0 : i32
    %c0_i32_1 = arith.constant 0 : i32
    %c0_i32_2 = arith.constant 0 : i32
    return %c0_i32, %c0_i32_0, %c0_i32_1 : i32, i32, i32
  }
  func.func @transform_4(%arg0: i32, %arg1: i32) -> (i32, i32, i32) {
    %c0_i32 = arith.constant 0 : i32
    %c0_i32_0 = arith.constant 0 : i32
    %c0_i32_1 = arith.constant 0 : i32
    %c0_i32_2 = arith.constant 0 : i32
    return %c0_i32, %c0_i32_0, %c0_i32_1 : i32, i32, i32
  }
  func.func @transform_5(%arg0: i32, %arg1: i32) -> (i32, i32, i32) {
    %c0_i32 = arith.constant 0 : i32
    %c0_i32_0 = arith.constant 0 : i32
    %c0_i32_1 = arith.constant 0 : i32
    %c0_i32_2 = arith.constant 0 : i32
    return %c0_i32, %c0_i32_0, %c0_i32_1 : i32, i32, i32
  }
  func.func @transform_6(%arg0: i32, %arg1: i32) -> (i32, i32) {
    %c0_i32 = arith.constant 0 : i32
    %c0_i32_0 = arith.constant 0 : i32
    %c0_i32_1 = arith.constant 0 : i32
    return %c0_i32, %c0_i32_0 : i32, i32
  }
  func.func @transform_7(%arg0: i32, %arg1: i32) -> (i32, i32) {
    %c0_i32 = arith.constant 0 : i32
    %c0_i32_0 = arith.constant 0 : i32
    %c0_i32_1 = arith.constant 0 : i32
    return %c0_i32, %c0_i32_0 : i32, i32
  }
  func.func @transform_8(%arg0: i32, %arg1: i32) -> (i32, i32, i32) {
    %c0_i32 = arith.constant 0 : i32
    %c0_i32_0 = arith.constant 0 : i32
    return %arg0, %c0_i32, %arg1 : i32, i32, i32
  }
}

</mosaic_0001>

<bundles_post_ra>
// kernel: _lambda_.5
= control target key start
LH: loop header
LB: loop body
LE: loop exit
PB: predicated region body
PF: predicated region fallthrough
CT: control target
= control target key end

     0   :  { %9 = vsyncpa [#allocation5], 0  ;;  %s1182_s0 = inlined_call_operand.hbm [shape: f32[2,16,64], index: 0, kind: input, shape index: {}, may-alias: {0,1}]   ;;  %s1183_s1 = inlined_call_operand.hbm [shape: f32[2,16,64], index: 1, kind: input, shape index: {}, may-alias: {0,1}]   ;;  %s1184_s2 = inlined_call_operand.hbm [shape: bf16[32,112], index: 2, kind: input, shape index: {}]   ;;  %s1185_s3 = inlined_call_operand.vmem [shape: f32[32,1], index: 3, kind: input, shape index: {}]   ;;  %s1186_s4 = inlined_call_operand.vmem [shape: bf16[2,32,64], index: 4, kind: output, shape index: {}]  }
   0x1   :  { %11 = vsyncpa [#allocation5 + $0x1], 0 }
   0x2   :  { %12 = vsyncpa [#allocation7], 0 }
   0x3   :  { %14 = vsyncpa [#allocation7 + $0x1], 0  ;;  %s947_s15 = smov 0   ;;  %s949_s16 = smov 0  }
   0x4   :  { %s951_s17 = smov 0   ;;  %s953_s18 = smov 0  }
   0x5   :  { %s955_s19 = smov 0   ;;  %s957_s20 = smov 0  }
   0x6 LB: > { %s1191_s21 = sadd.s32 4294967295, %s904_s20   ;;  %p60_p0 = scmp.ne.s32.totalorder %s888_s16, %s884_s15  ;;  %s904_s20 = sphi %s957_s20, %s20_s20   ;;  %s900_s19 = sphi %s955_s19, %s1205_s19   ;;  %s896_s18 = sphi %s953_s18, %s1204_s18   ;;  %s892_s17 = sphi %s951_s17, %s1203_s17   ;;  %s888_s16 = sphi %s949_s16, %s1202_s16   ;;  %s884_s15 = sphi %s947_s15, %s1201_s15  }
   0x7   : > { %p979_p1 = scmp.eq.s32.totalorder %s1191_s21, 0  ;;  %p611_p2 = scmp.ge.s32.totalorder %s904_s20, 1 }
   0x8   : > { %p169_p3 = scmp.lt.s32.totalorder %s904_s20, 3  ;;  %s906_s25 = smov [#allocation8]  }
   0x9   : > { %s1192_s22 = scalar_select %p979_p1, 1, 0 }
   0xa   : > { %p987_p4 = por %p979_p1, %p60_p0  ;;  %p991_p5 = pnand %p611_p2, %p169_p3 }
   0xb   : > { %s181_s26 = sshll.u32 %s906_s25, 4  ;;  %s32_s28 = sadd.s32 1, %s900_s19  ;;  %s182_s26 = int_to_ptr.vmem [resolvable:$true] %s181_s26 }
   0xc   : > { %s1193_s23 = scalar_select %p987_p4, 1, 0 }
   0xd   : > { %s1194_s24 = scalar_select %p991_p5, 1, 0 }
   0xe   : > { %p678_p6 = pneg %p991_p5  ;;  %s758_s5 = scalar_lea.hbm %s1184_s2, 256 }
   0xf   : > { %p759_p8 = scmp.ne.s32.totalorder %s1184_s2, %s758_s5  ;;  %p765_p12 = scmp.lt.u32.totalorder %s758_s5, %s1184_s2 }
  0x10   : > { %p999_p7 = pnand %p678_p6, %p979_p1 }
  0x12   : > { %p760_p9 = pneg %p999_p7 }
  0x14   : > { %p761_p10 = pnand %p760_p9, %p759_p8 }
  0x16   : > { %p762_p11 = pneg %p761_p10 }
  0x18   : > { %p767_p13 = pnand %p765_p12, %p762_p11 }
  0x1a   : > { %770 = shalt.err (!%p767_p13)
}
  0x1b   : > { %s771_s10 = scalar_lea.vmem %s182_s26, 256  ;;  %p779_p6 = scmp.lt.s32.totalorder %s182_s26, %s182_s26 }
  0x1c   : > { %p772_p0 = scmp.ne.s32.totalorder %s182_s26, %s771_s10  ;;  %p780_p1 = scmp.lt.s32.totalorder %s771_s10, %s771_s10 }
  0x1e   : > { %p774_p2 = pnand %p772_p0, %p760_p9  ;;  %p781_p4 = por %p780_p1, %p779_p6 }
  0x20   : > { %p775_p3 = pneg %p774_p2 }
  0x22   : > { %p782_p5 = pnand %p781_p4, %p775_p3 }
  0x24   : > { %785 = shalt.err (!%p782_p5)
}
  0x25   : > { %s907_s11 = smov 64   ;;  %s908_s12 = smov 4  }
  0x26   : > { %681 = dma.hbm_to_vmem [thread:$0]  (!%p999_p7), %s1184_s2, 256, %s182_s26, [#allocation7], %s907_s11, %s907_s11, %s908_s12  }
  0x27   : > { %p34_p1 = scmp.ge.s32.totalorder %s32_s28, 2  ;;  %s47_s15 = sadd.s32 1, %s892_s17 }
  0x28   : > { %p54_p4 = scmp.ne.s32.totalorder %s892_s17, %s888_s16  ;;  %p55_p5 = scmp.eq.s32.totalorder %s904_s20, 0 }
  0x29   : > { %s1207_s28 = smov (%p34_p1, %s32_s28), 0  ;;  %p690_p9 = scmp.lt.s32.totalorder %s904_s20, 2 }
  0x2a   : > { %p56_p8 = por %p55_p5, %p54_p4  ;;  %s42_s25 = ssub.s32 %s900_s19, %s1207_s28 }
  0x2b   : > { %s198_s29 = sand.u32 1, %s892_s17   ;;  %p45_p10 = scmp.eq.s32.totalorder %s42_s25, 0 }
  0x2c   : > { %s1030_s30 = sshll.u32 %s198_s29, 4  ;;  %s636_s27 = sshll.u32 %s900_s19, 8 }
  0x2d   : > { %s1034_s5 = scalar_select %p45_p10, %s892_s17, %s47_s15  }
  0x2e   : > { %s1041_s7 = scalar_lea.hbm %s1182_s0, %s636_s27  ;;  %s202_s8 = scalar_lea.vmem [#allocation4], %s1030_s30 }
  0x2f   : > { %s213_s9 = sshll.u32 %s202_s8, 4  ;;  %p1044_p7 = pnand %p690_p9, %p56_p8  ;;  %s1048_s9 = int_to_ptr.vmem [resolvable:$true] %s213_s9 }
  0x30   : > { %s1050_s11 = scalar_lea.sflag [#allocation5], %s198_s29  ;;  %s786_s12 = scalar_lea.hbm %s1041_s7, 256 }
  0x31   : > { %p787_p11 = scmp.ne.s32.totalorder %s1041_s7, %s786_s12  ;;  %p788_p12 = pneg %p1044_p7 }
  0x32   : > { %s791_s15 = scalar_lea.hbm %s1182_s0, 512  ;;  %p792_p2 = scmp.lt.u32.totalorder %s1041_s7, %s1182_s0 }
  0x33   : > { %p789_p13 = pnand %p788_p12, %p787_p11  ;;  %p793_p3 = scmp.lt.u32.totalorder %s791_s15, %s786_s12 }
  0x34   : > { %p795_p1 = scmp.lt.u32.totalorder %s786_s12, %s1041_s7 }
  0x35   : > { %p790_p0 = pneg %p789_p13  ;;  %p794_p6 = por %p793_p3, %p792_p2 }
  0x37   : > { %p796_p4 = por %p795_p1, %p794_p6 }
  0x39   : > { %p797_p5 = pnand %p796_p4, %p790_p0 }
  0x3b   : > { %800 = shalt.err (!%p797_p5)
}
  0x3c   : > { %s801_s29 = scalar_lea.vmem %s1048_s9, 256  ;;  %s909_s6 = smov [#allocation4]  }
  0x3d   : > { %p802_p8 = scmp.ne.s32.totalorder %s1048_s9, %s801_s29  ;;  %s806_s8 = sshll.u32 %s909_s6, 4  ;;  %s807_s8 = int_to_ptr.vmem [resolvable:$false] %s806_s8 }
  0x3e   : > { %s808_s13 = scalar_lea.vmem %s807_s8, 512  ;;  %p809_p11 = scmp.lt.s32.totalorder %s1048_s9, %s807_s8 }
  0x3f   : > { %p804_p9 = pnand %p802_p8, %p788_p12  ;;  %p810_p13 = scmp.lt.s32.totalorder %s808_s13, %s801_s29 }
  0x41   : > { %p805_p10 = pneg %p804_p9  ;;  %p811_p2 = por %p810_p13, %p809_p11 }
  0x43   : > { %p812_p3 = pnand %p811_p2, %p805_p10 }
  0x45   : > { %815 = shalt.err (!%p812_p3)
}
  0x46   : > { %s910_s12 = smov 128   ;;  %s911_s14 = smov 8  }
  0x47   : > { %685 = dma.hbm_to_vmem [thread:$0]  (!%p1044_p7), %s1041_s7, 256, %s1048_s9, %s1050_s11, %s910_s12, %s910_s12, %s911_s14  }
  0x48   : > { %s1086_s26 = scalar_lea.hbm %s1183_s1, %s636_s27  ;;  %s227_s29 = scalar_lea.vmem [#allocation6], %s1030_s30 }
  0x49   : > { %s235_s6 = sshll.u32 %s227_s29, 4  ;;  %s223_s8 = sand.u32 1, %s904_s20   ;;  %s1090_s6 = int_to_ptr.vmem [resolvable:$true] %s235_s6 }
  0x4a   : > { %s1092_s13 = scalar_lea.sflag [#allocation7], %s223_s8  ;;  %s816_s21 = scalar_lea.hbm %s1086_s26, 256 }
  0x4b   : > { %p817_p0 = scmp.ne.s32.totalorder %s1086_s26, %s816_s21  ;;  %s821_s9 = scalar_lea.hbm %s1183_s1, 512 }
  0x4c   : > { %p822_p4 = scmp.lt.u32.totalorder %s1086_s26, %s1183_s1  ;;  %p823_p5 = scmp.lt.u32.totalorder %s821_s9, %s816_s21 }
  0x4d   : > { %p819_p6 = pnand %p817_p0, %p788_p12  ;;  %p825_p9 = scmp.lt.u32.totalorder %s816_s21, %s1086_s26 }
  0x4e   : > { %p824_p8 = por %p823_p5, %p822_p4 }
  0x4f   : > { %p820_p1 = pneg %p819_p6 }
  0x50   : > { %p826_p10 = por %p825_p9, %p824_p8 }
  0x52   : > { %p827_p11 = pnand %p826_p10, %p820_p1 }
  0x54   : > { %830 = shalt.err (!%p827_p11)
}
  0x55   : > { %s831_s30 = scalar_lea.vmem %s1090_s6, 256  ;;  %s912_s25 = smov [#allocation6]  }
  0x56   : > { %p832_p13 = scmp.ne.s32.totalorder %s1090_s6, %s831_s30  ;;  %s836_s29 = sshll.u32 %s912_s25, 4  ;;  %s837_s29 = int_to_ptr.vmem [resolvable:$false] %s836_s29 }
  0x57   : > { %s838_s8 = scalar_lea.vmem %s837_s29, 512  ;;  %p839_p0 = scmp.lt.s32.totalorder %s1090_s6, %s837_s29 }
  0x58   : > { %p834_p2 = pnand %p832_p13, %p788_p12  ;;  %p840_p6 = scmp.lt.s32.totalorder %s838_s8, %s831_s30 }
  0x5a   : > { %p835_p3 = pneg %p834_p2  ;;  %p841_p4 = por %p840_p6, %p839_p0 }
  0x5c   : > { %p842_p5 = pnand %p841_p4, %p835_p3 }
  0x5e   : > { %845 = shalt.err (!%p842_p5)
}
  0x5f   : > { %688 = dma.hbm_to_vmem [thread:$0]  (!%p1044_p7), %s1086_s26, 256, %s1090_s6, %s1092_s13, %s910_s12, %s910_s12, %s911_s14  }
  0x60   : > { %p1197_p12 = scmp.ne.s32.totalorder %s1194_s24, 0 }
  0x61   : > { %s249_s21 = sand.u32 (!%p1197_p12), 1, %s888_s16   ;;  %p1198_p1 = scmp.ne.s32.totalorder (!%p1197_p12), %s1193_s23, 0 }
  0x62   : > { %247 = sbr.rel (%p1197_p12) target bundleno = 608 (0x260), region = 36  ;;  %s250_s7 = scalar_lea.sflag (!%p1197_p12), [#allocation5], %s249_s21 }
  0x69   : > { %871 = dma.done.wait (%p1198_p1), %s250_s7, 256  }
  0x6a   : > { %873 = vsyncadd (%p1198_p1), %s250_s7, 4294967040  ;;  %s1199_s10 = sadd.s32 4294967295, %s904_s20   ;;  %s622_s9 = sshll.u32 %s249_s21, 4 }
  0x6b   : > { %s258_s27 = sand.u32 1, %s1199_s10   ;;  %s262_s15 = scalar_lea.vmem [#allocation6], %s622_s9 }
  0x6c   : > { %s259_s11 = scalar_lea.sflag [#allocation7], %s258_s27 }
  0x6d   : > { %875 = dma.done.wait (%p1198_p1), %s259_s11, 256  }
  0x6e   : > { %877 = vsyncadd (%p1198_p1), %s259_s11, 4294967040  ;;  %p1200_p7 = scmp.ne.s32.totalorder %s1192_s22, 0 }
  0x70   : > { %879 = dma.done.wait (%p1200_p7), [#allocation7], 256  }
  0x71   : > { %881 = vsyncadd (%p1200_p7), [#allocation7], 4294967040  ;;  %v913_v0 = vmov 0   ;;  %s914_s24 = smov 70   ;;  %v325_v1 = vld [vmem:[%s262_s15] sm:$0xff]  ;;  %v326_v2 = vld [vmem:[%s262_s15 + $0x8] sm:$0xff] }
  0x72   : > { %320 = vrot.lane.b32.xlu0 %v913_v0, %s914_s24  ;;  %755 = vset.pattern.permute.xlu1 %v913_v0  ;;  %v327_v3 = vpack.c.bf16 %v326_v2, %v325_v1  ;;  %s915_s12 = smov 6   ;;  %vm323_vm0 = vcmask 48128   ;;  %vm332_vm1 = vcmask 572464   ;;  %vm335_vm2 = vcmask 523264   ;;  %s916_s22 = smov 125   ;;  %v756_v8 = vld [vmem:[#allocation8] sm:$0xff]  }
  0x73   : > { %754 = vset.pattern.permute.xlu0 %v913_v0  ;;  %s917_s23 = smov 127   ;;  %s918_s14 = smov 123   ;;  %vm407_vm3 = vcmask 916480   ;;  %v373_v9 = vld [vmem:[%s1185_s3] sm:$0xff]  ;;  %v374_v10 = vld [vmem:[%s1185_s3 + $0x8] sm:$0xff]  ;;  %v376_v11 = vld [vmem:[%s1185_s3 + $0x18] sm:$0xff] }
  0x74   : > { %s919_s26 = smov 126   ;;  %s920_s6 = smov 124   ;;  %666 = vmatprep.mubr.msk.bf16.mxu0 %vm407_vm3, %v756_v8  ;;  %v375_v12 = vld [vmem:[%s1185_s3 + $0x10] sm:$0xff]  ;;  %v757_v25 = vld [vmem:[#allocation8 + $0x8] sm:$0xff]   ;;  %vm479_vm4 = vcmask 519168  }
  0x75   : > { %s921_s13 = smov 122   ;;  %p302_p8 = scmp.lt.s32.totalorder %s896_s18, 1 }
  0x76   : > { %329 = vrot.lane.b32.xlu0 %v327_v3, %s915_s12 }
  0x77   : > { %s1209_s18 = smov (!%p302_p8, %s896_s18), 1 }
  0x78   : > { %s638_s9 = sshll.u32 %s1209_s18, 4 }
  0x79   : > { %s309_s24 = scalar_lea.vmem %s1186_s4, %s638_s9 }
  0xe4   : > { %v321_v4 = vpop.permute.xlu0 %320 }
  0xe5   : > { %324 = vst.msk [vmem:[#allocation2] sm:$0xff] %vm323_vm0, %v321_v4 }
  0xe8   : > { %v330_v5 = vpop.permute.xlu0 %329 }
  0xe9   : > { %333 = vst.msk [vmem:[#allocation2] sm:$0xff] %vm332_vm1, %v330_v5 }
  0xf0   : > { %v334_v6 = vld [vmem:[#allocation2] sm:$0xff] }
  0xf1   : > { %346 = vrot.lane.b32.xlu0 %v334_v6, %s916_s22  ;;  %336 = vst.msk [vmem:[#allocation3] sm:$0xff] %vm335_vm2, %v334_v6  ;;  %338 = vrot.lane.b32.xlu1 %v334_v6, %s917_s23 }
  0xf5   : > { %354 = vrot.lane.b32.xlu0 %v334_v6, %s918_s14  ;;  %342 = vrot.lane.b32.xlu1 %v334_v6, %s919_s26 }
  0xf8   : > { %v366_v7 = vld [vmem:[#allocation3] sm:$0xff] }
  0xf9   : > { %350 = vrot.lane.b32.xlu1 %v334_v6, %s920_s6  ;;  %652 = vmatprep.subr.bf16.mxu0 %v366_v7 }
  0xfa   : > { %653 = vmatpush3.bf16.msra.mxu0 %v366_v7  ;;  %379 = vperm.xlu0 %754, %v373_v9  }
  0xfd   : > { %358 = vrot.lane.b32.xlu1 %v334_v6, %s921_s13 }
  0xfe   : > { %394 = vperm.xlu0 %754, %v376_v11  }
 0x101   : > { %384 = vperm.xlu1 %755, %v374_v10  }
 0x105   : > { %389 = vperm.xlu1 %755, %v375_v12  }
 0x163   : > { %v347_v13 = vpop.permute.xlu0 %346  ;;  %v339_v14 = vpop.permute.xlu1 %338 }
 0x164   : > { %349 = vst.msk [vmem:[#allocation3 + $0x18] sm:$0xff] %vm335_vm2, %v347_v13  ;;  %341 = vst.msk [vmem:[#allocation3 + $0x8] sm:$0xff] %vm335_vm2, %v339_v14 }
 0x167   : > { %v355_v15 = vpop.permute.xlu0 %354  ;;  %v343_v16 = vpop.permute.xlu1 %342 }
 0x168   : > { %357 = vst.msk [vmem:[#allocation3 + $0x28] sm:$0xff] %vm335_vm2, %v355_v15  ;;  %345 = vst.msk [vmem:[#allocation3 + $0x10] sm:$0xff] %vm335_vm2, %v343_v16 }
 0x16b   : > { %v351_v17 = vpop.permute.xlu1 %350  ;;  %v367_v18 = vld [vmem:[#allocation3 + $0x8] sm:$0xff]  ;;  %v369_v21 = vld [vmem:[#allocation3 + $0x18] sm:$0xff] }
 0x16c   : > { %353 = vst.msk [vmem:[#allocation3 + $0x20] sm:$0xff] %vm335_vm2, %v351_v17  ;;  %654 = vmatprep.subr.bf16.mxu0 %v367_v18 }
 0x16d   : > { %655 = vmatpush3.bf16.msra.mxu0 %v367_v18 }
 0x16f   : > { %v359_v19 = vpop.permute.xlu1 %358  ;;  %v368_v20 = vld [vmem:[#allocation3 + $0x10] sm:$0xff]  ;;  %v371_v23 = vld [vmem:[#allocation3 + $0x28] sm:$0xff] }
 0x170   : > { %361 = vst.msk [vmem:[#allocation3 + $0x30] sm:$0xff] %vm335_vm2, %v359_v19  ;;  %656 = vmatprep.subr.bf16.mxu0 %v368_v20 }
 0x171   : > { %657 = vmatpush3.bf16.msra.mxu0 %v368_v20 }
 0x172   : > { %658 = vmatprep.subr.bf16.mxu0 %v369_v21 }
 0x173   : > { %v370_v22 = vld [vmem:[#allocation3 + $0x20] sm:$0xff] }
 0x175   : > { %659 = vmatpush3.bf16.msra.mxu0 %v369_v21 }
 0x176   : > { %660 = vmatprep.subr.bf16.mxu0 %v370_v22 }
 0x177   : > { %v372_v24 = vld [vmem:[#allocation3 + $0x30] sm:$0xff] }
 0x179   : > { %661 = vmatpush3.bf16.msra.mxu0 %v370_v22  ;;  %v380_v27 = vpop.permute.xlu0 %379 }
 0x17a   : > { %662 = vmatprep.subr.bf16.mxu0 %v371_v23 }
 0x17d   : > { %663 = vmatpush3.bf16.msra.mxu0 %v371_v23  ;;  %v395_v32 = vpop.permute.xlu0 %394 }
 0x17e   : > { %664 = vmatprep.subr.bf16.mxu0 %v372_v24 }
 0x180   : > { %v385_v26 = vpop.permute.xlu1 %384 }
 0x181   : > { %665 = vmatpush3.bf16.msra.mxu0 %v372_v24 }
 0x184   : > { %667 = vmatmul.mubr.msk.bf16.vlgmr.msra.gmra.mrb[0].mxu0 %vm407_vm3, %v757_v25  ;;  %v390_v28 = vpop.permute.xlu1 %389 }
 0x257   : > { %v668_v29 = vpop.f32.mrb[0].mxu0 }
 0x258   : > { %v457_v30 = vadd.f32 %v668_v29, %v390_v28  ;;  %v448_v31 = vpop.f32.mrb[1].mxu0 }
 0x259   : > { %v449_v33 = vadd.f32 %v448_v31, %v380_v27  ;;  %v669_v34 = vpop.f32.mrb[2].mxu0 }
 0x25a   : > { %v641_v35 = vpack.c.bf16 %v457_v30, %v457_v30  ;;  %v460_v36 = vadd.f32 %v669_v34, %v395_v32  ;;  %v451_v37 = vpop.f32.mrb[3].mxu0 }
 0x25b   : > { %v639_v38 = vpack.c.bf16 %v449_v33, %v449_v33  ;;  %v452_v39 = vadd.f32 %v451_v37, %v385_v26 }
 0x25c   : > { %482 = vst.msk [vmem:[%s309_s24 + $0x8] sm:$0xf] %vm479_vm4, %v641_v35  ;;  %v642_v40 = vpack.c.bf16 %v460_v36, %v460_v36 }
 0x25d   : > { %480 = vst.msk [vmem:[%s309_s24] sm:$0xf] %vm479_vm4, %v639_v38  ;;  %v640_v41 = vpack.c.bf16 %v452_v39, %v452_v39 }
 0x25e   : > { %483 = vst.msk [vmem:[%s309_s24 + $0xc] sm:$0xf] %vm479_vm4, %v642_v40 }
 0x25f   : > { %481 = vst.msk [vmem:[%s309_s24 + $0x4] sm:$0xf] %vm479_vm4, %v640_v41 }
 0x260 PF: > { %s20_s20 = sadd.s32 1, %s904_s20   ;;  %s1201_s15 = smov %s888_s16 }
 0x261   : > { %p17_p9 = scmp.ge.s32.totalorder %s20_s20, 4   ;;  %s1202_s16 = smov %s892_s17 }
 0x262   : > { %s1203_s17 = smov %s1034_s5  ;;  %s1204_s18 = smov %s900_s19 }
 0x263   : > { %s1205_s19 = smov %s1207_s28  ;;  %19 = sbr.rel (!%p17_p9) target bundleno = 6 (0x6), region = 93 }
 0x26a   :  { %511 = vsyncpa [#allocation5], 1 }
 0x26b   :  { %513 = vsyncpa [#allocation5 + $0x1], 1 }
 0x26c   :  { %514 = vsyncpa [#allocation7], 1 }
 0x26d   :  { %516 = vsyncpa [#allocation7 + $0x1], 1 }

// kernel: _lambda_.6
= control target key start
LH: loop header
LB: loop body
LE: loop exit
PB: predicated region body
PF: predicated region fallthrough
CT: control target
= control target key end

     0   :  { %10 = vsyncpa [#allocation6], 0  ;;  %s1239_s18 = smov 0   ;;  %s1241_s19 = smov 0   ;;  %s1454_s0 = inlined_call_operand.vmem [shape: bf16[2,32,64], index: 0, kind: input, shape index: {}, may-alias: {0,1}]   ;;  %s1455_s1 = inlined_call_operand.vmem [shape: bf16[2,32,64], index: 1, kind: input, shape index: {}, may-alias: {0,1}]   ;;  %s1456_s2 = inlined_call_operand.hbm [shape: bf16[64,96], index: 2, kind: input, shape index: {}]   ;;  %s1457_s3 = inlined_call_operand.vmem [shape: f32[64,1], index: 3, kind: input, shape index: {}]   ;;  %s1458_s4 = inlined_call_operand.vmem [shape: bf16[256,256], index: 4, kind: input, shape index: {}]   ;;  %s1459_s5 = inlined_call_operand.vmem [shape: bf16[2,16,256], index: 5, kind: output, shape index: {}]  }
   0x1   :  { %s1243_s0 = smov 0  }
   0x2 LB: > { %s949_s20 = sadd.s32 4294967295, %s1198_s0   ;;  %s28_s21 = sadd.s32 1, %s1194_s19  ;;  %s1198_s0 = sphi %s1243_s0, %s16_s0   ;;  %s1194_s19 = sphi %s1241_s19, %s1469_s19   ;;  %s1190_s18 = sphi %s1239_s18, %s1468_s18  }
   0x3   : > { %p30_p0 = scmp.ge.s32.totalorder %s28_s21, 2  ;;  %p951_p1 = scmp.ge.s32.totalorder %s1198_s0, 1 }
   0x4   : > { %p186_p2 = scmp.lt.s32.totalorder %s1198_s0, 3  ;;  %p1264_p4 = scmp.eq.s32.totalorder %s949_s20, 0 }
   0x5   : > { %s1471_s21 = smov (%p30_p0, %s28_s21), 0  ;;  %s1200_s24 = smov [#allocation5]  }
   0x6   : > { %p1260_p3 = pnand %p951_p1, %p186_p2  ;;  %s198_s25 = sshll.u32 %s1200_s24, 4  ;;  %s199_s25 = int_to_ptr.vmem [resolvable:$true] %s198_s25 }
   0x7   : > { %s1464_s23 = scalar_select %p1264_p4, 1, 0 }
   0x8   : > { %s1463_s22 = scalar_select %p1260_p3, 1, 0 }
   0x9   : > { %p1049_p5 = pneg %p1260_p3  ;;  %s1144_s29 = scalar_lea.hbm %s1456_s2, 512 }
   0xa   : > { %p1145_p7 = scmp.ne.s32.totalorder %s1456_s2, %s1144_s29  ;;  %p1151_p11 = scmp.lt.u32.totalorder %s1144_s29, %s1456_s2 }
   0xb   : > { %p1272_p6 = pnand %p1264_p4, %p1049_p5 }
   0xd   : > { %p1146_p8 = pneg %p1272_p6 }
   0xf   : > { %p1147_p9 = pnand %p1146_p8, %p1145_p7 }
  0x11   : > { %p1148_p10 = pneg %p1147_p9 }
  0x13   : > { %p1153_p12 = pnand %p1151_p11, %p1148_p10 }
  0x15   : > { %1156 = shalt.err (!%p1153_p12)
}
  0x16   : > { %s1157_s9 = scalar_lea.vmem %s199_s25, 512  ;;  %p1165_p2 = scmp.lt.s32.totalorder %s199_s25, %s199_s25 }
  0x17   : > { %p1158_p13 = scmp.ne.s32.totalorder %s199_s25, %s1157_s9  ;;  %p1166_p5 = scmp.lt.s32.totalorder %s1157_s9, %s1157_s9 }
  0x19   : > { %p1160_p0 = pnand %p1158_p13, %p1146_p8  ;;  %p1167_p4 = por %p1166_p5, %p1165_p2 }
  0x1b   : > { %p1161_p1 = pneg %p1160_p0 }
  0x1d   : > { %p1168_p3 = pnand %p1167_p4, %p1161_p1 }
  0x1f   : > { %1171 = shalt.err (!%p1168_p3)
}
  0x20   : > { %s1201_s10 = smov 64   ;;  %s1202_s11 = smov 4  }
  0x21   : > { %1052 = dma.hbm_to_vmem [thread:$0]  (!%p1272_p6), %s1456_s2, 512, %s199_s25, [#allocation6], %s1201_s10, %s1201_s10, %s1202_s11  }
  0x22   : > { %p1466_p7 = scmp.ne.s32.totalorder %s1463_s22, 0 }
  0x23   : > { %p1467_p9 = scmp.ne.s32.totalorder (!%p1466_p7), %s1464_s23, 0 }
  0x24   : > { %248 = sbr.rel (%p1466_p7) target bundleno = 889 (0x379), region = 40 }
  0x2b   : > { %1185 = dma.done.wait (%p1467_p9), [#allocation6], 512  }
  0x2c   : > { %1187 = vsyncadd (%p1467_p9), [#allocation6], 4294966784  ;;  %p308_p3 = scmp.lt.s32.totalorder %s1190_s18, 1  ;;  %v1203_v0 = vmov 0   ;;  %s1204_s14 = smov 66   ;;  %vm355_vm0 = vcmask 15360  }
  0x2d   : > { %v962_v1 = vcombine.low %v1203_v0, %v1203_v0  ;;  %1089 = vset.pattern.permute.xlu1 %v1203_v0  ;;  %1088 = vset.pattern.permute.xlu0 %v1203_v0  ;;  %s1205_s22 = smov 2   ;;  %vm378_vm1 = vcmask 539664   ;;  %vm391_vm2 = vcmask 523264   ;;  %s1206_s23 = smov 126   ;;  %v1092_v10 = vld [vmem:[#allocation5] sm:$0xff]   ;;  %vm486_vm3 = vcmask 785408  }
  0x2e   : > { %s1473_s18 = smov (!%p308_p3, %s1190_s18), 1  ;;  %s1207_s24 = smov 127   ;;  %1037 = vmatprep.mubr.msk.bf16.mxu0 %vm486_vm3, %v1092_v10  ;;  %v425_v11 = vld [vmem:[%s1457_s3 + $0x38] sm:$0xff]  ;;  %v424_v12 = vld [vmem:[%s1457_s3 + $0x30] sm:$0xff]  ;;  %v422_v15 = vld [vmem:[%s1457_s3 + $0x20] sm:$0xff]  ;;  %vm571_vm4 = vcmask 1048064  }
  0x2f   : > { %351 = vrot.lane.b32.xlu1 %v962_v1, %s1204_s14  ;;  %349 = vrot.lane.b32.xlu0 %v962_v1, %s1204_s14  ;;  %s1011_s15 = sshll.u32 %s1473_s18, 4  ;;  %v420_v13 = vld [vmem:[%s1457_s3 + $0x10] sm:$0xff]  ;;  %v421_v14 = vld [vmem:[%s1457_s3 + $0x18] sm:$0xff]  ;;  %v1094_v30 = vld [vmem:[#allocation5 + $0x10] sm:$0xff]  }
  0x30   : > { %s315_s20 = scalar_lea.vmem %s1455_s1, %s1011_s15  ;;  %v423_v16 = vld [vmem:[%s1457_s3 + $0x28] sm:$0xff]  ;;  %v418_v17 = vld [vmem:[%s1457_s3] sm:$0xff]  ;;  %v1093_v29 = vld [vmem:[#allocation5 + $0x8] sm:$0xff]  }
  0x31   : > { %v1090_v2 = vld [vmem:[%s315_s20 + $0x8] sm:$0xff]   ;;  %v1091_v3 = vld [vmem:[%s315_s20] sm:$0xff]   ;;  %v1099_v34 = vld [vmem:[%s1458_s4 + $0x14] ss:$8 sps:$4 sm:$0xff]   ;;  %s1208_s20 = smov 64  }
  0x32   : > { %v419_v18 = vld [vmem:[%s1457_s3 + $0x8] sm:$0xff]  ;;  %v1101_v35 = vld [vmem:[%s1458_s4 + $0x10] ss:$8 sps:$4 sm:$0xff]   ;;  %v1105_v38 = vld [vmem:[%s1458_s4 + $0x34] ss:$8 sps:$4 sm:$0xff]  }
  0x33   : > { %374 = vrot.lane.b32.xlu1 %v1090_v2, %s1205_s22  ;;  %372 = vrot.lane.b32.xlu0 %v1091_v3, %s1205_s22  ;;  %v1095_v31 = vld [vmem:[#allocation5 + $0x18] sm:$0xff]   ;;  %v1107_v39 = vld [vmem:[%s1458_s4 + $0x30] ss:$8 sps:$4 sm:$0xff]   ;;  %v1111_v42 = vld [vmem:[%s1458_s4 + $0x54] ss:$8 sps:$4 sm:$0xff]  }
  0x34   : > { %v1096_v32 = vld [vmem:[%s1458_s4 + $0x4] ss:$8 sps:$4 sm:$0xff]   ;;  %v1098_v33 = vld [vmem:[%s1458_s4] ss:$8 sps:$4 sm:$0xff]   ;;  %v1113_v43 = vld [vmem:[%s1458_s4 + $0x50] ss:$8 sps:$4 sm:$0xff]  }
  0x35   : > { %775 = vmatprep.subr.bf16.mxu1 %v1096_v32  ;;  %v1102_v36 = vld [vmem:[%s1458_s4 + $0x24] ss:$8 sps:$4 sm:$0xff]   ;;  %v1104_v37 = vld [vmem:[%s1458_s4 + $0x20] ss:$8 sps:$4 sm:$0xff]   ;;  %v1117_v46 = vld [vmem:[%s1458_s4 + $0x74] ss:$8 sps:$4 sm:$0xff]  }
  0x36   : > { %776 = vmatpush1.bf16.msra.mxu1 %v1098_v33  ;;  %v1108_v40 = vld [vmem:[%s1458_s4 + $0x44] ss:$8 sps:$4 sm:$0xff]   ;;  %v1110_v41 = vld [vmem:[%s1458_s4 + $0x40] ss:$8 sps:$4 sm:$0xff]   ;;  %v1119_v47 = vld [vmem:[%s1458_s4 + $0x70] ss:$8 sps:$4 sm:$0xff]  }
  0x37   : > { %777 = vmatprep.subr.bf16.mxu1 %v1099_v34  ;;  %v1114_v44 = vld [vmem:[%s1458_s4 + $0x64] ss:$8 sps:$4 sm:$0xff]   ;;  %v1116_v45 = vld [vmem:[%s1458_s4 + $0x60] ss:$8 sps:$4 sm:$0xff]   ;;  %v1123_v50 = vld [vmem:[%s1458_s4 + $0x94] ss:$8 sps:$4 sm:$0xff]  }
  0x38   : > { %v1120_v48 = vld [vmem:[%s1458_s4 + $0x84] ss:$8 sps:$4 sm:$0xff]   ;;  %v1122_v49 = vld [vmem:[%s1458_s4 + $0x80] ss:$8 sps:$4 sm:$0xff]   ;;  %v1125_v51 = vld [vmem:[%s1458_s4 + $0x90] ss:$8 sps:$4 sm:$0xff]  }
  0x39   : > { %v1126_v52 = vld [vmem:[%s1458_s4 + $0xa4] ss:$8 sps:$4 sm:$0xff]   ;;  %v1128_v53 = vld [vmem:[%s1458_s4 + $0xa0] ss:$8 sps:$4 sm:$0xff]   ;;  %v1129_v54 = vld [vmem:[%s1458_s4 + $0xb4] ss:$8 sps:$4 sm:$0xff]  }
  0x3a   : > { %778 = vmatpush1.bf16.msra.mxu1 %v1101_v35  ;;  %v1131_v55 = vld [vmem:[%s1458_s4 + $0xb0] ss:$8 sps:$4 sm:$0xff]   ;;  %v1132_v60 = vld [vmem:[%s1458_s4 + $0xc4] ss:$8 sps:$4 sm:$0xff]   ;;  %v1134_v62 = vld [vmem:[%s1458_s4 + $0xc0] ss:$8 sps:$4 sm:$0xff]  }
  0x3b   : > { %779 = vmatprep.subr.bf16.mxu1 %v1102_v36  ;;  %v1135_v63 = vld [vmem:[%s1458_s4 + $0xd4] ss:$8 sps:$4 sm:$0xff]   ;;  %v1137_v1 = vld [vmem:[%s1458_s4 + $0xd0] ss:$8 sps:$4 sm:$0xff]  }
  0x3e   : > { %780 = vmatpush1.bf16.msra.mxu1 %v1104_v37 }
  0x3f   : > { %781 = vmatprep.subr.bf16.mxu1 %v1105_v38 }
  0x42   : > { %782 = vmatpush1.bf16.msra.mxu1 %v1107_v39 }
  0x43   : > { %783 = vmatprep.subr.bf16.mxu1 %v1108_v40 }
  0x46   : > { %784 = vmatpush1.bf16.msra.mxu1 %v1110_v41 }
  0x47   : > { %785 = vmatprep.subr.bf16.mxu1 %v1111_v42 }
  0x4a   : > { %786 = vmatpush1.bf16.msra.mxu1 %v1113_v43 }
  0x4b   : > { %787 = vmatprep.subr.bf16.mxu1 %v1114_v44 }
  0x4e   : > { %788 = vmatpush1.bf16.msra.mxu1 %v1116_v45 }
  0x4f   : > { %789 = vmatprep.subr.bf16.mxu1 %v1117_v46 }
  0x52   : > { %790 = vmatpush1.bf16.msra.mxu1 %v1119_v47 }
  0x53   : > { %791 = vmatprep.subr.bf16.mxu1 %v1120_v48 }
  0x56   : > { %792 = vmatpush1.bf16.msra.mxu1 %v1122_v49 }
  0x57   : > { %793 = vmatprep.subr.bf16.mxu1 %v1123_v50 }
  0x5a   : > { %794 = vmatpush1.bf16.msra.mxu1 %v1125_v51 }
  0x5b   : > { %795 = vmatprep.subr.bf16.mxu1 %v1126_v52 }
  0x5e   : > { %796 = vmatpush1.bf16.msra.mxu1 %v1128_v53 }
  0x5f   : > { %797 = vmatprep.subr.bf16.mxu1 %v1129_v54 }
  0x62   : > { %798 = vmatpush1.bf16.msra.mxu1 %v1131_v55 }
  0x63   : > { %799 = vmatprep.subr.bf16.mxu1 %v1132_v60 }
  0x66   : > { %800 = vmatpush1.bf16.msra.mxu1 %v1134_v62 }
  0x67   : > { %801 = vmatprep.subr.bf16.mxu1 %v1135_v63 }
  0x6a   : > { %802 = vmatpush1.bf16.msra.mxu1 %v1137_v1 }
  0xa1   : > { %v352_v4 = vpop.permute.xlu1 %351  ;;  %v350_v5 = vpop.permute.xlu0 %349 }
  0xa2   : > { %357 = vst.msk [vmem:[#allocation2 + $0x8] sm:$0xff] %vm355_vm0, %v352_v4  ;;  %356 = vst.msk [vmem:[#allocation2] sm:$0xff] %vm355_vm0, %v350_v5 }
  0xa5   : > { %v375_v6 = vpop.permute.xlu1 %374  ;;  %v373_v7 = vpop.permute.xlu0 %372 }
  0xa6   : > { %380 = vst.msk [vmem:[#allocation2 + $0x8] sm:$0xff] %vm378_vm1, %v375_v6  ;;  %379 = vst.msk [vmem:[#allocation2] sm:$0xff] %vm378_vm1, %v373_v7  ;;  %v1138_v6 = vld [vmem:[%s1458_s4 + $0xe4] ss:$8 sps:$4 sm:$0xff]  }
  0xa7   : > { %803 = vmatprep.subr.bf16.mxu1 %v1138_v6 }
  0xad   : > { %v382_v8 = vld [vmem:[#allocation2 + $0x8] sm:$0xff]  ;;  %v381_v9 = vld [vmem:[#allocation2] sm:$0xff] }
  0xae   : > { %387 = vrot.lane.b32.xlu1 %v382_v8, %s1206_s23  ;;  %403 = vst.msk [vmem:[#allocation3 + $0x28] sm:$0xff] %vm391_vm2, %v382_v8  ;;  %385 = vrot.lane.b32.xlu0 %v381_v9, %s1206_s23  ;;  %402 = vst.msk [vmem:[#allocation3 + $0x20] sm:$0xff] %vm391_vm2, %v381_v9 }
  0xb2   : > { %396 = vrot.lane.b32.xlu1 %v382_v8, %s1207_s24  ;;  %394 = vrot.lane.b32.xlu0 %v381_v9, %s1207_s24  ;;  %v1140_v8 = vld [vmem:[%s1458_s4 + $0xe0] ss:$8 sps:$4 sm:$0xff]   ;;  %v1141_v9 = vld [vmem:[%s1458_s4 + $0xf4] ss:$8 sps:$4 sm:$0xff]   ;;  %s324_s24 = scalar_lea.vmem %s1459_s5, %s1011_s15 }
  0xb3   : > { %804 = vmatpush1.bf16.msra.mxu1 %v1140_v8 }
  0xb4   : > { %805 = vmatprep.subr.bf16.mxu1 %v1141_v9 }
  0xb5   : > { %v416_v27 = vld [vmem:[#allocation3 + $0x20] sm:$0xff]  ;;  %v417_v28 = vld [vmem:[#allocation3 + $0x28] sm:$0xff] }
  0xb6   : > { %463 = vperm.xlu1 %1089, %v425_v11   ;;  %458 = vperm.xlu0 %1088, %v424_v12  }
  0xba   : > { %438 = vperm.xlu1 %1089, %v420_v13   ;;  %443 = vperm.xlu0 %1088, %v421_v14  }
  0xbe   : > { %448 = vperm.xlu1 %1089, %v422_v15   ;;  %453 = vperm.xlu0 %1088, %v423_v16   ;;  %v1143_v15 = vld [vmem:[%s1458_s4 + $0xf0] ss:$8 sps:$4 sm:$0xff]  }
  0xbf   : > { %806 = vmatpush1.bf16.msra.mxu1 %v1143_v15 }
  0xc2   : > { %428 = vperm.xlu1 %1089, %v418_v17   ;;  %433 = vperm.xlu0 %1088, %v419_v18  }
 0x120   : > { %v388_v19 = vpop.permute.xlu1 %387  ;;  %v386_v20 = vpop.permute.xlu0 %385 }
 0x121   : > { %393 = vst.msk [vmem:[#allocation3 + $0x8] sm:$0xff] %vm391_vm2, %v388_v19  ;;  %392 = vst.msk [vmem:[#allocation3] sm:$0xff] %vm391_vm2, %v386_v20 }
 0x124   : > { %v397_v21 = vpop.permute.xlu1 %396  ;;  %v395_v22 = vpop.permute.xlu0 %394 }
 0x125   : > { %401 = vst.msk [vmem:[#allocation3 + $0x18] sm:$0xff] %vm391_vm2, %v397_v21  ;;  %400 = vst.msk [vmem:[#allocation3 + $0x10] sm:$0xff] %vm391_vm2, %v395_v22 }
 0x128   : > { %v412_v23 = vld [vmem:[#allocation3] sm:$0xff]  ;;  %v413_v24 = vld [vmem:[#allocation3 + $0x8] sm:$0xff] }
 0x129   : > { %1025 = vmatprep.subr.bf16.mxu0 %v412_v23 }
 0x12a   : > { %1026 = vmatpush3.bf16.msra.mxu0 %v412_v23 }
 0x12b   : > { %1027 = vmatprep.subr.bf16.mxu0 %v413_v24 }
 0x12c   : > { %v414_v25 = vld [vmem:[#allocation3 + $0x10] sm:$0xff]  ;;  %v415_v26 = vld [vmem:[#allocation3 + $0x18] sm:$0xff] }
 0x12e   : > { %1028 = vmatpush3.bf16.msra.mxu0 %v413_v24 }
 0x12f   : > { %1029 = vmatprep.subr.bf16.mxu0 %v414_v25 }
 0x132   : > { %1030 = vmatpush3.bf16.msra.mxu0 %v414_v25 }
 0x133   : > { %1031 = vmatprep.subr.bf16.mxu0 %v415_v26 }
 0x135   : > { %v464_v56 = vpop.permute.xlu1 %463  ;;  %v459_v57 = vpop.permute.xlu0 %458 }
 0x136   : > { %1032 = vmatpush3.bf16.msra.mxu0 %v415_v26 }
 0x137   : > { %1033 = vmatprep.subr.bf16.mxu0 %v416_v27 }
 0x139   : > { %v439_v58 = vpop.permute.xlu1 %438  ;;  %v444_v59 = vpop.permute.xlu0 %443 }
 0x13a   : > { %1034 = vmatpush3.bf16.msra.mxu0 %v416_v27 }
 0x13b   : > { %1035 = vmatprep.subr.bf16.mxu0 %v417_v28 }
 0x13d   : > { %v449_v61 = vpop.permute.xlu1 %448  ;;  %v454_v0 = vpop.permute.xlu0 %453 }
 0x13e   : > { %1036 = vmatpush3.bf16.msra.mxu0 %v417_v28 }
 0x141   : > { %1038 = vmatmul.mubr.msk.bf16.vlgmr.msra.gmra.mrb[0].mxu0 %vm486_vm3, %v1093_v29  ;;  %v429_v3 = vpop.permute.xlu1 %428  ;;  %v434_v5 = vpop.permute.xlu0 %433 }
 0x142   : > { %1041 = vmatprep.mubr.msk.bf16.mxu0 %vm486_vm3, %v1094_v30 }
 0x149   : > { %1042 = vmatmul.mubr.msk.bf16.gmra.mrb[4].mxu0 %vm486_vm3, %v1095_v31 }
 0x214   : > { %v1039_v2 = vpop.f32.mrb[0].mxu0 }
 0x215   : > { %v533_v4 = vpop.f32.mrb[1].mxu0  ;;  %v542_v10 = vadd.f32 %v1039_v2, %v439_v58 }
 0x216   : > { %v1040_v7 = vpop.f32.mrb[2].mxu0  ;;  %v534_v13 = vadd.f32 %v533_v4, %v429_v3 }
 0x217   : > { %v545_v11 = vadd.f32 %v1040_v7, %v444_v59  ;;  %v536_v12 = vpop.f32.mrb[3].mxu0 }
 0x218   : > { %v537_v14 = vadd.f32 %v536_v12, %v434_v5 }
 0x219   : > { %v566_v16 = vpack.c.bf16 %v545_v11, %v542_v10 }
 0x21a   : > { %v564_v17 = vpack.c.bf16 %v537_v14, %v534_v13 }
 0x21b   : > { %568 = vrot.lane.b32.xlu0 %v566_v16, %s1208_s20 }
 0x21c   : > { %565 = vst.msk [vmem:[#allocation4] sm:$0xff] %vm391_vm2, %v564_v17  ;;  %v1043_v18 = vpop.f32.mrb[4].mxu0 }
 0x21d   : > { %v549_v19 = vpop.f32.mrb[5].mxu0  ;;  %v558_v21 = vadd.f32 %v1043_v18, %v459_v57 }
 0x21e   : > { %v1044_v20 = vpop.f32.mrb[6].mxu0  ;;  %v550_v24 = vadd.f32 %v549_v19, %v449_v61 }
 0x21f   : > { %v561_v22 = vadd.f32 %v1044_v20, %v464_v56  ;;  %v552_v23 = vpop.f32.mrb[7].mxu0 }
 0x220   : > { %v553_v25 = vadd.f32 %v552_v23, %v454_v0 }
 0x221   : > { %v575_v26 = vpack.c.bf16 %v561_v22, %v558_v21 }
 0x222   : > { %v573_v27 = vpack.c.bf16 %v553_v25, %v550_v24 }
 0x223   : > { %577 = vrot.lane.b32.xlu1 %v575_v26, %s1208_s20 }
 0x224   : > { %574 = vst.msk [vmem:[#allocation4 + $0x8] sm:$0xff] %vm391_vm2, %v573_v27 }
 0x28d   : > { %v569_v28 = vpop.permute.xlu0 %568 }
 0x28e   : > { %572 = vst.msk [vmem:[#allocation4] sm:$0xff] %vm571_vm4, %v569_v28 }
 0x295   : > { %v578_v29 = vpop.permute.xlu1 %577  ;;  %v581_v31 = vld [vmem:[#allocation4] sm:$0xff] }
 0x296   : > { %580 = vst.msk [vmem:[#allocation4 + $0x8] sm:$0xff] %vm571_vm4, %v578_v29 }
 0x29d   : > { %v582_v30 = vld [vmem:[#allocation4 + $0x8] sm:$0xff] }
 0x29e   : > { %807 = vmatprep.mubr.bf16.mxu1 %v582_v30 }
 0x29f   : > { %808 = vmatmul.mubr.bf16.vlgmr.msra.gmra.mrb[0].mxu1 %v581_v31 }
 0x372   : > { %v809_v32 = vpop.f32.mrb[0].mxu1 }
 0x373   : > { %v811_v33 = vpop.f32.mrb[1].mxu1 }
 0x374   : > { %v1013_v34 = vpack.c.bf16 %v811_v33, %v809_v32  ;;  %v813_v35 = vpop.f32.mrb[2].mxu1 }
 0x375   : > { %v815_v36 = vpop.f32.mrb[3].mxu1 }
 0x376   : > { %830 = vst [vmem:[%s324_s24] sm:$0xff] %v1013_v34  ;;  %v1014_v37 = vpack.c.bf16 %v815_v36, %v813_v35 }
 0x378   : > { %831 = vst [vmem:[%s324_s24 + $0x8] sm:$0xff] %v1014_v37 }
 0x379 PF: > { %s16_s0 = sadd.s32 1, %s1198_s0   ;;  %s1468_s18 = smov %s1194_s19 }
 0x37a   : > { %p13_p4 = scmp.ge.s32.totalorder %s16_s0, 4   ;;  %s1469_s19 = smov %s1471_s21 }
 0x37c   :  { %15 = sbr.rel (!%p13_p4) target bundleno = 2 (0x2), region = 78 }
 0x383   :  { %862 = vsyncpa [#allocation6], 1 }
 0x384   :  { %864 = vsyncpa [#allocation6 + $0x1], 1 }

// kernel: _lambda_.8
= control target key start
LH: loop header
LB: loop body
LE: loop exit
PB: predicated region body
PF: predicated region fallthrough
CT: control target
= control target key end

     0   :  { %s2195_s18 = smov 0   ;;  %s2197_s19 = smov 0   ;;  %s2733_s0 = inlined_call_operand.vmem [shape: bf16[2,16,256], index: 0, kind: input, shape index: {}, may-alias: {0,1}]   ;;  %s2734_s1 = inlined_call_operand.vmem [shape: bf16[2,16,256], index: 1, kind: input, shape index: {}, may-alias: {0,1}]   ;;  %s2735_s2 = inlined_call_operand.vmem [shape: bf16[32,48], index: 2, kind: input, shape index: {}]   ;;  %s2736_s3 = inlined_call_operand.vmem [shape: f32[32,1], index: 3, kind: input, shape index: {}]   ;;  %s2737_s4 = inlined_call_operand.vmem [shape: bf16[512,512], index: 4, kind: input, shape index: {}]   ;;  %s2738_s5 = inlined_call_operand.vmem [shape: bf16[2,8,1024], index: 5, kind: output, shape index: {}]  }
   0x1   :  { %s2199_s20 = smov 0   ;;  %s2201_s21 = smov 0  }
   0x2   :  { %s2203_s22 = smov 0   ;;  %s2205_s23 = smov 0  }
   0x3   :  { %s2207_s24 = smov 0   ;;  %s2209_s25 = smov 0  }
   0x4   :  { %s2211_s26 = smov 0  }
   0x5 LB: > { %s24_s27 = sadd.s32 1, %s2151_s24  ;;  %s27_s28 = sadd.s32 1, %s2155_s25  ;;  %s2159_s26 = sphi %s2211_s26, %s15_s26   ;;  %s2155_s25 = sphi %s2209_s25, %s2750_s25   ;;  %s2151_s24 = sphi %s2207_s24, %s2749_s24   ;;  %s2147_s23 = sphi %s2205_s23, %s2748_s23   ;;  %s2143_s22 = sphi %s2203_s22, %s2747_s22   ;;  %s2139_s21 = sphi %s2201_s21, %s2746_s21   ;;  %s2135_s20 = sphi %s2199_s20, %s2745_s20   ;;  %s2131_s19 = sphi %s2197_s19, %s2744_s19   ;;  %s2127_s18 = sphi %s2195_s18, %s2743_s18  }
   0x6   : > { %p25_p0 = scmp.ge.s32.totalorder %s24_s27, 2  ;;  %s42_s29 = sadd.s32 1, %s2139_s21 }
   0x7   : > { %p49_p2 = scmp.ne.s32.totalorder %s2139_s21, %s2135_s20  ;;  %p50_p3 = scmp.eq.s32.totalorder %s2159_s26, 0 }
   0x8   : > { %s2752_s27 = smov (%p25_p0, %s24_s27), 0  ;;  %s2754_s28 = smov (!%p25_p0, %s27_s28), %s2155_s25 }
   0x9   : > { %p29_p1 = scmp.ge.s32.totalorder %s2754_s28, 2  ;;  %s66_s6 = ssub.s32 %s2151_s24, %s2752_s27 }
   0xa   : > { %p51_p4 = por %p50_p3, %p49_p2  ;;  %s70_s8 = sadd.s32 1, %s2131_s19 }
   0xb   : > { %s2756_s28 = smov (%p29_p1, %s2754_s28), 0  ;;  %p77_p7 = scmp.ne.s32.totalorder %s2131_s19, %s2127_s18 }
   0xc   : > { %2740 = sst [smem:[#allocation7_spill]] %s2756_s28  ;;  %s37_s30 = ssub.s32 %s2155_s25, %s2756_s28 }
   0xd   : > { %p40_p5 = scmp.eq.s32.totalorder %s37_s30, 0  ;;  %s67_s7 = sor.u32 %s66_s6, %s37_s30 }
   0xe   : > { %p68_p6 = scmp.eq.s32.totalorder %s67_s7, 0  ;;  %p2264_p8 = por %p77_p7, %p50_p3 }
   0xf   : > { %s2257_s9 = scalar_select %p40_p5, %s2139_s21, %s42_s29  }
  0x10   : > { %s2260_s10 = scalar_select %p68_p6, %s2131_s19, %s70_s8  }
  0x11   : > { %p1619_p9 = scmp.ge.s32.totalorder %s2159_s26, 4 }
  0x13   : > { %203 = sbr.rel (%p1619_p9) target bundleno = 40 (0x28), region = 28 }
  0x1a   : > { %206 = sbr.rel (!%p51_p4) target bundleno = 33 (0x21), region = 32  ;;  %s208_s12 = sand.u32 (%p51_p4), 1, %s2139_s21  }
  0x1b   : > { %s1620_s13 = sshll.u32 (%p51_p4), %s208_s12, 3  ;;  %s2124_s14 = sshll.u32 (%p51_p4), %s2155_s25, 4 }
  0x1c   : > { %s217_s17 = scalar_lea.vmem (%p51_p4), %s2733_s0, %s2124_s14  ;;  %s210_s29 = scalar_lea.vmem (%p51_p4), [#allocation5], %s1620_s13 }
  0x1d   : > { %v233_v0 = vld [vmem:[%s217_s17] sm:$0xf] (%p51_p4)  ;;  %v235_v1 = vld [vmem:[%s217_s17 + $0x8] sm:$0xf] (%p51_p4) }
  0x1e   : > { %234 = vst [vmem:[%s210_s29] sm:$0xf] (%p51_p4), %v233_v0  ;;  %236 = vst [vmem:[%s210_s29 + $0x4] sm:$0xf] (%p51_p4), %v235_v1 }
  0x21 PF: > { %263 = sbr.rel (!%p2264_p8) target bundleno = 40 (0x28), region = 73  ;;  %s265_s30 = sand.u32 (%p2264_p8), 1, %s2131_s19  }
  0x22   : > { %s1625_s6 = sshll.u32 (%p2264_p8), %s2155_s25, 2  ;;  %s1624_s7 = sshll.u32 (%p2264_p8), %s265_s30, 3 }
  0x23   : > { %s269_s8 = sadd.s32 (%p2264_p8), %s2151_s24, %s1625_s6  ;;  %s267_s13 = scalar_lea.vmem (%p2264_p8), [#allocation6], %s1624_s7 }
  0x24   : > { %s1626_s12 = sshll.u32 (%p2264_p8), %s269_s8, 2 }
  0x25   : > { %s271_s14 = scalar_lea.vmem (%p2264_p8), %s2734_s1, %s1626_s12 }
  0x26   : > { %v287_v2 = vld [vmem:[%s271_s14] sm:$0xf] (%p2264_p8)  ;;  %v289_v3 = vld [vmem:[%s271_s14 + $0x8] sm:$0xf] (%p2264_p8) }
  0x27   : > { %288 = vst [vmem:[%s267_s13] sm:$0xf] (%p2264_p8), %v287_v2  ;;  %290 = vst [vmem:[%s267_s13 + $0x4] sm:$0xf] (%p2264_p8), %v289_v3 }
  0x28 PF: > { %p1627_p10 = scmp.ge.s32.totalorder %s2159_s26, 1  ;;  %p316_p11 = scmp.lt.s32.totalorder %s2159_s26, 5 }
  0x2a   : > { %p317_p12 = pnand %p1627_p10, %p316_p11 }
  0x2b   : > { %s323_s11 = sand.u32 (!%p317_p12), 1, %s2135_s20   ;;  %p381_p13 = scmp.eq.s32.totalorder (!%p317_p12), %s2143_s22, 0  ;;  %vm395_vm1 = vcmask (!%p317_p12), 15360   ;;  %vm407_vm2 = vcmask (!%p317_p12), 1047568   ;;  %v1894_v15 = vld [vmem:[%s2735_s2] sm:$0xff] (!%p317_p12)   ;;  %vm472_vm3 = vcmask (!%p317_p12), 392192  }
  0x2c   : > { %320 = sbr.rel (%p317_p12) target bundleno = 818 (0x332), region = 114  ;;  %s1628_s28 = sshll.u32 (!%p317_p12), %s323_s11, 3  ;;  %1803 = vmatprep.mubr.msk.bf16.mxu0 (!%p317_p12), %vm472_vm3, %v1894_v15  ;;  %v439_v16 = vld [vmem:[%s2736_s3 + $0x8] sm:$0xff] (!%p317_p12)  ;;  %v2164_v17 = vmov (!%p317_p12), 0   ;;  %v1896_v18 = vld [vmem:[%s2737_s4 + $0x4] ss:$16 sps:$4 sm:$0xff] (!%p317_p12)  }
  0x2d   : > { %s330_s16 = sand.u32 (!%p317_p12), 1, %s2127_s18   ;;  %s325_s17 = scalar_lea.vmem (!%p317_p12), [#allocation5], %s1628_s28  ;;  %1891 = vset.pattern.permute.xlu0 (!%p317_p12), %v2164_v17  ;;  %1892 = vset.pattern.permute.xlu1 (!%p317_p12), %v2164_v17  ;;  %v1901_v19 = vld [vmem:[%s2737_s4] ss:$16 sps:$4 sm:$0xff] (!%p317_p12)   ;;  %v1902_v20 = vld [vmem:[%s2737_s4 + $0x24] ss:$16 sps:$4 sm:$0xff] (!%p317_p12)  }
  0x2e   : > { %v379_v4 = vld [vmem:[%s325_s17] sm:$0xf] (!%p317_p12)  ;;  %v380_v5 = vld [vmem:[%s325_s17 + $0x4] sm:$0xf] (!%p317_p12)  ;;  %s1629_s30 = sshll.u32 (!%p317_p12), %s330_s16, 3  ;;  %s2161_s7 = smov (!%p317_p12), 2   ;;  %1320 = vmatprep.subr.bf16.mxu1 (!%p317_p12), %v1896_v18 }
  0x2f   : > { %s332_s6 = scalar_lea.vmem (!%p317_p12), [#allocation6], %s1629_s30  ;;  %s2162_s18 = smov (!%p317_p12), 126   ;;  %v440_v21 = vld [vmem:[%s2736_s3 + $0x10] sm:$0xff] (!%p317_p12)  ;;  %1321 = vmatpush1.bf16.msra.mxu1 (!%p317_p12), %v1901_v19  ;;  %v438_v23 = vld [vmem:[%s2736_s3] sm:$0xff] (!%p317_p12)  ;;  %v441_v26 = vld [vmem:[%s2736_s3 + $0x18] sm:$0xff] (!%p317_p12)  ;;  %vm418_vm4 = vcmask (!%p317_p12), 1031168  }
  0x30   : > { %v1893_v10 = vld [vmem:[%s332_s6] sm:$0xff] (!%p317_p12)   ;;  %s2163_s20 = smov (!%p317_p12), 127   ;;  %1322 = vmatprep.subr.bf16.mxu1 (!%p317_p12), %v1902_v20  ;;  %vm426_vm5 = vcmask (!%p317_p12), 1039360   ;;  %p369_p0 = scmp.lt.s32.totalorder (!%p317_p12), %s2147_s23, 1 }
  0x31   : > { %v1907_v22 = vld [vmem:[%s2737_s4 + $0x20] ss:$16 sps:$4 sm:$0xff] (!%p317_p12)   ;;  %v1908_v24 = vld [vmem:[%s2737_s4 + $0x44] ss:$16 sps:$4 sm:$0xff] (!%p317_p12)   ;;  %v1900_v56 = vld [vmem:[%s2737_s4 + $0xc] ss:$16 sps:$4 sm:$0xff] (!%p317_p12)  }
  0x32   : > { %v1913_v25 = vld [vmem:[%s2737_s4 + $0x40] ss:$16 sps:$4 sm:$0xff] (!%p317_p12)   ;;  %v1914_v27 = vld [vmem:[%s2737_s4 + $0x64] ss:$16 sps:$4 sm:$0xff] (!%p317_p12)   ;;  %v1895_v57 = vld [vmem:[%s2735_s2 + $0x8] sm:$0xff] (!%p317_p12)  }
  0x33   : > { %s382_s29 = scalar_select %p381_p13, 1, 0  ;;  %1323 = vmatpush1.bf16.msra.mxu1 %v1907_v22  ;;  %v1919_v28 = vld [vmem:[%s2737_s4 + $0x60] ss:$16 sps:$4 sm:$0xff]   ;;  %v1920_v29 = vld [vmem:[%s2737_s4 + $0x84] ss:$16 sps:$4 sm:$0xff]  }
  0x34   : > { %1324 = vmatprep.subr.bf16.mxu1 %v1908_v24  ;;  %v1925_v30 = vld [vmem:[%s2737_s4 + $0x80] ss:$16 sps:$4 sm:$0xff]   ;;  %v1926_v31 = vld [vmem:[%s2737_s4 + $0xa4] ss:$16 sps:$4 sm:$0xff]   ;;  %v1898_v58 = vld [vmem:[%s2737_s4 + $0x8] ss:$16 sps:$4 sm:$0xff]  }
  0x35   : > { %v383_v6 = vstv %s382_s29  ;;  %v1931_v32 = vld [vmem:[%s2737_s4 + $0xa0] ss:$16 sps:$4 sm:$0xff]   ;;  %v1932_v33 = vld [vmem:[%s2737_s4 + $0xc4] ss:$16 sps:$4 sm:$0xff]   ;;  %v1906_v59 = vld [vmem:[%s2737_s4 + $0x2c] ss:$16 sps:$4 sm:$0xff]  }
  0x36   : > { %vm384_vm0 = vcmp.eq.s32.totalorder %v383_v6, 1  ;;  %v1937_v34 = vld [vmem:[%s2737_s4 + $0xc0] ss:$16 sps:$4 sm:$0xff]   ;;  %v1938_v35 = vld [vmem:[%s2737_s4 + $0xe4] ss:$16 sps:$4 sm:$0xff]   ;;  %s2758_s23 = smov (!%p369_p0, %s2147_s23), 1 }
  0x37   : > { %v385_v7 = vsel %vm384_vm0, 0, %v379_v4  ;;  %v386_v8 = vsel %vm384_vm0, 0, %v380_v5  ;;  %1325 = vmatpush1.bf16.msra.mxu1 %v1913_v25  ;;  %v1943_v36 = vld [vmem:[%s2737_s4 + $0xe0] ss:$16 sps:$4 sm:$0xff]   ;;  %v1944_v37 = vld [vmem:[%s2737_s4 + $0x104] ss:$16 sps:$4 sm:$0xff]  }
  0x38   : > { %v1633_v9 = vcombine.low %v385_v7, %v386_v8  ;;  %1326 = vmatprep.subr.bf16.mxu1 %v1914_v27  ;;  %v1949_v38 = vld [vmem:[%s2737_s4 + $0x100] ss:$16 sps:$4 sm:$0xff]   ;;  %v1950_v39 = vld [vmem:[%s2737_s4 + $0x124] ss:$16 sps:$4 sm:$0xff]   ;;  %v1904_v60 = vld [vmem:[%s2737_s4 + $0x28] ss:$16 sps:$4 sm:$0xff]  }
  0x39   : > { %v1955_v40 = vld [vmem:[%s2737_s4 + $0x120] ss:$16 sps:$4 sm:$0xff]   ;;  %v1956_v41 = vld [vmem:[%s2737_s4 + $0x144] ss:$16 sps:$4 sm:$0xff]   ;;  %v1912_v61 = vld [vmem:[%s2737_s4 + $0x4c] ss:$16 sps:$4 sm:$0xff]  }
  0x3a   : > { %392 = vrot.lane.b32.xlu0 %v1633_v9, %s2161_s7  ;;  %v1961_v42 = vld [vmem:[%s2737_s4 + $0x140] ss:$16 sps:$4 sm:$0xff]   ;;  %v1962_v43 = vld [vmem:[%s2737_s4 + $0x164] ss:$16 sps:$4 sm:$0xff]   ;;  %v1910_v62 = vld [vmem:[%s2737_s4 + $0x48] ss:$16 sps:$4 sm:$0xff]  }
  0x3b   : > { %1327 = vmatpush1.bf16.msra.mxu1 %v1919_v28  ;;  %v1967_v44 = vld [vmem:[%s2737_s4 + $0x160] ss:$16 sps:$4 sm:$0xff]   ;;  %v1968_v45 = vld [vmem:[%s2737_s4 + $0x184] ss:$16 sps:$4 sm:$0xff]   ;;  %v1918_v63 = vld [vmem:[%s2737_s4 + $0x6c] ss:$16 sps:$4 sm:$0xff]  }
  0x3c   : > { %1328 = vmatprep.subr.bf16.mxu1 %v1920_v29  ;;  %v1973_v46 = vld [vmem:[%s2737_s4 + $0x180] ss:$16 sps:$4 sm:$0xff]   ;;  %v1974_v47 = vld [vmem:[%s2737_s4 + $0x1a4] ss:$16 sps:$4 sm:$0xff]   ;;  %v1916_v0 = vld [vmem:[%s2737_s4 + $0x68] ss:$16 sps:$4 sm:$0xff]  }
  0x3d   : > { %v1979_v48 = vld [vmem:[%s2737_s4 + $0x1a0] ss:$16 sps:$4 sm:$0xff]   ;;  %v1980_v49 = vld [vmem:[%s2737_s4 + $0x1c4] ss:$16 sps:$4 sm:$0xff]   ;;  %v1924_v1 = vld [vmem:[%s2737_s4 + $0x8c] ss:$16 sps:$4 sm:$0xff]  }
  0x3e   : > { %404 = vrot.lane.b32.xlu0 %v1893_v10, %s2161_s7  ;;  %v1922_v2 = vld [vmem:[%s2737_s4 + $0x88] ss:$16 sps:$4 sm:$0xff]   ;;  %v1930_v3 = vld [vmem:[%s2737_s4 + $0xac] ss:$16 sps:$4 sm:$0xff]   ;;  %v1986_v24 = vld [vmem:[%s2737_s4 + $0x1e4] ss:$16 sps:$4 sm:$0xff]  }
  0x3f   : > { %1329 = vmatpush1.bf16.msra.mxu1 %v1925_v30  ;;  %v1928_v4 = vld [vmem:[%s2737_s4 + $0xa8] ss:$16 sps:$4 sm:$0xff]   ;;  %v1936_v5 = vld [vmem:[%s2737_s4 + $0xcc] ss:$16 sps:$4 sm:$0xff]   ;;  %v1991_v27 = vld [vmem:[%s2737_s4 + $0x1e0] ss:$16 sps:$4 sm:$0xff]  }
  0x40   : > { %1330 = vmatprep.subr.bf16.mxu1 %v1926_v31  ;;  %v1934_v6 = vld [vmem:[%s2737_s4 + $0xc8] ss:$16 sps:$4 sm:$0xff]   ;;  %v1942_v7 = vld [vmem:[%s2737_s4 + $0xec] ss:$16 sps:$4 sm:$0xff]   ;;  %v1994_v28 = vld [vmem:[%s2737_s4 + $0x204] ss:$16 sps:$4 sm:$0xff]  }
  0x41   : > { %v1940_v8 = vld [vmem:[%s2737_s4 + $0xe8] ss:$16 sps:$4 sm:$0xff]   ;;  %v1948_v9 = vld [vmem:[%s2737_s4 + $0x10c] ss:$16 sps:$4 sm:$0xff]   ;;  %s1631_s8 = sshll.u32 %s2758_s23, 3 }
  0x42   : > { %v1946_v10 = vld [vmem:[%s2737_s4 + $0x108] ss:$16 sps:$4 sm:$0xff]   ;;  %v1966_v15 = vld [vmem:[%s2737_s4 + $0x16c] ss:$16 sps:$4 sm:$0xff]  }
  0x43   : > { %1331 = vmatpush1.bf16.msra.mxu1 %v1931_v32  ;;  %v1972_v17 = vld [vmem:[%s2737_s4 + $0x18c] ss:$16 sps:$4 sm:$0xff]   ;;  %v1970_v18 = vld [vmem:[%s2737_s4 + $0x188] ss:$16 sps:$4 sm:$0xff]  }
  0x44   : > { %1332 = vmatprep.subr.bf16.mxu1 %v1932_v33  ;;  %v1978_v19 = vld [vmem:[%s2737_s4 + $0x1ac] ss:$16 sps:$4 sm:$0xff]   ;;  %v1976_v20 = vld [vmem:[%s2737_s4 + $0x1a8] ss:$16 sps:$4 sm:$0xff]  }
  0x45   : > { %v1982_v22 = vld [vmem:[%s2737_s4 + $0x1c8] ss:$16 sps:$4 sm:$0xff]   ;;  %v1990_v25 = vld [vmem:[%s2737_s4 + $0x1ec] ss:$16 sps:$4 sm:$0xff]  }
  0x46   : > { %v1997_v29 = vld [vmem:[%s2737_s4 + $0x20c] ss:$16 sps:$4 sm:$0xff]  }
  0x47   : > { %1333 = vmatpush1.bf16.msra.mxu1 %v1937_v34 }
  0x48   : > { %1334 = vmatprep.subr.bf16.mxu1 %v1938_v35 }
  0x4b   : > { %1335 = vmatpush1.bf16.msra.mxu1 %v1943_v36 }
  0x4c   : > { %1336 = vmatprep.subr.bf16.mxu1 %v1944_v37 }
  0x4f   : > { %1337 = vmatpush1.bf16.msra.mxu1 %v1949_v38 }
  0x50   : > { %1338 = vmatprep.subr.bf16.mxu1 %v1950_v39 }
  0x53   : > { %1339 = vmatpush1.bf16.msra.mxu1 %v1955_v40 }
  0x54   : > { %1340 = vmatprep.subr.bf16.mxu1 %v1956_v41  ;;  %v1992_v41 = vld [vmem:[%s2737_s4 + $0x200] ss:$16 sps:$4 sm:$0xff]  }
  0x57   : > { %1341 = vmatpush1.bf16.msra.mxu1 %v1961_v42  ;;  %v1995_v42 = vld [vmem:[%s2737_s4 + $0x208] ss:$16 sps:$4 sm:$0xff]  }
  0x58   : > { %1342 = vmatprep.subr.bf16.mxu1 %v1962_v43 }
  0x5b   : > { %1343 = vmatpush1.bf16.msra.mxu1 %v1967_v44  ;;  %v2000_v44 = vld [vmem:[%s2737_s4 + $0x224] ss:$16 sps:$4 sm:$0xff]  }
  0x5c   : > { %1344 = vmatprep.subr.bf16.mxu1 %v1968_v45  ;;  %v2003_v45 = vld [vmem:[%s2737_s4 + $0x22c] ss:$16 sps:$4 sm:$0xff]  }
  0x5f   : > { %1345 = vmatpush1.bf16.msra.mxu1 %v1973_v46 }
  0x60   : > { %1346 = vmatprep.subr.bf16.mxu1 %v1974_v47  ;;  %v1998_v47 = vld [vmem:[%s2737_s4 + $0x220] ss:$16 sps:$4 sm:$0xff]  }
  0x63   : > { %1347 = vmatpush1.bf16.msra.mxu1 %v1979_v48  ;;  %v2001_v48 = vld [vmem:[%s2737_s4 + $0x228] ss:$16 sps:$4 sm:$0xff]  }
  0x64   : > { %1348 = vmatprep.subr.bf16.mxu1 %v1980_v49  ;;  %v2006_v49 = vld [vmem:[%s2737_s4 + $0x244] ss:$16 sps:$4 sm:$0xff]  }
  0xac   : > { %v393_v11 = vpop.permute.xlu0 %392 }
  0xad   : > { %396 = vst.msk [vmem:[#allocation2] sm:$0xff] %vm395_vm1, %v393_v11  ;;  %v1954_v11 = vld [vmem:[%s2737_s4 + $0x12c] ss:$16 sps:$4 sm:$0xff]  }
  0xb0   : > { %v405_v12 = vpop.permute.xlu0 %404 }
  0xb1   : > { %408 = vst.msk [vmem:[#allocation2] sm:$0xff] %vm407_vm2, %v405_v12 }
  0xb2   : > { %409 = vst.msk [vmem:[#allocation2 + $0x8] sm:$0xff] %vm395_vm1, %v405_v12  ;;  %v1952_v12 = vld [vmem:[%s2737_s4 + $0x128] ss:$16 sps:$4 sm:$0xff]  }
  0xb8   : > { %v2287_v14 = vld [vmem:[#allocation2] sm:$0xff] }
  0xb9   : > { %v411_v13 = vld [vmem:[#allocation2 + $0x8] sm:$0xff]  ;;  %422 = vrot.lane.b32.xlu0 %v2287_v14, %s2163_s20 }
  0xba   : > { %416 = vrot.lane.b32.xlu1 %v411_v13, %s2162_s18 }
  0xbd   : > { %449 = vperm.xlu0 %1891, %v439_v16   ;;  %v1964_v16 = vld [vmem:[%s2737_s4 + $0x168] ss:$16 sps:$4 sm:$0xff]  }
  0xbe   : > { %414 = vrot.lane.b32.xlu1 %v2287_v14, %s2162_s18  ;;  %s1630_s18 = sshll.u32 %s2143_s22, 2 }
  0xbf   : > { %p371_p1 = scmp.lt.s32.totalorder %s1630_s18, 7 }
  0xc1   : > { %454 = vperm.xlu0 %1891, %v440_v21   ;;  %v1984_v21 = vld [vmem:[%s2737_s4 + $0x1cc] ss:$16 sps:$4 sm:$0xff]   ;;  %s2760_s18 = smov (!%p371_p1, %s1630_s18), 7 }
  0xc2   : > { %424 = vrot.lane.b32.xlu1 %v411_v13, %s2163_s20  ;;  %v1960_v13 = vld [vmem:[%s2737_s4 + $0x14c] ss:$16 sps:$4 sm:$0xff]   ;;  %s374_s12 = sadd.s32 %s1631_s8, %s2760_s18 }
  0xc3   : > { %s1632_s15 = sshll.u32 %s374_s12, 2 }
  0xc4   : > { %s376_s11 = scalar_lea.vmem %s2738_s5, %s1632_s15 }
  0xc6   : > { %444 = vperm.xlu1 %1892, %v438_v23   ;;  %v1985_v23 = vld [vmem:[%s2737_s4 + $0x1c0] ss:$16 sps:$4 sm:$0xff]  }
  0xc7   : > { %1349 = vmatpush1.bf16.msra.mxu1 %v1985_v23  ;;  %v2058_v23 = vld [vmem:[%s2737_s4 + $0x360] ss:$16 sps:$4 sm:$0xff]  }
  0xc8   : > { %1350 = vmatprep.subr.bf16.mxu1 %v1986_v24  ;;  %v2061_v24 = vld [vmem:[%s2737_s4 + $0x368] ss:$16 sps:$4 sm:$0xff]  }
  0xca   : > { %459 = vperm.xlu1 %1892, %v441_v26   ;;  %v1988_v26 = vld [vmem:[%s2737_s4 + $0x1e8] ss:$16 sps:$4 sm:$0xff]  }
  0xcb   : > { %1351 = vmatpush1.bf16.msra.mxu1 %v1991_v27  ;;  %v2064_v27 = vld [vmem:[%s2737_s4 + $0x380] ss:$16 sps:$4 sm:$0xff]  }
  0xcc   : > { %1361 = vmatprep.subr.bf16.mxu1 %v1994_v28  ;;  %v2067_v28 = vld [vmem:[%s2737_s4 + $0x388] ss:$16 sps:$4 sm:$0xff]  }
 0x12b   : > { %v423_v53 = vpop.permute.xlu0 %422 }
 0x12c   : > { %v417_v50 = vpop.permute.xlu1 %416 }
 0x130   : > { %v415_v51 = vpop.permute.xlu1 %414 }
 0x131   : > { %v419_v52 = vsel %vm418_vm4, %v415_v51, %v417_v50  ;;  %v2009_v50 = vld [vmem:[%s2737_s4 + $0x24c] ss:$16 sps:$4 sm:$0xff]   ;;  %v2004_v51 = vld [vmem:[%s2737_s4 + $0x240] ss:$16 sps:$4 sm:$0xff]  }
 0x132   : > { %1797 = vmatprep.subr.bf16.mxu0 %v419_v52 }
 0x133   : > { %1798 = vmatpush3.bf16.msra.mxu0 %v419_v52  ;;  %v2007_v52 = vld [vmem:[%s2737_s4 + $0x248] ss:$16 sps:$4 sm:$0xff]  }
 0x134   : > { %v425_v54 = vpop.permute.xlu1 %424 }
 0x135   : > { %v427_v55 = vsel %vm426_vm5, %v423_v53, %v425_v54  ;;  %v2012_v53 = vld [vmem:[%s2737_s4 + $0x264] ss:$16 sps:$4 sm:$0xff]   ;;  %v2015_v54 = vld [vmem:[%s2737_s4 + $0x26c] ss:$16 sps:$4 sm:$0xff]  }
 0x136   : > { %1799 = vmatprep.subr.bf16.mxu0 %v427_v55 }
 0x137   : > { %1800 = vmatpush3.bf16.msra.mxu0 %v427_v55  ;;  %v2010_v55 = vld [vmem:[%s2737_s4 + $0x260] ss:$16 sps:$4 sm:$0xff]  }
 0x138   : > { %1801 = vmatprep.subr.bf16.mxu0 %v2287_v14 }
 0x13b   : > { %1802 = vmatpush3.bf16.msra.mxu0 %v2287_v14  ;;  %v1958_v14 = vld [vmem:[%s2737_s4 + $0x148] ss:$16 sps:$4 sm:$0xff]  }
 0x13c   : > { %1402 = vmatprep.subr.bf16.mxu0 %v1900_v56  ;;  %v450_v35 = vpop.permute.xlu0 %449  ;;  %v2013_v56 = vld [vmem:[%s2737_s4 + $0x268] ss:$16 sps:$4 sm:$0xff]  }
 0x13e   : > { %1804 = vmatmul.mubr.msk.bf16.vlgmr.msra.gmra.mrb[0].mxu0 %vm472_vm3, %v1895_v57  ;;  %v2018_v57 = vld [vmem:[%s2737_s4 + $0x284] ss:$16 sps:$4 sm:$0xff]  }
 0x13f   : > { %1403 = vmatpush1.bf16.msra.mxu0 %v1898_v58  ;;  %v2021_v58 = vld [vmem:[%s2737_s4 + $0x28c] ss:$16 sps:$4 sm:$0xff]  }
 0x140   : > { %1404 = vmatprep.subr.bf16.mxu0 %v1906_v59  ;;  %v2016_v59 = vld [vmem:[%s2737_s4 + $0x280] ss:$16 sps:$4 sm:$0xff]  }
 0x143   : > { %1405 = vmatpush1.bf16.msra.mxu0 %v1904_v60  ;;  %v2019_v60 = vld [vmem:[%s2737_s4 + $0x288] ss:$16 sps:$4 sm:$0xff]  }
 0x144   : > { %1406 = vmatprep.subr.bf16.mxu0 %v1912_v61  ;;  %v2024_v61 = vld [vmem:[%s2737_s4 + $0x2a4] ss:$16 sps:$4 sm:$0xff]  }
 0x145   : > { %v445_v30 = vpop.permute.xlu1 %444 }
 0x147   : > { %1407 = vmatpush1.bf16.msra.mxu0 %v1910_v62  ;;  %v2027_v62 = vld [vmem:[%s2737_s4 + $0x2ac] ss:$16 sps:$4 sm:$0xff]  }
 0x148   : > { %1408 = vmatprep.subr.bf16.mxu0 %v1918_v63  ;;  %v2022_v63 = vld [vmem:[%s2737_s4 + $0x2a0] ss:$16 sps:$4 sm:$0xff]  }
 0x149   : > { %v460_v34 = vpop.permute.xlu1 %459 }
 0x14b   : > { %1409 = vmatpush1.bf16.msra.mxu0 %v1916_v0  ;;  %v2025_v0 = vld [vmem:[%s2737_s4 + $0x2a8] ss:$16 sps:$4 sm:$0xff]  }
 0x14c   : > { %1410 = vmatprep.subr.bf16.mxu0 %v1924_v1  ;;  %v2030_v1 = vld [vmem:[%s2737_s4 + $0x2c4] ss:$16 sps:$4 sm:$0xff]  }
 0x14f   : > { %1411 = vmatpush1.bf16.msra.mxu0 %v1922_v2  ;;  %v2033_v2 = vld [vmem:[%s2737_s4 + $0x2cc] ss:$16 sps:$4 sm:$0xff]  }
 0x150   : > { %1412 = vmatprep.subr.bf16.mxu0 %v1930_v3  ;;  %v2028_v3 = vld [vmem:[%s2737_s4 + $0x2c0] ss:$16 sps:$4 sm:$0xff]  }
 0x153   : > { %1413 = vmatpush1.bf16.msra.mxu0 %v1928_v4  ;;  %v2031_v4 = vld [vmem:[%s2737_s4 + $0x2c8] ss:$16 sps:$4 sm:$0xff]  }
 0x154   : > { %1414 = vmatprep.subr.bf16.mxu0 %v1936_v5  ;;  %v2036_v5 = vld [vmem:[%s2737_s4 + $0x2e4] ss:$16 sps:$4 sm:$0xff]  }
 0x157   : > { %1415 = vmatpush1.bf16.msra.mxu0 %v1934_v6  ;;  %v2039_v6 = vld [vmem:[%s2737_s4 + $0x2ec] ss:$16 sps:$4 sm:$0xff]  }
 0x158   : > { %1416 = vmatprep.subr.bf16.mxu0 %v1942_v7  ;;  %v2034_v7 = vld [vmem:[%s2737_s4 + $0x2e0] ss:$16 sps:$4 sm:$0xff]  }
 0x15b   : > { %1417 = vmatpush1.bf16.msra.mxu0 %v1940_v8  ;;  %v2037_v8 = vld [vmem:[%s2737_s4 + $0x2e8] ss:$16 sps:$4 sm:$0xff]  }
 0x15c   : > { %1418 = vmatprep.subr.bf16.mxu0 %v1948_v9  ;;  %v2042_v9 = vld [vmem:[%s2737_s4 + $0x304] ss:$16 sps:$4 sm:$0xff]  }
 0x15f   : > { %1419 = vmatpush1.bf16.msra.mxu0 %v1946_v10  ;;  %v2045_v10 = vld [vmem:[%s2737_s4 + $0x30c] ss:$16 sps:$4 sm:$0xff]  }
 0x160   : > { %1420 = vmatprep.subr.bf16.mxu0 %v1954_v11  ;;  %v2040_v11 = vld [vmem:[%s2737_s4 + $0x300] ss:$16 sps:$4 sm:$0xff]  }
 0x163   : > { %1421 = vmatpush1.bf16.msra.mxu0 %v1952_v12  ;;  %v2043_v12 = vld [vmem:[%s2737_s4 + $0x308] ss:$16 sps:$4 sm:$0xff]  }
 0x164   : > { %1422 = vmatprep.subr.bf16.mxu0 %v1960_v13  ;;  %v2048_v13 = vld [vmem:[%s2737_s4 + $0x324] ss:$16 sps:$4 sm:$0xff]  }
 0x167   : > { %1423 = vmatpush1.bf16.msra.mxu0 %v1958_v14  ;;  %v2051_v14 = vld [vmem:[%s2737_s4 + $0x32c] ss:$16 sps:$4 sm:$0xff]  }
 0x168   : > { %1424 = vmatprep.subr.bf16.mxu0 %v1966_v15  ;;  %v2046_v15 = vld [vmem:[%s2737_s4 + $0x320] ss:$16 sps:$4 sm:$0xff]  }
 0x16b   : > { %1425 = vmatpush1.bf16.msra.mxu0 %v1964_v16  ;;  %v2049_v16 = vld [vmem:[%s2737_s4 + $0x328] ss:$16 sps:$4 sm:$0xff]  }
 0x16c   : > { %1426 = vmatprep.subr.bf16.mxu0 %v1972_v17  ;;  %v2054_v17 = vld [vmem:[%s2737_s4 + $0x344] ss:$16 sps:$4 sm:$0xff]  }
 0x16f   : > { %1427 = vmatpush1.bf16.msra.mxu0 %v1970_v18  ;;  %v2057_v18 = vld [vmem:[%s2737_s4 + $0x34c] ss:$16 sps:$4 sm:$0xff]  }
 0x170   : > { %1428 = vmatprep.subr.bf16.mxu0 %v1978_v19  ;;  %v2052_v19 = vld [vmem:[%s2737_s4 + $0x340] ss:$16 sps:$4 sm:$0xff]  }
 0x173   : > { %1429 = vmatpush1.bf16.msra.mxu0 %v1976_v20  ;;  %v2055_v20 = vld [vmem:[%s2737_s4 + $0x348] ss:$16 sps:$4 sm:$0xff]  }
 0x174   : > { %1430 = vmatprep.subr.bf16.mxu0 %v1984_v21  ;;  %v2060_v21 = vld [vmem:[%s2737_s4 + $0x364] ss:$16 sps:$4 sm:$0xff]  }
 0x177   : > { %1431 = vmatpush1.bf16.msra.mxu0 %v1982_v22  ;;  %v2063_v22 = vld [vmem:[%s2737_s4 + $0x36c] ss:$16 sps:$4 sm:$0xff]  }
 0x178   : > { %1432 = vmatprep.subr.bf16.mxu0 %v1990_v25  ;;  %v2066_v25 = vld [vmem:[%s2737_s4 + $0x384] ss:$16 sps:$4 sm:$0xff]  }
 0x17b   : > { %1433 = vmatpush1.bf16.msra.mxu0 %v1988_v26  ;;  %v2069_v26 = vld [vmem:[%s2737_s4 + $0x38c] ss:$16 sps:$4 sm:$0xff]  }
 0x17c   : > { %1443 = vmatprep.subr.bf16.mxu0 %v1997_v29  ;;  %v2072_v29 = vld [vmem:[%s2737_s4 + $0x3a4] ss:$16 sps:$4 sm:$0xff]  }
 0x211   : > { %v2511_v31 = vpop.f32.mrb[0].mxu0 }
 0x212   : > { %v513_v32 = vpop.f32.mrb[1].mxu0 }
 0x213   : > { %v1806_v33 = vpop.f32.mrb[2].mxu0  ;;  %v514_v36 = vadd.f32 %v513_v32, %v445_v30  ;;  %v2075_v30 = vld [vmem:[%s2737_s4 + $0x3ac] ss:$16 sps:$4 sm:$0xff]   ;;  %v2070_v32 = vld [vmem:[%s2737_s4 + $0x3a0] ss:$16 sps:$4 sm:$0xff]  }
 0x214   : > { %v516_v37 = vpop.f32.mrb[3].mxu0  ;;  %v525_v39 = vadd.f32 %v1806_v33, %v460_v34  ;;  %v2073_v33 = vld [vmem:[%s2737_s4 + $0x3a8] ss:$16 sps:$4 sm:$0xff]   ;;  %v2078_v34 = vld [vmem:[%s2737_s4 + $0x3c4] ss:$16 sps:$4 sm:$0xff]  }
 0x215   : > { %v517_v38 = vadd.f32 %v516_v37, %v450_v35  ;;  %v1788_v43 = vpack.c.bf16 %v514_v36, %v514_v36  ;;  %v2081_v35 = vld [vmem:[%s2737_s4 + $0x3cc] ss:$16 sps:$4 sm:$0xff]   ;;  %v2076_v36 = vld [vmem:[%s2737_s4 + $0x3c0] ss:$16 sps:$4 sm:$0xff]   ;;  %v2079_v37 = vld [vmem:[%s2737_s4 + $0x3c8] ss:$16 sps:$4 sm:$0xff]  }
 0x216   : > { %v1791_v46 = vpack.c.bf16 %v525_v39, %v525_v39  ;;  %v2087_v39 = vld [vmem:[%s2737_s4 + $0x3ec] ss:$16 sps:$4 sm:$0xff]  }
 0x217   : > { %v1789_v40 = vpack.c.bf16 %v517_v38, %v517_v38  ;;  %v2084_v38 = vld [vmem:[%s2737_s4 + $0x3e4] ss:$16 sps:$4 sm:$0xff]  }
 0x219   : > { %1352 = vmatprep.mubr.bf16.mxu1 %v1789_v40  ;;  %1434 = vmatprep.mubr.bf16.mxu0 %v1789_v40  ;;  %v455_v40 = vpop.permute.xlu0 %454 }
 0x21a   : > { %1353 = vmatmul.mubr.bf16.vlgmr.msra.gmra.mrb[0].mxu1 %v1788_v43  ;;  %1435 = vmatmul.mubr.bf16.vlgmr.msra.gmra.mrb[4].mxu0 %v1788_v43  ;;  %v522_v43 = vadd.f32 %v2511_v31, %v455_v40 }
 0x21b   : > { %1362 = vmatpush1.bf16.msra.mxu1 %v1992_v41  ;;  %1444 = vmatpush1.bf16.msra.mxu0 %v1995_v42  ;;  %v2082_v41 = vld [vmem:[%s2737_s4 + $0x3e0] ss:$16 sps:$4 sm:$0xff]   ;;  %v2085_v42 = vld [vmem:[%s2737_s4 + $0x3e8] ss:$16 sps:$4 sm:$0xff]  }
 0x21c   : > { %1393 = vmatprep.mubr.bf16.mxu1 %v1791_v46  ;;  %1475 = vmatprep.mubr.bf16.mxu0 %v1791_v46 }
 0x21d   : > { %1363 = vmatprep.subr.bf16.mxu1 %v2000_v44  ;;  %1445 = vmatprep.subr.bf16.mxu0 %v2003_v45  ;;  %v1790_v44 = vpack.c.bf16 %v522_v43, %v522_v43 }
 0x21f   : > { %1364 = vmatpush1.bf16.msra.mxu1 %v1998_v47  ;;  %1446 = vmatpush1.bf16.msra.mxu0 %v2001_v48 }
 0x220   : > { %1365 = vmatprep.subr.bf16.mxu1 %v2006_v49  ;;  %1447 = vmatprep.subr.bf16.mxu0 %v2009_v50 }
 0x223   : > { %1366 = vmatpush1.bf16.msra.mxu1 %v2004_v51  ;;  %1448 = vmatpush1.bf16.msra.mxu0 %v2007_v52 }
 0x224   : > { %1367 = vmatprep.subr.bf16.mxu1 %v2012_v53  ;;  %1449 = vmatprep.subr.bf16.mxu0 %v2015_v54 }
 0x227   : > { %1368 = vmatpush1.bf16.msra.mxu1 %v2010_v55  ;;  %1450 = vmatpush1.bf16.msra.mxu0 %v2013_v56 }
 0x228   : > { %1369 = vmatprep.subr.bf16.mxu1 %v2018_v57  ;;  %1451 = vmatprep.subr.bf16.mxu0 %v2021_v58 }
 0x22b   : > { %1370 = vmatpush1.bf16.msra.mxu1 %v2016_v59  ;;  %1452 = vmatpush1.bf16.msra.mxu0 %v2019_v60 }
 0x22c   : > { %1371 = vmatprep.subr.bf16.mxu1 %v2024_v61  ;;  %1453 = vmatprep.subr.bf16.mxu0 %v2027_v62 }
 0x22f   : > { %1372 = vmatpush1.bf16.msra.mxu1 %v2022_v63  ;;  %1454 = vmatpush1.bf16.msra.mxu0 %v2025_v0 }
 0x230   : > { %1373 = vmatprep.subr.bf16.mxu1 %v2030_v1  ;;  %1455 = vmatprep.subr.bf16.mxu0 %v2033_v2 }
 0x233   : > { %1374 = vmatpush1.bf16.msra.mxu1 %v2028_v3  ;;  %1456 = vmatpush1.bf16.msra.mxu0 %v2031_v4 }
 0x234   : > { %1375 = vmatprep.subr.bf16.mxu1 %v2036_v5  ;;  %1457 = vmatprep.subr.bf16.mxu0 %v2039_v6 }
 0x237   : > { %1376 = vmatpush1.bf16.msra.mxu1 %v2034_v7  ;;  %1458 = vmatpush1.bf16.msra.mxu0 %v2037_v8 }
 0x238   : > { %1377 = vmatprep.subr.bf16.mxu1 %v2042_v9  ;;  %1459 = vmatprep.subr.bf16.mxu0 %v2045_v10 }
 0x23b   : > { %1378 = vmatpush1.bf16.msra.mxu1 %v2040_v11  ;;  %1460 = vmatpush1.bf16.msra.mxu0 %v2043_v12 }
 0x23c   : > { %1379 = vmatprep.subr.bf16.mxu1 %v2048_v13  ;;  %1461 = vmatprep.subr.bf16.mxu0 %v2051_v14 }
 0x23f   : > { %1380 = vmatpush1.bf16.msra.mxu1 %v2046_v15  ;;  %1462 = vmatpush1.bf16.msra.mxu0 %v2049_v16 }
 0x240   : > { %1381 = vmatprep.subr.bf16.mxu1 %v2054_v17  ;;  %1463 = vmatprep.subr.bf16.mxu0 %v2057_v18 }
 0x243   : > { %1382 = vmatpush1.bf16.msra.mxu1 %v2052_v19  ;;  %1464 = vmatpush1.bf16.msra.mxu0 %v2055_v20 }
 0x244   : > { %1383 = vmatprep.subr.bf16.mxu1 %v2060_v21  ;;  %1465 = vmatprep.subr.bf16.mxu0 %v2063_v22 }
 0x247   : > { %1384 = vmatpush1.bf16.msra.mxu1 %v2058_v23  ;;  %1466 = vmatpush1.bf16.msra.mxu0 %v2061_v24 }
 0x248   : > { %1385 = vmatprep.subr.bf16.mxu1 %v2066_v25  ;;  %1467 = vmatprep.subr.bf16.mxu0 %v2069_v26 }
 0x24b   : > { %1386 = vmatpush1.bf16.msra.mxu1 %v2064_v27  ;;  %1468 = vmatpush1.bf16.msra.mxu0 %v2067_v28 }
 0x24c   : > { %1387 = vmatprep.subr.bf16.mxu1 %v2072_v29  ;;  %1469 = vmatprep.subr.bf16.mxu0 %v2075_v30 }
 0x24f   : > { %1388 = vmatpush1.bf16.msra.mxu1 %v2070_v32  ;;  %1470 = vmatpush1.bf16.msra.mxu0 %v2073_v33 }
 0x250   : > { %1389 = vmatprep.subr.bf16.mxu1 %v2078_v34  ;;  %1471 = vmatprep.subr.bf16.mxu0 %v2081_v35 }
 0x253   : > { %1390 = vmatpush1.bf16.msra.mxu1 %v2076_v36  ;;  %1472 = vmatpush1.bf16.msra.mxu0 %v2079_v37 }
 0x254   : > { %1391 = vmatprep.subr.bf16.mxu1 %v2084_v38  ;;  %1473 = vmatprep.subr.bf16.mxu0 %v2087_v39 }
 0x257   : > { %1392 = vmatpush1.bf16.msra.mxu1 %v2082_v41  ;;  %1474 = vmatpush1.bf16.msra.mxu0 %v2085_v42 }
 0x25a   : > { %1394 = vmatmul.mubr.bf16.vlgmr.msra.gmra.mrb[0].mxu1 %v1790_v44  ;;  %1476 = vmatmul.mubr.bf16.vlgmr.msra.gmra.mrb[4].mxu0 %v1790_v44 }
 0x32d   : > { %v1395_v45 = vpop.f32.mrb[0].mxu1  ;;  %v1477_v46 = vpop.f32.mrb[4].mxu0 }
 0x32e   : > { %v1397_v31 = vpop.f32.mrb[1].mxu1  ;;  %v1479_v47 = vpop.f32.mrb[5].mxu0 }
 0x32f   : > { %v1775_v48 = vpack.c.bf16 %v1397_v31, %v1395_v45  ;;  %v1776_v49 = vpack.c.bf16 %v1479_v47, %v1477_v46  ;;  %v1399_v50 = vpop.f32.mrb[2].mxu1  ;;  %v1481_v51 = vpop.f32.mrb[6].mxu0 }
 0x330   : > { %v1400_v52 = vpop.f32.mrb[3].mxu1  ;;  %v1482_v53 = vpop.f32.mrb[7].mxu0 }
 0x331   : > { %1500 = vst [vmem:[%s376_s11] sm:$0xff] %v1775_v48  ;;  %1501 = vst [vmem:[%s376_s11 + $0x8] sm:$0xff] %v1776_v49 }
 0x332 PF: > { %s15_s26 = sadd.s32 1, %s2159_s26   ;;  %s2742_s28 = sld [smem:[#allocation7_spill]] }
 0x333   : > { %p12_p2 = scmp.ge.s32.totalorder %s15_s26, 6   ;;  %s2743_s18 = smov %s2131_s19 }
 0x334   : > { %s2744_s19 = smov %s2260_s10  ;;  %s2745_s20 = smov %s2139_s21 }
 0x335   : > { %s2746_s21 = smov %s2257_s9  ;;  %s2747_s22 = smov %s2151_s24 }
 0x336   : > { %s2748_s23 = smov %s2155_s25  ;;  %s2749_s24 = smov %s2752_s27 }
 0x337   :  { %14 = sbr.rel (!%p12_p2) target bundleno = 5 (0x5), region = 165 }
 0x338   : > { %s2750_s25 = smov %s2742_s28 }

// kernel: _lambda_.7
= control target key start
LH: loop header
LB: loop body
LE: loop exit
PB: predicated region body
PF: predicated region fallthrough
CT: control target
= control target key end

     0   :  { %s2624_s21 = smov 0   ;;  %s2626_s0 = smov 0   ;;  %s3143_s0 = inlined_call_operand.vmem [shape: bf16[2,16,256], index: 0, kind: input, shape index: {}, may-alias: {0,1}]   ;;  %s3144_s1 = inlined_call_operand.vmem [shape: bf16[2,16,256], index: 1, kind: input, shape index: {}, may-alias: {0,1}]   ;;  %s3145_s2 = inlined_call_operand.vmem [shape: bf16[4,16,48], index: 2, kind: input, shape index: {}]   ;;  %s3146_s3 = inlined_call_operand.vmem [shape: f32[4,16,1], index: 3, kind: input, shape index: {}]   ;;  %s3147_s4 = inlined_call_operand.vmem [shape: bf16[4,16,80], index: 4, kind: input, shape index: {}]   ;;  %s3148_s5 = inlined_call_operand.vmem [shape: f32[4,16,1], index: 5, kind: input, shape index: {}]   ;;  %s3149_s6 = inlined_call_operand.vmem [shape: bf16[2,16,256], index: 6, kind: output, shape index: {}]  }
   0x1   :  { %s2628_s22 = smov 0  }
   0x2 LB: > { %s28_s23 = sadd.s32 1, %s2564_s0  ;;  %p2262_p1 = scmp.ge.s32.totalorder %s2568_s22, 2  ;;  %s2568_s22 = sphi %s2628_s22, %s16_s22   ;;  %s2564_s0 = sphi %s2626_s0, %s3154_s0   ;;  %s2560_s21 = sphi %s2624_s21, %s3153_s21  }
   0x3   : > { %p30_p0 = scmp.ge.s32.totalorder %s28_s23, 2  ;;  %p2266_p2 = scmp.ge.s32.totalorder %s2568_s22, 1 }
   0x4   : > { %p303_p3 = scmp.lt.s32.totalorder %s2568_s22, 3 }
   0x5   : > { %s3156_s23 = smov (%p30_p0, %s28_s23), 0 }
   0x6   : > { %p304_p4 = pnand %p2266_p2, %p303_p3 }
   0x7   : > { %p357_p5 = scmp.lt.s32.totalorder (!%p304_p4), %s2560_s21, 1  ;;  %v2570_v0 = vmov (!%p304_p4), 0.0   ;;  %s2571_s24 = smov (!%p304_p4), 24   ;;  %vm3150_vm0 = vcmask (!%p304_p4), 195584   ;;  %vm424_vm1 = vcmask (!%p304_p4), 1047744   ;;  %vm464_vm8 = vcmask (!%p304_p4), 179200  }
   0x8   : > { %307 = sbr.rel (%p304_p4) target bundleno = 3184 (0xc70), region = 81  ;;  %2518 = vrot.lane.b32.xlu1 (!%p304_p4), %v2570_v0, %s2571_s24  ;;  %v2572_v39 = vmov (!%p304_p4), 0   ;;  %s2573_s29 = smov (!%p304_p4), 127   ;;  %v457_v40 = vld [vmem:[%s3146_s3] sm:$0xff] (!%p304_p4)  ;;  %v458_v41 = vld [vmem:[%s3146_s3 + $0x8] sm:$0xff] (!%p304_p4)  ;;  %vm475_vm9 = vcmask (!%p304_p4), 1039360   ;;  %v611_v56 = vlaneseq (!%p304_p4) }
   0x9   : > { %559 = vmatprep.mubr.bf16.mxu1 (!%p304_p4), %v2572_v39  ;;  %2522 = vset.pattern.permute.xlu1 (!%p304_p4), %v2572_v39  ;;  %s2574_s30 = smov (!%p304_p4), 126   ;;  %vm490_vm10 = vcmask (!%p304_p4), 1031168   ;;  %v2524_v52 = vld [vmem:[%s3145_s2] sm:$0xff] (!%p304_p4)   ;;  %vm523_vm11 = vcmask (!%p304_p4), 392192   ;;  %vm2575_vm12 = vmmov (!%p304_p4), 0   ;;  %s2576_s19 = smov (!%p304_p4), 4  }
   0xa   : > { %2523 = vset.pattern.permute.xlu0 (!%p304_p4), %v2572_v39  ;;  %748 = vmatprep.mubr.bf16.mxu0 (!%p304_p4), %v2572_v39  ;;  %v2764_v57 = vand.u32 (!%p304_p4), 127, %v611_v56  ;;  %s2577_s20 = smov (!%p304_p4), 121   ;;  %s2578_s26 = smov (!%p304_p4), 124  }
   0xb   : > { %s2579_s27 = smov (!%p304_p4), 118   ;;  %s2580_s12 = smov (!%p304_p4), 125  }
   0xc   : > { %vm615_vm13 = vcmp.lt.s32.totalorder (!%p304_p4), %v2764_v57, 22  ;;  %s2581_s11 = smov (!%p304_p4), 8   ;;  %s2582_s13 = smov (!%p304_p4), 117  }
   0xd   : > { %s2583_s14 = smov (!%p304_p4), 120   ;;  %s2584_s15 = smov (!%p304_p4), 111  }
   0xe   : > { %s2585_s16 = smov (!%p304_p4), 114   ;;  %s2586_s17 = smov (!%p304_p4), 108  }
   0xf   : > { %s3158_s21 = smov (!%p357_p5, %s2560_s21), 1 }
  0x10   : > { %s2326_s25 = sshll.u32 %s3158_s21, 4 }
  0x11   : > { %s364_s28 = scalar_lea.vmem %s3144_s1, %s2326_s25  ;;  %s374_s18 = scalar_lea.vmem %s3149_s6, %s2326_s25 }
  0x12   : > { %v398_v1 = vld [vmem:[%s364_s28] sm:$0xff]  ;;  %v399_v2 = vld [vmem:[%s364_s28 + $0x8] sm:$0xff] }
  0x13   : > { %v400_v3 = vunpack.c.l.bf16 %v398_v1  ;;  %v401_v4 = vunpack.c.h.bf16 %v398_v1  ;;  %v402_v5 = vunpack.c.l.bf16 %v399_v2  ;;  %v403_v6 = vunpack.c.h.bf16 %v399_v2 }
  0x15   : > { %v2507_v7 = vpack.i.bf16 %v401_v4, %v400_v3  ;;  %v2512_v8 = vpack.i.bf16 %v403_v6, %v402_v5 }
  0x17   : > { %2508 = vrot.lane.b32.xlu0 %v2507_v7, %s2571_s24 }
  0x1b   : > { %2513 = vrot.lane.b32.xlu0 %v2512_v8, %s2571_s24 }
  0x7a   : > { %v2519_v9 = vpop.permute.xlu1 %2518 }
  0x7b   : > { %v2521_v10 = vunpack.i.h.bf16 %v2519_v9  ;;  %v2520_v11 = vunpack.i.l.bf16 %v2519_v9 }
  0x7d   : > { %397 = vst.msk [vmem:[#allocation2 + $0x18] sm:$0xff] %vm3150_vm0, %v2521_v10  ;;  %396 = vst.msk [vmem:[#allocation2] sm:$0xff] %vm3150_vm0, %v2520_v11 }
  0x89   : > { %v2509_v12 = vpop.permute.xlu0 %2508 }
  0x8a   : > { %v2511_v13 = vunpack.i.h.bf16 %v2509_v12  ;;  %v2510_v14 = vunpack.i.l.bf16 %v2509_v12 }
  0x8c   : > { %427 = vst.msk [vmem:[#allocation2 + $0x10] sm:$0xff] %vm3150_vm0, %v2511_v13  ;;  %v2659_v15 = vsel %vm3150_vm0, %v2510_v14, %v2511_v13 }
  0x8d   : > { %425 = vst.msk [vmem:[#allocation2] sm:$0xff] %vm424_vm1, %v2510_v14  ;;  %426 = vst [vmem:[#allocation2 + $0x8] sm:$0xff] %v2659_v15  ;;  %v2514_v16 = vpop.permute.xlu0 %2513  ;;  %v444_v20 = vmul.f32 0.1, %v2659_v15  ;;  %vm438_vm2 = vcmp.ge.f32.partialorder %v2659_v15, 0.0 }
  0x8e   : > { %v2516_v17 = vunpack.i.h.bf16 %v2514_v16  ;;  %v2515_v18 = vunpack.i.l.bf16 %v2514_v16 }
  0x8f   : > { %v450_v25 = vsel %vm438_vm2, %v2659_v15, %v444_v20 }
  0x90   : > { %430 = vst.msk [vmem:[#allocation2 + $0x28] sm:$0xff] %vm3150_vm0, %v2516_v17  ;;  %v2664_v19 = vsel %vm3150_vm0, %v2515_v18, %v2516_v17  ;;  %vm1075_vm0 = vcmask 97280  }
  0x91   : > { %428 = vst.msk [vmem:[#allocation2 + $0x18] sm:$0xff] %vm424_vm1, %v2515_v18  ;;  %429 = vst [vmem:[#allocation2 + $0x20] sm:$0xff] %v2664_v19  ;;  %vm441_vm3 = vcmp.ge.f32.partialorder %v2664_v19, 0.0  ;;  %v447_v21 = vmul.f32 0.1, %v2664_v19 }
  0x93   : > { %v2671_v22 = vld [vmem:[#allocation2 + $0x10] sm:$0xff]  ;;  %v453_v24 = vsel %vm441_vm3, %v2664_v19, %v447_v21 }
  0x94   : > { %v2673_v23 = vld [vmem:[#allocation2] sm:$0xff]  ;;  %v445_v26 = vmul.f32 0.1, %v2671_v22  ;;  %v2678_v27 = vpack.c.bf16 %v453_v24, %v450_v25  ;;  %vm439_vm4 = vcmp.ge.f32.partialorder %v2671_v22, 0.0 }
  0x95   : > { %v443_v28 = vmul.f32 0.1, %v2673_v23  ;;  %vm437_vm5 = vcmp.ge.f32.partialorder %v2673_v23, 0.0 }
  0x96   : > { %527 = vmatprep.subr.bf16.mxu1 %v2678_v27  ;;  %v451_v33 = vsel %vm439_vm4, %v2671_v22, %v445_v26 }
  0x97   : > { %v2682_v29 = vld [vmem:[#allocation2 + $0x28] sm:$0xff]  ;;  %v449_v35 = vsel %vm437_vm5, %v2673_v23, %v443_v28  ;;  %vm656_vm5 = vcmask 162816  }
  0x98   : > { %v2684_v30 = vld [vmem:[#allocation2 + $0x18] sm:$0xff]  ;;  %vm442_vm6 = vcmp.ge.f32.partialorder %v2682_v29, 0.0  ;;  %v448_v31 = vmul.f32 0.1, %v2682_v29 }
  0x99   : > { %vm440_vm7 = vcmp.ge.f32.partialorder %v2684_v30, 0.0  ;;  %v446_v32 = vmul.f32 0.1, %v2684_v30 }
  0x9a   : > { %v454_v34 = vsel %vm442_vm6, %v2682_v29, %v448_v31  ;;  %vm800_vm6 = vcmp.lt.s32.totalorder %v2764_v57, 20 }
  0x9b   : > { %v452_v36 = vsel %vm440_vm7, %v2684_v30, %v446_v32  ;;  %v2696_v37 = vpack.c.bf16 %v454_v34, %v451_v33  ;;  %vm830_vm7 = vcmask 31744  }
  0x9c   : > { %v2698_v38 = vpack.c.bf16 %v452_v36, %v449_v35  ;;  %v2277_v35 = vld [vmem:[%s3146_s3 + $0x10] sm:$0xff] }
  0x9d   : > { %473 = vrot.lane.b32.xlu0 %v2696_v37, %s2573_s29  ;;  %465 = vst.msk [vmem:[#allocation3 + $0x10] sm:$0xff] %vm464_vm8, %v2696_v37 }
  0x9e   : > { %469 = vrot.lane.b32.xlu1 %v2698_v38, %s2573_s29  ;;  %528 = vmatpush1.bf16.msra.mxu1 %v2698_v38 }
  0xa1   : > { %486 = vrot.lane.b32.xlu0 %v2678_v27, %s2574_s30 }
  0xa2   : > { %471 = vrot.lane.b32.xlu1 %v2678_v27, %s2573_s29 }
  0xa4   : > { %v501_v53 = vld [vmem:[#allocation3 + $0x10] sm:$0xff] }
  0xa5   : > { %484 = vrot.lane.b32.xlu0 %v2698_v38, %s2574_s30 }
  0xa6   : > { %488 = vrot.lane.b32.xlu1 %v2696_v37, %s2574_s30 }
  0xa9   : > { %515 = vperm.xlu0 %2523, %v458_v41  }
  0xaa   : > { %510 = vperm.xlu1 %2522, %v457_v40   ;;  %v2278_v40 = vld [vmem:[%s3146_s3 + $0x18] sm:$0xff] }
 0x10f   : > { %v2725_v42 = vpop.permute.xlu0 %473 }
 0x110   : > { %v470_v43 = vpop.permute.xlu1 %469  ;;  %483 = vst.msk [vmem:[#allocation3 + $0x28] sm:$0xff] %vm464_vm8, %v2725_v42 }
 0x113   : > { %v487_v44 = vpop.permute.xlu0 %486 }
 0x114   : > { %v472_v45 = vpop.permute.xlu1 %471 }
 0x115   : > { %v2730_v46 = vsel %vm475_vm9, %v470_v43, %v472_v45  ;;  %v2734_v47 = vsel %vm475_vm9, %v472_v45, %v2725_v42 }
 0x116   : > { %529 = vmatprep.subr.bf16.mxu1 %v2734_v47 }
 0x117   : > { %530 = vmatpush1.bf16.msra.mxu1 %v2730_v46  ;;  %v485_v48 = vpop.permute.xlu0 %484  ;;  %v504_v54 = vld [vmem:[#allocation3 + $0x28] sm:$0xff] }
 0x118   : > { %v2738_v49 = vpop.permute.xlu1 %488  ;;  %v2741_v50 = vsel %vm490_vm10, %v485_v48, %v487_v44 }
 0x119   : > { %v2745_v51 = vsel %vm490_vm10, %v487_v44, %v2738_v49  ;;  %498 = vst.msk [vmem:[#allocation3 + $0x40] sm:$0xff] %vm464_vm8, %v2738_v49 }
 0x11a   : > { %531 = vmatprep.subr.bf16.mxu1 %v2745_v51 }
 0x11b   : > { %532 = vmatpush1.bf16.msra.mxu1 %v2741_v50 }
 0x11c   : > { %2366 = vmatprep.subr.bf16.mxu1 %v2570_v0 }
 0x11e   : > { %2273 = vmatmul.mubr.msk.bf16.vlgmr.msra.gmra.mrb[0].mxu1 %vm523_vm11, %v2524_v52 }
 0x11f   : > { %2367 = vmatpush3.bf16.msra.mxu1 %v501_v53  ;;  %2372 = vmatprep.mubr.msk.bf16.mxu1 %vm2575_vm12, %v2570_v0 }
 0x120   : > { %2368 = vmatprep.subr.bf16.mxu1 %v2570_v0  ;;  %v507_v55 = vld [vmem:[#allocation3 + $0x40] sm:$0xff] }
 0x123   : > { %2369 = vmatpush3.bf16.msra.mxu1 %v504_v54 }
 0x124   : > { %2370 = vmatprep.subr.bf16.mxu1 %v2570_v0 }
 0x127   : > { %2371 = vmatpush3.bf16.msra.mxu1 %v507_v55 }
 0x128   : > { %2376 = vmatprep.subr.bf16.mxu1 %v2570_v0  ;;  %v516_v60 = vpop.permute.xlu0 %515 }
 0x129   : > { %v511_v58 = vpop.permute.xlu1 %510 }
 0x12a   : > { %2373 = vmatmul.mubr.msk.bf16.vlgmr.msra.gmra.mrb[4].mxu1 %vm523_vm11, %v2524_v52 }
 0x12b   : > { %2382 = vmatprep.mubr.msk.bf16.mxu1 %vm2575_vm12, %v2570_v0 }
 0x1f1   : > { %v561_v59 = vpop.f32.mrb[0].mxu1 }
 0x1f2   : > { %v562_v61 = vadd.f32 %v561_v59, %v511_v58  ;;  %v563_v62 = vpop.f32.mrb[1].mxu1  ;;  %v2525_v59 = vld [vmem:[%s3145_s2 + $0x8] sm:$0xff]  }
 0x1f3   : > { %v564_v63 = vadd.f32 %v563_v62, %v511_v58  ;;  %v565_v1 = vpop.f32.mrb[2].mxu1 }
 0x1f4   : > { %v621_v2 = vsel %vm615_vm13, 0.0, %v562_v61  ;;  %v566_v3 = vadd.f32 %v565_v1, %v516_v60  ;;  %v567_v4 = vpop.f32.mrb[3].mxu1 }
 0x1f5   : > { %v633_v5 = vmul.f32 0.1, %v621_v2  ;;  %vm627_vm14 = vcmp.ge.f32.partialorder %v621_v2, 0.0  ;;  %v634_v6 = vmul.f32 0.1, %v564_v63  ;;  %v568_v8 = vadd.f32 %v567_v4, %v516_v60 }
 0x1f6   : > { %v624_v7 = vsel %vm615_vm13, 0.0, %v566_v3  ;;  %vm628_vm15 = vcmp.ge.f32.partialorder %v564_v63, 0.0 }
 0x1f7   : > { %vm630_vm1 = vcmp.ge.f32.partialorder %v624_v7, 0.0  ;;  %v636_v9 = vmul.f32 0.1, %v624_v7  ;;  %vm631_vm2 = vcmp.ge.f32.partialorder %v568_v8, 0.0  ;;  %v637_v10 = vmul.f32 0.1, %v568_v8 }
 0x1f8   : > { %v639_v11 = vsel %vm627_vm14, %v621_v2, %v633_v5  ;;  %v640_v13 = vsel %vm628_vm15, %v564_v63, %v634_v6 }
 0x1f9   : > { %v642_v12 = vsel %vm630_vm1, %v624_v7, %v636_v9  ;;  %v643_v14 = vsel %vm631_vm2, %v568_v8, %v637_v10 }
 0x1fa   : > { %v651_v16 = vpack.c.bf16 %v642_v12, %v639_v11  ;;  %v652_v17 = vpack.c.bf16 %v643_v14, %v640_v13 }
 0x1fc   : > { %661 = vrot.lane.b32.xlu0 %v651_v16, %s2573_s29  ;;  %663 = vrot.lane.b32.xlu1 %v652_v17, %s2573_s29 }
 0x1fd   : > { %v604_v18 = vpop.f32.mrb[4].mxu1  ;;  %716 = vmatprep.subr.bf16.mxu0 %v652_v17 }
 0x1fe   : > { %v605_v20 = vadd.f32 %v604_v18, %v511_v58  ;;  %v2374_v21 = vpop.f32.mrb[5].mxu1  ;;  %717 = vmatpush1.bf16.msra.mxu0 %v651_v16 }
 0x1ff   : > { %v607_v24 = vpop.f32.mrb[6].mxu1 }
 0x200   : > { %v635_v25 = vmul.f32 0.1, %v605_v20  ;;  %v608_v26 = vadd.f32 %v607_v24, %v516_v60  ;;  %v2375_v28 = vpop.f32.mrb[7].mxu1  ;;  %vm629_vm3 = vcmp.ge.f32.partialorder %v605_v20, 0.0 }
 0x202   : > { %vm632_vm4 = vcmp.ge.f32.partialorder %v608_v26, 0.0  ;;  %v638_v31 = vmul.f32 0.1, %v608_v26  ;;  %v641_v32 = vsel %vm629_vm3, %v605_v20, %v635_v25  ;;  %vm883_vm3 = vcmask 1014784  }
 0x204   : > { %v644_v33 = vsel %vm632_vm4, %v608_v26, %v638_v31  ;;  %vm891_vm4 = vcmask 113664  }
 0x205   : > { %v653_v34 = vpack.c.bf16 %v644_v33, %v641_v32 }
 0x207   : > { %657 = vst.msk [vmem:[#allocation3 + $0x10] sm:$0xff] %vm656_vm5, %v653_v34  ;;  %665 = vrot.lane.b32.xlu1 %v653_v34, %s2573_s29  ;;  %679 = vrot.lane.b32.xlu0 %v653_v34, %s2574_s30 }
 0x20b   : > { %677 = vrot.lane.b32.xlu1 %v652_v17, %s2574_s30  ;;  %700 = vperm.xlu0 %2523, %v2277_v35  }
 0x20e   : > { %v691_v36 = vld [vmem:[#allocation3 + $0x10] sm:$0xff] }
 0x20f   : > { %2377 = vmatpush3.bf16.msra.mxu1 %v691_v36  ;;  %675 = vrot.lane.b32.xlu1 %v651_v16, %s2574_s30 }
 0x210   : > { %2378 = vmatprep.subr.bf16.mxu1 %v2570_v0 }
 0x213   : > { %705 = vperm.xlu1 %2522, %v2278_v40  }
 0x26e   : > { %v664_v41 = vpop.permute.xlu1 %663  ;;  %v662_v43 = vpop.permute.xlu0 %661 }
 0x26f   : > { %v667_v52 = vsel %vm475_vm9, %v662_v43, %v664_v41 }
 0x279   : > { %v666_v44 = vpop.permute.xlu1 %665  ;;  %v680_v45 = vpop.permute.xlu0 %679 }
 0x27a   : > { %v668_v48 = vsel %vm475_vm9, %v664_v41, %v666_v44  ;;  %674 = vst.msk [vmem:[#allocation3 + $0x28] sm:$0xff] %vm656_vm5, %v666_v44  ;;  %688 = vst.msk [vmem:[#allocation3 + $0x40] sm:$0xff] %vm656_vm5, %v680_v45 }
 0x27b   : > { %718 = vmatprep.subr.bf16.mxu0 %v668_v48 }
 0x27c   : > { %719 = vmatpush1.bf16.msra.mxu0 %v667_v52 }
 0x27d   : > { %v678_v53 = vpop.permute.xlu1 %677 }
 0x27e   : > { %v682_v54 = vsel %vm490_vm10, %v678_v53, %v680_v45 }
 0x27f   : > { %720 = vmatprep.subr.bf16.mxu0 %v682_v54 }
 0x281   : > { %v676_v55 = vpop.permute.xlu1 %675  ;;  %v694_v56 = vld [vmem:[#allocation3 + $0x28] sm:$0xff]  ;;  %v697_v60 = vld [vmem:[#allocation3 + $0x40] sm:$0xff] }
 0x282   : > { %v681_v58 = vsel %vm490_vm10, %v676_v55, %v678_v53  ;;  %2379 = vmatpush3.bf16.msra.mxu1 %v694_v56 }
 0x283   : > { %2380 = vmatprep.subr.bf16.mxu1 %v2570_v0  ;;  %721 = vmatpush1.bf16.msra.mxu0 %v681_v58  ;;  %v2284_v58 = vld [vmem:[%s3146_s3 + $0x20] sm:$0xff] }
 0x286   : > { %2381 = vmatpush3.bf16.msra.mxu1 %v697_v60  ;;  %2280 = vmatmul.mubr.msk.bf16.vlgmr.msra.gmra.mrb[0].mxu0 %vm523_vm11, %v2525_v59 }
 0x287   : > { %2386 = vmatprep.subr.bf16.mxu1 %v2570_v0  ;;  %982 = vmatprep.mubr.bf16.mxu0 %v2572_v39 }
 0x289   : > { %2383 = vmatmul.mubr.msk.bf16.vlgmr.msra.gmra.mrb[8].mxu1 %vm523_vm11, %v2525_v59  ;;  %v2285_v59 = vld [vmem:[%s3146_s3 + $0x28] sm:$0xff] }
 0x28a   : > { %2392 = vmatprep.mubr.msk.bf16.mxu1 %vm2575_vm12, %v2570_v0  ;;  %v701_v62 = vpop.permute.xlu0 %700 }
 0x292   : > { %v706_v1 = vpop.permute.xlu1 %705 }
 0x359   : > { %v750_v61 = vpop.f32.mrb[0].mxu0 }
 0x35a   : > { %v752_v63 = vpop.f32.mrb[1].mxu0  ;;  %v751_v10 = vadd.f32 %v750_v61, %v701_v62 }
 0x35b   : > { %v753_v2 = vadd.f32 %v752_v63, %v701_v62  ;;  %v754_v3 = vpop.f32.mrb[2].mxu0 }
 0x35c   : > { %v793_v4 = vpop.f32.mrb[8].mxu1  ;;  %v755_v5 = vadd.f32 %v754_v3, %v706_v1  ;;  %v756_v6 = vpop.f32.mrb[3].mxu0  ;;  %v806_v13 = vsel %vm800_vm6, 0.0, %v751_v10 }
 0x35d   : > { %v794_v7 = vadd.f32 %v793_v4, %v701_v62  ;;  %v2384_v8 = vpop.f32.mrb[9].mxu1  ;;  %820 = vrot.lane.b32.xlu1 %v753_v2, %s2576_s19  ;;  %v757_v16 = vadd.f32 %v756_v6, %v706_v1 }
 0x35e   : > { %v796_v9 = vpop.f32.mrb[10].mxu1  ;;  %v809_v12 = vsel %vm800_vm6, 0.0, %v755_v5 }
 0x35f   : > { %822 = vrot.lane.b32.xlu0 %v794_v7, %s2576_s19  ;;  %v2385_v11 = vpop.f32.mrb[11].mxu1  ;;  %v797_v14 = vadd.f32 %v796_v9, %v706_v1 }
 0x361   : > { %824 = vrot.lane.b32.xlu1 %v809_v12, %s2576_s19 }
 0x363   : > { %818 = vrot.lane.b32.xlu0 %v806_v13, %s2576_s19 }
 0x365   : > { %828 = vrot.lane.b32.xlu1 %v797_v14, %s2576_s19  ;;  %v2526_v14 = vld [vmem:[%s3145_s2 + $0x10] sm:$0xff]  }
 0x367   : > { %826 = vrot.lane.b32.xlu0 %v757_v16, %s2576_s19 }
 0x3cf   : > { %v821_v17 = vpop.permute.xlu1 %820 }
 0x3d1   : > { %v823_v18 = vpop.permute.xlu0 %822 }
 0x3d2   : > { %v832_v20 = vsel %vm830_vm7, %v821_v17, %v823_v18 }
 0x3d3   : > { %v825_v21 = vpop.permute.xlu1 %824  ;;  %v2807_v25 = vadd.f32 %v832_v20, %v2671_v22 }
 0x3d4   : > { %v2804_v24 = vadd.f32 %v825_v21, %v2684_v30 }
 0x3d5   : > { %v819_v26 = vpop.permute.xlu0 %818  ;;  %v855_v35 = vmul.f32 0.1, %v2807_v25  ;;  %vm849_vm15 = vcmp.ge.f32.partialorder %v2807_v25, 0.0 }
 0x3d6   : > { %v831_v28 = vsel %vm830_vm7, %v819_v26, %v821_v17  ;;  %v2811_v31 = vadd.f32 %v819_v26, %v2673_v23  ;;  %v856_v32 = vmul.f32 0.1, %v2804_v24  ;;  %vm850_vm8 = vcmp.ge.f32.partialorder %v2804_v24, 0.0 }
 0x3d7   : > { %v2815_v33 = vadd.f32 %v831_v28, %v2659_v15  ;;  %v829_v22 = vpop.permute.xlu1 %828  ;;  %v861_v53 = vsel %vm849_vm15, %v2807_v25, %v855_v35 }
 0x3d8   : > { %vm847_vm13 = vcmp.ge.f32.partialorder %v2811_v31, 0.0  ;;  %v853_v30 = vmul.f32 0.1, %v2811_v31  ;;  %v862_v41 = vsel %vm850_vm8, %v2804_v24, %v856_v32  ;;  %vm899_vm8 = vcmask 990208  }
 0x3d9   : > { %v827_v34 = vpop.permute.xlu0 %826  ;;  %v854_v45 = vmul.f32 0.1, %v2815_v33  ;;  %vm848_vm14 = vcmp.ge.f32.partialorder %v2815_v33, 0.0 }
 0x3da   : > { %v833_v36 = vsel %vm830_vm7, %v825_v21, %v827_v34  ;;  %v834_v23 = vsel %vm830_vm7, %v827_v34, %v829_v22  ;;  %v859_v40 = vsel %vm847_vm13, %v2811_v31, %v853_v30  ;;  %vm914_vm13 = vcmask 965632  }
 0x3db   : > { %v2826_v15 = vadd.f32 %v833_v36, %v2664_v19  ;;  %v2829_v43 = vadd.f32 %v834_v23, %v2682_v29  ;;  %v871_v44 = vpack.c.bf16 %v862_v41, %v859_v40  ;;  %v860_v48 = vsel %vm848_vm14, %v2815_v33, %v854_v45 }
 0x3dc   : > { %vm1034_vm14 = vcmp.lt.s32.totalorder %v2764_v57, 14 }
 0x3dd   : > { %893 = vrot.lane.b32.xlu1 %v871_v44, %s2577_s20  ;;  %877 = vrot.lane.b32.xlu0 %v871_v44, %s2578_s26  ;;  %vm851_vm1 = vcmp.ge.f32.partialorder %v2826_v15, 0.0  ;;  %v857_v19 = vmul.f32 0.1, %v2826_v15  ;;  %vm852_vm2 = vcmp.ge.f32.partialorder %v2829_v43, 0.0  ;;  %v858_v29 = vmul.f32 0.1, %v2829_v43 }
 0x3df   : > { %v863_v52 = vsel %vm851_vm1, %v2826_v15, %v857_v19  ;;  %v864_v54 = vsel %vm852_vm2, %v2829_v43, %v858_v29 }
 0x3e0   : > { %v872_v55 = vpack.c.bf16 %v863_v52, %v860_v48  ;;  %v873_v56 = vpack.c.bf16 %v864_v54, %v861_v53 }
 0x3e2   : > { %879 = vrot.lane.b32.xlu0 %v872_v55, %s2578_s26  ;;  %881 = vrot.lane.b32.xlu1 %v873_v56, %s2578_s26 }
 0x3e6   : > { %897 = vrot.lane.b32.xlu0 %v873_v56, %s2577_s20  ;;  %895 = vrot.lane.b32.xlu1 %v872_v55, %s2577_s20 }
 0x3ea   : > { %910 = vrot.lane.b32.xlu0 %v872_v55, %s2579_s27  ;;  %912 = vrot.lane.b32.xlu1 %v873_v56, %s2579_s27 }
 0x3ee   : > { %908 = vrot.lane.b32.xlu0 %v871_v44, %s2579_s27  ;;  %934 = vperm.xlu1 %2522, %v2284_v58  }
 0x3f2   : > { %939 = vperm.xlu0 %2523, %v2285_v59  }
 0x44f   : > { %v894_v60 = vpop.permute.xlu1 %893  ;;  %v878_v61 = vpop.permute.xlu0 %877 }
 0x454   : > { %v880_v62 = vpop.permute.xlu0 %879  ;;  %v882_v63 = vpop.permute.xlu1 %881 }
 0x455   : > { %v884_v1 = vsel %vm883_vm3, %v878_v61, %v880_v62  ;;  %v885_v2 = vsel %vm883_vm3, %v880_v62, %v882_v63  ;;  %892 = vst.msk [vmem:[#allocation3 + $0x10] sm:$0xff] %vm891_vm4, %v882_v63 }
 0x456   : > { %950 = vmatprep.subr.bf16.mxu0 %v885_v2 }
 0x457   : > { %951 = vmatpush1.bf16.msra.mxu0 %v884_v1 }
 0x458   : > { %v898_v3 = vpop.permute.xlu0 %897  ;;  %v896_v4 = vpop.permute.xlu1 %895 }
 0x459   : > { %907 = vst.msk [vmem:[#allocation3 + $0x28] sm:$0xff] %vm891_vm4, %v898_v3  ;;  %v900_v5 = vsel %vm899_vm8, %v894_v60, %v896_v4  ;;  %v901_v6 = vsel %vm899_vm8, %v896_v4, %v898_v3  ;;  %v1273_v4 = vld [vmem:[%s3148_s5] sm:$0xff] }
 0x45a   : > { %952 = vmatprep.subr.bf16.mxu0 %v901_v6 }
 0x45b   : > { %953 = vmatpush1.bf16.msra.mxu0 %v900_v5  ;;  %v1274_v5 = vld [vmem:[%s3148_s5 + $0x8] sm:$0xff] }
 0x45c   : > { %v911_v7 = vpop.permute.xlu0 %910  ;;  %v913_v8 = vpop.permute.xlu1 %912  ;;  %v925_v9 = vld [vmem:[#allocation3 + $0x10] sm:$0xff] }
 0x45d   : > { %v916_v10 = vsel %vm914_vm13, %v911_v7, %v913_v8  ;;  %922 = vst.msk [vmem:[#allocation3 + $0x40] sm:$0xff] %vm891_vm4, %v913_v8  ;;  %2387 = vmatpush3.bf16.msra.mxu1 %v925_v9 }
 0x45e   : > { %2388 = vmatprep.subr.bf16.mxu1 %v2570_v0  ;;  %954 = vmatprep.subr.bf16.mxu0 %v916_v10 }
 0x460   : > { %v909_v11 = vpop.permute.xlu0 %908  ;;  %v928_v12 = vld [vmem:[#allocation3 + $0x28] sm:$0xff] }
 0x461   : > { %v915_v13 = vsel %vm914_vm13, %v909_v11, %v911_v7  ;;  %2389 = vmatpush3.bf16.msra.mxu1 %v928_v12 }
 0x462   : > { %2390 = vmatprep.subr.bf16.mxu1 %v2570_v0  ;;  %955 = vmatpush1.bf16.msra.mxu0 %v915_v13 }
 0x464   : > { %v931_v16 = vld [vmem:[#allocation3 + $0x40] sm:$0xff] }
 0x465   : > { %2391 = vmatpush3.bf16.msra.mxu1 %v931_v16  ;;  %2287 = vmatmul.mubr.msk.bf16.vlgmr.msra.gmra.mrb[4].mxu0 %vm523_vm11, %v2526_v14 }
 0x466   : > { %2396 = vmatprep.subr.bf16.mxu1 %v2570_v0  ;;  %1167 = vmatprep.mubr.bf16.mxu0 %v2572_v39 }
 0x468   : > { %2393 = vmatmul.mubr.msk.bf16.vlgmr.msra.gmra.mrb[12].mxu1 %vm523_vm11, %v2526_v14 }
 0x469   : > { %2402 = vmatprep.mubr.msk.bf16.mxu1 %vm2575_vm12, %v2570_v0 }
 0x46d   : > { %v935_v17 = vpop.permute.xlu1 %934 }
 0x471   : > { %v940_v26 = vpop.permute.xlu0 %939 }
 0x538   : > { %v984_v18 = vpop.f32.mrb[4].mxu0 }
 0x539   : > { %v985_v20 = vadd.f32 %v984_v18, %v935_v17  ;;  %v986_v21 = vpop.f32.mrb[5].mxu0 }
 0x53a   : > { %v987_v28 = vadd.f32 %v986_v21, %v935_v17  ;;  %v988_v32 = vpop.f32.mrb[6].mxu0 }
 0x53b   : > { %v1027_v30 = vpop.f32.mrb[12].mxu1  ;;  %v1040_v34 = vsel %vm1034_vm14, 0.0, %v985_v20  ;;  %v989_v22 = vadd.f32 %v988_v32, %v940_v26  ;;  %v990_v35 = vpop.f32.mrb[7].mxu0 }
 0x53c   : > { %v1028_v36 = vadd.f32 %v1027_v30, %v935_v17  ;;  %v2394_v23 = vpop.f32.mrb[13].mxu1  ;;  %vm1046_vm15 = vcmp.ge.f32.partialorder %v1040_v34, 0.0  ;;  %v1052_v41 = vmul.f32 0.1, %v1040_v34  ;;  %v1053_v44 = vmul.f32 0.1, %v987_v28 }
 0x53d   : > { %v1030_v40 = vpop.f32.mrb[14].mxu1  ;;  %v1043_v45 = vsel %vm1034_vm14, 0.0, %v989_v22  ;;  %v991_v19 = vadd.f32 %v990_v35, %v940_v26  ;;  %vm1047_vm2 = vcmp.ge.f32.partialorder %v987_v28, 0.0  ;;  %v2527_v17 = vld [vmem:[%s3145_s2 + $0x18] sm:$0xff]   ;;  %vm1290_vm14 = vcmask 1022976  }
 0x53e   : > { %vm1048_vm1 = vcmp.ge.f32.partialorder %v1028_v36, 0.0  ;;  %v1054_v29 = vmul.f32 0.1, %v1028_v36  ;;  %v1031_v48 = vadd.f32 %v1030_v40, %v940_v26  ;;  %v2395_v52 = vpop.f32.mrb[15].mxu1  ;;  %vm1049_vm4 = vcmp.ge.f32.partialorder %v1043_v45, 0.0 }
 0x53f   : > { %v1055_v53 = vmul.f32 0.1, %v1043_v45  ;;  %vm1050_vm8 = vcmp.ge.f32.partialorder %v991_v19, 0.0  ;;  %v1056_v54 = vmul.f32 0.1, %v991_v19  ;;  %v1058_v56 = vsel %vm1046_vm15, %v1040_v34, %v1052_v41 }
 0x540   : > { %vm1051_vm13 = vcmp.ge.f32.partialorder %v1031_v48, 0.0  ;;  %v1057_v55 = vmul.f32 0.1, %v1031_v48  ;;  %v1059_v59 = vsel %vm1047_vm2, %v987_v28, %v1053_v44  ;;  %v1060_v61 = vsel %vm1048_vm1, %v1028_v36, %v1054_v29 }
 0x541   : > { %v1061_v58 = vsel %vm1049_vm4, %v1043_v45, %v1055_v53  ;;  %v1062_v60 = vsel %vm1050_vm8, %v991_v19, %v1056_v54  ;;  %vm1466_vm8 = vcmask 130048  }
 0x542   : > { %v1063_v62 = vsel %vm1051_vm13, %v1031_v48, %v1057_v55  ;;  %v1071_v63 = vpack.c.bf16 %v1062_v60, %v1059_v59  ;;  %v1070_v1 = vpack.c.bf16 %v1061_v58, %v1058_v56  ;;  %vm1644_vm13 = vcmp.lt.s32.totalorder %v2764_v57, 16 }
 0x543   : > { %v1072_v2 = vpack.c.bf16 %v1063_v62, %v1060_v61 }
 0x544   : > { %1082 = vrot.lane.b32.xlu1 %v1071_v63, %s2573_s29  ;;  %1135 = vmatprep.subr.bf16.mxu0 %v1071_v63 }
 0x545   : > { %1084 = vrot.lane.b32.xlu0 %v1072_v2, %s2573_s29  ;;  %1076 = vst.msk [vmem:[#allocation3 + $0x10] sm:$0xff] %vm1075_vm0, %v1072_v2  ;;  %1136 = vmatpush1.bf16.msra.mxu0 %v1070_v1 }
 0x548   : > { %1080 = vrot.lane.b32.xlu1 %v1070_v1, %s2573_s29 }
 0x549   : > { %1096 = vrot.lane.b32.xlu0 %v1071_v63, %s2574_s30 }
 0x54c   : > { %v1110_v3 = vld [vmem:[#allocation3 + $0x10] sm:$0xff]  ;;  %1098 = vrot.lane.b32.xlu1 %v1072_v2, %s2574_s30 }
 0x54d   : > { %2397 = vmatpush3.bf16.msra.mxu1 %v1110_v3  ;;  %1277 = vst.msk [vmem:[#allocation3 + $0x10] sm:$0xff] %vm656_vm5, %v2696_v37  ;;  %1094 = vrot.lane.b32.xlu0 %v1070_v1, %s2574_s30 }
 0x54e   : > { %2398 = vmatprep.subr.bf16.mxu1 %v2570_v0 }
 0x550   : > { %1286 = vrot.lane.b32.xlu1 %v2678_v27, %s2580_s12 }
 0x551   : > { %1288 = vrot.lane.b32.xlu0 %v2696_v37, %s2580_s12 }
 0x554   : > { %1284 = vrot.lane.b32.xlu1 %v2698_v38, %s2580_s12  ;;  %v1315_v26 = vld [vmem:[#allocation3 + $0x10] sm:$0xff] }
 0x555   : > { %1301 = vrot.lane.b32.xlu0 %v2678_v27, %s2578_s26 }
 0x558   : > { %1303 = vrot.lane.b32.xlu1 %v2696_v37, %s2578_s26 }
 0x559   : > { %1299 = vrot.lane.b32.xlu0 %v2698_v38, %s2578_s26 }
 0x55c   : > { %1330 = vperm.xlu1 %2522, %v1273_v4  }
 0x55d   : > { %1335 = vperm.xlu0 %2523, %v1274_v5  }
 0x5b6   : > { %v1083_v6 = vpop.permute.xlu1 %1082 }
 0x5b7   : > { %v1085_v7 = vpop.permute.xlu0 %1084 }
 0x5b8   : > { %1093 = vst.msk [vmem:[#allocation3 + $0x28] sm:$0xff] %vm1075_vm0, %v1085_v7  ;;  %v1087_v8 = vsel %vm475_vm9, %v1083_v6, %v1085_v7 }
 0x5b9   : > { %1137 = vmatprep.subr.bf16.mxu0 %v1087_v8 }
 0x5ba   : > { %v1081_v37 = vpop.permute.xlu1 %1080 }
 0x5bb   : > { %v1097_v9 = vpop.permute.xlu0 %1096  ;;  %v1086_v10 = vsel %vm475_vm9, %v1081_v37, %v1083_v6 }
 0x5bc   : > { %1138 = vmatpush1.bf16.msra.mxu0 %v1086_v10 }
 0x5be   : > { %v1099_v11 = vpop.permute.xlu1 %1098 }
 0x5bf   : > { %v1113_v12 = vld [vmem:[#allocation3 + $0x28] sm:$0xff]  ;;  %v1095_v13 = vpop.permute.xlu0 %1094  ;;  %v1101_v14 = vsel %vm490_vm10, %v1097_v9, %v1099_v11  ;;  %1107 = vst.msk [vmem:[#allocation3 + $0x40] sm:$0xff] %vm1075_vm0, %v1099_v11 }
 0x5c0   : > { %2399 = vmatpush3.bf16.msra.mxu1 %v1113_v12  ;;  %1280 = vst.msk [vmem:[#allocation3 + $0x28] sm:$0xff] %vm656_vm5, %v2725_v42  ;;  %v1100_v16 = vsel %vm490_vm10, %v1095_v13, %v1097_v9  ;;  %1139 = vmatprep.subr.bf16.mxu0 %v1101_v14 }
 0x5c1   : > { %2400 = vmatprep.subr.bf16.mxu1 %v2570_v0  ;;  %1140 = vmatpush1.bf16.msra.mxu0 %v1100_v16 }
 0x5c2   : > { %v1287_v18 = vpop.permute.xlu1 %1286  ;;  %1347 = vmatprep.subr.bf16.mxu0 %v2678_v27 }
 0x5c3   : > { %v1289_v20 = vpop.permute.xlu0 %1288 }
 0x5c4   : > { %1298 = vst.msk [vmem:[#allocation3 + $0x58] sm:$0xff] %vm656_vm5, %v1289_v20  ;;  %2294 = vmatmul.mubr.msk.bf16.vlgmr.msra.gmra.mrb[8].mxu0 %vm523_vm11, %v2527_v17 }
 0x5c5   : > { %1348 = vmatpush1.bf16.msra.mxu0 %v2698_v38  ;;  %1379 = vmatprep.mubr.bf16.mxu0 %v2572_v39 }
 0x5c6   : > { %v1285_v42 = vpop.permute.xlu1 %1284  ;;  %v1116_v21 = vld [vmem:[#allocation3 + $0x40] sm:$0xff]  ;;  %1349 = vmatprep.subr.bf16.mxu0 %v2734_v47  ;;  %v1292_v47 = vsel %vm1290_vm14, %v1287_v18, %v1289_v20 }
 0x5c7   : > { %2401 = vmatpush3.bf16.msra.mxu1 %v1116_v21  ;;  %1283 = vst.msk [vmem:[#allocation3 + $0x40] sm:$0xff] %vm656_vm5, %v2738_v49  ;;  %v1302_v38 = vpop.permute.xlu0 %1301  ;;  %v1291_v49 = vsel %vm1290_vm14, %v1285_v42, %v1287_v18 }
 0x5c8   : > { %2406 = vmatprep.subr.bf16.mxu1 %v2570_v0 }
 0x5c9   : > { %1350 = vmatpush1.bf16.msra.mxu0 %v2730_v46  ;;  %v1318_v46 = vld [vmem:[#allocation3 + $0x28] sm:$0xff] }
 0x5ca   : > { %2403 = vmatmul.mubr.msk.bf16.vlgmr.msra.gmra.mrb[16].mxu1 %vm523_vm11, %v2527_v17  ;;  %v1304_v27 = vpop.permute.xlu1 %1303  ;;  %1351 = vmatprep.subr.bf16.mxu0 %v2745_v51  ;;  %vm1343_vm11 = vcmask 654336  }
 0x5cb   : > { %1312 = vst.msk [vmem:[#allocation3 + $0x70] sm:$0xff] %vm656_vm5, %v1304_v27  ;;  %2407 = vmatpush3.bf16.msra.mxu1 %v1315_v26  ;;  %2416 = vmatprep.mubr.msk.bf16.mxu1 %vm2575_vm12, %v2570_v0  ;;  %v1300_v51 = vpop.permute.xlu0 %1299  ;;  %v1306_v28 = vsel %vm883_vm3, %v1302_v38, %v1304_v27  ;;  %v1324_v34 = vld [vmem:[#allocation3 + $0x58] sm:$0xff]  ;;  %v2302_v27 = vld [vmem:[%s3148_s5 + $0x18] sm:$0xff]  ;;  %v2301_v26 = vld [vmem:[%s3148_s5 + $0x10] sm:$0xff] }
 0x5cc   : > { %2408 = vmatprep.subr.bf16.mxu1 %v2570_v0  ;;  %v1305_v30 = vsel %vm883_vm3, %v1300_v51, %v1302_v38 }
 0x5cd   : > { %1352 = vmatpush1.bf16.msra.mxu0 %v2741_v50  ;;  %v2528_v50 = vld [vmem:[%s3147_s4] sm:$0xff]  }
 0x5ce   : > { %1353 = vmatprep.subr.bf16.mxu0 %v1292_v47  ;;  %v1321_v32 = vld [vmem:[#allocation3 + $0x40] sm:$0xff] }
 0x5cf   : > { %2409 = vmatpush3.bf16.msra.mxu1 %v1318_v46 }
 0x5d0   : > { %2410 = vmatprep.subr.bf16.mxu1 %v2570_v0 }
 0x5d1   : > { %1354 = vmatpush1.bf16.msra.mxu0 %v1291_v49 }
 0x5d2   : > { %1355 = vmatprep.subr.bf16.mxu0 %v1306_v28  ;;  %v1327_v22 = vld [vmem:[#allocation3 + $0x70] sm:$0xff] }
 0x5d3   : > { %2411 = vmatpush3.bf16.msra.mxu1 %v1321_v32 }
 0x5d4   : > { %2412 = vmatprep.subr.bf16.mxu1 %v2570_v0 }
 0x5d5   : > { %1356 = vmatpush1.bf16.msra.mxu0 %v1305_v30 }
 0x5d7   : > { %2413 = vmatpush3.bf16.msra.mxu1 %v1324_v34 }
 0x5d8   : > { %2414 = vmatprep.subr.bf16.mxu1 %v2570_v0  ;;  %2297 = vmatmul.mubr.msk.bf16.vlgmr.msra.gmra.mrb[12].mxu0 %vm1343_vm11, %v2528_v50 }
 0x5d9   : > { %1592 = vmatprep.mubr.bf16.mxu0 %v2572_v39 }
 0x5db   : > { %2415 = vmatpush3.bf16.msra.mxu1 %v1327_v22  ;;  %v1331_v29 = vpop.permute.xlu1 %1330 }
 0x5dc   : > { %2420 = vmatprep.subr.bf16.mxu1 %v2570_v0  ;;  %v1336_v54 = vpop.permute.xlu0 %1335 }
 0x5de   : > { %2417 = vmatmul.mubr.msk.bf16.vlgmr.msra.gmra.mrb[20].mxu1 %vm1343_vm11, %v2528_v50 }
 0x5df   : > { %2430 = vmatprep.mubr.msk.bf16.mxu1 %vm2575_vm12, %v2570_v0 }
 0x697   : > { %v2947_v35 = vpop.f32.mrb[8].mxu0 }
 0x698   : > { %v2949_v36 = vpop.f32.mrb[9].mxu0 }
 0x699   : > { %v2951_v23 = vpop.f32.mrb[10].mxu0 }
 0x69a   : > { %v2953_v40 = vpop.f32.mrb[11].mxu0 }
 0x69d   : > { %v2955_v41 = vpop.f32.mrb[16].mxu1 }
 0x69e   : > { %v2404_v44 = vpop.f32.mrb[17].mxu1 }
 0x69f   : > { %v2957_v45 = vpop.f32.mrb[18].mxu1 }
 0x6a0   : > { %v2405_v19 = vpop.f32.mrb[19].mxu1 }
 0x6ab   : > { %v1381_v48 = vpop.f32.mrb[12].mxu0 }
 0x6ac   : > { %v1382_v52 = vadd.f32 %v1381_v48, %v1331_v29  ;;  %v1383_v53 = vpop.f32.mrb[13].mxu0 }
 0x6ad   : > { %v1384_v55 = vadd.f32 %v1383_v53, %v1331_v29  ;;  %v1385_v56 = vpop.f32.mrb[14].mxu0 }
 0x6ae   : > { %v1431_v58 = vsel %vm800_vm6, 0.0, %v1382_v52  ;;  %v1386_v59 = vadd.f32 %v1385_v56, %v1336_v54  ;;  %v1387_v60 = vpop.f32.mrb[15].mxu0 }
 0x6af   : > { %v1443_v61 = vmul.f32 0.1, %v1431_v58  ;;  %vm1437_vm5 = vcmp.ge.f32.partialorder %v1431_v58, 0.0  ;;  %v1388_v63 = vadd.f32 %v1387_v60, %v1336_v54  ;;  %v1444_v2 = vmul.f32 0.1, %v1384_v55 }
 0x6b0   : > { %v1434_v62 = vsel %vm800_vm6, 0.0, %v1386_v59  ;;  %vm1438_vm1 = vcmp.ge.f32.partialorder %v1384_v55, 0.0 }
 0x6b1   : > { %v1424_v1 = vpop.f32.mrb[20].mxu1  ;;  %vm1440_vm15 = vcmp.ge.f32.partialorder %v1434_v62, 0.0  ;;  %v1446_v3 = vmul.f32 0.1, %v1434_v62  ;;  %vm1441_vm2 = vcmp.ge.f32.partialorder %v1388_v63, 0.0  ;;  %v1449_v7 = vsel %vm1437_vm5, %v1431_v58, %v1443_v61  ;;  %v2529_v61 = vld [vmem:[%s3147_s4 + $0x8] sm:$0xff]  }
 0x6b2   : > { %v1425_v4 = vadd.f32 %v1424_v1, %v1331_v29  ;;  %v2418_v5 = vpop.f32.mrb[21].mxu1  ;;  %v1447_v6 = vmul.f32 0.1, %v1388_v63  ;;  %v1450_v13 = vsel %vm1438_vm1, %v1384_v55, %v1444_v2 }
 0x6b3   : > { %v1427_v8 = vpop.f32.mrb[22].mxu1  ;;  %v1452_v37 = vsel %vm1440_vm15, %v1434_v62, %v1446_v3 }
 0x6b4   : > { %v1445_v9 = vmul.f32 0.1, %v1425_v4  ;;  %v1428_v10 = vadd.f32 %v1427_v8, %v1336_v54  ;;  %v2419_v11 = vpop.f32.mrb[23].mxu1  ;;  %v1461_v12 = vpack.c.bf16 %v1452_v37, %v1449_v7  ;;  %vm1439_vm4 = vcmp.ge.f32.partialorder %v1425_v4, 0.0 }
 0x6b5   : > { %v1453_v14 = vsel %vm1441_vm2, %v1388_v63, %v1447_v6 }
 0x6b6   : > { %vm1442_vm6 = vcmp.ge.f32.partialorder %v1428_v10, 0.0  ;;  %v1448_v16 = vmul.f32 0.1, %v1428_v10  ;;  %v1462_v17 = vpack.c.bf16 %v1453_v14, %v1450_v13  ;;  %v1451_v18 = vsel %vm1439_vm4, %v1425_v4, %v1445_v9 }
 0x6b8   : > { %v1454_v20 = vsel %vm1442_vm6, %v1428_v10, %v1448_v16  ;;  %1560 = vmatprep.subr.bf16.mxu0 %v1462_v17 }
 0x6b9   : > { %v1463_v42 = vpack.c.bf16 %v1454_v20, %v1451_v18  ;;  %1561 = vmatpush1.bf16.msra.mxu0 %v1461_v12 }
 0x6bb   : > { %1467 = vst.msk [vmem:[#allocation3 + $0x10] sm:$0xff] %vm1466_vm8, %v1463_v42  ;;  %1489 = vrot.lane.b32.xlu1 %v1463_v42, %s2574_s30  ;;  %1475 = vrot.lane.b32.xlu0 %v1463_v42, %s2573_s29 }
 0x6bf   : > { %1503 = vrot.lane.b32.xlu0 %v1463_v42, %s2580_s12  ;;  %1473 = vrot.lane.b32.xlu1 %v1462_v17, %s2573_s29 }
 0x6c2   : > { %v1529_v21 = vld [vmem:[#allocation3 + $0x10] sm:$0xff] }
 0x6c3   : > { %2421 = vmatpush3.bf16.msra.mxu1 %v1529_v21  ;;  %1487 = vrot.lane.b32.xlu0 %v1462_v17, %s2574_s30  ;;  %v2532_v21 = vld [vmem:[#allocation2 + $0x18] sm:$0xff] }
 0x6c4   : > { %1471 = vrot.lane.b32.xlu1 %v1461_v12, %s2573_s29  ;;  %2422 = vmatprep.subr.bf16.mxu1 %v2570_v0 }
 0x6c7   : > { %1485 = vrot.lane.b32.xlu0 %v1461_v12, %s2574_s30 }
 0x6c8   : > { %1501 = vrot.lane.b32.xlu1 %v1462_v17, %s2580_s12 }
 0x6cb   : > { %1515 = vrot.lane.b32.xlu0 %v1462_v17, %s2578_s26 }
 0x6cc   : > { %1499 = vrot.lane.b32.xlu1 %v1461_v12, %s2580_s12 }
 0x6cf   : > { %1513 = vrot.lane.b32.xlu0 %v1461_v12, %s2578_s26 }
 0x6d0   : > { %1517 = vrot.lane.b32.xlu1 %v1463_v42, %s2578_s26 }
 0x6d3   : > { %1549 = vperm.xlu0 %2523, %v2302_v27  }
 0x6d4   : > { %1544 = vperm.xlu1 %2522, %v2301_v26  }
 0x72d   : > { %v1490_v38 = vpop.permute.xlu1 %1489  ;;  %v1476_v47 = vpop.permute.xlu0 %1475 }
 0x72e   : > { %1498 = vst.msk [vmem:[#allocation3 + $0x40] sm:$0xff] %vm1466_vm8, %v1490_v38  ;;  %1484 = vst.msk [vmem:[#allocation3 + $0x28] sm:$0xff] %vm1466_vm8, %v1476_v47 }
 0x731   : > { %v1504_v46 = vpop.permute.xlu0 %1503  ;;  %v1474_v49 = vpop.permute.xlu1 %1473 }
 0x732   : > { %1512 = vst.msk [vmem:[#allocation3 + $0x58] sm:$0xff] %vm1466_vm8, %v1504_v46  ;;  %v1478_v51 = vsel %vm475_vm9, %v1474_v49, %v1476_v47 }
 0x733   : > { %1562 = vmatprep.subr.bf16.mxu0 %v1478_v51 }
 0x735   : > { %v1488_v28 = vpop.permute.xlu0 %1487  ;;  %v1532_v32 = vld [vmem:[#allocation3 + $0x28] sm:$0xff]  ;;  %v1535_v44 = vld [vmem:[#allocation3 + $0x40] sm:$0xff] }
 0x736   : > { %v1492_v30 = vsel %vm490_vm10, %v1488_v28, %v1490_v38  ;;  %v1472_v50 = vpop.permute.xlu1 %1471  ;;  %2423 = vmatpush3.bf16.msra.mxu1 %v1532_v32  ;;  %v2534_v32 = vld [vmem:[#allocation2 + $0x10] sm:$0xff] }
 0x737   : > { %v1477_v34 = vsel %vm475_vm9, %v1472_v50, %v1474_v49  ;;  %2424 = vmatprep.subr.bf16.mxu1 %v2570_v0 }
 0x738   : > { %1563 = vmatpush1.bf16.msra.mxu0 %v1477_v34 }
 0x739   : > { %v1486_v22 = vpop.permute.xlu0 %1485  ;;  %1564 = vmatprep.subr.bf16.mxu0 %v1492_v30  ;;  %v1538_v53 = vld [vmem:[#allocation3 + $0x58] sm:$0xff] }
 0x73a   : > { %v1491_v19 = vsel %vm490_vm10, %v1486_v22, %v1488_v28  ;;  %v1502_v29 = vpop.permute.xlu1 %1501  ;;  %2425 = vmatpush3.bf16.msra.mxu1 %v1535_v44  ;;  %v2535_v44 = vld [vmem:[#allocation2 + $0x8] sm:$0xff] }
 0x73b   : > { %v1506_v48 = vsel %vm1290_vm14, %v1502_v29, %v1504_v46  ;;  %2426 = vmatprep.subr.bf16.mxu1 %v2570_v0  ;;  %v2533_v46 = vld [vmem:[#allocation2] sm:$0xff] }
 0x73c   : > { %1565 = vmatpush1.bf16.msra.mxu0 %v1491_v19 }
 0x73d   : > { %v1516_v52 = vpop.permute.xlu0 %1515  ;;  %1566 = vmatprep.subr.bf16.mxu0 %v1506_v48 }
 0x73e   : > { %v1500_v54 = vpop.permute.xlu1 %1499  ;;  %2427 = vmatpush3.bf16.msra.mxu1 %v1538_v53 }
 0x73f   : > { %v1505_v55 = vsel %vm1290_vm14, %v1500_v54, %v1502_v29  ;;  %2428 = vmatprep.subr.bf16.mxu1 %v2570_v0  ;;  %v2536_v54 = vld [vmem:[#allocation2 + $0x20] sm:$0xff] }
 0x740   : > { %1567 = vmatpush1.bf16.msra.mxu0 %v1505_v55 }
 0x741   : > { %v1514_v56 = vpop.permute.xlu0 %1513 }
 0x742   : > { %v1519_v58 = vsel %vm883_vm3, %v1514_v56, %v1516_v52  ;;  %v1518_v59 = vpop.permute.xlu1 %1517  ;;  %v2537_v56 = vld [vmem:[#allocation2 + $0x28] sm:$0xff] }
 0x743   : > { %v1520_v60 = vsel %vm883_vm3, %v1516_v52, %v1518_v59  ;;  %1526 = vst.msk [vmem:[#allocation3 + $0x70] sm:$0xff] %vm1466_vm8, %v1518_v59  ;;  %vm1727_vm8 = vcmask 982016  }
 0x744   : > { %1568 = vmatprep.subr.bf16.mxu0 %v1520_v60 }
 0x745   : > { %1569 = vmatpush1.bf16.msra.mxu0 %v1519_v58 }
 0x748   : > { %2304 = vmatmul.mubr.msk.bf16.vlgmr.msra.gmra.mrb[16].mxu0 %vm1343_vm11, %v2529_v61 }
 0x749   : > { %1861 = vmatprep.mubr.bf16.mxu0 %v2572_v39 }
 0x74a   : > { %v1541_v62 = vld [vmem:[#allocation3 + $0x70] sm:$0xff] }
 0x74b   : > { %2429 = vmatpush3.bf16.msra.mxu1 %v1541_v62 }
 0x74c   : > { %2434 = vmatprep.subr.bf16.mxu1 %v2570_v0 }
 0x74e   : > { %2431 = vmatmul.mubr.msk.bf16.vlgmr.msra.gmra.mrb[24].mxu1 %vm1343_vm11, %v2529_v61 }
 0x74f   : > { %2444 = vmatprep.mubr.msk.bf16.mxu1 %vm2575_vm12, %v2570_v0  ;;  %vm1674_vm12 = vcmask 64512  }
 0x752   : > { %v1550_v3 = vpop.permute.xlu0 %1549 }
 0x753   : > { %v1545_v1 = vpop.permute.xlu1 %1544 }
 0x81b   : > { %v1594_v63 = vpop.f32.mrb[16].mxu0 }
 0x81c   : > { %v1596_v2 = vpop.f32.mrb[17].mxu0  ;;  %v1595_v11 = vadd.f32 %v1594_v63, %v1545_v1 }
 0x81d   : > { %v1597_v4 = vadd.f32 %v1596_v2, %v1545_v1  ;;  %v1598_v5 = vpop.f32.mrb[18].mxu0 }
 0x81e   : > { %v1599_v6 = vadd.f32 %v1598_v5, %v1550_v3  ;;  %v1600_v7 = vpop.f32.mrb[19].mxu0  ;;  %v1650_v16 = vsel %vm1644_vm13, 0.0, %v1595_v11 }
 0x81f   : > { %1664 = vrot.lane.b32.xlu0 %v1597_v4, %s2581_s11  ;;  %v1601_v17 = vadd.f32 %v1600_v7, %v1550_v3  ;;  %v2309_v7 = vld [vmem:[%s3148_s5 + $0x28] sm:$0xff] }
 0x820   : > { %v1653_v10 = vsel %vm1644_vm13, 0.0, %v1599_v6  ;;  %v2308_v6 = vld [vmem:[%s3148_s5 + $0x20] sm:$0xff]  ;;  %vm1742_vm13 = vcmask 957440  }
 0x821   : > { %v1637_v8 = vpop.f32.mrb[24].mxu1 }
 0x822   : > { %v1638_v37 = vadd.f32 %v1637_v8, %v1545_v1  ;;  %v2432_v9 = vpop.f32.mrb[25].mxu1 }
 0x823   : > { %v1640_v12 = vpop.f32.mrb[26].mxu1  ;;  %1668 = vrot.lane.b32.xlu0 %v1653_v10, %s2581_s11 }
 0x824   : > { %v1641_v13 = vadd.f32 %v1640_v12, %v1550_v3  ;;  %v2433_v14 = vpop.f32.mrb[27].mxu1  ;;  %1666 = vrot.lane.b32.xlu1 %v1638_v37, %s2581_s11 }
 0x827   : > { %1672 = vrot.lane.b32.xlu0 %v1641_v13, %s2581_s11 }
 0x828   : > { %1662 = vrot.lane.b32.xlu1 %v1650_v16, %s2581_s11 }
 0x82c   : > { %1670 = vrot.lane.b32.xlu1 %v1601_v17, %s2581_s11 }
 0x891   : > { %v1665_v18 = vpop.permute.xlu0 %1664 }
 0x895   : > { %v1669_v20 = vpop.permute.xlu0 %1668 }
 0x896   : > { %v1667_v42 = vpop.permute.xlu1 %1666  ;;  %v3008_v27 = vadd.f32 %v2532_v21, %v1669_v20 }
 0x897   : > { %v1676_v47 = vsel %vm1674_vm12, %v1665_v18, %v1667_v42 }
 0x898   : > { %v1700_v38 = vmul.f32 0.1, %v3008_v27  ;;  %vm1694_vm5 = vcmp.ge.f32.partialorder %v3008_v27, 0.0  ;;  %v3018_v30 = vadd.f32 %v2534_v32, %v1676_v47 }
 0x899   : > { %v1673_v22 = vpop.permute.xlu0 %1672 }
 0x89a   : > { %v1663_v26 = vpop.permute.xlu1 %1662  ;;  %v1706_v50 = vsel %vm1694_vm5, %v3008_v27, %v1700_v38  ;;  %v1699_v61 = vmul.f32 0.1, %v3018_v30  ;;  %vm1693_vm4 = vcmp.ge.f32.partialorder %v3018_v30, 0.0  ;;  %vm1772_vm5 = vcmask 908288  }
 0x89b   : > { %v3012_v49 = vadd.f32 %v2533_v46, %v1663_v26  ;;  %v1675_v51 = vsel %vm1674_vm12, %v1663_v26, %v1665_v18 }
 0x89c   : > { %v3021_v19 = vadd.f32 %v2535_v44, %v1675_v51  ;;  %v1705_v2 = vsel %vm1693_vm4, %v3018_v30, %v1699_v61 }
 0x89d   : > { %vm1691_vm15 = vcmp.ge.f32.partialorder %v3012_v49, 0.0  ;;  %v1697_v28 = vmul.f32 0.1, %v3012_v49 }
 0x89e   : > { %v1671_v34 = vpop.permute.xlu1 %1670  ;;  %v1698_v62 = vmul.f32 0.1, %v3021_v19  ;;  %vm1692_vm6 = vcmp.ge.f32.partialorder %v3021_v19, 0.0 }
 0x89f   : > { %v1703_v29 = vsel %vm1691_vm15, %v3012_v49, %v1697_v28  ;;  %v1677_v48 = vsel %vm1674_vm12, %v1669_v20, %v1671_v34  ;;  %v1678_v52 = vsel %vm1674_vm12, %v1671_v34, %v1673_v22  ;;  %vm1757_vm12 = vcmask 932864  }
 0x8a0   : > { %v1715_v53 = vpack.c.bf16 %v1706_v50, %v1703_v29  ;;  %v3026_v55 = vadd.f32 %v2536_v54, %v1677_v48  ;;  %v3028_v58 = vadd.f32 %v2537_v56, %v1678_v52  ;;  %v1704_v3 = vsel %vm1692_vm6, %v3021_v19, %v1698_v62  ;;  %v2530_v54 = vld [vmem:[%s3147_s4 + $0x10] sm:$0xff]  }
 0x8a1   : > { %vm1787_vm15 = vcmask 883712  }
 0x8a2   : > { %vm1695_vm1 = vcmp.ge.f32.partialorder %v3026_v55, 0.0  ;;  %v1701_v59 = vmul.f32 0.1, %v3026_v55  ;;  %vm1696_vm2 = vcmp.ge.f32.partialorder %v3028_v58, 0.0  ;;  %v1702_v60 = vmul.f32 0.1, %v3028_v58  ;;  %1736 = vrot.lane.b32.xlu0 %v1715_v53, %s2582_s13  ;;  %1721 = vrot.lane.b32.xlu1 %v1715_v53, %s2583_s14 }
 0x8a4   : > { %v1707_v63 = vsel %vm1695_vm1, %v3026_v55, %v1701_v59  ;;  %v1708_v1 = vsel %vm1696_vm2, %v3028_v58, %v1702_v60 }
 0x8a5   : > { %v1716_v4 = vpack.c.bf16 %v1707_v63, %v1704_v3  ;;  %v1717_v5 = vpack.c.bf16 %v1708_v1, %v1705_v2 }
 0x8a6   : > { %1766 = vrot.lane.b32.xlu0 %v1715_v53, %s2584_s15  ;;  %1751 = vrot.lane.b32.xlu1 %v1715_v53, %s2585_s16 }
 0x8aa   : > { %1725 = vrot.lane.b32.xlu0 %v1717_v5, %s2583_s14  ;;  %1723 = vrot.lane.b32.xlu1 %v1716_v4, %s2583_s14 }
 0x8ae   : > { %1738 = vrot.lane.b32.xlu0 %v1716_v4, %s2582_s13  ;;  %1740 = vrot.lane.b32.xlu1 %v1717_v5, %s2582_s13 }
 0x8b2   : > { %1755 = vrot.lane.b32.xlu0 %v1717_v5, %s2585_s16  ;;  %1753 = vrot.lane.b32.xlu1 %v1716_v4, %s2585_s16 }
 0x8b6   : > { %1768 = vrot.lane.b32.xlu0 %v1716_v4, %s2584_s15  ;;  %1770 = vrot.lane.b32.xlu1 %v1717_v5, %s2584_s15  ;;  %s2587_s15 = smov 12  }
 0x8ba   : > { %1785 = vrot.lane.b32.xlu0 %v1717_v5, %s2586_s17  ;;  %1783 = vrot.lane.b32.xlu1 %v1716_v4, %s2586_s17 }
 0x8be   : > { %1813 = vperm.xlu0 %2523, %v2308_v6   ;;  %1781 = vrot.lane.b32.xlu1 %v1715_v53, %s2586_s17 }
 0x8c2   : > { %1818 = vperm.xlu1 %2522, %v2309_v7  }
 0x914   : > { %v1737_v8 = vpop.permute.xlu0 %1736  ;;  %v1722_v37 = vpop.permute.xlu1 %1721 }
 0x918   : > { %v1767_v9 = vpop.permute.xlu0 %1766  ;;  %v1752_v10 = vpop.permute.xlu1 %1751 }
 0x91c   : > { %v1726_v11 = vpop.permute.xlu0 %1725  ;;  %v1724_v12 = vpop.permute.xlu1 %1723 }
 0x91d   : > { %1735 = vst.msk [vmem:[#allocation3 + $0x10] sm:$0xff] %vm830_vm7, %v1726_v11  ;;  %v1728_v13 = vsel %vm1727_vm8, %v1722_v37, %v1724_v12  ;;  %v1729_v14 = vsel %vm1727_vm8, %v1724_v12, %v1726_v11 }
 0x91e   : > { %1829 = vmatprep.subr.bf16.mxu0 %v1729_v14 }
 0x91f   : > { %1830 = vmatpush1.bf16.msra.mxu0 %v1728_v13 }
 0x920   : > { %v1739_v16 = vpop.permute.xlu0 %1738  ;;  %v1741_v17 = vpop.permute.xlu1 %1740 }
 0x921   : > { %v1743_v18 = vsel %vm1742_vm13, %v1737_v8, %v1739_v16  ;;  %v1744_v20 = vsel %vm1742_vm13, %v1739_v16, %v1741_v17  ;;  %1750 = vst.msk [vmem:[#allocation3 + $0x28] sm:$0xff] %vm830_vm7, %v1741_v17 }
 0x922   : > { %1831 = vmatprep.subr.bf16.mxu0 %v1744_v20 }
 0x923   : > { %1832 = vmatpush1.bf16.msra.mxu0 %v1743_v18 }
 0x924   : > { %v1756_v42 = vpop.permute.xlu0 %1755  ;;  %v1754_v21 = vpop.permute.xlu1 %1753  ;;  %v1798_v26 = vld [vmem:[#allocation3 + $0x10] sm:$0xff] }
 0x925   : > { %1765 = vst.msk [vmem:[#allocation3 + $0x40] sm:$0xff] %vm830_vm7, %v1756_v42  ;;  %v1758_v38 = vsel %vm1757_vm12, %v1752_v10, %v1754_v21  ;;  %v1759_v47 = vsel %vm1757_vm12, %v1754_v21, %v1756_v42  ;;  %2435 = vmatpush3.bf16.msra.mxu1 %v1798_v26 }
 0x926   : > { %2436 = vmatprep.subr.bf16.mxu1 %v2570_v0  ;;  %1833 = vmatprep.subr.bf16.mxu0 %v1759_v47 }
 0x927   : > { %1834 = vmatpush1.bf16.msra.mxu0 %v1758_v38 }
 0x928   : > { %v1769_v46 = vpop.permute.xlu0 %1768  ;;  %v1771_v51 = vpop.permute.xlu1 %1770  ;;  %v1801_v28 = vld [vmem:[#allocation3 + $0x28] sm:$0xff] }
 0x929   : > { %v1773_v32 = vsel %vm1772_vm5, %v1767_v9, %v1769_v46  ;;  %v1774_v50 = vsel %vm1772_vm5, %v1769_v46, %v1771_v51  ;;  %1780 = vst.msk [vmem:[#allocation3 + $0x58] sm:$0xff] %vm830_vm7, %v1771_v51  ;;  %2437 = vmatpush3.bf16.msra.mxu1 %v1801_v28  ;;  %v2292_v28 = vld [vmem:[%s3146_s3 + $0x38] sm:$0xff] }
 0x92a   : > { %2438 = vmatprep.subr.bf16.mxu1 %v2570_v0  ;;  %1835 = vmatprep.subr.bf16.mxu0 %v1774_v50  ;;  %v2316_v50 = vld [vmem:[%s3148_s5 + $0x38] sm:$0xff] }
 0x92b   : > { %1836 = vmatpush1.bf16.msra.mxu0 %v1773_v32  ;;  %v2291_v32 = vld [vmem:[%s3146_s3 + $0x30] sm:$0xff] }
 0x92c   : > { %v1786_v34 = vpop.permute.xlu0 %1785  ;;  %v1784_v22 = vpop.permute.xlu1 %1783  ;;  %v1804_v44 = vld [vmem:[#allocation3 + $0x40] sm:$0xff] }
 0x92d   : > { %1795 = vst.msk [vmem:[#allocation3 + $0x70] sm:$0xff] %vm830_vm7, %v1786_v34  ;;  %v1789_v29 = vsel %vm1787_vm15, %v1784_v22, %v1786_v34  ;;  %2439 = vmatpush3.bf16.msra.mxu1 %v1804_v44  ;;  %vm1913_vm7 = vcmp.lt.s32.totalorder %v2764_v57, 4  ;;  %v2315_v34 = vld [vmem:[%s3148_s5 + $0x30] sm:$0xff] }
 0x92e   : > { %2440 = vmatprep.subr.bf16.mxu1 %v2570_v0  ;;  %1837 = vmatprep.subr.bf16.mxu0 %v1789_v29 }
 0x930   : > { %v1782_v48 = vpop.permute.xlu1 %1781  ;;  %v1807_v52 = vld [vmem:[#allocation3 + $0x58] sm:$0xff] }
 0x931   : > { %v1788_v53 = vsel %vm1787_vm15, %v1782_v48, %v1784_v22  ;;  %2441 = vmatpush3.bf16.msra.mxu1 %v1807_v52 }
 0x932   : > { %2442 = vmatprep.subr.bf16.mxu1 %v2570_v0  ;;  %1838 = vmatpush1.bf16.msra.mxu0 %v1788_v53 }
 0x934   : > { %v1810_v56 = vld [vmem:[#allocation3 + $0x70] sm:$0xff] }
 0x935   : > { %2443 = vmatpush3.bf16.msra.mxu1 %v1810_v56  ;;  %2311 = vmatmul.mubr.msk.bf16.vlgmr.msra.gmra.mrb[20].mxu0 %vm1343_vm11, %v2530_v54 }
 0x936   : > { %2065 = vmatprep.mubr.bf16.mxu0 %v2572_v39 }
 0x938   : > { %2445 = vmatmul.mubr.msk.bf16.vlgmr.msra.gmra.mrb[28].mxu1 %vm1343_vm11, %v2530_v54 }
 0x93d   : > { %v1814_v59 = vpop.permute.xlu0 %1813 }
 0x941   : > { %v1819_v63 = vpop.permute.xlu1 %1818 }
 0xa08   : > { %v1863_v60 = vpop.f32.mrb[20].mxu0 }
 0xa09   : > { %v1864_v61 = vadd.f32 %v1863_v60, %v1814_v59  ;;  %v1865_v62 = vpop.f32.mrb[21].mxu0 }
 0xa0a   : > { %v1866_v1 = vadd.f32 %v1865_v62, %v1814_v59  ;;  %v1867_v2 = vpop.f32.mrb[22].mxu0 }
 0xa0b   : > { %v1906_v3 = vpop.f32.mrb[28].mxu1  ;;  %v1919_v0 = vsel %vm1913_vm7, 0.0, %v1864_v61  ;;  %v1868_v4 = vadd.f32 %v1867_v2, %v1819_v63  ;;  %v1869_v5 = vpop.f32.mrb[23].mxu0 }
 0xa0c   : > { %v1907_v6 = vadd.f32 %v1906_v3, %v1814_v59  ;;  %v2446_v7 = vpop.f32.mrb[29].mxu1  ;;  %v1931_v37 = vmul.f32 0.1, %v1919_v0  ;;  %v1932_v39 = vmul.f32 0.1, %v1866_v1  ;;  %v1870_v10 = vadd.f32 %v1869_v5, %v1819_v63 }
 0xa0d   : > { %v1909_v8 = vpop.f32.mrb[30].mxu1  ;;  %v1922_v9 = vsel %vm1913_vm7, 0.0, %v1868_v4  ;;  %vm1925_vm1 = vcmp.ge.f32.partialorder %v1919_v0, 0.0  ;;  %vm1926_vm2 = vcmp.ge.f32.partialorder %v1866_v1, 0.0  ;;  %v2531_v7 = vld [vmem:[%s3147_s4 + $0x18] sm:$0xff]  }
 0xa0e   : > { %v1933_v11 = vmul.f32 0.1, %v1907_v6  ;;  %v1910_v12 = vadd.f32 %v1909_v8, %v1819_v63  ;;  %v2447_v13 = vpop.f32.mrb[31].mxu1  ;;  %vm1927_vm4 = vcmp.ge.f32.partialorder %v1907_v6, 0.0  ;;  %vm1928_vm6 = vcmp.ge.f32.partialorder %v1922_v9, 0.0 }
 0xa0f   : > { %v1934_v14 = vmul.f32 0.1, %v1922_v9  ;;  %vm1929_vm8 = vcmp.ge.f32.partialorder %v1870_v10, 0.0  ;;  %v1935_v17 = vmul.f32 0.1, %v1870_v10  ;;  %v1937_v18 = vsel %vm1925_vm1, %v1919_v0, %v1931_v37 }
 0xa10   : > { %vm1930_vm13 = vcmp.ge.f32.partialorder %v1910_v12, 0.0  ;;  %v1936_v16 = vmul.f32 0.1, %v1910_v12  ;;  %v1938_v20 = vsel %vm1926_vm2, %v1866_v1, %v1932_v39  ;;  %v1939_v21 = vsel %vm1927_vm4, %v1907_v6, %v1933_v11 }
 0xa11   : > { %v1940_v42 = vsel %vm1928_vm6, %v1922_v9, %v1934_v14  ;;  %v1941_v47 = vsel %vm1929_vm8, %v1870_v10, %v1935_v17 }
 0xa12   : > { %v1942_v26 = vsel %vm1930_vm13, %v1910_v12, %v1936_v16  ;;  %v1949_v38 = vpack.c.bf16 %v1940_v42, %v1937_v18  ;;  %v1950_v51 = vpack.c.bf16 %v1941_v47, %v1938_v20 }
 0xa13   : > { %v1951_v46 = vpack.c.bf16 %v1942_v26, %v1939_v21 }
 0xa14   : > { %2033 = vmatprep.subr.bf16.mxu0 %v1950_v51 }
 0xa15   : > { %1973 = vrot.lane.b32.xlu0 %v1951_v46, %s2574_s30  ;;  %1961 = vrot.lane.b32.xlu1 %v1951_v46, %s2573_s29 }
 0xa16   : > { %2034 = vmatpush1.bf16.msra.mxu0 %v1949_v38 }
 0xa19   : > { %1985 = vrot.lane.b32.xlu1 %v1951_v46, %s2580_s12  ;;  %1959 = vrot.lane.b32.xlu0 %v1950_v51, %s2573_s29 }
 0xa1d   : > { %1971 = vrot.lane.b32.xlu1 %v1950_v51, %s2574_s30  ;;  %1957 = vrot.lane.b32.xlu0 %v1949_v38, %s2573_s29 }
 0xa21   : > { %1969 = vrot.lane.b32.xlu1 %v1949_v38, %s2574_s30  ;;  %1983 = vrot.lane.b32.xlu0 %v1950_v51, %s2580_s12 }
 0xa25   : > { %1995 = vrot.lane.b32.xlu1 %v1950_v51, %s2578_s26  ;;  %1981 = vrot.lane.b32.xlu0 %v1949_v38, %s2580_s12 }
 0xa29   : > { %1993 = vrot.lane.b32.xlu1 %v1949_v38, %s2578_s26  ;;  %1997 = vrot.lane.b32.xlu0 %v1951_v46, %s2578_s26 }
 0xa2d   : > { %1124 = vperm.xlu1 %2522, %v2292_v28   ;;  %1119 = vperm.xlu0 %2523, %v2291_v32  }
 0xa31   : > { %2022 = vperm.xlu1 %2522, %v2316_v50   ;;  %2017 = vperm.xlu0 %2523, %v2315_v34  }
 0xa87   : > { %v1974_v22 = vpop.permute.xlu0 %1973  ;;  %v1962_v44 = vpop.permute.xlu1 %1961 }
 0xa8b   : > { %v1986_v29 = vpop.permute.xlu1 %1985  ;;  %v1960_v48 = vpop.permute.xlu0 %1959 }
 0xa8c   : > { %v1964_v52 = vsel %vm475_vm9, %v1960_v48, %v1962_v44 }
 0xa8d   : > { %2035 = vmatprep.subr.bf16.mxu0 %v1964_v52 }
 0xa8f   : > { %v1972_v53 = vpop.permute.xlu1 %1971  ;;  %v1958_v54 = vpop.permute.xlu0 %1957 }
 0xa90   : > { %v1976_v56 = vsel %vm490_vm10, %v1972_v53, %v1974_v22  ;;  %v1963_v59 = vsel %vm475_vm9, %v1958_v54, %v1960_v48  ;;  %vm1219_vm9 = vcmp.lt.s32.totalorder %v2764_v57, 12 }
 0xa91   : > { %2036 = vmatpush1.bf16.msra.mxu0 %v1963_v59 }
 0xa92   : > { %2037 = vmatprep.subr.bf16.mxu0 %v1976_v56 }
 0xa93   : > { %v1970_v60 = vpop.permute.xlu1 %1969  ;;  %v1984_v61 = vpop.permute.xlu0 %1983 }
 0xa94   : > { %v1975_v62 = vsel %vm490_vm10, %v1970_v60, %v1972_v53  ;;  %v1988_v63 = vsel %vm1290_vm14, %v1984_v61, %v1986_v29  ;;  %vm3151_vm10 = vcmask 195584  }
 0xa95   : > { %2038 = vmatpush1.bf16.msra.mxu0 %v1975_v62 }
 0xa96   : > { %2039 = vmatprep.subr.bf16.mxu0 %v1988_v63 }
 0xa97   : > { %v1996_v1 = vpop.permute.xlu1 %1995  ;;  %v1982_v2 = vpop.permute.xlu0 %1981 }
 0xa98   : > { %v1987_v3 = vsel %vm1290_vm14, %v1982_v2, %v1984_v61  ;;  %vm2144_vm14 = vcmask 850944  }
 0xa99   : > { %2040 = vmatpush1.bf16.msra.mxu0 %v1987_v3 }
 0xa9b   : > { %v1994_v0 = vpop.permute.xlu1 %1993  ;;  %v1998_v4 = vpop.permute.xlu0 %1997 }
 0xa9c   : > { %v1999_v5 = vsel %vm883_vm3, %v1994_v0, %v1996_v1  ;;  %v2000_v6 = vsel %vm883_vm3, %v1996_v1, %v1998_v4  ;;  %vm3152_vm3 = vmmov %vm3151_vm10 }
 0xa9d   : > { %2041 = vmatprep.subr.bf16.mxu0 %v2000_v6 }
 0xa9e   : > { %2042 = vmatpush1.bf16.msra.mxu0 %v1999_v5 }
 0xaa1   : > { %2318 = vmatmul.mubr.msk.bf16.vlgmr.msra.gmra.mrb[24].mxu0 %vm1343_vm11, %v2531_v7 }
 0xaac   : > { %v1125_v8 = vpop.permute.xlu1 %1124  ;;  %v1120_v37 = vpop.permute.xlu0 %1119 }
 0xaad   : > { %v1170_v39 = vadd.f32 %v2947_v35, %v1120_v37  ;;  %v1172_v9 = vadd.f32 %v2949_v36, %v1120_v37  ;;  %v1174_v10 = vadd.f32 %v2951_v23, %v1125_v8  ;;  %v1213_v12 = vadd.f32 %v2955_v41, %v1120_v37 }
 0xaae   : > { %v1176_v14 = vadd.f32 %v2953_v40, %v1125_v8  ;;  %v1216_v16 = vadd.f32 %v2957_v45, %v1125_v8 }
 0xaaf   : > { %v1225_v11 = vsel %vm1219_vm9, 0.0, %v1170_v39  ;;  %1239 = vrot.lane.b32.xlu1 %v1172_v9, %s2587_s15  ;;  %v1228_v13 = vsel %vm1219_vm9, 0.0, %v1174_v10 }
 0xab0   : > { %1237 = vrot.lane.b32.xlu0 %v1225_v11, %s2587_s15  ;;  %v2018_v57 = vpop.permute.xlu0 %2017  ;;  %v2023_v42 = vpop.permute.xlu1 %2022 }
 0xab3   : > { %1243 = vrot.lane.b32.xlu1 %v1228_v13, %s2587_s15 }
 0xab4   : > { %1241 = vrot.lane.b32.xlu0 %v1213_v12, %s2587_s15 }
 0xab7   : > { %1247 = vrot.lane.b32.xlu1 %v1216_v16, %s2587_s15 }
 0xab8   : > { %1245 = vrot.lane.b32.xlu0 %v1176_v14, %s2587_s15 }
 0xb21   : > { %v1240_v45 = vpop.permute.xlu1 %1239 }
 0xb22   : > { %v1238_v40 = vpop.permute.xlu0 %1237 }
 0xb23   : > { %v1249_v28 = vsel %vm1075_vm0, %v1238_v40, %v1240_v45  ;;  %v1259_v50 = vadd.f32 %v1238_v40, %v2811_v31 }
 0xb24   : > { %v1260_v53 = vadd.f32 %v1249_v28, %v2815_v33 }
 0xb25   : > { %v1244_v38 = vpop.permute.xlu1 %1243 }
 0xb26   : > { %v1242_v26 = vpop.permute.xlu0 %1241 }
 0xb27   : > { %v1250_v51 = vsel %vm1075_vm0, %v1240_v45, %v1242_v26 }
 0xb28   : > { %v1261_v44 = vadd.f32 %v1250_v51, %v2807_v25 }
 0xb29   : > { %v1248_v46 = vpop.permute.xlu1 %1247 }
 0xb2a   : > { %v1246_v47 = vpop.permute.xlu0 %1245 }
 0xb2b   : > { %v1251_v29 = vsel %vm1075_vm0, %v1244_v38, %v1246_v47  ;;  %v1252_v54 = vsel %vm1075_vm0, %v1246_v47, %v1248_v46  ;;  %vm2142_vm0 = vcmask 1043456  }
 0xb2c   : > { %v1263_v61 = vadd.f32 %v1251_v29, %v2826_v15  ;;  %v1264_v1 = vadd.f32 %v1252_v54, %v2829_v43 }
 0xb74   : > { %v2067_v35 = vpop.f32.mrb[24].mxu0 }
 0xb75   : > { %v2068_v36 = vadd.f32 %v2067_v35, %v2018_v57  ;;  %v2069_v17 = vpop.f32.mrb[25].mxu0 }
 0xb76   : > { %v2070_v23 = vadd.f32 %v2069_v17, %v2018_v57  ;;  %v2071_v18 = vpop.f32.mrb[26].mxu0 }
 0xb77   : > { %v2073_v20 = vpop.f32.mrb[27].mxu0  ;;  %2080 = vrot.lane.b32.xlu0 %v2068_v36, %s2571_s24  ;;  %v2072_v41 = vadd.f32 %v2071_v18, %v2023_v42 }
 0xb78   : > { %2082 = vrot.lane.b32.xlu1 %v2070_v23, %s2571_s24  ;;  %v2074_v21 = vadd.f32 %v2073_v20, %v2023_v42 }
 0xb7b   : > { %2084 = vrot.lane.b32.xlu0 %v2072_v41, %s2571_s24 }
 0xb7c   : > { %2086 = vrot.lane.b32.xlu1 %v2074_v21, %s2571_s24  ;;  %s2588_s24 = smov 104  }
 0xbe9   : > { %v2081_v32 = vpop.permute.xlu0 %2080 }
 0xbea   : > { %v2096_v34 = vadd.f32 %v2081_v32, %v3012_v49  ;;  %v2083_v22 = vpop.permute.xlu1 %2082  ;;  %v1262_v49 = vadd.f32 %v1244_v38, %v2804_v24 }
 0xbeb   : > { %v2088_v48 = vsel %vm3151_vm10, %v2081_v32, %v2083_v22  ;;  %v2098_v52 = vadd.f32 %v2083_v22, %v3018_v30 }
 0xbec   : > { %v2102_v56 = vadd.f32 %v2096_v34, %v1259_v50  ;;  %v2097_v59 = vadd.f32 %v2088_v48, %v3021_v19 }
 0xbed   : > { %v2104_v60 = vadd.f32 %v2098_v52, %v1261_v44  ;;  %v2085_v31 = vpop.permute.xlu0 %2084 }
 0xbee   : > { %v2103_v25 = vadd.f32 %v2097_v59, %v1260_v53  ;;  %v2099_v62 = vadd.f32 %v2085_v31, %v3008_v27  ;;  %v2087_v63 = vpop.permute.xlu1 %2086  ;;  %v2108_v3 = vmul.f32 0.5, %v2102_v56 }
 0xbef   : > { %v2110_v30 = vmul.f32 0.5, %v2104_v60  ;;  %v2089_v33 = vsel %vm3152_vm3, %v2085_v31, %v2087_v63  ;;  %v2101_v2 = vadd.f32 %v2087_v63, %v3028_v58 }
 0xbf0   : > { %v2109_v0 = vmul.f32 0.5, %v2103_v25  ;;  %v2105_v19 = vadd.f32 %v2099_v62, %v1262_v49  ;;  %v2100_v4 = vadd.f32 %v2089_v33, %v3026_v55 }
 0xbf1   : > { %v2329_v5 = vpack.c.bf16 %v2110_v30, %v2110_v30  ;;  %v2107_v24 = vadd.f32 %v2101_v2, %v1264_v1 }
 0xbf2   : > { %v2328_v6 = vpack.c.bf16 %v2109_v0, %v2108_v3  ;;  %v2106_v15 = vadd.f32 %v2100_v4, %v1263_v61  ;;  %v2111_v27 = vmul.f32 0.5, %v2105_v19 }
 0xbf3   : > { %v2113_v7 = vmul.f32 0.5, %v2107_v24  ;;  %2132 = vrot.lane.b32.xlu1 %v2329_v5, %s2588_s24 }
 0xbf4   : > { %v2112_v43 = vmul.f32 0.5, %v2106_v15  ;;  %2130 = vrot.lane.b32.xlu0 %v2328_v6, %s2588_s24 }
 0xbf5   : > { %v2331_v8 = vpack.c.bf16 %v2113_v7, %v2113_v7 }
 0xbf6   : > { %v2330_v37 = vpack.c.bf16 %v2112_v43, %v2111_v27 }
 0xbf7   : > { %2136 = vrot.lane.b32.xlu1 %v2331_v8, %s2588_s24 }
 0xbf8   : > { %2134 = vrot.lane.b32.xlu0 %v2330_v37, %s2588_s24 }
 0xc65   : > { %v2133_v58 = vpop.permute.xlu1 %2132 }
 0xc66   : > { %v2139_v39 = vrot.slane %v2133_v58, 4  ;;  %v2131_v9 = vpop.permute.xlu0 %2130 }
 0xc67   : > { %v2138_v55 = vrot.slane %v2131_v9, 4 }
 0xc69   : > { %v2143_v10 = vsel %vm2142_vm0, %v2138_v55, %v2139_v39  ;;  %v2137_v11 = vpop.permute.xlu1 %2136 }
 0xc6a   : > { %v2145_v12 = vsel %vm2144_vm14, %v2131_v9, %v2143_v10  ;;  %v2141_v13 = vrot.slane %v2137_v11, 4  ;;  %v2135_v14 = vpop.permute.xlu0 %2134 }
 0xc6b   : > { %2150 = vst [vmem:[%s374_s18] sm:$0xff] %v2145_v12  ;;  %v2140_v16 = vrot.slane %v2135_v14, 4 }
 0xc6d   : > { %v2146_v57 = vsel %vm2142_vm0, %v2140_v16, %v2141_v13 }
 0xc6e   : > { %v2147_v35 = vsel %vm2144_vm14, %v2135_v14, %v2146_v57 }
 0xc6f   : > { %2151 = vst [vmem:[%s374_s18 + $0x8] sm:$0xff] %v2147_v35 }
 0xc70 PF: > { %s16_s22 = sadd.s32 1, %s2568_s22   ;;  %s3153_s21 = smov %s2564_s0 }
 0xc71   : > { %p13_p6 = scmp.ge.s32.totalorder %s16_s22, 4   ;;  %s3154_s0 = smov %s3156_s23 }
 0xc73   :  { %15 = sbr.rel (!%p13_p6) target bundleno = 2 (0x2), region = 135 }

// kernel: _lambda_.9
= control target key start
LH: loop header
LB: loop body
LE: loop exit
PB: predicated region body
PF: predicated region fallthrough
CT: control target
= control target key end

     0   :  { %s4836_s0 = inlined_call_operand.vmem [shape: bf16[2,8,1024], index: 0, kind: input, shape index: {}, may-alias: {0,1}]   ;;  %s4837_s1 = inlined_call_operand.vmem [shape: bf16[2,8,1024], index: 1, kind: input, shape index: {}, may-alias: {0,1}]   ;;  %s4838_s2 = inlined_call_operand.vmem [shape: bf16[4,8,24], index: 2, kind: input, shape index: {}]   ;;  %s4839_s3 = inlined_call_operand.vmem [shape: f32[4,8,1], index: 3, kind: input, shape index: {}]   ;;  %s4840_s4 = inlined_call_operand.vmem [shape: bf16[4,8,40], index: 4, kind: input, shape index: {}]   ;;  %s4841_s5 = inlined_call_operand.vmem [shape: f32[4,8,1], index: 5, kind: input, shape index: {}]   ;;  %s4842_s6 = inlined_call_operand.vmem [shape: bf16[1,56], index: 6, kind: input, shape index: {}]   ;;  %s4843_s7 = inlined_call_operand.<no memory space> [shape: f32[1,1], index: 7, kind: input, shape index: {}]   ;;  %s4844_s8 = inlined_call_operand.hbm [shape: f32[2,1,1024], index: 8, kind: output, shape index: {}]  }
   0x1   :  { %v13_v0 = vstv %s4843_s7 }
   0x2   :  { %14 = vst [vmem:[#allocation4] sm:$0x1] %v13_v0 }
   0x3   :  { %15 = vsyncpa [#allocation6], 0 }
   0x4   :  { %17 = vsyncpa [#allocation6 + $0x1], 0  ;;  %s3893_s29 = smov 0   ;;  %s3895_s30 = smov 0  }
   0x5   :  { %s3897_s9 = smov 0   ;;  %s3899_s10 = smov 0  }
   0x6   :  { %s3901_s11 = smov 0   ;;  %s3903_s12 = smov 0  }
   0x7   :  { %s3905_s13 = smov 0   ;;  %s3907_s14 = smov 0  }
   0x8 LB: > { %4848 = sst [smem:[#allocation8_spill]] %s3814_s13  ;;  %s3415_s7 = sadd.s32 4294967295, %s3818_s14   ;;  %s3818_s14 = sphi %s3907_s14, %s23_s14   ;;  %s3814_s13 = sphi %s3905_s13, %s4861_s13   ;;  %s3810_s12 = sphi %s3903_s12, %s4866_s12   ;;  %s3806_s11 = sphi %s3901_s11, %s4859_s11   ;;  %s3802_s10 = sphi %s3899_s10, %s4865_s10   ;;  %s3798_s9 = sphi %s3897_s9, %s4864_s9   ;;  %s3794_s30 = sphi %s3895_s30, %s4863_s30   ;;  %s3790_s29 = sphi %s3893_s29, %s4862_s29  }
   0x9   : > { %s3416_s15 = sadd.s32 4294967294, %s3818_s14   ;;  %s32_s16 = sadd.s32 1, %s3810_s12 }
   0xa   : > { %p33_p0 = scmp.ge.s32.totalorder %s32_s16, 2  ;;  %s35_s17 = sadd.s32 1, %s3814_s13 }
   0xb   : > { %p244_p1 = scmp.ne.s32.totalorder %s3798_s9, %s3794_s30  ;;  %p245_p2 = scmp.eq.s32.totalorder %s3415_s7, 3 }
   0xc   : > { %s4868_s16 = smov (%p33_p0, %s32_s16), 0  ;;  %s4870_s17 = smov (!%p33_p0, %s35_s17), %s3814_s13 }
   0xd   : > { %4849 = sst [smem:[#allocation9_spill]] %s4868_s16  ;;  %s230_s18 = ssub.s32 %s3810_s12, %s4868_s16 }
   0xe   : > { %p3944_p3 = por %p245_p2, %p244_p1  ;;  %p37_p4 = scmp.ge.s32.totalorder %s4870_s17, 2 }
   0xf   : > { %p250_p5 = scmp.ne.s32.totalorder %s3794_s30, %s3790_s29  ;;  %p251_p6 = scmp.eq.s32.totalorder %s3416_s15, 3 }
  0x10   : > { %p3423_p7 = scmp.ge.s32.totalorder %s3818_s14, 1  ;;  %s4872_s17 = smov (%p37_p4, %s4870_s17), 0 }
  0x11   : > { %4851 = sst [smem:[#allocation10_spill]] %s4872_s17  ;;  %p3953_p8 = por %p251_p6, %p250_p5 }
  0x12   : > { %p319_p9 = scmp.lt.s32.totalorder %s3818_s14, 5  ;;  %s229_s21 = ssub.s32 %s3814_s13, %s4872_s17 }
  0x13   : > { %s234_s22 = sadd.s32 1, %s3798_s9  ;;  %s231_s23 = sor.u32 %s230_s18, %s229_s21 }
  0x14   : > { %p320_p10 = pnand %p3423_p7, %p319_p9  ;;  %p232_p11 = scmp.eq.s32.totalorder %s231_s23, 0 }
  0x15   : > { %s3965_s25 = sshll.u32 (!%p320_p10), %s3802_s10, 2  ;;  %p373_p12 = scmp.lt.s32.totalorder (!%p320_p10), %s3806_s11, 1  ;;  %vm408_vm1 = vcmask (!%p320_p10), 244736   ;;  %vm468_vm3 = vcmask (!%p320_p10), 228352   ;;  %vm436_vm4 = vcmask (!%p320_p10), 1047792   ;;  %v3823_v34 = vmov (!%p320_p10), 0  }
  0x16   : > { %s3962_s24 = scalar_select %p232_p11, %s3798_s9, %s234_s22  }
  0x17   : > { %323 = sbr.rel (%p320_p10) target bundleno = 3624 (0xe28), region = 52  ;;  %p388_p13 = scmp.lt.s32.totalorder (!%p320_p10), %s3965_s25, 7  ;;  %607 = vmatprep.mubr.bf16.mxu0 (!%p320_p10), %v3823_v34  ;;  %648 = vmatprep.mubr.bf16.mxu1 (!%p320_p10), %v3823_v34  ;;  %v463_v37 = vld [vmem:[%s4839_s3] sm:$0xff] (!%p320_p10)  ;;  %vm485_vm9 = vcmask (!%p320_p10), 1039360   ;;  %vm510_vm10 = vcmask (!%p320_p10), 1031168   ;;  %vm559_vm11 = vcmask (!%p320_p10), 1043456  }
  0x18   : > { %s3426_s7 = sadd.s32 (!%p320_p10), 4294967295, %s3965_s25  ;;  %p399_p2 = scmp.eq.s32.totalorder (!%p320_p10), %s3802_s10, 0  ;;  %3705 = vset.pattern.permute.xlu1 (!%p320_p10), %v3823_v34  ;;  %3706 = vset.pattern.permute.xlu0 (!%p320_p10), %v3823_v34  ;;  %vm555_vm12 = vcmask (!%p320_p10), 195584   ;;  %vm3825_vm13 = vmmov (!%p320_p10), 0  }
  0x19   : > { %p371_p0 = scmp.gt.s32.totalorder (!%p320_p10), %s3426_s7, 0  ;;  %p3427_p1 = scmp.lt.s32.totalorder (!%p320_p10), %s3426_s7, 7 }
  0x1a   : > { %s3820_s16 = smov (!%p320_p10), 30   ;;  %s3821_s10 = smov (!%p320_p10), 127  }
  0x1b   : > { %s3822_s13 = smov (!%p320_p10), 126   ;;  %s3837_s22 = smov (!%p320_p10), 12  }
  0x1e   : > { %s374_s26 = scalar_select %p373_p12, %s3806_s11, 1 }
  0x1f   : > { %s389_s27 = scalar_select %p388_p13, %s3965_s25, 7 }
  0x20   : > { %s3432_s28 = sshll.u32 %s374_s26, 3  ;;  %s4874_s7 = smov (!%p371_p0, %s3426_s7), 0 }
  0x21   : > { %s391_s15 = sadd.s32 %s3432_s28, %s389_s27  ;;  %s4876_s7 = smov (!%p3427_p1, %s4874_s7), 7 }
  0x22   : > { %s3436_s18 = sshll.u32 %s391_s15, 2  ;;  %s378_s26 = sadd.s32 %s4876_s7, %s3432_s28 }
  0x23   : > { %s393_s23 = scalar_lea.vmem %s4837_s1, %s3436_s18  ;;  %s3433_s27 = sshll.u32 %s378_s26, 2 }
  0x24   : > { %v411_v1 = vld [vmem:[%s393_s23 + $0x8] sm:$0xff]  ;;  %v410_v2 = vld [vmem:[%s393_s23] sm:$0xff]  ;;  %s400_s17 = scalar_select %p399_p2, 1, 0 }
  0x25   : > { %v415_v3 = vunpack.c.h.bf16 %v411_v1  ;;  %v412_v4 = vunpack.c.l.bf16 %v410_v2  ;;  %v413_v5 = vunpack.c.h.bf16 %v410_v2  ;;  %s380_s18 = scalar_lea.vmem %s4836_s0, %s3433_s27  ;;  %v414_v9 = vunpack.c.l.bf16 %v411_v1  ;;  %v462_v1 = vld [vmem:[%s4838_s2] sm:$0xf]  ;;  %s3826_s27 = smov 4  }
  0x26   : > { %v401_v7 = vstv %s400_s17  ;;  %v397_v8 = vld [vmem:[%s380_s18] sm:$0xf]  ;;  %s3827_s15 = smov 124   ;;  %s3828_s18 = smov 121  }
  0x27   : > { %426 = vrot.lane.b32.xlu1 %v415_v3, %s3820_s16  ;;  %v3695_v6 = vpack.i.bf16 %v413_v5, %v412_v4  ;;  %vm3979_vm0 = vcmp.eq.s32.totalorder %v401_v7, 1  ;;  %v398_v11 = vunpack.c.l.bf16 %v397_v8  ;;  %v3824_v3 = vmov 0.0   ;;  %s3830_s7 = smov 125   ;;  %s3831_s26 = smov 8  }
  0x28   : > { %s3835_s17 = smov 114   ;;  %s3836_s28 = smov 108  }
  0x29   : > { %3696 = vrot.lane.b32.xlu0 %v3695_v6, %s3820_s16  ;;  %v403_v12 = vsel %vm3979_vm0, 0.0, %v398_v11  ;;  %v697_v11 = vlaneseq  ;;  %s3838_s23 = smov 24  }
  0x2a   : > { %v3700_v13 = vpack.i.bf16 %v403_v12, %v414_v9 }
  0x2b   : > { %v4125_v12 = vand.u32 127, %v697_v11 }
  0x2d   : > { %3701 = vrot.lane.b32.xlu0 %v3700_v13, %s3820_s16  ;;  %vm703_vm14 = vcmp.lt.s32.totalorder %v4125_v12, 28  ;;  %s3829_s16 = smov 118  }
  0x2e   : > { %vm708_vm15 = vmand %vm3979_vm0, %vm703_vm14  ;;  %vm996_vm14 = vcmask 31744  }
  0x99   : > { %v427_v14 = vpop.permute.xlu1 %426 }
  0x9a   : > { %441 = vst.msk [vmem:[#allocation2 + $0x20] sm:$0xff] %vm408_vm1, %v427_v14 }
  0x9b   : > { %v3697_v15 = vpop.permute.xlu0 %3696 }
  0x9c   : > { %v3699_v16 = vunpack.i.h.bf16 %v3697_v15  ;;  %v3698_v17 = vunpack.i.l.bf16 %v3697_v15 }
  0x9e   : > { %v3987_v18 = vsel %vm408_vm1, %v3698_v17, %v3699_v16 }
  0x9f   : > { %438 = vst [vmem:[#allocation2 + $0x8] sm:$0xff] %v3987_v18  ;;  %v3702_v21 = vpop.permute.xlu0 %3701  ;;  %v453_v25 = vmul.f32 0.1, %v3987_v18  ;;  %vm448_vm5 = vcmp.ge.f32.partialorder %v3987_v18, 0.0 }
  0xa0   : > { %v3704_v22 = vunpack.i.h.bf16 %v3702_v21  ;;  %v3703_v23 = vunpack.i.l.bf16 %v3702_v21 }
  0xa1   : > { %v3990_v19 = vld [vmem:[#allocation2 + $0x20] sm:$0xff]  ;;  %v4015_v29 = vsel %vm448_vm5, %v3987_v18, %v453_v25 }
  0xa2   : > { %vm451_vm2 = vcmp.ge.f32.partialorder %v3990_v19, 0.0  ;;  %v456_v20 = vmul.f32 0.1, %v3990_v19  ;;  %409 = vst.msk [vmem:[#allocation2] sm:$0xff] %vm408_vm1, %v3704_v22  ;;  %v4005_v26 = vsel %vm408_vm1, %v3699_v16, %v3703_v23  ;;  %v4008_v27 = vsel %vm408_vm1, %v3703_v23, %v427_v14 }
  0xa3   : > { %437 = vst.msk [vmem:[#allocation2] sm:$0xff] %vm436_vm4, %v3698_v17  ;;  %439 = vst [vmem:[#allocation2 + $0x10] sm:$0xff] %v4005_v26  ;;  %vm449_vm6 = vcmp.ge.f32.partialorder %v4005_v26, 0.0  ;;  %v454_v28 = vmul.f32 0.1, %v4005_v26  ;;  %vm450_vm7 = vcmp.ge.f32.partialorder %v4008_v27, 0.0 }
  0xa4   : > { %v3995_v24 = vsel %vm451_vm2, %v3990_v19, %v456_v20  ;;  %440 = vst [vmem:[#allocation2 + $0x18] sm:$0xff] %v4008_v27  ;;  %v455_v31 = vmul.f32 0.1, %v4008_v27  ;;  %vm741_vm4 = vcmask 211968  }
  0xa5   : > { %483 = vrot.lane.b32.xlu1 %v3995_v24, %s3821_s10  ;;  %469 = vst.msk [vmem:[#allocation3 + $0x20] sm:$0xff] %vm468_vm3, %v3995_v24  ;;  %v4020_v30 = vsel %vm449_vm6, %v4005_v26, %v454_v28 }
  0xa6   : > { %479 = vrot.lane.b32.xlu0 %v4020_v30, %s3821_s10  ;;  %v4029_v32 = vsel %vm450_vm7, %v4008_v27, %v455_v31  ;;  %vm966_vm7 = vcmp.lt.s32.totalorder %v4125_v12, 26 }
  0xa9   : > { %477 = vrot.lane.b32.xlu1 %v4015_v29, %s3821_s10 }
  0xaa   : > { %v4031_v33 = vld [vmem:[#allocation2] sm:$0xff]  ;;  %481 = vrot.lane.b32.xlu0 %v4029_v32, %s3821_s10 }
  0xab   : > { %vm447_vm8 = vcmp.ge.f32.partialorder %v4031_v33, 0.0  ;;  %v452_v35 = vmul.f32 0.1, %v4031_v33 }
  0xac   : > { %v529_v5 = vld [vmem:[#allocation3 + $0x20] sm:$0xff] }
  0xad   : > { %502 = vrot.lane.b32.xlu1 %v4015_v29, %s3822_s13  ;;  %v4042_v36 = vsel %vm447_vm8, %v4031_v33, %v452_v35  ;;  %vm4179_vm8 = vmand %vm3979_vm0, %vm966_vm7  ;;  %vm1096_vm7 = vcmask 965632  }
  0xae   : > { %504 = vrot.lane.b32.xlu0 %v4020_v30, %s3822_s13 }
  0xb1   : > { %475 = vrot.lane.b32.xlu1 %v4042_v36, %s3821_s10 }
  0xb2   : > { %500 = vrot.lane.b32.xlu0 %v4042_v36, %s3822_s13 }
  0xb5   : > { %506 = vrot.lane.b32.xlu1 %v4029_v32, %s3822_s13 }
  0xb6   : > { %508 = vrot.lane.b32.xlu0 %v3995_v24, %s3822_s13 }
  0xb9   : > { %552 = vperm.xlu1 %3705, %v463_v37  }
 0x117   : > { %v4057_v38 = vpop.permute.xlu1 %483 }
 0x118   : > { %499 = vst.msk [vmem:[#allocation3 + $0x48] sm:$0xff] %vm468_vm3, %v4057_v38  ;;  %v480_v40 = vpop.permute.xlu0 %479 }
 0x11b   : > { %v478_v39 = vpop.permute.xlu1 %477 }
 0x11c   : > { %v487_v41 = vsel %vm485_vm9, %v478_v39, %v480_v40  ;;  %v482_v44 = vpop.permute.xlu0 %481 }
 0x11d   : > { %v4063_v42 = vpack.c.bf16 %v487_v41, %v4015_v29  ;;  %v488_v45 = vsel %vm485_vm9, %v480_v40, %v482_v44  ;;  %v489_v46 = vsel %vm485_vm9, %v482_v44, %v4057_v38 }
 0x11e   : > { %v4070_v47 = vpack.c.bf16 %v489_v46, %v4029_v32  ;;  %v4073_v48 = vpack.c.bf16 %v488_v45, %v4020_v30 }
 0x11f   : > { %v503_v43 = vpop.permute.xlu1 %502  ;;  %575 = vmatprep.subr.bf16.mxu0 %v4063_v42  ;;  %v534_v63 = vld [vmem:[#allocation3 + $0x48] sm:$0xff] }
 0x120   : > { %v505_v50 = vpop.permute.xlu0 %504  ;;  %616 = vmatprep.subr.bf16.mxu1 %v4070_v47  ;;  %v544_v6 = vpack.c.bf16 %v534_v63, %v529_v5 }
 0x121   : > { %v4078_v52 = vsel %vm510_vm10, %v503_v43, %v505_v50  ;;  %617 = vmatpush1.bf16.msra.mxu1 %v4073_v48 }
 0x122   : > { %v546_v54 = vpack.c.bf16 %v4078_v52, %v4078_v52 }
 0x123   : > { %v476_v49 = vpop.permute.xlu1 %475 }
 0x124   : > { %v486_v51 = vsel %vm485_vm9, %v476_v49, %v478_v39  ;;  %v501_v56 = vpop.permute.xlu0 %500 }
 0x125   : > { %v4082_v53 = vpack.c.bf16 %v486_v51, %v4042_v36  ;;  %v4091_v58 = vsel %vm510_vm10, %v501_v56, %v503_v43 }
 0x126   : > { %v545_v59 = vpack.c.bf16 %v4091_v58, %v4091_v58 }
 0x127   : > { %v507_v55 = vpop.permute.xlu1 %506  ;;  %576 = vmatpush1.bf16.msra.mxu0 %v4082_v53 }
 0x128   : > { %v4088_v57 = vsel %vm510_vm10, %v505_v50, %v507_v55  ;;  %3437 = vmatprep.subr.msk.bf16.mxu0 %vm559_vm11, %v546_v54  ;;  %v4098_v61 = vpop.permute.xlu0 %508  ;;  %v561_v62 = vsel %vm559_vm11, %v545_v59, 0 }
 0x129   : > { %v547_v60 = vpack.c.bf16 %v4088_v57, %v4088_v57  ;;  %v4103_v0 = vsel %vm510_vm10, %v507_v55, %v4098_v61  ;;  %524 = vst.msk [vmem:[#allocation3 + $0x70] sm:$0xff] %vm468_vm3, %v4098_v61 }
 0x12a   : > { %v548_v2 = vpack.c.bf16 %v4103_v0, %v4103_v0 }
 0x12b   : > { %578 = vmatpush1.bf16.msra.mxu0 %v561_v62  ;;  %v567_v4 = vsel %vm559_vm11, %v547_v60, 0  ;;  %v3443_v62 = vld [vmem:[%s4839_s3 + $0x8] sm:$0xff] }
 0x12c   : > { %3529 = vmatprep.subr.bf16.mxu0 %v3824_v3  ;;  %3439 = vmatprep.subr.msk.bf16.mxu1 %vm559_vm11, %v548_v2 }
 0x12d   : > { %619 = vmatpush1.bf16.msra.mxu1 %v567_v4 }
 0x12e   : > { %3438 = vmatmul.mubr.msk.bf16.vlgmr.msra.gmra.mrb[0].mxu0 %vm555_vm12, %v462_v1 }
 0x12f   : > { %3530 = vmatpush3.bf16.msra.mxu0 %v544_v6  ;;  %3533 = vmatprep.mubr.msk.bf16.mxu0 %vm3825_vm13, %v3824_v3 }
 0x130   : > { %3531 = vmatprep.subr.bf16.mxu0 %v3824_v3  ;;  %3440 = vmatmul.mubr.msk.bf16.vlgmr.msra.gmra.mrb[0].mxu1 %vm555_vm12, %v462_v1  ;;  %v539_v7 = vld [vmem:[#allocation3 + $0x70] sm:$0xff] }
 0x131   : > { %v549_v8 = vpack.c.bf16 %v539_v7, %v539_v7  ;;  %876 = vmatprep.mubr.bf16.mxu1 %v3823_v34 }
 0x133   : > { %v573_v9 = vsel %vm559_vm11, %v549_v8, 0 }
 0x134   : > { %3532 = vmatpush3.bf16.msra.mxu0 %v573_v9 }
 0x137   : > { %3534 = vmatmul.mubr.msk.bf16.vlgmr.msra.gmra.mrb[4].mxu0 %vm555_vm12, %v462_v1 }
 0x138   : > { %917 = vmatprep.mubr.bf16.mxu0 %v3823_v34  ;;  %v553_v13 = vpop.permute.xlu1 %552 }
 0x201   : > { %v609_v14 = vpop.f32.mrb[0].mxu0 }
 0x202   : > { %v611_v15 = vpop.f32.mrb[1].mxu0  ;;  %v610_v16 = vadd.f32 %v609_v14, %v553_v13 }
 0x203   : > { %v612_v17 = vadd.f32 %v611_v15, %v553_v13  ;;  %v613_v20 = vpop.f32.mrb[2].mxu0  ;;  %v650_v25 = vpop.f32.mrb[0].mxu1 }
 0x204   : > { %v614_v21 = vpop.f32.mrb[3].mxu0  ;;  %v713_v22 = vsel %vm708_vm15, 0.0, %v610_v16  ;;  %v651_v28 = vadd.f32 %v650_v25, %v553_v13  ;;  %v652_v31 = vpop.f32.mrb[1].mxu1 }
 0x205   : > { %v724_v23 = vmul.f32 0.1, %v612_v17  ;;  %vm719_vm1 = vcmp.ge.f32.partialorder %v612_v17, 0.0  ;;  %v654_v35 = vpop.f32.mrb[2].mxu1  ;;  %v723_v39 = vmul.f32 0.1, %v713_v22  ;;  %v653_v44 = vadd.f32 %v652_v31, %v553_v13 }
 0x206   : > { %v725_v40 = vmul.f32 0.1, %v651_v28  ;;  %v655_v41 = vpop.f32.mrb[3].mxu1  ;;  %vm720_vm2 = vcmp.ge.f32.partialorder %v651_v28, 0.0  ;;  %vm718_vm3 = vcmp.ge.f32.partialorder %v713_v22, 0.0 }
 0x207   : > { %v729_v37 = vsel %vm719_vm1, %v612_v17, %v724_v23  ;;  %v728_v45 = vsel %vm718_vm3, %v713_v22, %v723_v39  ;;  %v726_v54 = vmul.f32 0.1, %v653_v44  ;;  %vm721_vm6 = vcmp.ge.f32.partialorder %v653_v44, 0.0  ;;  %v3442_v31 = vld [vmem:[%s4838_s2 + $0x4] sm:$0xf] }
 0x208   : > { %750 = vrot.lane.b32.xlu0 %v729_v37, %s3821_s10  ;;  %v4131_v43 = vsel %vm720_vm2, %v651_v28, %v725_v40 }
 0x209   : > { %752 = vrot.lane.b32.xlu1 %v4131_v43, %s3821_s10  ;;  %v731_v60 = vsel %vm721_vm6, %v653_v44, %v726_v54  ;;  %vm1071_vm6 = vcmask 990208  }
 0x20a   : > { %v691_v46 = vpop.f32.mrb[4].mxu0 }
 0x20b   : > { %v692_v49 = vadd.f32 %v691_v46, %v553_v13  ;;  %v3535_v50 = vpop.f32.mrb[5].mxu0 }
 0x20c   : > { %748 = vrot.lane.b32.xlu0 %v728_v45, %s3821_s10  ;;  %v694_v51 = vpop.f32.mrb[6].mxu0 }
 0x20d   : > { %v727_v55 = vmul.f32 0.1, %v692_v49  ;;  %776 = vrot.lane.b32.xlu1 %v4131_v43, %s3822_s13  ;;  %v3536_v56 = vpop.f32.mrb[7].mxu0  ;;  %vm722_vm5 = vcmp.ge.f32.partialorder %v692_v49, 0.0 }
 0x20f   : > { %v732_v59 = vsel %vm722_vm5, %v692_v49, %v727_v55 }
 0x210   : > { %774 = vrot.lane.b32.xlu0 %v729_v37, %s3822_s13  ;;  %742 = vst.msk [vmem:[#allocation3 + $0x20] sm:$0xff] %vm741_vm4, %v732_v59 }
 0x211   : > { %772 = vrot.lane.b32.xlu1 %v728_v45, %s3822_s13 }
 0x214   : > { %754 = vrot.lane.b32.xlu0 %v731_v60, %s3821_s10 }
 0x215   : > { %756 = vrot.lane.b32.xlu1 %v732_v59, %s3821_s10 }
 0x217   : > { %v800_v49 = vld [vmem:[#allocation3 + $0x20] sm:$0xff] }
 0x218   : > { %778 = vrot.lane.b32.xlu0 %v731_v60, %s3822_s13 }
 0x219   : > { %780 = vrot.lane.b32.xlu1 %v732_v59, %s3822_s13 }
 0x21c   : > { %823 = vperm.xlu0 %3706, %v3443_v62  }
 0x27a   : > { %v751_v63 = vpop.permute.xlu0 %750 }
 0x27b   : > { %v753_v1 = vpop.permute.xlu1 %752 }
 0x27c   : > { %v759_v2 = vsel %vm485_vm9, %v751_v63, %v753_v1 }
 0x27d   : > { %v812_v6 = vpack.c.bf16 %v759_v2, %v729_v37 }
 0x27e   : > { %v749_v4 = vpop.permute.xlu0 %748 }
 0x27f   : > { %v758_v5 = vsel %vm485_vm9, %v749_v4, %v751_v63  ;;  %v777_v8 = vpop.permute.xlu1 %776  ;;  %844 = vmatprep.subr.bf16.mxu1 %v812_v6 }
 0x280   : > { %v811_v7 = vpack.c.bf16 %v758_v5, %v728_v45 }
 0x282   : > { %v775_v9 = vpop.permute.xlu0 %774  ;;  %845 = vmatpush1.bf16.msra.mxu1 %v811_v7 }
 0x283   : > { %v783_v13 = vsel %vm510_vm10, %v775_v9, %v777_v8  ;;  %v773_v15 = vpop.permute.xlu1 %772 }
 0x284   : > { %v817_v14 = vpack.c.bf16 %v783_v13, %v783_v13  ;;  %v782_v16 = vsel %vm510_vm10, %v773_v15, %v775_v9 }
 0x285   : > { %v816_v20 = vpack.c.bf16 %v782_v16, %v782_v16 }
 0x286   : > { %v755_v17 = vpop.permute.xlu0 %754  ;;  %3444 = vmatprep.subr.msk.bf16.mxu1 %vm559_vm11, %v817_v14 }
 0x287   : > { %v760_v21 = vsel %vm485_vm9, %v753_v1, %v755_v17  ;;  %v757_v22 = vpop.permute.xlu1 %756  ;;  %v830_v23 = vsel %vm559_vm11, %v816_v20, 0 }
 0x288   : > { %v761_v25 = vsel %vm485_vm9, %v755_v17, %v757_v22  ;;  %771 = vst.msk [vmem:[#allocation3 + $0x48] sm:$0xff] %vm741_vm4, %v757_v22  ;;  %847 = vmatpush1.bf16.msra.mxu1 %v830_v23  ;;  %v813_v39 = vpack.c.bf16 %v760_v21, %v4131_v43 }
 0x289   : > { %v814_v37 = vpack.c.bf16 %v761_v25, %v731_v60  ;;  %3537 = vmatprep.subr.bf16.mxu1 %v3824_v3 }
 0x28a   : > { %v779_v28 = vpop.permute.xlu0 %778 }
 0x28b   : > { %v784_v35 = vsel %vm510_vm10, %v777_v8, %v779_v28  ;;  %v781_v41 = vpop.permute.xlu1 %780  ;;  %3445 = vmatmul.mubr.msk.bf16.vlgmr.msra.gmra.mrb[4].mxu1 %vm555_vm12, %v3442_v31  ;;  %885 = vmatprep.subr.bf16.mxu0 %v814_v37 }
 0x28c   : > { %v818_v40 = vpack.c.bf16 %v784_v35, %v784_v35  ;;  %v785_v44 = vsel %vm510_vm10, %v779_v28, %v781_v41  ;;  %795 = vst.msk [vmem:[#allocation3 + $0x70] sm:$0xff] %vm741_vm4, %v781_v41  ;;  %886 = vmatpush1.bf16.msra.mxu0 %v813_v39  ;;  %3541 = vmatprep.mubr.msk.bf16.mxu1 %vm3825_vm13, %v3824_v3 }
 0x28d   : > { %v819_v45 = vpack.c.bf16 %v785_v44, %v785_v44 }
 0x28e   : > { %v836_v46 = vsel %vm559_vm11, %v818_v40, 0 }
 0x28f   : > { %v805_v50 = vld [vmem:[#allocation3 + $0x48] sm:$0xff]  ;;  %3446 = vmatprep.subr.msk.bf16.mxu0 %vm559_vm11, %v819_v45 }
 0x290   : > { %v815_v43 = vpack.c.bf16 %v805_v50, %v800_v49  ;;  %888 = vmatpush1.bf16.msra.mxu0 %v836_v46 }
 0x292   : > { %3538 = vmatpush3.bf16.msra.mxu1 %v815_v43 }
 0x293   : > { %3539 = vmatprep.subr.bf16.mxu1 %v3824_v3  ;;  %v810_v51 = vld [vmem:[#allocation3 + $0x70] sm:$0xff]  ;;  %3447 = vmatmul.mubr.msk.bf16.vlgmr.msra.gmra.mrb[8].mxu0 %vm555_vm12, %v3442_v31 }
 0x294   : > { %v820_v54 = vpack.c.bf16 %v810_v51, %v810_v51  ;;  %1191 = vmatprep.mubr.bf16.mxu0 %v3823_v34 }
 0x296   : > { %v842_v55 = vsel %vm559_vm11, %v820_v54, 0 }
 0x297   : > { %3540 = vmatpush3.bf16.msra.mxu1 %v842_v55 }
 0x29a   : > { %3542 = vmatmul.mubr.msk.bf16.vlgmr.msra.gmra.mrb[8].mxu1 %vm555_vm12, %v3442_v31 }
 0x29b   : > { %1232 = vmatprep.mubr.bf16.mxu1 %v3823_v34  ;;  %v824_v56 = vpop.permute.xlu0 %823 }
 0x35e   : > { %v878_v59 = vpop.f32.mrb[4].mxu1 }
 0x35f   : > { %v879_v62 = vadd.f32 %v878_v59, %v824_v56  ;;  %v880_v63 = vpop.f32.mrb[5].mxu1 }
 0x360   : > { %v882_v1 = vpop.f32.mrb[6].mxu1  ;;  %v881_v5 = vadd.f32 %v880_v63, %v824_v56 }
 0x361   : > { %v883_v2 = vpop.f32.mrb[7].mxu1  ;;  %v976_v4 = vsel %vm4179_vm8, 0.0, %v879_v62 }
 0x362   : > { %986 = vrot.lane.b32.xlu1 %v976_v4, %s3826_s27 }
 0x366   : > { %988 = vrot.lane.b32.xlu1 %v881_v5, %s3826_s27  ;;  %v919_v6 = vpop.f32.mrb[8].mxu0 }
 0x367   : > { %v920_v7 = vadd.f32 %v919_v6, %v824_v56  ;;  %v921_v8 = vpop.f32.mrb[9].mxu0 }
 0x368   : > { %v922_v9 = vadd.f32 %v921_v8, %v824_v56  ;;  %v923_v13 = vpop.f32.mrb[10].mxu0 }
 0x369   : > { %990 = vrot.lane.b32.xlu0 %v920_v7, %s3826_s27  ;;  %v924_v14 = vpop.f32.mrb[11].mxu0 }
 0x36a   : > { %992 = vrot.lane.b32.xlu1 %v922_v9, %s3826_s27 }
 0x36d   : > { %v960_v15 = vpop.f32.mrb[8].mxu1 }
 0x36e   : > { %v961_v16 = vadd.f32 %v960_v15, %v824_v56  ;;  %v3543_v17 = vpop.f32.mrb[9].mxu1  ;;  %v3450_v56 = vld [vmem:[%s4839_s3 + $0x10] sm:$0xff] }
 0x36f   : > { %v963_v20 = vpop.f32.mrb[10].mxu1 }
 0x370   : > { %994 = vrot.lane.b32.xlu0 %v961_v16, %s3826_s27  ;;  %v3544_v21 = vpop.f32.mrb[11].mxu1  ;;  %s3832_s27 = smov 117  }
 0x3d4   : > { %v987_v22 = vpop.permute.xlu1 %986 }
 0x3d5   : > { %v4186_v23 = vadd.f32 %v987_v22, %v4031_v33 }
 0x3d7   : > { %vm1011_vm15 = vcmp.ge.f32.partialorder %v4186_v23, 0.0  ;;  %v1016_v25 = vmul.f32 0.1, %v4186_v23 }
 0x3d8   : > { %v989_v28 = vpop.permute.xlu1 %988 }
 0x3d9   : > { %v997_v31 = vsel %vm996_vm14, %v987_v22, %v989_v28  ;;  %v1021_v35 = vsel %vm1011_vm15, %v4186_v23, %v1016_v25  ;;  %vm1059_vm15 = vcmask 162816  }
 0x3da   : > { %v4193_v37 = vadd.f32 %v997_v31, %v3987_v18  ;;  %1035 = vrot.lane.b32.xlu1 %v1021_v35, %s3827_s15  ;;  %1061 = vrot.lane.b32.xlu0 %v1021_v35, %s3828_s18 }
 0x3db   : > { %v991_v33 = vpop.permute.xlu0 %990 }
 0x3dc   : > { %v998_v39 = vsel %vm996_vm14, %v989_v28, %v991_v33  ;;  %v993_v40 = vpop.permute.xlu1 %992  ;;  %vm1012_vm1 = vcmp.ge.f32.partialorder %v4193_v37, 0.0  ;;  %v1017_v41 = vmul.f32 0.1, %v4193_v37 }
 0x3dd   : > { %v4201_v44 = vadd.f32 %v998_v39, %v4005_v26  ;;  %v999_v45 = vsel %vm996_vm14, %v991_v33, %v993_v40  ;;  %v3449_v33 = vld [vmem:[%s4838_s2 + $0x8] sm:$0xf] }
 0x3de   : > { %1086 = vrot.lane.b32.xlu1 %v1021_v35, %s3829_s16  ;;  %v1022_v18 = vsel %vm1012_vm1, %v4193_v37, %v1017_v41  ;;  %v4209_v50 = vadd.f32 %v999_v45, %v4008_v27  ;;  %vm1281_vm1 = vcmp.lt.s32.totalorder %v4125_v12, 20 }
 0x3df   : > { %1088 = vrot.lane.b32.xlu0 %v1022_v18, %s3829_s16  ;;  %vm1013_vm2 = vcmp.ge.f32.partialorder %v4201_v44, 0.0  ;;  %v1018_v46 = vmul.f32 0.1, %v4201_v44 }
 0x3e0   : > { %v1019_v54 = vmul.f32 0.1, %v4209_v50  ;;  %vm1014_vm3 = vcmp.ge.f32.partialorder %v4209_v50, 0.0 }
 0x3e1   : > { %v1023_v49 = vsel %vm1013_vm2, %v4201_v44, %v1018_v46  ;;  %vm1286_vm2 = vmand %vm3979_vm0, %vm1281_vm1  ;;  %vm1319_vm1 = vcmask 146432  }
 0x3e2   : > { %v995_v43 = vpop.permute.xlu0 %994  ;;  %1037 = vrot.lane.b32.xlu1 %v1022_v18, %s3827_s15  ;;  %v1024_v55 = vsel %vm1014_vm3, %v4209_v50, %v1019_v54 }
 0x3e3   : > { %v1000_v26 = vsel %vm996_vm14, %v993_v40, %v995_v43  ;;  %1039 = vrot.lane.b32.xlu0 %v1023_v49, %s3827_s15  ;;  %vm1045_vm14 = vcmask 1014784  }
 0x3e4   : > { %v4215_v51 = vadd.f32 %v1000_v26, %v3990_v19 }
 0x3e6   : > { %1063 = vrot.lane.b32.xlu1 %v1022_v18, %s3828_s18  ;;  %v1020_v27 = vmul.f32 0.1, %v4215_v51  ;;  %vm1015_vm5 = vcmp.ge.f32.partialorder %v4215_v51, 0.0 }
 0x3e7   : > { %1065 = vrot.lane.b32.xlu0 %v1023_v49, %s3828_s18 }
 0x3e8   : > { %v1025_v19 = vsel %vm1015_vm5, %v4215_v51, %v1020_v27 }
 0x3ea   : > { %1090 = vrot.lane.b32.xlu1 %v1023_v49, %s3829_s16 }
 0x3eb   : > { %1041 = vrot.lane.b32.xlu0 %v1024_v55, %s3827_s15 }
 0x3ee   : > { %1043 = vrot.lane.b32.xlu1 %v1025_v19, %s3827_s15 }
 0x3ef   : > { %1069 = vrot.lane.b32.xlu0 %v1025_v19, %s3828_s18 }
 0x3f2   : > { %1067 = vrot.lane.b32.xlu1 %v1024_v55, %s3828_s18  ;;  %s3833_s18 = smov 120  }
 0x3f3   : > { %1092 = vrot.lane.b32.xlu0 %v1024_v55, %s3829_s16 }
 0x3f6   : > { %1094 = vrot.lane.b32.xlu1 %v1025_v19, %s3829_s16  ;;  %s3834_s16 = smov 111  }
 0x3f7   : > { %1138 = vperm.xlu0 %3706, %v3450_v56  }
 0x3fa   : > { %1613 = vrot.lane.b32.xlu1 %v4015_v29, %s3830_s7 }
 0x3fb   : > { %1615 = vrot.lane.b32.xlu0 %v4020_v30, %s3830_s7 }
 0x44c   : > { %v1036_v59 = vpop.permute.xlu1 %1035  ;;  %v1062_v62 = vpop.permute.xlu0 %1061 }
 0x450   : > { %v1087_v63 = vpop.permute.xlu1 %1086 }
 0x451   : > { %v1089_v1 = vpop.permute.xlu0 %1088 }
 0x452   : > { %v1097_v8 = vsel %vm1096_vm7, %v1087_v63, %v1089_v1 }
 0x453   : > { %v1131_v22 = vpack.c.bf16 %v1097_v8, %v1097_v8 }
 0x454   : > { %v1038_v2 = vpop.permute.xlu1 %1037 }
 0x455   : > { %v1040_v4 = vpop.permute.xlu0 %1039  ;;  %v1046_v14 = vsel %vm1045_vm14, %v1036_v59, %v1038_v2  ;;  %v1145_v35 = vsel %vm559_vm11, %v1131_v22, 0 }
 0x456   : > { %v1047_v9 = vsel %vm1045_vm14, %v1038_v2, %v1040_v4 }
 0x458   : > { %v1064_v5 = vpop.permute.xlu1 %1063 }
 0x459   : > { %v1072_v6 = vsel %vm1071_vm6, %v1062_v62, %v1064_v5  ;;  %v1066_v7 = vpop.permute.xlu0 %1065 }
 0x45a   : > { %v1073_v13 = vsel %vm1071_vm6, %v1064_v5, %v1066_v7  ;;  %v1126_v17 = vpack.c.bf16 %v1072_v6, %v1046_v14 }
 0x45b   : > { %v1127_v15 = vpack.c.bf16 %v1073_v13, %v1047_v9 }
 0x45c   : > { %v1091_v16 = vpop.permute.xlu1 %1090 }
 0x45d   : > { %v1098_v20 = vsel %vm1096_vm7, %v1089_v1, %v1091_v16  ;;  %v1042_v21 = vpop.permute.xlu0 %1041  ;;  %1159 = vmatprep.subr.bf16.mxu0 %v1127_v15 }
 0x45e   : > { %1160 = vmatpush1.bf16.msra.mxu0 %v1126_v17  ;;  %v1132_v25 = vpack.c.bf16 %v1098_v20, %v1098_v20  ;;  %v1048_v40 = vsel %vm1045_vm14, %v1040_v4, %v1042_v21 }
 0x460   : > { %v1044_v28 = vpop.permute.xlu1 %1043  ;;  %3451 = vmatprep.subr.msk.bf16.mxu0 %vm559_vm11, %v1132_v25 }
 0x461   : > { %1060 = vst.msk [vmem:[#allocation3 + $0x20] sm:$0xff] %vm1059_vm15, %v1044_v28  ;;  %v1070_v31 = vpop.permute.xlu0 %1069  ;;  %v1049_v41 = vsel %vm1045_vm14, %v1042_v21, %v1044_v28 }
 0x462   : > { %1085 = vst.msk [vmem:[#allocation3 + $0x48] sm:$0xff] %vm1059_vm15, %v1070_v31  ;;  %1162 = vmatpush1.bf16.msra.mxu0 %v1145_v35 }
 0x463   : > { %3545 = vmatprep.subr.bf16.mxu0 %v3824_v3 }
 0x464   : > { %v1068_v39 = vpop.permute.xlu1 %1067 }
 0x465   : > { %v1074_v18 = vsel %vm1071_vm6, %v1066_v7, %v1068_v39  ;;  %v1075_v45 = vsel %vm1071_vm6, %v1068_v39, %v1070_v31  ;;  %v1093_v46 = vpop.permute.xlu0 %1092  ;;  %3452 = vmatmul.mubr.msk.bf16.vlgmr.msra.gmra.mrb[12].mxu0 %vm555_vm12, %v3449_v33 }
 0x466   : > { %v1099_v49 = vsel %vm1096_vm7, %v1091_v16, %v1093_v46  ;;  %v1129_v43 = vpack.c.bf16 %v1075_v45, %v1049_v41  ;;  %v1128_v26 = vpack.c.bf16 %v1074_v18, %v1048_v40  ;;  %3549 = vmatprep.mubr.msk.bf16.mxu0 %vm3825_vm13, %v3824_v3 }
 0x467   : > { %v1133_v55 = vpack.c.bf16 %v1099_v49, %v1099_v49 }
 0x468   : > { %v1095_v54 = vpop.permute.xlu1 %1094  ;;  %v1115_v27 = vld [vmem:[#allocation3 + $0x20] sm:$0xff]  ;;  %1200 = vmatprep.subr.bf16.mxu1 %v1129_v43 }
 0x469   : > { %v1100_v19 = vsel %vm1096_vm7, %v1093_v46, %v1095_v54  ;;  %1110 = vst.msk [vmem:[#allocation3 + $0x70] sm:$0xff] %vm1059_vm15, %v1095_v54  ;;  %v1120_v56 = vld [vmem:[#allocation3 + $0x48] sm:$0xff]  ;;  %1201 = vmatpush1.bf16.msra.mxu1 %v1128_v26  ;;  %v1151_v63 = vsel %vm559_vm11, %v1133_v55, 0 }
 0x46a   : > { %v1130_v59 = vpack.c.bf16 %v1120_v56, %v1115_v27  ;;  %v1134_v62 = vpack.c.bf16 %v1100_v19, %v1100_v19  ;;  %v1595_v19 = vld [vmem:[%s4841_s5] sm:$0xff] }
 0x46c   : > { %3546 = vmatpush3.bf16.msra.mxu0 %v1130_v59  ;;  %3453 = vmatprep.subr.msk.bf16.mxu1 %vm559_vm11, %v1134_v62 }
 0x46d   : > { %3547 = vmatprep.subr.bf16.mxu0 %v3824_v3  ;;  %1203 = vmatpush1.bf16.msra.mxu1 %v1151_v63 }
 0x470   : > { %v1125_v1 = vld [vmem:[#allocation3 + $0x70] sm:$0xff]  ;;  %3454 = vmatmul.mubr.msk.bf16.vlgmr.msra.gmra.mrb[12].mxu1 %vm555_vm12, %v3449_v33 }
 0x471   : > { %v1135_v2 = vpack.c.bf16 %v1125_v1, %v1125_v1  ;;  %1454 = vmatprep.mubr.bf16.mxu1 %v3823_v34 }
 0x473   : > { %v1157_v4 = vsel %vm559_vm11, %v1135_v2, 0 }
 0x474   : > { %3548 = vmatpush3.bf16.msra.mxu0 %v1157_v4 }
 0x476   : > { %v1139_v5 = vpop.permute.xlu0 %1138 }
 0x477   : > { %3550 = vmatmul.mubr.msk.bf16.vlgmr.msra.gmra.mrb[16].mxu0 %vm555_vm12, %v3449_v33 }
 0x478   : > { %1495 = vmatprep.mubr.bf16.mxu0 %v3823_v34 }
 0x47a   : > { %v4313_v62 = vpop.permute.xlu0 %1615 }
 0x538   : > { %v1193_v6 = vpop.f32.mrb[12].mxu0 }
 0x539   : > { %v1194_v7 = vadd.f32 %v1193_v6, %v1139_v5  ;;  %v1195_v8 = vpop.f32.mrb[13].mxu0 }
 0x53a   : > { %v1196_v9 = vadd.f32 %v1195_v8, %v1139_v5  ;;  %v1197_v13 = vpop.f32.mrb[14].mxu0 }
 0x53b   : > { %v1291_v14 = vsel %vm1286_vm2, 0.0, %v1194_v7  ;;  %v1198_v15 = vpop.f32.mrb[15].mxu0  ;;  %vm1621_vm2 = vcmask 1022976  }
 0x53c   : > { %v1302_v16 = vmul.f32 0.1, %v1196_v9  ;;  %vm1297_vm3 = vcmp.ge.f32.partialorder %v1196_v9, 0.0  ;;  %v1301_v17 = vmul.f32 0.1, %v1291_v14  ;;  %vm1296_vm5 = vcmp.ge.f32.partialorder %v1291_v14, 0.0 }
 0x53e   : > { %v1307_v20 = vsel %vm1297_vm3, %v1196_v9, %v1302_v16  ;;  %v1306_v21 = vsel %vm1296_vm5, %v1291_v14, %v1301_v17  ;;  %vm1705_vm3 = vcmask 326656  }
 0x53f   : > { %1328 = vrot.lane.b32.xlu1 %v1307_v20, %s3821_s10 }
 0x543   : > { %v1234_v22 = vpop.f32.mrb[12].mxu1  ;;  %1326 = vrot.lane.b32.xlu1 %v1306_v21, %s3821_s10 }
 0x544   : > { %v1235_v25 = vadd.f32 %v1234_v22, %v1139_v5  ;;  %v1236_v28 = vpop.f32.mrb[13].mxu1  ;;  %v3456_v22 = vld [vmem:[%s4838_s2 + $0xc] sm:$0xf] }
 0x545   : > { %v1237_v31 = vadd.f32 %v1236_v28, %v1139_v5  ;;  %v1238_v35 = vpop.f32.mrb[14].mxu1 }
 0x546   : > { %v1303_v33 = vmul.f32 0.1, %v1235_v25  ;;  %v1239_v39 = vpop.f32.mrb[15].mxu1  ;;  %vm1298_vm6 = vcmp.ge.f32.partialorder %v1235_v25, 0.0 }
 0x547   : > { %v1304_v40 = vmul.f32 0.1, %v1237_v31  ;;  %1352 = vrot.lane.b32.xlu1 %v1307_v20, %s3822_s13  ;;  %vm1299_vm7 = vcmp.ge.f32.partialorder %v1237_v31, 0.0 }
 0x548   : > { %v4274_v41 = vsel %vm1298_vm6, %v1235_v25, %v1303_v33 }
 0x549   : > { %1330 = vrot.lane.b32.xlu0 %v4274_v41, %s3821_s10  ;;  %v4278_v18 = vsel %vm1299_vm7, %v1237_v31, %v1304_v40  ;;  %vm1874_vm7 = vcmask 179200  }
 0x54a   : > { %v1275_v45 = vpop.f32.mrb[16].mxu0 }
 0x54b   : > { %v1276_v46 = vadd.f32 %v1275_v45, %v1139_v5  ;;  %1332 = vrot.lane.b32.xlu1 %v4278_v18, %s3821_s10  ;;  %v3551_v49 = vpop.f32.mrb[17].mxu0 }
 0x54c   : > { %v1278_v43 = vpop.f32.mrb[18].mxu0 }
 0x54d   : > { %v1305_v26 = vmul.f32 0.1, %v1276_v46  ;;  %1350 = vrot.lane.b32.xlu0 %v1306_v21, %s3822_s13  ;;  %v3552_v54 = vpop.f32.mrb[19].mxu0  ;;  %vm1300_vm15 = vcmp.ge.f32.partialorder %v1276_v46, 0.0 }
 0x54f   : > { %1356 = vrot.lane.b32.xlu1 %v4278_v18, %s3822_s13  ;;  %v1310_v27 = vsel %vm1300_vm15, %v1276_v46, %v1305_v26 }
 0x550   : > { %1320 = vst.msk [vmem:[#allocation3 + $0x20] sm:$0xff] %vm1319_vm1, %v1310_v27 }
 0x551   : > { %1354 = vrot.lane.b32.xlu0 %v4274_v41, %s3822_s13 }
 0x553   : > { %1611 = vrot.lane.b32.xlu1 %v4042_v36, %s3830_s7 }
 0x555   : > { %1334 = vrot.lane.b32.xlu0 %v1310_v27, %s3821_s10 }
 0x557   : > { %1619 = vrot.lane.b32.xlu1 %v3995_v24, %s3830_s7  ;;  %v4293_v55 = vld [vmem:[#allocation3 + $0x20] sm:$0xff] }
 0x558   : > { %1600 = vst.msk [vmem:[#allocation3 + $0x20] sm:$0xff] %vm741_vm4, %v3995_v24 }
 0x559   : > { %1358 = vrot.lane.b32.xlu0 %v1310_v27, %s3822_s13 }
 0x55b   : > { %1638 = vrot.lane.b32.xlu1 %v4015_v29, %s3827_s15  ;;  %v1614_v29 = vpop.permute.xlu1 %1613 }
 0x55c   : > { %v1623_v46 = vsel %vm1621_vm2, %v1614_v29, %v4313_v62 }
 0x55d   : > { %1617 = vrot.lane.b32.xlu0 %v4029_v32, %s3830_s7 }
 0x55f   : > { %1642 = vrot.lane.b32.xlu1 %v4029_v32, %s3827_s15 }
 0x561   : > { %1636 = vrot.lane.b32.xlu0 %v4042_v36, %s3827_s15 }
 0x563   : > { %1702 = vperm.xlu1 %3705, %v1595_v19   ;;  %v1691_v19 = vpack.c.bf16 %v1623_v46, %v4078_v52 }
 0x565   : > { %1640 = vrot.lane.b32.xlu0 %v4020_v30, %s3827_s15 }
 0x569   : > { %1644 = vrot.lane.b32.xlu0 %v3995_v24, %s3827_s15 }
 0x5b1   : > { %v1329_v56 = vpop.permute.xlu1 %1328 }
 0x5b5   : > { %v1327_v59 = vpop.permute.xlu1 %1326 }
 0x5b6   : > { %v1336_v63 = vsel %vm485_vm9, %v1327_v59, %v1329_v56 }
 0x5b7   : > { %v1389_v5 = vpack.c.bf16 %v1336_v63, %v1306_v21 }
 0x5b9   : > { %v1353_v32 = vpop.permute.xlu1 %1352 }
 0x5bb   : > { %v1331_v1 = vpop.permute.xlu0 %1330 }
 0x5bc   : > { %v1337_v2 = vsel %vm485_vm9, %v1329_v56, %v1331_v1 }
 0x5bd   : > { %v1333_v4 = vpop.permute.xlu1 %1332  ;;  %v1390_v36 = vpack.c.bf16 %v1337_v2, %v1307_v20 }
 0x5be   : > { %v1338_v15 = vsel %vm485_vm9, %v1331_v1, %v1333_v4 }
 0x5bf   : > { %v1351_v6 = vpop.permute.xlu0 %1350  ;;  %1422 = vmatprep.subr.bf16.mxu1 %v1390_v36  ;;  %v1391_v31 = vpack.c.bf16 %v1338_v15, %v4274_v41 }
 0x5c0   : > { %v1360_v30 = vsel %vm510_vm10, %v1351_v6, %v1353_v32  ;;  %1423 = vmatpush1.bf16.msra.mxu1 %v1389_v5 }
 0x5c1   : > { %v1357_v24 = vpop.permute.xlu1 %1356  ;;  %v1394_v8 = vpack.c.bf16 %v1360_v30, %v1360_v30 }
 0x5c3   : > { %v1355_v7 = vpop.permute.xlu0 %1354  ;;  %v1408_v17 = vsel %vm559_vm11, %v1394_v8, 0 }
 0x5c4   : > { %v1361_v9 = vsel %vm510_vm10, %v1353_v32, %v1355_v7  ;;  %v1362_v20 = vsel %vm510_vm10, %v1355_v7, %v1357_v24 }
 0x5c5   : > { %v1612_v13 = vpop.permute.xlu1 %1611  ;;  %v1395_v14 = vpack.c.bf16 %v1361_v9, %v1361_v9  ;;  %v1396_v33 = vpack.c.bf16 %v1362_v20, %v1362_v20 }
 0x5c6   : > { %v1622_v43 = vsel %vm1621_vm2, %v1612_v13, %v1614_v29 }
 0x5c7   : > { %v1335_v16 = vpop.permute.xlu0 %1334  ;;  %3458 = vmatprep.subr.msk.bf16.mxu1 %vm559_vm11, %v1395_v14  ;;  %v1414_v41 = vsel %vm559_vm11, %v1396_v33, 0 }
 0x5c8   : > { %v1339_v21 = vsel %vm485_vm9, %v1333_v4, %v1335_v16  ;;  %1349 = vst.msk [vmem:[#allocation3 + $0x48] sm:$0xff] %vm1319_vm1, %v1335_v16  ;;  %1425 = vmatpush1.bf16.msra.mxu1 %v1408_v17 }
 0x5c9   : > { %v1620_v25 = vpop.permute.xlu1 %1619  ;;  %v1392_v28 = vpack.c.bf16 %v1339_v21, %v4278_v18  ;;  %3553 = vmatprep.subr.bf16.mxu1 %v3824_v3 }
 0x5ca   : > { %1635 = vst.msk [vmem:[#allocation3 + $0x98] sm:$0xff] %vm741_vm4, %v1620_v25 }
 0x5cb   : > { %v1359_v35 = vpop.permute.xlu0 %1358  ;;  %1463 = vmatprep.subr.bf16.mxu0 %v1392_v28  ;;  %3459 = vmatmul.mubr.msk.bf16.vlgmr.msra.gmra.mrb[16].mxu1 %vm555_vm12, %v3456_v22 }
 0x5cc   : > { %v1363_v39 = vsel %vm510_vm10, %v1357_v24, %v1359_v35  ;;  %1373 = vst.msk [vmem:[#allocation3 + $0x70] sm:$0xff] %vm1319_vm1, %v1359_v35  ;;  %1464 = vmatpush1.bf16.msra.mxu0 %v1391_v31  ;;  %3557 = vmatprep.mubr.msk.bf16.mxu1 %vm3825_vm13, %v3824_v3  ;;  %vm2162_vm1 = vcmp.lt.s32.totalorder %v4125_v12, 22 }
 0x5cd   : > { %v1397_v40 = vpack.c.bf16 %v1363_v39, %v1363_v39  ;;  %v1639_v26 = vpop.permute.xlu1 %1638 }
 0x5cf   : > { %v1383_v18 = vld [vmem:[#allocation3 + $0x48] sm:$0xff]  ;;  %v1618_v45 = vpop.permute.xlu0 %1617  ;;  %3460 = vmatprep.subr.msk.bf16.mxu0 %vm559_vm11, %v1397_v40 }
 0x5d0   : > { %1605 = vst.msk [vmem:[#allocation3 + $0x48] sm:$0xff] %vm741_vm4, %v4057_v38  ;;  %v1393_v49 = vpack.c.bf16 %v1383_v18, %v4293_v55  ;;  %1466 = vmatpush1.bf16.msra.mxu0 %v1414_v41  ;;  %v1690_v55 = vpack.c.bf16 %v1622_v43, %v4091_v58  ;;  %v1625_v29 = vsel %vm1621_vm2, %v1618_v45, %v1620_v25 }
 0x5d1   : > { %1724 = vmatprep.subr.bf16.mxu0 %v4063_v42  ;;  %v1643_v63 = vpop.permute.xlu1 %1642  ;;  %v1693_v1 = vpack.c.bf16 %v1625_v29, %v4103_v0  ;;  %v1594_v0 = vld [vmem:[%s4840_s4] sm:$0xf] }
 0x5d2   : > { %3554 = vmatpush3.bf16.msra.mxu1 %v1393_v49  ;;  %v1679_v7 = vld [vmem:[#allocation3 + $0x98] sm:$0xff] }
 0x5d3   : > { %v1637_v54 = vpop.permute.xlu0 %1636  ;;  %3555 = vmatprep.subr.bf16.mxu1 %v3824_v3  ;;  %v1388_v27 = vld [vmem:[#allocation3 + $0x70] sm:$0xff]  ;;  %3461 = vmatmul.mubr.msk.bf16.vlgmr.msra.gmra.mrb[20].mxu0 %vm555_vm12, %v3456_v22 }
 0x5d4   : > { %v1646_v56 = vsel %vm1045_vm14, %v1637_v54, %v1639_v26  ;;  %v1398_v38 = vpack.c.bf16 %v1388_v27, %v1388_v27  ;;  %1610 = vst.msk [vmem:[#allocation3 + $0x70] sm:$0xff] %vm741_vm4, %v4098_v61  ;;  %1725 = vmatpush1.bf16.msra.mxu0 %v4082_v53  ;;  %1756 = vmatprep.mubr.bf16.mxu0 %v3823_v34 }
 0x5d5   : > { %1726 = vmatprep.subr.bf16.mxu0 %v1691_v19  ;;  %v1695_v52 = vpack.c.bf16 %v1646_v56, %v1646_v56  ;;  %v1624_v53 = vsel %vm1621_vm2, %v4313_v62, %v1618_v45 }
 0x5d6   : > { %v1420_v42 = vsel %vm559_vm11, %v1398_v38, 0  ;;  %v1692_v62 = vpack.c.bf16 %v1624_v53, %v4088_v57 }
 0x5d7   : > { %v1641_v59 = vpop.permute.xlu0 %1640  ;;  %3556 = vmatpush3.bf16.msra.mxu1 %v1420_v42  ;;  %v1710_v4 = vsel %vm559_vm11, %v1695_v52, 0 }
 0x5d8   : > { %v1647_v32 = vsel %vm1045_vm14, %v1639_v26, %v1641_v59  ;;  %1765 = vmatprep.subr.bf16.mxu1 %v4070_v47  ;;  %1727 = vmatpush1.bf16.msra.mxu0 %v1690_v55  ;;  %v1648_v58 = vsel %vm1045_vm14, %v1641_v59, %v1643_v63  ;;  %v1669_v47 = vld [vmem:[#allocation3 + $0x48] sm:$0xff] }
 0x5d9   : > { %v1696_v61 = vpack.c.bf16 %v1647_v32, %v1647_v32  ;;  %v1697_v6 = vpack.c.bf16 %v1648_v58, %v1648_v58 }
 0x5da   : > { %3558 = vmatmul.mubr.msk.bf16.vlgmr.msra.gmra.mrb[20].mxu1 %vm555_vm12, %v3456_v22 }
 0x5db   : > { %v1645_v2 = vpop.permute.xlu0 %1644  ;;  %1766 = vmatpush1.bf16.msra.mxu1 %v4073_v48  ;;  %3463 = vmatprep.subr.msk.bf16.mxu0 %vm559_vm11, %v1696_v61  ;;  %v1664_v48 = vld [vmem:[#allocation3 + $0x20] sm:$0xff]  ;;  %v1674_v24 = vld [vmem:[#allocation3 + $0x70] sm:$0xff]  ;;  %v1716_v57 = vsel %vm559_vm11, %v1697_v6, 0 }
 0x5dc   : > { %v1649_v36 = vsel %vm1045_vm14, %v1643_v63, %v1645_v2  ;;  %1659 = vst.msk [vmem:[#allocation3 + $0xc0] sm:$0xff] %vm741_vm4, %v1645_v2  ;;  %1767 = vmatprep.subr.bf16.mxu1 %v1693_v1  ;;  %1729 = vmatpush1.bf16.msra.mxu0 %v1710_v4  ;;  %v1689_v30 = vpack.c.bf16 %v1669_v47, %v1664_v48 }
 0x5dd   : > { %v1698_v5 = vpack.c.bf16 %v1649_v36, %v1649_v36  ;;  %3561 = vmatprep.subr.bf16.mxu0 %v3824_v3  ;;  %1797 = vmatprep.mubr.bf16.mxu1 %v3823_v34  ;;  %v1694_v8 = vpack.c.bf16 %v1679_v7, %v1674_v24 }
 0x5df   : > { %1768 = vmatpush1.bf16.msra.mxu1 %v1692_v62  ;;  %3464 = vmatmul.mubr.msk.bf16.vlgmr.msra.gmra.mrb[24].mxu0 %vm1705_vm3, %v1594_v0 }
 0x5e0   : > { %3465 = vmatprep.subr.msk.bf16.mxu1 %vm559_vm11, %v1698_v5  ;;  %3562 = vmatpush3.bf16.msra.mxu0 %v1689_v30 }
 0x5e1   : > { %3563 = vmatprep.subr.bf16.mxu0 %v3824_v3  ;;  %3567 = vmatprep.mubr.msk.bf16.mxu0 %vm3825_vm13, %v3824_v3 }
 0x5e2   : > { %v1703_v40 = vpop.permute.xlu1 %1702 }
 0x5e3   : > { %1770 = vmatpush1.bf16.msra.mxu1 %v1716_v57  ;;  %v1684_v9 = vld [vmem:[#allocation3 + $0xc0] sm:$0xff] }
 0x5e4   : > { %3564 = vmatpush3.bf16.msra.mxu0 %v1694_v8  ;;  %v1699_v13 = vpack.c.bf16 %v1684_v9, %v1684_v9 }
 0x5e5   : > { %3565 = vmatprep.subr.bf16.mxu0 %v3824_v3 }
 0x5e6   : > { %3466 = vmatmul.mubr.msk.bf16.vlgmr.msra.gmra.mrb[24].mxu1 %vm1705_vm3, %v1594_v0  ;;  %v1722_v14 = vsel %vm559_vm11, %v1699_v13, 0 }
 0x5e7   : > { %2072 = vmatprep.mubr.bf16.mxu1 %v3823_v34 }
 0x5e8   : > { %3566 = vmatpush3.bf16.msra.mxu0 %v1722_v14 }
 0x5eb   : > { %3568 = vmatmul.mubr.msk.bf16.vlgmr.msra.gmra.mrb[28].mxu0 %vm1705_vm3, %v1594_v0  ;;  %v3469_v0 = vld [vmem:[%s4841_s5 + $0x8] sm:$0xff] }
 0x5ec   : > { %2113 = vmatprep.mubr.bf16.mxu0 %v3823_v34 }
 0x69e   : > { %v4387_v15 = vpop.f32.mrb[16].mxu1 }
 0x69f   : > { %v4389_v16 = vpop.f32.mrb[17].mxu1 }
 0x6a0   : > { %v1460_v17 = vpop.f32.mrb[18].mxu1 }
 0x6a1   : > { %v1461_v20 = vpop.f32.mrb[19].mxu1 }
 0x6a6   : > { %v4391_v21 = vpop.f32.mrb[20].mxu0 }
 0x6a7   : > { %v4393_v22 = vpop.f32.mrb[21].mxu0 }
 0x6a8   : > { %v1501_v25 = vpop.f32.mrb[22].mxu0 }
 0x6a9   : > { %v1502_v28 = vpop.f32.mrb[23].mxu0 }
 0x6ad   : > { %v4395_v31 = vpop.f32.mrb[20].mxu1 }
 0x6ae   : > { %v3559_v35 = vpop.f32.mrb[21].mxu1 }
 0x6af   : > { %v1541_v33 = vpop.f32.mrb[22].mxu1 }
 0x6b0   : > { %v3560_v39 = vpop.f32.mrb[23].mxu1 }
 0x6b2   : > { %v1758_v18 = vpop.f32.mrb[24].mxu0 }
 0x6b3   : > { %v1759_v45 = vadd.f32 %v1758_v18, %v1703_v40  ;;  %v1760_v41 = vpop.f32.mrb[25].mxu0 }
 0x6b4   : > { %v1761_v46 = vadd.f32 %v1760_v41, %v1703_v40  ;;  %v1762_v49 = vpop.f32.mrb[26].mxu0 }
 0x6b5   : > { %v1846_v43 = vsel %vm4179_vm8, 0.0, %v1759_v45  ;;  %v1763_v26 = vpop.f32.mrb[27].mxu0 }
 0x6b6   : > { %vm1852_vm4 = vcmp.ge.f32.partialorder %v1761_v46, 0.0  ;;  %v1857_v54 = vmul.f32 0.1, %v1761_v46  ;;  %v1856_v27 = vmul.f32 0.1, %v1846_v43  ;;  %vm1851_vm5 = vcmp.ge.f32.partialorder %v1846_v43, 0.0 }
 0x6b8   : > { %v1862_v19 = vsel %vm1852_vm4, %v1761_v46, %v1857_v54  ;;  %v1861_v29 = vsel %vm1851_vm5, %v1846_v43, %v1856_v27  ;;  %vm2167_vm4 = vmand %vm3979_vm0, %vm2162_vm1  ;;  %vm2192_vm5 = vcmask 64512  }
 0x6b9   : > { %v1799_v56 = vpop.f32.mrb[24].mxu1  ;;  %1883 = vrot.lane.b32.xlu0 %v1862_v19, %s3821_s10 }
 0x6ba   : > { %v1800_v38 = vadd.f32 %v1799_v56, %v1703_v40  ;;  %v1801_v42 = vpop.f32.mrb[25].mxu1 }
 0x6bb   : > { %v1803_v55 = vpop.f32.mrb[26].mxu1  ;;  %v1802_v4 = vadd.f32 %v1801_v42, %v1703_v40  ;;  %v3468_v42 = vld [vmem:[%s4840_s4 + $0x4] sm:$0xf] }
 0x6bc   : > { %vm1853_vm6 = vcmp.ge.f32.partialorder %v1800_v38, 0.0  ;;  %v1858_v59 = vmul.f32 0.1, %v1800_v38  ;;  %v1804_v52 = vpop.f32.mrb[27].mxu1 }
 0x6bd   : > { %1881 = vrot.lane.b32.xlu0 %v1861_v29, %s3821_s10  ;;  %v1859_v47 = vmul.f32 0.1, %v1802_v4  ;;  %vm1854_vm15 = vcmp.ge.f32.partialorder %v1802_v4, 0.0 }
 0x6be   : > { %v4401_v60 = vsel %vm1853_vm6, %v1800_v38, %v1858_v59  ;;  %v1840_v32 = vpop.f32.mrb[28].mxu0 }
 0x6bf   : > { %1885 = vrot.lane.b32.xlu1 %v4401_v60, %s3821_s10  ;;  %v1841_v61 = vadd.f32 %v1840_v32, %v1703_v40  ;;  %v3569_v53 = vpop.f32.mrb[29].mxu0  ;;  %v1864_v36 = vsel %vm1854_vm15, %v1802_v4, %v1859_v47 }
 0x6c0   : > { %v1843_v63 = vpop.f32.mrb[30].mxu0 }
 0x6c1   : > { %vm1855_vm8 = vcmp.ge.f32.partialorder %v1841_v61, 0.0  ;;  %v1860_v1 = vmul.f32 0.1, %v1841_v61  ;;  %1909 = vrot.lane.b32.xlu0 %v4401_v60, %s3822_s13  ;;  %v3570_v58 = vpop.f32.mrb[31].mxu0 }
 0x6c3   : > { %v1865_v2 = vsel %vm1855_vm8, %v1841_v61, %v1860_v1  ;;  %1907 = vrot.lane.b32.xlu1 %v1862_v19, %s3822_s13 }
 0x6c4   : > { %1875 = vst.msk [vmem:[#allocation3 + $0x20] sm:$0xff] %vm1874_vm7, %v1865_v2 }
 0x6c5   : > { %1933 = vrot.lane.b32.xlu0 %v4401_v60, %s3830_s7 }
 0x6c7   : > { %1931 = vrot.lane.b32.xlu1 %v1862_v19, %s3830_s7 }
 0x6c9   : > { %1929 = vrot.lane.b32.xlu0 %v1861_v29, %s3830_s7 }
 0x6cb   : > { %1905 = vrot.lane.b32.xlu1 %v1861_v29, %s3822_s13  ;;  %v1981_v63 = vld [vmem:[#allocation3 + $0x20] sm:$0xff] }
 0x6cd   : > { %1955 = vrot.lane.b32.xlu0 %v1862_v19, %s3827_s15 }
 0x6cf   : > { %1953 = vrot.lane.b32.xlu1 %v1861_v29, %s3827_s15 }
 0x6d1   : > { %1887 = vrot.lane.b32.xlu0 %v1864_v36, %s3821_s10 }
 0x6d3   : > { %1957 = vrot.lane.b32.xlu1 %v4401_v60, %s3827_s15 }
 0x6d5   : > { %1911 = vrot.lane.b32.xlu0 %v1864_v36, %s3822_s13 }
 0x6d7   : > { %1889 = vrot.lane.b32.xlu1 %v1865_v2, %s3821_s10 }
 0x6d9   : > { %1935 = vrot.lane.b32.xlu0 %v1864_v36, %s3830_s7 }
 0x6db   : > { %1913 = vrot.lane.b32.xlu1 %v1865_v2, %s3822_s13 }
 0x6dd   : > { %1959 = vrot.lane.b32.xlu0 %v1864_v36, %s3827_s15 }
 0x6df   : > { %1937 = vrot.lane.b32.xlu1 %v1865_v2, %s3830_s7 }
 0x6e1   : > { %2019 = vperm.xlu0 %3706, %v3469_v0  }
 0x6e3   : > { %1961 = vrot.lane.b32.xlu1 %v1865_v2, %s3827_s15 }
 0x72b   : > { %v1884_v62 = vpop.permute.xlu0 %1883 }
 0x72f   : > { %v1882_v5 = vpop.permute.xlu0 %1881 }
 0x730   : > { %v1891_v6 = vsel %vm485_vm9, %v1882_v5, %v1884_v62 }
 0x731   : > { %v1886_v48 = vpop.permute.xlu1 %1885  ;;  %v2002_v57 = vpack.c.bf16 %v1891_v6, %v1861_v29 }
 0x732   : > { %v1892_v30 = vsel %vm485_vm9, %v1884_v62, %v1886_v48 }
 0x733   : > { %v1910_v24 = vpop.permute.xlu0 %1909  ;;  %v2003_v7 = vpack.c.bf16 %v1892_v30, %v1862_v19 }
 0x735   : > { %v1908_v8 = vpop.permute.xlu1 %1907  ;;  %2040 = vmatprep.subr.bf16.mxu1 %v2003_v7 }
 0x736   : > { %2041 = vmatpush1.bf16.msra.mxu1 %v2002_v57  ;;  %v1916_v14 = vsel %vm510_vm10, %v1908_v8, %v1910_v24 }
 0x737   : > { %v1934_v9 = vpop.permute.xlu0 %1933 }
 0x739   : > { %v1932_v13 = vpop.permute.xlu1 %1931 }
 0x73a   : > { %v1940_v17 = vsel %vm1621_vm2, %v1932_v13, %v1934_v9 }
 0x73b   : > { %v1930_v20 = vpop.permute.xlu0 %1929  ;;  %v2008_v25 = vpack.c.bf16 %v1940_v17, %v1916_v14 }
 0x73c   : > { %v1939_v33 = vsel %vm1621_vm2, %v1930_v20, %v1932_v13 }
 0x73d   : > { %v1906_v28 = vpop.permute.xlu1 %1905  ;;  %2042 = vmatprep.subr.bf16.mxu1 %v2008_v25 }
 0x73e   : > { %v1915_v35 = vsel %vm510_vm10, %v1906_v28, %v1908_v8 }
 0x73f   : > { %v1956_v39 = vpop.permute.xlu0 %1955  ;;  %v2007_v40 = vpack.c.bf16 %v1939_v33, %v1915_v35 }
 0x741   : > { %v1954_v18 = vpop.permute.xlu1 %1953  ;;  %2043 = vmatpush1.bf16.msra.mxu1 %v2007_v40 }
 0x742   : > { %v1963_v45 = vsel %vm1045_vm14, %v1954_v18, %v1956_v39 }
 0x743   : > { %v1888_v41 = vpop.permute.xlu0 %1887  ;;  %v2012_v49 = vpack.c.bf16 %v1963_v45, %v1963_v45 }
 0x744   : > { %v1893_v27 = vsel %vm485_vm9, %v1886_v48, %v1888_v41 }
 0x745   : > { %v1958_v46 = vpop.permute.xlu1 %1957  ;;  %v2026_v56 = vsel %vm559_vm11, %v2012_v49, 0  ;;  %v2004_v59 = vpack.c.bf16 %v1893_v27, %v4401_v60 }
 0x746   : > { %v1964_v43 = vsel %vm1045_vm14, %v1956_v39, %v1958_v46 }
 0x747   : > { %v1912_v26 = vpop.permute.xlu0 %1911  ;;  %v2013_v54 = vpack.c.bf16 %v1964_v43, %v1964_v43 }
 0x748   : > { %v1917_v47 = vsel %vm510_vm10, %v1910_v24, %v1912_v26 }
 0x749   : > { %v1890_v19 = vpop.permute.xlu1 %1889  ;;  %3470 = vmatprep.subr.msk.bf16.mxu1 %vm559_vm11, %v2013_v54 }
 0x74a   : > { %v1894_v38 = vsel %vm485_vm9, %v1888_v41, %v1890_v19  ;;  %1904 = vst.msk [vmem:[#allocation3 + $0x48] sm:$0xff] %vm1874_vm7, %v1890_v19  ;;  %2045 = vmatpush1.bf16.msra.mxu1 %v2026_v56 }
 0x74b   : > { %v1936_v55 = vpop.permute.xlu0 %1935  ;;  %v2005_v29 = vpack.c.bf16 %v1894_v38, %v1864_v36  ;;  %3571 = vmatprep.subr.bf16.mxu1 %v3824_v3 }
 0x74c   : > { %v1941_v61 = vsel %vm1621_vm2, %v1934_v9, %v1936_v55 }
 0x74d   : > { %v1914_v52 = vpop.permute.xlu1 %1913  ;;  %3471 = vmatmul.mubr.msk.bf16.vlgmr.msra.gmra.mrb[28].mxu1 %vm1705_vm3, %v3468_v42  ;;  %2081 = vmatprep.subr.bf16.mxu0 %v2005_v29  ;;  %v2009_v0 = vpack.c.bf16 %v1941_v61, %v1917_v47 }
 0x74e   : > { %1928 = vst.msk [vmem:[#allocation3 + $0x70] sm:$0xff] %vm1874_vm7, %v1914_v52  ;;  %2082 = vmatpush1.bf16.msra.mxu0 %v2004_v59  ;;  %3577 = vmatprep.mubr.msk.bf16.mxu1 %vm3825_vm13, %v3824_v3  ;;  %v1918_v58 = vsel %vm510_vm10, %v1912_v26, %v1914_v52  ;;  %v3716_v52 = vld [vmem:[#allocation2 + $0x8] sm:$0xff] }
 0x74f   : > { %v1960_v32 = vpop.permute.xlu0 %1959 }
 0x750   : > { %v1965_v2 = vsel %vm1045_vm14, %v1958_v46, %v1960_v32 }
 0x751   : > { %v1938_v53 = vpop.permute.xlu1 %1937  ;;  %v1986_v1 = vld [vmem:[#allocation3 + $0x48] sm:$0xff]  ;;  %v2014_v5 = vpack.c.bf16 %v1965_v2, %v1965_v2 }
 0x752   : > { %v1942_v60 = vsel %vm1621_vm2, %v1936_v55, %v1938_v53  ;;  %1952 = vst.msk [vmem:[#allocation3 + $0x98] sm:$0xff] %vm1874_vm7, %v1938_v53  ;;  %v2006_v4 = vpack.c.bf16 %v1986_v1, %v1981_v63 }
 0x753   : > { %v2010_v36 = vpack.c.bf16 %v1942_v60, %v1918_v58  ;;  %v2032_v24 = vsel %vm559_vm11, %v2014_v5, 0  ;;  %v3717_v60 = vld [vmem:[#allocation2 + $0x10] sm:$0xff] }
 0x754   : > { %3572 = vmatpush3.bf16.msra.mxu1 %v2006_v4 }
 0x755   : > { %v1962_v62 = vpop.permute.xlu1 %1961  ;;  %3573 = vmatprep.subr.bf16.mxu1 %v3824_v3  ;;  %2083 = vmatprep.subr.bf16.mxu0 %v2010_v36  ;;  %v1991_v30 = vld [vmem:[#allocation3 + $0x70] sm:$0xff] }
 0x756   : > { %v1966_v48 = vsel %vm1045_vm14, %v1960_v32, %v1962_v62  ;;  %1976 = vst.msk [vmem:[#allocation3 + $0xc0] sm:$0xff] %vm1874_vm7, %v1962_v62  ;;  %2084 = vmatpush1.bf16.msra.mxu0 %v2009_v0 }
 0x757   : > { %v2015_v6 = vpack.c.bf16 %v1966_v48, %v1966_v48  ;;  %v3718_v48 = vld [vmem:[#allocation2 + $0x18] sm:$0xff] }
 0x759   : > { %v1996_v7 = vld [vmem:[#allocation3 + $0x98] sm:$0xff]  ;;  %3472 = vmatprep.subr.msk.bf16.mxu0 %vm559_vm11, %v2015_v6 }
 0x75a   : > { %v2011_v57 = vpack.c.bf16 %v1996_v7, %v1991_v30  ;;  %2086 = vmatpush1.bf16.msra.mxu0 %v2032_v24  ;;  %v3719_v30 = vld [vmem:[#allocation2 + $0x20] sm:$0xff] }
 0x75c   : > { %3574 = vmatpush3.bf16.msra.mxu1 %v2011_v57 }
 0x75d   : > { %3575 = vmatprep.subr.bf16.mxu1 %v3824_v3  ;;  %v2001_v8 = vld [vmem:[#allocation3 + $0xc0] sm:$0xff]  ;;  %3473 = vmatmul.mubr.msk.bf16.vlgmr.msra.gmra.mrb[32].mxu0 %vm1705_vm3, %v3468_v42 }
 0x75e   : > { %v2016_v9 = vpack.c.bf16 %v2001_v8, %v2001_v8  ;;  %2452 = vmatprep.mubr.bf16.mxu0 %v3823_v34 }
 0x760   : > { %v2038_v13 = vsel %vm559_vm11, %v2016_v9, 0  ;;  %v2020_v14 = vpop.permute.xlu0 %2019 }
 0x761   : > { %3576 = vmatpush3.bf16.msra.mxu1 %v2038_v13  ;;  %v3476_v13 = vld [vmem:[%s4841_s5 + $0x10] sm:$0xff] }
 0x764   : > { %3578 = vmatmul.mubr.msk.bf16.vlgmr.msra.gmra.mrb[32].mxu1 %vm1705_vm3, %v3468_v42  ;;  %v3715_v42 = vld [vmem:[#allocation2] sm:$0xff] }
 0x765   : > { %2493 = vmatprep.mubr.bf16.mxu1 %v3823_v34 }
 0x820   : > { %v2074_v17 = vpop.f32.mrb[28].mxu1 }
 0x821   : > { %v2075_v20 = vadd.f32 %v2074_v17, %v2020_v14  ;;  %v2076_v25 = vpop.f32.mrb[29].mxu1 }
 0x822   : > { %v2077_v28 = vadd.f32 %v2076_v25, %v2020_v14  ;;  %v2078_v35 = vpop.f32.mrb[30].mxu1 }
 0x823   : > { %v2079_v33 = vpop.f32.mrb[31].mxu1  ;;  %v2172_v39 = vsel %vm2167_vm4, 0.0, %v2075_v20  ;;  %vm2267_vm4 = vcmask 957440  }
 0x824   : > { %2184 = vrot.lane.b32.xlu0 %v2077_v28, %s3831_s26  ;;  %2182 = vrot.lane.b32.xlu1 %v2172_v39, %s3831_s26 }
 0x830   : > { %v2115_v40 = vpop.f32.mrb[32].mxu0 }
 0x831   : > { %v2116_v18 = vadd.f32 %v2115_v40, %v2020_v14  ;;  %v2117_v45 = vpop.f32.mrb[33].mxu0 }
 0x832   : > { %v2118_v41 = vadd.f32 %v2117_v45, %v2020_v14  ;;  %v2119_v46 = vpop.f32.mrb[34].mxu0 }
 0x833   : > { %v2120_v49 = vpop.f32.mrb[35].mxu0  ;;  %2186 = vrot.lane.b32.xlu1 %v2116_v18, %s3831_s26 }
 0x834   : > { %2188 = vrot.lane.b32.xlu0 %v2118_v41, %s3831_s26 }
 0x837   : > { %v2156_v43 = vpop.f32.mrb[32].mxu1 }
 0x838   : > { %v2157_v26 = vadd.f32 %v2156_v43, %v2020_v14  ;;  %v3579_v54 = vpop.f32.mrb[33].mxu1 }
 0x839   : > { %v2159_v27 = vpop.f32.mrb[34].mxu1 }
 0x83a   : > { %2190 = vrot.lane.b32.xlu1 %v2157_v26, %s3831_s26  ;;  %v3580_v19 = vpop.f32.mrb[35].mxu1  ;;  %s3839_s26 = smov 104  }
 0x896   : > { %v2185_v56 = vpop.permute.xlu0 %2184  ;;  %v2183_v38 = vpop.permute.xlu1 %2182 }
 0x897   : > { %v4471_v55 = vadd.f32 %v3715_v42, %v2183_v38  ;;  %v2193_v29 = vsel %vm2192_vm5, %v2183_v38, %v2185_v56 }
 0x898   : > { %v4476_v32 = vadd.f32 %v3716_v52, %v2193_v29 }
 0x899   : > { %vm2207_vm6 = vcmp.ge.f32.partialorder %v4471_v55, 0.0  ;;  %v2212_v59 = vmul.f32 0.1, %v4471_v55 }
 0x89a   : > { %v2213_v53 = vmul.f32 0.1, %v4476_v32  ;;  %vm2208_vm8 = vcmp.ge.f32.partialorder %v4476_v32, 0.0 }
 0x89b   : > { %v2217_v61 = vsel %vm2207_vm6, %v4471_v55, %v2212_v59  ;;  %vm2317_vm6 = vcmask 908288  }
 0x89c   : > { %2257 = vrot.lane.b32.xlu1 %v2217_v61, %s3832_s27  ;;  %2231 = vrot.lane.b32.xlu0 %v2217_v61, %s3833_s18  ;;  %v2218_v63 = vsel %vm2208_vm8, %v4476_v32, %v2213_v53  ;;  %vm2342_vm8 = vcmask 883712  }
 0x8a0   : > { %2307 = vrot.lane.b32.xlu1 %v2217_v61, %s3834_s16  ;;  %2282 = vrot.lane.b32.xlu0 %v2217_v61, %s3835_s17 }
 0x8a4   : > { %2332 = vrot.lane.b32.xlu0 %v2217_v61, %s3836_s28  ;;  %2334 = vrot.lane.b32.xlu1 %v2218_v63, %s3836_s28 }
 0x8a5   : > { %v2187_v1 = vpop.permute.xlu1 %2186 }
 0x8a6   : > { %v2194_v58 = vsel %vm2192_vm5, %v2185_v56, %v2187_v1  ;;  %v2189_v36 = vpop.permute.xlu0 %2188 }
 0x8a7   : > { %v4489_v2 = vadd.f32 %v3717_v60, %v2194_v58  ;;  %v2195_v62 = vsel %vm2192_vm5, %v2187_v1, %v2189_v36 }
 0x8a8   : > { %2233 = vrot.lane.b32.xlu0 %v2218_v63, %s3833_s18  ;;  %v4501_v6 = vadd.f32 %v3718_v48, %v2195_v62 }
 0x8a9   : > { %vm2209_vm7 = vcmp.ge.f32.partialorder %v4489_v2, 0.0  ;;  %v2214_v4 = vmul.f32 0.1, %v4489_v2 }
 0x8aa   : > { %v2215_v24 = vmul.f32 0.1, %v4501_v6  ;;  %vm2210_vm15 = vcmp.ge.f32.partialorder %v4501_v6, 0.0 }
 0x8ab   : > { %v2219_v47 = vsel %vm2209_vm7, %v4489_v2, %v2214_v4  ;;  %vm2292_vm7 = vcmask 932864  }
 0x8ac   : > { %2259 = vrot.lane.b32.xlu0 %v2218_v63, %s3832_s27  ;;  %2235 = vrot.lane.b32.xlu1 %v2219_v47, %s3833_s18  ;;  %v2191_v0 = vpop.permute.xlu1 %2190  ;;  %v2220_v8 = vsel %vm2210_vm15, %v4501_v6, %v2215_v24  ;;  %vm2255_vm15 = vcmask 80896  }
 0x8ad   : > { %v2196_v5 = vsel %vm2192_vm5, %v2189_v36, %v2191_v0  ;;  %vm2241_vm5 = vcmask 982016  }
 0x8ae   : > { %v4503_v7 = vadd.f32 %v3719_v30, %v2196_v5 }
 0x8b0   : > { %2284 = vrot.lane.b32.xlu0 %v2218_v63, %s3835_s17  ;;  %2261 = vrot.lane.b32.xlu1 %v2219_v47, %s3832_s27  ;;  %v2216_v57 = vmul.f32 0.1, %v4503_v7  ;;  %vm2211_vm1 = vcmp.ge.f32.partialorder %v4503_v7, 0.0 }
 0x8b2   : > { %v2221_v9 = vsel %vm2211_vm1, %v4503_v7, %v2216_v57  ;;  %v3475_v57 = vld [vmem:[%s4840_s4 + $0x8] sm:$0xf]  ;;  %vm2542_vm1 = vcmp.lt.s32.totalorder %v4125_v12, 10 }
 0x8b4   : > { %2309 = vrot.lane.b32.xlu0 %v2218_v63, %s3834_s16  ;;  %2286 = vrot.lane.b32.xlu1 %v2219_v47, %s3835_s17 }
 0x8b8   : > { %2336 = vrot.lane.b32.xlu0 %v2219_v47, %s3836_s28  ;;  %2311 = vrot.lane.b32.xlu1 %v2219_v47, %s3834_s16 }
 0x8bc   : > { %2237 = vrot.lane.b32.xlu1 %v2220_v8, %s3833_s18  ;;  %2239 = vrot.lane.b32.xlu0 %v2221_v9, %s3833_s18  ;;  %s3841_s18 = smov 123  }
 0x8c0   : > { %2265 = vrot.lane.b32.xlu1 %v2221_v9, %s3832_s27  ;;  %2263 = vrot.lane.b32.xlu0 %v2220_v8, %s3832_s27  ;;  %s3840_s27 = smov 122  }
 0x8c4   : > { %2288 = vrot.lane.b32.xlu1 %v2220_v8, %s3835_s17  ;;  %2290 = vrot.lane.b32.xlu0 %v2221_v9, %s3835_s17 }
 0x8c8   : > { %2315 = vrot.lane.b32.xlu1 %v2221_v9, %s3834_s16  ;;  %2313 = vrot.lane.b32.xlu0 %v2220_v8, %s3834_s16  ;;  %s3495_s16 = sshll.u32 %s3806_s11, 3 }
 0x8c9   : > { %s3314_s17 = sadd.s32 %s3495_s16, %s3965_s25 }
 0x8cc   : > { %2338 = vrot.lane.b32.xlu1 %v2220_v8, %s3836_s28  ;;  %2340 = vrot.lane.b32.xlu0 %v2221_v9, %s3836_s28  ;;  %s3496_s28 = sshll.u32 %s3314_s17, 4 }
 0x8d0   : > { %2399 = vperm.xlu1 %3705, %v3476_v13  }
 0x90e   : > { %v2232_v14 = vpop.permute.xlu0 %2231  ;;  %v2258_v17 = vpop.permute.xlu1 %2257 }
 0x912   : > { %v2283_v20 = vpop.permute.xlu0 %2282  ;;  %v2308_v25 = vpop.permute.xlu1 %2307 }
 0x916   : > { %v2333_v28 = vpop.permute.xlu0 %2332  ;;  %v2335_v35 = vpop.permute.xlu1 %2334 }
 0x917   : > { %v2343_v29 = vsel %vm2342_vm8, %v2333_v28, %v2335_v35 }
 0x918   : > { %v2392_v47 = vpack.c.bf16 %v2343_v29, %v2343_v29 }
 0x91a   : > { %v2234_v33 = vpop.permute.xlu0 %2233  ;;  %v2406_v62 = vsel %vm559_vm11, %v2392_v47, 0 }
 0x91b   : > { %v2242_v43 = vsel %vm2241_vm5, %v2232_v14, %v2234_v33 }
 0x91e   : > { %v2260_v39 = vpop.permute.xlu0 %2259  ;;  %v2236_v40 = vpop.permute.xlu1 %2235 }
 0x91f   : > { %v2268_v18 = vsel %vm2267_vm4, %v2258_v17, %v2260_v39  ;;  %v2243_v46 = vsel %vm2241_vm5, %v2234_v33, %v2236_v40 }
 0x920   : > { %v2382_v54 = vpack.c.bf16 %v2268_v18, %v2242_v43 }
 0x922   : > { %v2285_v45 = vpop.permute.xlu0 %2284  ;;  %v2262_v41 = vpop.permute.xlu1 %2261 }
 0x923   : > { %v2269_v49 = vsel %vm2267_vm4, %v2260_v39, %v2262_v41  ;;  %v2293_v53 = vsel %vm2292_vm7, %v2283_v20, %v2285_v45 }
 0x924   : > { %v2383_v26 = vpack.c.bf16 %v2269_v49, %v2243_v46 }
 0x926   : > { %v2310_v27 = vpop.permute.xlu0 %2309  ;;  %v2287_v19 = vpop.permute.xlu1 %2286  ;;  %2420 = vmatprep.subr.bf16.mxu0 %v2383_v26 }
 0x927   : > { %2421 = vmatpush1.bf16.msra.mxu0 %v2382_v54  ;;  %v2318_v56 = vsel %vm2317_vm6, %v2308_v25, %v2310_v27  ;;  %v2294_v59 = vsel %vm2292_vm7, %v2285_v45, %v2287_v19 }
 0x928   : > { %v2387_v1 = vpack.c.bf16 %v2318_v56, %v2293_v53 }
 0x92a   : > { %v2337_v38 = vpop.permute.xlu0 %2336  ;;  %v2312_v42 = vpop.permute.xlu1 %2311 }
 0x92b   : > { %v2344_v52 = vsel %vm2342_vm8, %v2335_v35, %v2337_v38  ;;  %v2319_v61 = vsel %vm2317_vm6, %v2310_v27, %v2312_v42 }
 0x92c   : > { %v2388_v63 = vpack.c.bf16 %v2319_v61, %v2294_v59  ;;  %v2393_v4 = vpack.c.bf16 %v2344_v52, %v2344_v52 }
 0x92e   : > { %v2240_v58 = vpop.permute.xlu0 %2239  ;;  %v2238_v60 = vpop.permute.xlu1 %2237  ;;  %2422 = vmatprep.subr.bf16.mxu0 %v2388_v63 }
 0x92f   : > { %2256 = vst.msk [vmem:[#allocation3 + $0x20] sm:$0xff] %vm2255_vm15, %v2240_v58  ;;  %2423 = vmatpush1.bf16.msra.mxu0 %v2387_v1  ;;  %v2244_v5 = vsel %vm2241_vm5, %v2236_v40, %v2238_v60  ;;  %v2245_v48 = vsel %vm2241_vm5, %v2238_v60, %v2240_v58 }
 0x930   : > { %3477 = vmatprep.subr.msk.bf16.mxu0 %vm559_vm11, %v2393_v4 }
 0x932   : > { %v2264_v36 = vpop.permute.xlu0 %2263  ;;  %v2266_v0 = vpop.permute.xlu1 %2265 }
 0x933   : > { %v2270_v30 = vsel %vm2267_vm4, %v2262_v41, %v2264_v36  ;;  %v2271_v24 = vsel %vm2267_vm4, %v2264_v36, %v2266_v0  ;;  %2281 = vst.msk [vmem:[#allocation3 + $0x48] sm:$0xff] %vm2255_vm15, %v2266_v0  ;;  %2425 = vmatpush1.bf16.msra.mxu0 %v2406_v62  ;;  %vm2547_vm4 = vmand %vm3979_vm0, %vm2542_vm1 }
 0x934   : > { %v2385_v8 = vpack.c.bf16 %v2271_v24, %v2245_v48  ;;  %3581 = vmatprep.subr.bf16.mxu0 %v3824_v3  ;;  %v2384_v9 = vpack.c.bf16 %v2270_v30, %v2244_v5 }
 0x936   : > { %v2291_v13 = vpop.permute.xlu0 %2290  ;;  %v2289_v14 = vpop.permute.xlu1 %2288  ;;  %3478 = vmatmul.mubr.msk.bf16.vlgmr.msra.gmra.mrb[36].mxu0 %vm1705_vm3, %v3475_v57  ;;  %2461 = vmatprep.subr.bf16.mxu1 %v2385_v8  ;;  %v2361_v28 = vld [vmem:[#allocation3 + $0x20] sm:$0xff] }
 0x937   : > { %2306 = vst.msk [vmem:[#allocation3 + $0x70] sm:$0xff] %vm2255_vm15, %v2291_v13  ;;  %2462 = vmatpush1.bf16.msra.mxu1 %v2384_v9  ;;  %3587 = vmatprep.mubr.msk.bf16.mxu0 %vm3825_vm13, %v3824_v3  ;;  %v2295_v17 = vsel %vm2292_vm7, %v2287_v19, %v2289_v14  ;;  %v2296_v33 = vsel %vm2292_vm7, %v2289_v14, %v2291_v13 }
 0x93a   : > { %v2314_v20 = vpop.permute.xlu0 %2313  ;;  %v2316_v25 = vpop.permute.xlu1 %2315  ;;  %v2366_v35 = vld [vmem:[#allocation3 + $0x48] sm:$0xff] }
 0x93b   : > { %v2320_v39 = vsel %vm2317_vm6, %v2312_v42, %v2314_v20  ;;  %v2321_v40 = vsel %vm2317_vm6, %v2314_v20, %v2316_v25  ;;  %2331 = vst.msk [vmem:[#allocation3 + $0x98] sm:$0xff] %vm2255_vm15, %v2316_v25  ;;  %v2386_v18 = vpack.c.bf16 %v2366_v35, %v2361_v28 }
 0x93c   : > { %v2390_v45 = vpack.c.bf16 %v2321_v40, %v2296_v33  ;;  %v2389_v41 = vpack.c.bf16 %v2320_v39, %v2295_v17 }
 0x93d   : > { %3582 = vmatpush3.bf16.msra.mxu0 %v2386_v18 }
 0x93e   : > { %v2341_v46 = vpop.permute.xlu0 %2340  ;;  %v2339_v49 = vpop.permute.xlu1 %2338  ;;  %3583 = vmatprep.subr.bf16.mxu0 %v3824_v3  ;;  %2463 = vmatprep.subr.bf16.mxu1 %v2390_v45  ;;  %v2371_v19 = vld [vmem:[#allocation3 + $0x70] sm:$0xff] }
 0x93f   : > { %2356 = vst.msk [vmem:[#allocation3 + $0xc0] sm:$0xff] %vm2255_vm15, %v2341_v46  ;;  %v2345_v43 = vsel %vm2342_vm8, %v2337_v38, %v2339_v49  ;;  %v2346_v26 = vsel %vm2342_vm8, %v2339_v49, %v2341_v46  ;;  %2464 = vmatpush1.bf16.msra.mxu1 %v2389_v41  ;;  %vm2580_vm15 = vcmask 48128   ;;  %v3457_v45 = vld [vmem:[%s4839_s3 + $0x18] sm:$0xff] }
 0x940   : > { %v2395_v54 = vpack.c.bf16 %v2346_v26, %v2346_v26  ;;  %v2394_v27 = vpack.c.bf16 %v2345_v43, %v2345_v43  ;;  %v3483_v41 = vld [vmem:[%s4841_s5 + $0x18] sm:$0xff] }
 0x942   : > { %v2376_v56 = vld [vmem:[#allocation3 + $0x98] sm:$0xff]  ;;  %3479 = vmatprep.subr.msk.bf16.mxu1 %vm559_vm11, %v2395_v54  ;;  %v2412_v42 = vsel %vm559_vm11, %v2394_v27, 0 }
 0x943   : > { %v2391_v29 = vpack.c.bf16 %v2376_v56, %v2371_v19  ;;  %2466 = vmatpush1.bf16.msra.mxu1 %v2412_v42 }
 0x945   : > { %3584 = vmatpush3.bf16.msra.mxu0 %v2391_v29 }
 0x946   : > { %3585 = vmatprep.subr.bf16.mxu0 %v3824_v3  ;;  %v2381_v59 = vld [vmem:[#allocation3 + $0xc0] sm:$0xff]  ;;  %3480 = vmatmul.mubr.msk.bf16.vlgmr.msra.gmra.mrb[36].mxu1 %vm1705_vm3, %v3475_v57 }
 0x947   : > { %v2396_v38 = vpack.c.bf16 %v2381_v59, %v2381_v59  ;;  %2778 = vmatprep.mubr.bf16.mxu1 %v3823_v34 }
 0x949   : > { %v2418_v52 = vsel %vm559_vm11, %v2396_v38, 0 }
 0x94a   : > { %3586 = vmatpush3.bf16.msra.mxu0 %v2418_v52 }
 0x94d   : > { %3588 = vmatmul.mubr.msk.bf16.vlgmr.msra.gmra.mrb[40].mxu0 %vm1705_vm3, %v3475_v57 }
 0x94e   : > { %2819 = vmatprep.mubr.bf16.mxu0 %v3823_v34 }
 0x94f   : > { %v2400_v61 = vpop.permute.xlu1 %2399 }
 0xa09   : > { %v2454_v53 = vpop.f32.mrb[36].mxu0 }
 0xa0a   : > { %v2455_v63 = vadd.f32 %v2454_v53, %v2400_v61  ;;  %v2456_v1 = vpop.f32.mrb[37].mxu0 }
 0xa0b   : > { %v2457_v58 = vadd.f32 %v2456_v1, %v2400_v61  ;;  %v2458_v60 = vpop.f32.mrb[38].mxu0 }
 0xa0c   : > { %v2552_v4 = vsel %vm2547_vm4, 0.0, %v2455_v63  ;;  %v2459_v47 = vpop.f32.mrb[39].mxu0 }
 0xa0d   : > { %vm2558_vm5 = vcmp.ge.f32.partialorder %v2457_v58, 0.0  ;;  %v2563_v36 = vmul.f32 0.1, %v2457_v58  ;;  %v2562_v0 = vmul.f32 0.1, %v2552_v4  ;;  %vm2557_vm6 = vcmp.ge.f32.partialorder %v2552_v4, 0.0 }
 0xa0f   : > { %v2568_v62 = vsel %vm2558_vm5, %v2457_v58, %v2563_v36  ;;  %v2567_v5 = vsel %vm2557_vm6, %v2552_v4, %v2562_v0  ;;  %vm2868_vm5 = vcmp.lt.s32.totalorder %v4125_v12, 6 }
 0xa10   : > { %2589 = vrot.lane.b32.xlu0 %v2568_v62, %s3821_s10  ;;  %vm4657_vm6 = vmand %vm3979_vm0, %vm2868_vm5 }
 0xa11   : > { %vm3720_vm5 = vmneg %vm4657_vm6 }
 0xa14   : > { %2587 = vrot.lane.b32.xlu0 %v2567_v5, %s3821_s10 }
 0xa19   : > { %v2495_v48 = vpop.f32.mrb[36].mxu1 }
 0xa1a   : > { %v2496_v30 = vadd.f32 %v2495_v48, %v2400_v61  ;;  %v2497_v24 = vpop.f32.mrb[37].mxu1 }
 0xa1b   : > { %v2499_v57 = vpop.f32.mrb[38].mxu1  ;;  %v2498_v39 = vadd.f32 %v2497_v24, %v2400_v61 }
 0xa1c   : > { %vm2559_vm8 = vcmp.ge.f32.partialorder %v2496_v30, 0.0  ;;  %v2564_v8 = vmul.f32 0.1, %v2496_v30  ;;  %v2500_v9 = vpop.f32.mrb[39].mxu1 }
 0xa1d   : > { %v2565_v40 = vmul.f32 0.1, %v2498_v39  ;;  %vm2560_vm1 = vcmp.ge.f32.partialorder %v2498_v39, 0.0 }
 0xa1e   : > { %v4576_v13 = vsel %vm2559_vm8, %v2496_v30, %v2564_v8 }
 0xa1f   : > { %2591 = vrot.lane.b32.xlu1 %v4576_v13, %s3821_s10  ;;  %2615 = vrot.lane.b32.xlu0 %v4576_v13, %s3822_s13  ;;  %v2570_v18 = vsel %vm2560_vm1, %v2498_v39, %v2565_v40 }
 0xa20   : > { %v2536_v14 = vpop.f32.mrb[40].mxu0 }
 0xa21   : > { %v2537_v17 = vadd.f32 %v2536_v14, %v2400_v61  ;;  %v3589_v20 = vpop.f32.mrb[41].mxu0 }
 0xa22   : > { %v2539_v25 = vpop.f32.mrb[42].mxu0  ;;  %v3482_v20 = vld [vmem:[%s4840_s4 + $0xc] sm:$0xf] }
 0xa23   : > { %vm2561_vm7 = vcmp.ge.f32.partialorder %v2537_v17, 0.0  ;;  %v2566_v28 = vmul.f32 0.1, %v2537_v17  ;;  %2613 = vrot.lane.b32.xlu1 %v2568_v62, %s3822_s13  ;;  %2639 = vrot.lane.b32.xlu0 %v4576_v13, %s3830_s7  ;;  %v3590_v35 = vpop.f32.mrb[43].mxu0 }
 0xa25   : > { %v2571_v33 = vsel %vm2561_vm7, %v2537_v17, %v2566_v28 }
 0xa26   : > { %2581 = vst.msk [vmem:[#allocation3 + $0x20] sm:$0xff] %vm2580_vm15, %v2571_v33 }
 0xa27   : > { %2637 = vrot.lane.b32.xlu1 %v2568_v62, %s3830_s7  ;;  %2635 = vrot.lane.b32.xlu0 %v2567_v5, %s3830_s7 }
 0xa2b   : > { %2611 = vrot.lane.b32.xlu1 %v2567_v5, %s3822_s13  ;;  %2661 = vrot.lane.b32.xlu0 %v2568_v62, %s3827_s15 }
 0xa2f   : > { %2659 = vrot.lane.b32.xlu1 %v2567_v5, %s3827_s15  ;;  %2593 = vrot.lane.b32.xlu0 %v2570_v18, %s3821_s10 }
 0xa33   : > { %2663 = vrot.lane.b32.xlu1 %v4576_v13, %s3827_s15  ;;  %2617 = vrot.lane.b32.xlu0 %v2570_v18, %s3822_s13 }
 0xa37   : > { %2595 = vrot.lane.b32.xlu1 %v2571_v33, %s3821_s10  ;;  %2641 = vrot.lane.b32.xlu0 %v2570_v18, %s3830_s7 }
 0xa3b   : > { %2619 = vrot.lane.b32.xlu1 %v2571_v33, %s3822_s13  ;;  %2665 = vrot.lane.b32.xlu0 %v2570_v18, %s3827_s15 }
 0xa3f   : > { %2643 = vrot.lane.b32.xlu1 %v2571_v33, %s3830_s7  ;;  %1401 = vperm.xlu0 %3706, %v3457_v45   ;;  %v2687_v45 = vld [vmem:[#allocation3 + $0x20] sm:$0xff] }
 0xa43   : > { %2667 = vrot.lane.b32.xlu1 %v2571_v33, %s3827_s15 }
 0xa47   : > { %2725 = vperm.xlu1 %3705, %v3483_v41  }
 0xa82   : > { %v2590_v46 = vpop.permute.xlu0 %2589 }
 0xa86   : > { %v2588_v49 = vpop.permute.xlu0 %2587 }
 0xa87   : > { %v2597_v43 = vsel %vm485_vm9, %v2588_v49, %v2590_v46 }
 0xa88   : > { %v2708_v56 = vpack.c.bf16 %v2597_v43, %v2567_v5 }
 0xa91   : > { %v2592_v26 = vpop.permute.xlu1 %2591  ;;  %v2616_v54 = vpop.permute.xlu0 %2615 }
 0xa92   : > { %v2598_v27 = vsel %vm485_vm9, %v2590_v46, %v2592_v26 }
 0xa93   : > { %v2709_v19 = vpack.c.bf16 %v2598_v27, %v2568_v62 }
 0xa95   : > { %v2614_v42 = vpop.permute.xlu1 %2613  ;;  %v2640_v29 = vpop.permute.xlu0 %2639  ;;  %2746 = vmatprep.subr.bf16.mxu1 %v2709_v19 }
 0xa96   : > { %2747 = vmatpush1.bf16.msra.mxu1 %v2708_v56  ;;  %v2622_v52 = vsel %vm510_vm10, %v2614_v42, %v2616_v54 }
 0xa99   : > { %v2638_v59 = vpop.permute.xlu1 %2637  ;;  %v2636_v38 = vpop.permute.xlu0 %2635 }
 0xa9a   : > { %v2646_v61 = vsel %vm1621_vm2, %v2638_v59, %v2640_v29  ;;  %v2645_v58 = vsel %vm1621_vm2, %v2636_v38, %v2638_v59 }
 0xa9b   : > { %v2714_v53 = vpack.c.bf16 %v2646_v61, %v2622_v52 }
 0xa9d   : > { %v2612_v63 = vpop.permute.xlu1 %2611  ;;  %v2662_v1 = vpop.permute.xlu0 %2661  ;;  %2748 = vmatprep.subr.bf16.mxu1 %v2714_v53 }
 0xa9e   : > { %v2621_v60 = vsel %vm510_vm10, %v2612_v63, %v2614_v42 }
 0xa9f   : > { %v2713_v4 = vpack.c.bf16 %v2645_v58, %v2621_v60 }
 0xaa1   : > { %v2660_v47 = vpop.permute.xlu1 %2659  ;;  %v2594_v36 = vpop.permute.xlu0 %2593  ;;  %2749 = vmatpush1.bf16.msra.mxu1 %v2713_v4 }
 0xaa2   : > { %v2669_v0 = vsel %vm1045_vm14, %v2660_v47, %v2662_v1  ;;  %v2599_v57 = vsel %vm485_vm9, %v2592_v26, %v2594_v36 }
 0xaa3   : > { %v2718_v48 = vpack.c.bf16 %v2669_v0, %v2669_v0  ;;  %v2710_v28 = vpack.c.bf16 %v2599_v57, %v4576_v13 }
 0xaa5   : > { %v2664_v62 = vpop.permute.xlu1 %2663  ;;  %v2618_v5 = vpop.permute.xlu0 %2617  ;;  %v2732_v14 = vsel %vm559_vm11, %v2718_v48, 0 }
 0xaa6   : > { %v2670_v30 = vsel %vm1045_vm14, %v2662_v1, %v2664_v62  ;;  %v2623_v43 = vsel %vm510_vm10, %v2616_v54, %v2618_v5 }
 0xaa7   : > { %v2719_v24 = vpack.c.bf16 %v2670_v30, %v2670_v30 }
 0xaa9   : > { %v2596_v8 = vpop.permute.xlu1 %2595  ;;  %v2642_v9 = vpop.permute.xlu0 %2641  ;;  %3484 = vmatprep.subr.msk.bf16.mxu1 %vm559_vm11, %v2719_v24 }
 0xaaa   : > { %v2600_v17 = vsel %vm485_vm9, %v2594_v36, %v2596_v8  ;;  %2610 = vst.msk [vmem:[#allocation3 + $0x48] sm:$0xff] %vm2580_vm15, %v2596_v8  ;;  %2751 = vmatpush1.bf16.msra.mxu1 %v2732_v14  ;;  %v2647_v39 = vsel %vm1621_vm2, %v2640_v29, %v2642_v9 }
 0xaab   : > { %v2711_v25 = vpack.c.bf16 %v2600_v17, %v2570_v18  ;;  %3591 = vmatprep.subr.bf16.mxu1 %v3824_v3  ;;  %v2715_v27 = vpack.c.bf16 %v2647_v39, %v2623_v43 }
 0xaad   : > { %v2620_v35 = vpop.permute.xlu1 %2619  ;;  %3485 = vmatmul.mubr.msk.bf16.vlgmr.msra.gmra.mrb[40].mxu1 %vm1705_vm3, %v3482_v20  ;;  %2787 = vmatprep.subr.bf16.mxu0 %v2711_v25  ;;  %v2666_v33 = vpop.permute.xlu0 %2665 }
 0xaae   : > { %2634 = vst.msk [vmem:[#allocation3 + $0x70] sm:$0xff] %vm2580_vm15, %v2620_v35  ;;  %2788 = vmatpush1.bf16.msra.mxu0 %v2710_v28  ;;  %3597 = vmatprep.mubr.msk.bf16.mxu1 %vm3825_vm13, %v3824_v3  ;;  %v2624_v41 = vsel %vm510_vm10, %v2618_v5, %v2620_v35  ;;  %v2671_v13 = vsel %vm1045_vm14, %v2664_v62, %v2666_v33  ;;  %vm1544_vm13 = vcmp.lt.s32.totalorder %v4125_v12, 18 }
 0xaaf   : > { %v2720_v56 = vpack.c.bf16 %v2671_v13, %v2671_v13  ;;  %vm1549_vm4 = vmand %vm3979_vm0, %vm1544_vm13  ;;  %vm1574_vm0 = vcmask 97280   ;;  %vm3076_vm13 = vcmask 1006592  }
 0xab1   : > { %v2644_v40 = vpop.permute.xlu1 %2643  ;;  %v2692_v18 = vld [vmem:[#allocation3 + $0x48] sm:$0xff]  ;;  %v2738_v54 = vsel %vm559_vm11, %v2720_v56, 0 }
 0xab2   : > { %v2648_v46 = vsel %vm1621_vm2, %v2642_v9, %v2644_v40  ;;  %2658 = vst.msk [vmem:[#allocation3 + $0x98] sm:$0xff] %vm2580_vm15, %v2644_v40  ;;  %v2712_v49 = vpack.c.bf16 %v2692_v18, %v2687_v45 }
 0xab3   : > { %v2716_v26 = vpack.c.bf16 %v2648_v46, %v2624_v41 }
 0xab4   : > { %3592 = vmatpush3.bf16.msra.mxu1 %v2712_v49 }
 0xab5   : > { %v2668_v19 = vpop.permute.xlu1 %2667  ;;  %3593 = vmatprep.subr.bf16.mxu1 %v3824_v3  ;;  %2789 = vmatprep.subr.bf16.mxu0 %v2716_v26  ;;  %v2697_v59 = vld [vmem:[#allocation3 + $0x70] sm:$0xff] }
 0xab6   : > { %v2672_v42 = vsel %vm1045_vm14, %v2666_v33, %v2668_v19  ;;  %2682 = vst.msk [vmem:[#allocation3 + $0xc0] sm:$0xff] %vm2580_vm15, %v2668_v19  ;;  %2790 = vmatpush1.bf16.msra.mxu0 %v2715_v27 }
 0xab7   : > { %v2721_v29 = vpack.c.bf16 %v2672_v42, %v2672_v42 }
 0xab9   : > { %v2702_v38 = vld [vmem:[#allocation3 + $0x98] sm:$0xff]  ;;  %3486 = vmatprep.subr.msk.bf16.mxu0 %vm559_vm11, %v2721_v29 }
 0xaba   : > { %v2717_v52 = vpack.c.bf16 %v2702_v38, %v2697_v59  ;;  %2792 = vmatpush1.bf16.msra.mxu0 %v2738_v54 }
 0xabc   : > { %3594 = vmatpush3.bf16.msra.mxu1 %v2717_v52 }
 0xabd   : > { %3595 = vmatprep.subr.bf16.mxu1 %v3824_v3  ;;  %v2707_v61 = vld [vmem:[#allocation3 + $0xc0] sm:$0xff]  ;;  %3487 = vmatmul.mubr.msk.bf16.vlgmr.msra.gmra.mrb[44].mxu0 %vm1705_vm3, %v3482_v20 }
 0xabe   : > { %v1402_v53 = vpop.permute.xlu0 %1401  ;;  %v2722_v63 = vpack.c.bf16 %v2707_v61, %v2707_v61  ;;  %3213 = vmatprep.mubr.bf16.mxu0 %v3823_v34 }
 0xabf   : > { %v1459_v1 = vadd.f32 %v4389_v16, %v1402_v53  ;;  %v1457_v58 = vadd.f32 %v4387_v15, %v1402_v53  ;;  %v1500_v4 = vadd.f32 %v4393_v22, %v1402_v53  ;;  %v1498_v47 = vadd.f32 %v4391_v21, %v1402_v53 }
 0xac0   : > { %v2744_v60 = vsel %vm559_vm11, %v2722_v63, 0  ;;  %v1539_v16 = vadd.f32 %v4395_v31, %v1402_v53 }
 0xac1   : > { %1566 = vrot.lane.b32.xlu1 %v1459_v1, %s3837_s22  ;;  %3596 = vmatpush3.bf16.msra.mxu1 %v2744_v60  ;;  %v1554_v3 = vsel %vm1549_vm4, 0.0, %v1457_v58  ;;  %vm3099_vm4 = vcmask 998400  }
 0xac2   : > { %1564 = vrot.lane.b32.xlu0 %v1554_v3, %s3837_s22 }
 0xac4   : > { %3598 = vmatmul.mubr.msk.bf16.vlgmr.msra.gmra.mrb[44].mxu1 %vm1705_vm3, %v3482_v20 }
 0xac5   : > { %1570 = vrot.lane.b32.xlu1 %v1500_v4, %s3837_s22  ;;  %3254 = vmatprep.mubr.bf16.mxu1 %v3823_v34 }
 0xac6   : > { %1568 = vrot.lane.b32.xlu0 %v1498_v47, %s3837_s22  ;;  %v2726_v15 = vpop.permute.xlu1 %2725 }
 0xaca   : > { %1572 = vrot.lane.b32.xlu0 %v1539_v16, %s3837_s22 }
 0xb33   : > { %v1567_v28 = vpop.permute.xlu1 %1566 }
 0xb34   : > { %v1565_v25 = vpop.permute.xlu0 %1564 }
 0xb35   : > { %v1575_v40 = vsel %vm1574_vm0, %v1565_v25, %v1567_v28  ;;  %v1584_v41 = vadd.f32 %v1565_v25, %v4186_v23 }
 0xb36   : > { %v1585_v49 = vadd.f32 %v1575_v40, %v4193_v37 }
 0xb37   : > { %v1571_v33 = vpop.permute.xlu1 %1570 }
 0xb38   : > { %v1569_v35 = vpop.permute.xlu0 %1568 }
 0xb39   : > { %v1577_v37 = vsel %vm1574_vm0, %v1569_v35, %v1571_v33 }
 0xb3a   : > { %v1587_v63 = vadd.f32 %v1577_v37, %v4209_v50 }
 0xb3c   : > { %v1573_v39 = vpop.permute.xlu0 %1572 }
 0xb3d   : > { %v1578_v3 = vsel %vm1574_vm0, %v1571_v33, %v1573_v39 }
 0xb80   : > { %v2780_v36 = vpop.f32.mrb[40].mxu1 }
 0xb81   : > { %v2781_v22 = vadd.f32 %v2780_v36, %v2726_v15  ;;  %v2782_v62 = vpop.f32.mrb[41].mxu1 }
 0xb82   : > { %v2783_v21 = vadd.f32 %v2782_v62, %v2726_v15  ;;  %v2784_v5 = vpop.f32.mrb[42].mxu1 }
 0xb83   : > { %v2878_v34 = vsel %vm4657_vm6, 0.0, %v2781_v22  ;;  %v2785_v48 = vpop.f32.mrb[43].mxu1 }
 0xb84   : > { %2890 = vrot.lane.b32.xlu0 %v2783_v21, %s3838_s23  ;;  %2888 = vrot.lane.b32.xlu1 %v2878_v34, %s3838_s23 }
 0xb90   : > { %v2821_v12 = vpop.f32.mrb[44].mxu0 }
 0xb91   : > { %v2822_v31 = vadd.f32 %v2821_v12, %v2726_v15  ;;  %v2823_v30 = vpop.f32.mrb[45].mxu0 }
 0xb92   : > { %v2824_v24 = vadd.f32 %v2823_v30, %v2726_v15  ;;  %v2825_v10 = vpop.f32.mrb[46].mxu0 }
 0xb93   : > { %v2826_v57 = vpop.f32.mrb[47].mxu0  ;;  %2892 = vrot.lane.b32.xlu1 %v2822_v31, %s3838_s23 }
 0xb94   : > { %2894 = vrot.lane.b32.xlu0 %v2824_v24, %s3838_s23 }
 0xb97   : > { %v2862_v8 = vpop.f32.mrb[44].mxu1 }
 0xb98   : > { %v2863_v9 = vadd.f32 %v2862_v8, %v2726_v15  ;;  %v3599_v14 = vpop.f32.mrb[45].mxu1 }
 0xb99   : > { %v2865_v17 = vpop.f32.mrb[46].mxu1 }
 0xb9a   : > { %v3600_v20 = vpop.f32.mrb[47].mxu1  ;;  %2896 = vrot.lane.b32.xlu1 %v2863_v9, %s3838_s23  ;;  %v2968_v9 = vld [vmem:[#allocation4] sm:$0x1] }
 0xbf6   : > { %v2891_v45 = vpop.permute.xlu0 %2890  ;;  %v2889_v18 = vpop.permute.xlu1 %2888 }
 0xbf7   : > { %v2898_v13 = vsel %vm555_vm12, %v2889_v18, %v2891_v45  ;;  %v2907_v46 = vadd.f32 %v2889_v18, %v4471_v55  ;;  %v1576_v55 = vsel %vm1574_vm0, %v1567_v28, %v1569_v35  ;;  %vm3842_vm0 = vmmov 1  }
 0xbf8   : > { %v2908_v43 = vadd.f32 %v2898_v13, %v4476_v32  ;;  %v1586_v52 = vadd.f32 %v1576_v55, %v4201_v44  ;;  %v1588_v44 = vadd.f32 %v1578_v3, %v4215_v51 }
 0xbf9   : > { %v2912_v26 = vadd.f32 %v2907_v46, %v1584_v41 }
 0xbfa   : > { %v2913_v27 = vadd.f32 %v2908_v43, %v1585_v49 }
 0xbfb   : > { %v2917_v19 = vmul.f32 0.5, %v2912_v26 }
 0xbfc   : > { %v2918_v56 = vmul.f32 0.5, %v2913_v27 }
 0xbfd   : > { %vm2922_vm3 = vcmp.ge.f32.partialorder %v2917_v19, 0.0  ;;  %v2927_v42 = vmul.f32 0.01, %v2917_v19 }
 0xbfe   : > { %vm2923_vm8 = vcmp.ge.f32.partialorder %v2918_v56, 0.0  ;;  %v2928_v29 = vmul.f32 0.01, %v2918_v56 }
 0xbff   : > { %v2932_v59 = vsel %vm2922_vm3, %v2917_v19, %v2927_v42 }
 0xc00   : > { %2942 = vrot.lane.b32.xlu0 %v2932_v59, %s3839_s26  ;;  %v2933_v23 = vsel %vm2923_vm8, %v2918_v56, %v2928_v29 }
 0xc01   : > { %2944 = vrot.lane.b32.xlu1 %v2933_v23, %s3839_s26 }
 0xc05   : > { %v2893_v32 = vpop.permute.xlu1 %2892 }
 0xc06   : > { %v2899_v38 = vsel %vm555_vm12, %v2891_v45, %v2893_v32  ;;  %v2895_v54 = vpop.permute.xlu0 %2894 }
 0xc07   : > { %v2909_v61 = vadd.f32 %v2899_v38, %v4489_v2  ;;  %v2900_v53 = vsel %vm555_vm12, %v2893_v32, %v2895_v54 }
 0xc08   : > { %v2910_v1 = vadd.f32 %v2900_v53, %v4501_v6 }
 0xc09   : > { %v2914_v58 = vadd.f32 %v2909_v61, %v1586_v52 }
 0xc0a   : > { %v2915_v60 = vadd.f32 %v2910_v1, %v1587_v63 }
 0xc0b   : > { %v2919_v4 = vmul.f32 0.5, %v2914_v58 }
 0xc0c   : > { %v2920_v47 = vmul.f32 0.5, %v2915_v60  ;;  %v2897_v16 = vpop.permute.xlu1 %2896 }
 0xc0d   : > { %v2901_v15 = vsel %vm555_vm12, %v2895_v54, %v2897_v16  ;;  %vm2924_vm7 = vcmp.ge.f32.partialorder %v2919_v4, 0.0  ;;  %v2929_v36 = vmul.f32 0.01, %v2919_v4  ;;  %vm2952_vm12 = vcmask 850944  }
 0xc0e   : > { %v2911_v2 = vadd.f32 %v2901_v15, %v4503_v7  ;;  %vm2925_vm15 = vcmp.ge.f32.partialorder %v2920_v47, 0.0  ;;  %v2930_v22 = vmul.f32 0.01, %v2920_v47 }
 0xc0f   : > { %v2934_v50 = vsel %vm2924_vm7, %v2919_v4, %v2929_v36 }
 0xc10   : > { %v2916_v62 = vadd.f32 %v2911_v2, %v1588_v44  ;;  %2946 = vrot.lane.b32.xlu0 %v2934_v50, %s3839_s26  ;;  %v2935_v6 = vsel %vm2925_vm15, %v2920_v47, %v2930_v22 }
 0xc11   : > { %2948 = vrot.lane.b32.xlu1 %v2935_v6, %s3839_s26 }
 0xc12   : > { %v2921_v21 = vmul.f32 0.5, %v2916_v62 }
 0xc14   : > { %vm2926_vm1 = vcmp.ge.f32.partialorder %v2921_v21, 0.0  ;;  %v2931_v5 = vmul.f32 0.01, %v2921_v21 }
 0xc16   : > { %v2936_v34 = vsel %vm2926_vm1, %v2921_v21, %v2931_v5 }
 0xc17   : > { %2950 = vrot.lane.b32.xlu0 %v2936_v34, %s3839_s26 }
 0xc72   : > { %v2943_v48 = vpop.permute.xlu0 %2942 }
 0xc73   : > { %v2945_v51 = vpop.permute.xlu1 %2944 }
 0xc74   : > { %v4687_v7 = vsel %vm2952_vm12, %v2943_v48, %v2945_v51 }
 0xc75   : > { %v2962_v12 = vsel %vm4657_vm6, 0.0, %v4687_v7 }
 0xc76   : > { %3000 = vrot.lane.b32.xlu0 %v2962_v12, %s3822_s13  ;;  %2978 = vrot.lane.b32.xlu1 %v2962_v12, %s3821_s10 }
 0xc7a   : > { %3044 = vrot.lane.b32.xlu0 %v2962_v12, %s3827_s15  ;;  %3022 = vrot.lane.b32.xlu1 %v2962_v12, %s3830_s7 }
 0xc7e   : > { %3089 = vrot.lane.b32.xlu0 %v2962_v12, %s3840_s27  ;;  %3066 = vrot.lane.b32.xlu1 %v2962_v12, %s3841_s18 }
 0xc82   : > { %v2947_v31 = vpop.permute.xlu0 %2946 }
 0xc83   : > { %v4698_v30 = vsel %vm2952_vm12, %v2945_v51, %v2947_v31  ;;  %v2949_v24 = vpop.permute.xlu1 %2948 }
 0xc84   : > { %v4701_v10 = vsel %vm2952_vm12, %v2947_v31, %v2949_v24  ;;  %2980 = vrot.lane.b32.xlu1 %v4698_v30, %s3821_s10 }
 0xc89   : > { %v2951_v57 = vpop.permute.xlu0 %2950 }
 0xc8a   : > { %2986 = vrot.lane.b32.xlu0 %v2951_v57, %s3821_s10  ;;  %3008 = vrot.lane.b32.xlu1 %v2951_v57, %s3822_s13  ;;  %v2956_v8 = vsel %vm2952_vm12, %v2949_v24, %v2951_v57 }
 0xc8e   : > { %3002 = vrot.lane.b32.xlu0 %v4698_v30, %s3822_s13  ;;  %3030 = vrot.lane.b32.xlu1 %v2951_v57, %s3830_s7 }
 0xc92   : > { %3024 = vrot.lane.b32.xlu0 %v4698_v30, %s3830_s7  ;;  %3052 = vrot.lane.b32.xlu1 %v2951_v57, %s3827_s15 }
 0xc96   : > { %3046 = vrot.lane.b32.xlu0 %v4698_v30, %s3827_s15  ;;  %3074 = vrot.lane.b32.xlu1 %v2951_v57, %s3841_s18 }
 0xc9a   : > { %3068 = vrot.lane.b32.xlu0 %v4698_v30, %s3841_s18  ;;  %3091 = vrot.lane.b32.xlu1 %v4698_v30, %s3840_s27 }
 0xc9e   : > { %2982 = vrot.lane.b32.xlu0 %v4701_v10, %s3821_s10  ;;  %2984 = vrot.lane.b32.xlu1 %v2956_v8, %s3821_s10 }
 0xca2   : > { %3006 = vrot.lane.b32.xlu0 %v2956_v8, %s3822_s13  ;;  %3004 = vrot.lane.b32.xlu1 %v4701_v10, %s3822_s13 }
 0xca6   : > { %3028 = vrot.lane.b32.xlu0 %v2956_v8, %s3830_s7  ;;  %3026 = vrot.lane.b32.xlu1 %v4701_v10, %s3830_s7 }
 0xcaa   : > { %3050 = vrot.lane.b32.xlu0 %v2956_v8, %s3827_s15  ;;  %3048 = vrot.lane.b32.xlu1 %v4701_v10, %s3827_s15  ;;  %s366_s15 = sand.u32 1, %s3794_s30  }
 0xcab   : > { %s3424_s7 = sshll.u32 %s366_s15, 2  ;;  %s3302_s11 = scalar_lea.sflag [#allocation6], %s366_s15 }
 0xcac   : > { %s368_s21 = scalar_lea.vmem [#allocation5], %s3424_s7 }
 0xcad   : > { %s3318_s22 = sshll.u32 %s368_s21, 4  ;;  %s4785_s22 = int_to_ptr.vmem [resolvable:$true] %s3318_s22 }
 0xcae   : > { %3072 = vrot.lane.b32.xlu0 %v2956_v8, %s3841_s18  ;;  %3070 = vrot.lane.b32.xlu1 %v4701_v10, %s3841_s18  ;;  %s3724_s25 = scalar_lea.vmem %s4785_s22, 64  ;;  %s3844_s18 = smov [#allocation5]  }
 0xcaf   : > { %p3725_p4 = scmp.ne.s32.totalorder %s4785_s22, %s3724_s25  ;;  %s3728_s10 = sshll.u32 %s3844_s18, 4  ;;  %s3729_s10 = int_to_ptr.vmem [resolvable:$false] %s3728_s10 }
 0xcb0   : > { %s3730_s13 = scalar_lea.vmem %s3729_s10, 128  ;;  %p3731_p7 = scmp.lt.s32.totalorder %s4785_s22, %s3729_s10 }
 0xcb1   : > { %p3726_p5 = pnand %p3725_p4, %p3944_p3  ;;  %p3732_p9 = scmp.lt.s32.totalorder %s3730_s13, %s3724_s25 }
 0xcb2   : > { %3093 = vrot.lane.b32.xlu0 %v4701_v10, %s3840_s27  ;;  %3095 = vrot.lane.b32.xlu1 %v2956_v8, %s3840_s27 }
 0xcb3   : > { %p3727_p6 = pneg %p3726_p5  ;;  %p3733_p10 = por %p3732_p9, %p3731_p7 }
 0xcb5   : > { %p3734_p11 = pnand %p3733_p10, %p3727_p6 }
 0xcb6   : > { %3097 = vrot.lane.b32.xlu0 %v2951_v57, %s3840_s27  ;;  %3158 = vperm.xlu1 %3705, %v2968_v9   ;;  %s4783_s27 = scalar_lea.hbm %s4844_s8, %s3496_s28 }
 0xce8   : > { %v2979_v14 = vpop.permute.xlu1 %2978  ;;  %v3001_v17 = vpop.permute.xlu0 %3000 }
 0xcec   : > { %v3023_v20 = vpop.permute.xlu1 %3022  ;;  %v3045_v25 = vpop.permute.xlu0 %3044 }
 0xcf0   : > { %v3067_v28 = vpop.permute.xlu1 %3066  ;;  %v3090_v39 = vpop.permute.xlu0 %3089 }
 0xcf6   : > { %v2981_v35 = vpop.permute.xlu1 %2980 }
 0xcf7   : > { %v2988_v33 = vsel %vm485_vm9, %v2979_v14, %v2981_v35 }
 0xcf8   : > { %v3722_v3 = vpack.c.bf16 %v2988_v33, %v4687_v7 }
 0xcfc   : > { %v2987_v40 = vpop.permute.xlu0 %2986  ;;  %v3009_v45 = vpop.permute.xlu1 %3008 }
 0xd00   : > { %v3003_v18 = vpop.permute.xlu0 %3002  ;;  %v3031_v41 = vpop.permute.xlu1 %3030 }
 0xd01   : > { %v3010_v13 = vsel %vm510_vm10, %v3001_v17, %v3003_v18 }
 0xd04   : > { %v3025_v46 = vpop.permute.xlu0 %3024  ;;  %v3053_v49 = vpop.permute.xlu1 %3052 }
 0xd05   : > { %v3032_v43 = vsel %vm1621_vm2, %v3023_v20, %v3025_v46 }
 0xd06   : > { %v3144_v50 = vpack.c.bf16 %v3032_v43, %v3010_v13 }
 0xd08   : > { %v3047_v26 = vpop.permute.xlu0 %3046  ;;  %v3075_v27 = vpop.permute.xlu1 %3074 }
 0xd09   : > { %v4740_v19 = vsel %vm1045_vm14, %v3045_v25, %v3047_v26 }
 0xd0c   : > { %v3069_v56 = vpop.permute.xlu0 %3068  ;;  %v3092_v42 = vpop.permute.xlu1 %3091 }
 0xd0d   : > { %v3077_v29 = vsel %vm3076_vm13, %v3067_v28, %v3069_v56  ;;  %v3100_v59 = vsel %vm3099_vm4, %v3090_v39, %v3092_v42  ;;  %v2967_v39 = vld [vmem:[%s4842_s6] sm:$0x1] }
 0xd0e   : > { %v3152_v9 = vpack.c.bf16 %v3100_v59, %v3100_v59 }
 0xd10   : > { %v2983_v23 = vpop.permute.xlu0 %2982  ;;  %v2985_v55 = vpop.permute.xlu1 %2984  ;;  %v3170_v28 = vsel %vm559_vm11, %v3152_v9, 0 }
 0xd11   : > { %v2989_v37 = vsel %vm485_vm9, %v2981_v35, %v2983_v23  ;;  %v2990_v32 = vsel %vm485_vm9, %v2983_v23, %v2985_v55  ;;  %v2991_v38 = vsel %vm485_vm9, %v2985_v55, %v2987_v40  ;;  %vm3721_vm9 = vmpackc.low %vm3842_vm0, %vm3720_vm5 }
 0xd12   : > { %v3141_v54 = vpack.c.bf16 %v2989_v37, %v4698_v30  ;;  %v3143_v52 = vpack.c.bf16 %v2991_v38, %v2956_v8  ;;  %v3142_v61 = vpack.c.bf16 %v2990_v32, %v4701_v10  ;;  %v3148_v10 = vpack.c.bf16 %v3077_v29, %v4740_v19 }
 0xd13   : > { %v3843_v32 = vmov 1966171168  }
 0xd14   : > { %v3007_v53 = vpop.permute.xlu0 %3006  ;;  %v3005_v63 = vpop.permute.xlu1 %3004  ;;  %3181 = vmatprep.subr.bf16.mxu0 %v3141_v54  ;;  %3222 = vmatprep.subr.bf16.mxu1 %v3143_v52  ;;  %v3274_v38 = vunpack.c.l.s4 %v3843_v32 }
 0xd15   : > { %v3013_v1 = vsel %vm510_vm10, %v3007_v53, %v3009_v45  ;;  %v3011_v58 = vsel %vm510_vm10, %v3003_v18, %v3005_v63  ;;  %v3012_v60 = vsel %vm510_vm10, %v3005_v63, %v3007_v53  ;;  %3723 = vmatpush1.bf16.msk.msra.mxu0 %vm3721_vm9, %v3722_v3  ;;  %3223 = vmatpush1.bf16.msra.mxu1 %v3142_v61  ;;  %vm3165_vm10 = vcmask 457728  }
 0xd16   : > { %v3162_v18 = vshrl.u32 %v697_v11, 7  ;;  %v3275_v52 = vunpack.c.0.s8 %v3274_v38 }
 0xd18   : > { %v3029_v4 = vpop.permute.xlu0 %3028  ;;  %v3027_v47 = vpop.permute.xlu1 %3026 }
 0xd19   : > { %v3035_v16 = vsel %vm1621_vm2, %v3029_v4, %v3031_v41  ;;  %v3033_v15 = vsel %vm1621_vm2, %v3025_v46, %v3027_v47  ;;  %v3034_v36 = vsel %vm1621_vm2, %v3027_v47, %v3029_v4  ;;  %v3163_v41 = vsub.s32 0, %v3162_v18 }
 0xd1a   : > { %v3147_v44 = vpack.c.bf16 %v3035_v16, %v3013_v1  ;;  %v3145_v2 = vpack.c.bf16 %v3033_v15, %v3011_v58  ;;  %v3146_v22 = vpack.c.bf16 %v3034_v36, %v3012_v60  ;;  %v3278_v1 = vsub.s32 %v3275_v52, %v3162_v18 }
 0xd1c   : > { %v3051_v0 = vpop.permute.xlu0 %3050  ;;  %v3049_v62 = vpop.permute.xlu1 %3048  ;;  %3224 = vmatprep.subr.bf16.mxu1 %v3147_v44  ;;  %3183 = vmatprep.subr.bf16.mxu0 %v3145_v2 }
 0xd1d   : > { %v3057_v6 = vsel %vm1045_vm14, %v3051_v0, %v3053_v49  ;;  %v3055_v21 = vsel %vm1045_vm14, %v3047_v26, %v3049_v62  ;;  %v3056_v5 = vsel %vm1045_vm14, %v3049_v62, %v3051_v0  ;;  %3225 = vmatpush1.bf16.msra.mxu1 %v3146_v22  ;;  %3184 = vmatpush1.bf16.msra.mxu0 %v3144_v50 }
 0xd20   : > { %v3073_v34 = vpop.permute.xlu0 %3072  ;;  %v3071_v48 = vpop.permute.xlu1 %3070 }
 0xd21   : > { %v3080_v51 = vsel %vm3076_vm13, %v3073_v34, %v3075_v27  ;;  %v3078_v7 = vsel %vm3076_vm13, %v3069_v56, %v3071_v48  ;;  %v3079_v12 = vsel %vm3076_vm13, %v3071_v48, %v3073_v34 }
 0xd22   : > { %v3151_v31 = vpack.c.bf16 %v3080_v51, %v3057_v6  ;;  %v3149_v30 = vpack.c.bf16 %v3078_v7, %v3055_v21  ;;  %v3150_v24 = vpack.c.bf16 %v3079_v12, %v3056_v5 }
 0xd24   : > { %v3094_v57 = vpop.permute.xlu0 %3093  ;;  %v3096_v8 = vpop.permute.xlu1 %3095  ;;  %3226 = vmatprep.subr.bf16.mxu1 %v3151_v31  ;;  %3185 = vmatprep.subr.bf16.mxu0 %v3149_v30 }
 0xd25   : > { %v3101_v14 = vsel %vm3099_vm4, %v3092_v42, %v3094_v57  ;;  %v3102_v17 = vsel %vm3099_vm4, %v3094_v57, %v3096_v8  ;;  %3227 = vmatpush1.bf16.msra.mxu1 %v3150_v24  ;;  %3186 = vmatpush1.bf16.msra.mxu0 %v3148_v10 }
 0xd26   : > { %v3153_v20 = vpack.c.bf16 %v3101_v14, %v3101_v14  ;;  %v3154_v35 = vpack.c.bf16 %v3102_v17, %v3102_v17 }
 0xd28   : > { %v3098_v25 = vpop.permute.xlu0 %3097  ;;  %3489 = vmatprep.subr.msk.bf16.mxu0 %vm559_vm11, %v3153_v20  ;;  %v3176_v45 = vsel %vm559_vm11, %v3154_v35, 0 }
 0xd29   : > { %v3103_v33 = vsel %vm3099_vm4, %v3096_v8, %v3098_v25  ;;  %3188 = vmatpush1.bf16.msra.mxu0 %v3170_v28 }
 0xd2a   : > { %v3155_v40 = vpack.c.bf16 %v3103_v33, %v3103_v33 }
 0xd2c   : > { %3491 = vmatprep.subr.msk.bf16.mxu1 %vm559_vm11, %v3155_v40  ;;  %3490 = vmatmul.mubr.msk.bf16.vlgmr.msra.gmra.mrb[48].mxu0 %vm3165_vm10, %v2967_v39  ;;  %vm3298_vm11 = vcmp.lt.s32.totalorder %v697_v11, 512 }
 0xd2d   : > { %3229 = vmatpush1.bf16.msra.mxu1 %v3176_v45 }
 0xd30   : > { %3492 = vmatmul.mubr.msk.bf16.vlgmr.msra.gmra.mrb[48].mxu1 %vm3165_vm10, %v2967_v39 }
 0xd35   : > { %v3159_v13 = vpop.permute.xlu1 %3158 }
 0xd36   : > { %v3164_v46 = vrot.slane %v3159_v13, %v3163_v41 }
 0xdff   : > { %v3215_v49 = vpop.f32.mrb[48].mxu0 }
 0xe00   : > { %v3216_v43 = vadd.f32 %v3215_v49, %v3164_v46  ;;  %v3217_v26 = vpop.f32.mrb[49].mxu0 }
 0xe01   : > { %v3218_v27 = vadd.f32 %v3217_v26, %v3164_v46  ;;  %v3219_v19 = vpop.f32.mrb[50].mxu0 }
 0xe02   : > { %3707 = vtanh.f32 %v3216_v43  ;;  %v3220_v56 = vpop.f32.mrb[51].mxu0 }
 0xe03   : > { %3709 = vtanh.f32 %v3218_v27  ;;  %v3256_v42 = vpop.f32.mrb[48].mxu1 }
 0xe04   : > { %v3257_v29 = vadd.f32 %v3256_v42, %v3164_v46  ;;  %v3258_v59 = vpop.f32.mrb[49].mxu1 }
 0xe05   : > { %v3259_v23 = vadd.f32 %v3258_v59, %v3164_v46  ;;  %v3260_v55 = vpop.f32.mrb[50].mxu1 }
 0xe06   : > { %3711 = vtanh.f32 %v3257_v29  ;;  %v3261_v37 = vpop.f32.mrb[51].mxu1 }
 0xe07   : > { %3713 = vtanh.f32 %v3259_v23 }
 0xe0c   : > { %v3708_v54 = vpop.eup %3707 }
 0xe0d   : > { %v3710_v61 = vpop.eup %3709 }
 0xe0e   : > { %v3271_v53 = vcombine.low %v3708_v54, %v3710_v61 }
 0xe10   : > { %v3712_v63 = vpop.eup %3711  ;;  %v3279_v3 = vrot.slane %v3271_v53, %v3278_v1 }
 0xe11   : > { %v3714_v58 = vpop.eup %3713 }
 0xe12   : > { %v3272_v60 = vcombine.low %v3712_v63, %v3714_v58 }
 0xe14   : > { %v3286_v4 = vrot.slane %v3272_v60, %v3278_v1 }
 0xe16   : > { %v3287_v47 = vcombine.low %v3279_v3, %v3286_v4 }
 0xe18   : > { %v3294_v16 = vrot.slane %v3287_v47, %v3278_v1 }
 0xe1a   : > { %3300 = vst.msk [vmem:[%s368_s21] sm:$0xf] %vm3298_vm11, %v3294_v16 }
 0xe1b   : > { %3737 = shalt.err (!%p3734_p11)
}
 0xe1c   : > { %s3738_s15 = scalar_lea.hbm %s4783_s27, 64  ;;  %s3742_s17 = scalar_lea.hbm %s4844_s8, 256 }
 0xe1d   : > { %p3739_p12 = scmp.ne.s32.totalorder %s4783_s27, %s3738_s15  ;;  %p3743_p1 = scmp.lt.u32.totalorder %s4783_s27, %s4844_s8 }
 0xe1e   : > { %p3744_p2 = scmp.lt.u32.totalorder %s3742_s17, %s3738_s15  ;;  %p3746_p5 = scmp.lt.u32.totalorder %s3738_s15, %s4783_s27 }
 0xe1f   : > { %p3740_p13 = pnand %p3739_p12, %p3944_p3 }
 0xe20   : > { %p3745_p4 = por %p3744_p2, %p3743_p1 }
 0xe21   : > { %p3741_p0 = pneg %p3740_p13 }
 0xe22   : > { %p3747_p6 = por %p3746_p5, %p3745_p4 }
 0xe24   : > { %p3748_p7 = pnand %p3747_p6, %p3741_p0 }
 0xe26   : > { %3751 = shalt.err (!%p3748_p7)
}
 0xe27   : > { %3601 = dma.vmem_to_hbm [thread:$0]  (%p3944_p3), %s4785_s22, 64, %s4783_s27, %s3302_s11  }
 0xe28 PF: > { %p3607_p9 = scmp.ge.s32.totalorder %s3818_s14, 2  ;;  %s3330_s23 = sand.u32 1, %s3790_s29  }
 0xe29   : > { %s3331_s26 = scalar_lea.sflag [#allocation6], %s3330_s23 }
 0xe2a   : > { %p3604_p10 = pnand %p3607_p9, %p3953_p8 }
 0xe2c   : > { %3785 = dma.done.wait (!%p3604_p10), %s3331_s26, 64  }
 0xe2d   : > { %3787 = vsyncadd (!%p3604_p10), %s3331_s26, 4294967232  ;;  %s23_s14 = sadd.s32 1, %s3818_s14   ;;  %s4859_s11 = sld [smem:[#allocation8_spill]] }
 0xe2e   : > { %p20_p11 = scmp.ge.s32.totalorder %s23_s14, 6   ;;  %s4860_s19 = sld [smem:[#allocation9_spill]] }
 0xe2f   : > { %s4861_s13 = sld [smem:[#allocation10_spill]]  ;;  %s4862_s29 = smov %s3794_s30 }
 0xe30   : > { %s4863_s30 = smov %s3798_s9  ;;  %s4864_s9 = smov %s3962_s24 }
 0xe31   : > { %s4865_s10 = smov %s3810_s12  ;;  %22 = sbr.rel (!%p20_p11) target bundleno = 8 (0x8), region = 102 }
 0xe34   : > { %s4866_s12 = smov %s4860_s19 }
 0xe38   :  { %3336 = vsyncpa [#allocation6], 1 }
 0xe39   :  { %3338 = vsyncpa [#allocation6 + $0x1], 1 }

</bundles_post_ra>
